<compile_context>
chip_gen: v6e
topology: v6e:2x2x1
jax: 0.10.0
libtpu: 0.0.40
codegen_flags: <defaults>
</compile_context>

<pallas_src>
import functools

import jax
import jax.numpy as jnp
from jax import lax
from jax.experimental import pallas as pl
from jax.experimental.pallas import tpu as pltpu

EPS = 1e-5
NEG_SLOPE = 0.01
LANE = 128


def _round_up(x, m):
    return ((x + m - 1) // m) * m


def _stacked_cnda_kernel(x_ref, w_ref, g_ref, beta_ref, o_ref, act_ref,
                         *, H, W, KH, KW, L):
    """Fused num_convs x (conv3x3 + instance-norm + leaky-relu) for ONE sample.

    x_ref    : (1, H, W, Cp)          f32, channel-padded input sample
    w_ref    : (L*KH*KW, Cp, Cp)      bf16 per-layer/per-tap weights (padded)
    g_ref    : (L, Cp)                f32 instance-norm gamma (padded with 0)
    beta_ref : (L, Cp)                f32 instance-norm beta  (padded with 0)
    o_ref    : (1, H, W, Cp)          f32 lane-dense output (padded chans = 0)
    act_ref  : (H+KH-1, Wp_alloc, Cp) bf16 VMEM zero-halo activation buffer
    """
    ph, pw = (KH - 1) // 2, (KW - 1) // 2
    inv_hw = 1.0 / float(H * W)
    Cp = act_ref.shape[2]
    adt = act_ref.dtype

    # Zero only the halo strips; the interior is overwritten by every layer.
    # Done per sample (NOT gated on program_id==0): with the batch axis marked
    # "parallel" each TensorCore owns its own scratch copy and the core that
    # never runs n==0 would otherwise read uninitialised VMEM.
    if ph:
        act_ref[0:ph, 0:W + 2 * pw, :] = jnp.zeros((ph, W + 2 * pw, Cp), adt)
        act_ref[H + ph:H + 2 * ph, 0:W + 2 * pw, :] = (
            jnp.zeros((ph, W + 2 * pw, Cp), adt))
    if pw:
        act_ref[ph:ph + H, 0:pw, :] = jnp.zeros((H, pw, Cp), adt)
        act_ref[ph:ph + H, W + pw:W + 2 * pw, :] = jnp.zeros((H, pw, Cp), adt)

    # Load the (channel-padded) sample into the interior, cast to bf16.
    act_ref[ph:ph + H, pw:pw + W, :] = x_ref[0].astype(adt)

    for l in range(L):                       # static, unrolled at trace time
        # --- conv as KH*KW shifted bf16 MXU matmuls, K = N = Cp ------------
        # Tap results are accumulated as traced f32 values (single writeback),
        # not via a scratch read-modify-write per tap.
        acc = None
        for kh in range(KH):
            for kw in range(KW):
                patch = act_ref[kh:kh + H, kw:kw + W, :]       # bf16 (H,W,Cp)
                tap = w_ref[l * KH * KW + kh * KW + kw]        # bf16 (Cp,Cp)
                t = lax.dot_general(
                    patch, tap,
                    dimension_numbers=(((2,), (0,)), ((), ())),
                    preferred_element_type=jnp.float32)
                acc = t if acc is None else acc + t
        # Conv bias omitted on purpose: InstanceNorm's mean subtraction
        # cancels a per-channel constant exactly.

        # --- InstanceNorm2d (f32 stats) folded into one scale/shift ---------
        mean = jnp.sum(acc, axis=(0, 1), keepdims=True) * inv_hw
        mean_sq = jnp.sum(acc * acc, axis=(0, 1), keepdims=True) * inv_hw
        var = jnp.maximum(mean_sq - mean * mean, 0.0)
        scale = g_ref[l:l + 1, :] * lax.rsqrt(var + EPS)       # (1,1,Cp)
        shift = beta_ref[l:l + 1, :] - mean * scale            # (1,1,Cp)
        y = acc * scale + shift

        # Dropout op is None -> identity.  LeakyReLU(0.01) as a single max.
        y = jnp.maximum(y, NEG_SLOPE * y)

        if l == L - 1:
            o_ref[0] = y.astype(o_ref.dtype)          # lane-dense store
        else:
            act_ref[ph:ph + H, pw:pw + W, :] = y.astype(adt)   # stays in VMEM


def init_stacked_conv_block(key, input_channels, output_channels, kernel_size,
                            num_convs):
    """Deterministic parameter init matching StackedConvBlock shapes."""
    KH, KW = kernel_size
    params = []
    cin = input_channels
    for _ in range(num_convs):
        k_w, k_b, key = jax.random.split(key, 3)
        fan_in = cin * KH * KW
        w = jax.random.normal(k_w, (KH, KW, cin, output_channels),
                              jnp.float32) * (2.0 / fan_in) ** 0.5
        b = 0.01 * jax.random.normal(k_b, (output_channels,), jnp.float32)
        gamma = jnp.ones((output_channels,), jnp.float32)
        beta = jnp.zeros((output_channels,), jnp.float32)
        params.append((w, b, gamma, beta))
        cin = output_channels
    return params


def stacked_conv_block_forward(x_nchw, params):
    """Forward of StackedConvBlock. Input/output NCHW like PyTorch."""
    x = jnp.transpose(x_nchw, (0, 2, 3, 1)).astype(jnp.float32)  # NCHW -> NHWC
    N, H, W, Cin = x.shape
    L = len(params)
    KH, KW, _, Cout = params[0][0].shape
    Cp = _round_up(max(Cin, Cout), LANE)           # lane-dense channels
    Hp = H + KH - 1
    Wp_alloc = _round_up(W + KW - 1, 8)            # honest (8,128) tiling

    # Channel-pad the input to the lane width (spatial halo handled in-kernel).
    x = jnp.pad(x, ((0, 0), (0, 0), (0, 0), (0, Cp - Cin)))

    # Stack + channel-pad parameters (tiny arrays, done once per call).
    # Padding with zeros is what keeps padded output channels exactly 0.
    w_stack = jnp.zeros((L, KH, KW, Cp, Cp), jnp.float32)
    g_stack = jnp.zeros((L, Cp), jnp.float32)
    beta_stack = jnp.zeros((L, Cp), jnp.float32)
    for l, (w, _b, gamma, beta) in enumerate(params):
        ci = w.shape[2]
        w_stack = w_stack.at[l, :, :, :ci, :Cout].set(w.astype(jnp.float32))
        g_stack = g_stack.at[l, :Cout].set(gamma.astype(jnp.float32))
        beta_stack = beta_stack.at[l, :Cout].set(beta.astype(jnp.float32))
        # conv bias _b is dropped: exactly cancelled by InstanceNorm.
    w_stack = w_stack.reshape(L * KH * KW, Cp, Cp).astype(jnp.bfloat16)

    kernel = functools.partial(_stacked_cnda_kernel,
                               H=H, W=W, KH=KH, KW=KW, L=L)
    out = pl.pallas_call(
        kernel,
        out_shape=jax.ShapeDtypeStruct((N, H, W, Cp), jnp.float32),
        grid_spec=pltpu.PrefetchScalarGridSpec(
            num_scalar_prefetch=0,
            grid=(N,),
            in_specs=[
                pl.BlockSpec((1, H, W, Cp), lambda n: (n, 0, 0, 0)),
                pl.BlockSpec((L * KH * KW, Cp, Cp), lambda n: (0, 0, 0)),
                pl.BlockSpec((L, Cp), lambda n: (0, 0)),
                pl.BlockSpec((L, Cp), lambda n: (0, 0)),
            ],
            out_specs=pl.BlockSpec((1, H, W, Cp), lambda n: (n, 0, 0, 0)),
            scratch_shapes=[
                pltpu.VMEM((Hp, Wp_alloc, Cp), jnp.bfloat16),  # halo act buffer
            ],
        ),
        compiler_params=pltpu.CompilerParams(
            dimension_semantics=("parallel",)),   # batch axis -> both v7x TCs
    )(x, w_stack, g_stack, beta_stack)

    out = out[..., :Cout]                          # drop lane padding
    return jnp.transpose(out, (0, 3, 1, 2))        # NHWC -> NCHW


# ---------------- pure-JAX references (for correctness checks) ----------------
def _reference_forward(x_nchw, params, conv_dtype=jnp.float32):
    """conv_dtype=f32  -> exact PyTorch-module semantics.
       conv_dtype=bf16 -> precision-matched to the kernel's bf16 MXU path."""
    x = jnp.transpose(x_nchw, (0, 2, 3, 1)).astype(jnp.float32)
    for (w, b, gamma, beta) in params:
        y = lax.conv_general_dilated(
            x.astype(conv_dtype), w.astype(conv_dtype),
            window_strides=(1, 1), padding="SAME",
            dimension_numbers=("NHWC", "HWIO", "NHWC"),
            preferred_element_type=jnp.float32)
        y = y + b                       # kernel drops this: IN cancels it
        mean = jnp.mean(y, axis=(1, 2), keepdims=True)
        var = jnp.mean((y - mean) ** 2, axis=(1, 2), keepdims=True)
        y = (y - mean) * lax.rsqrt(var + EPS) * gamma + beta
        x = jnp.where(y >= 0, y, NEG_SLOPE * y)
    return jnp.transpose(x, (0, 3, 1, 2))


if __name__ == "__main__":
    key = jax.random.PRNGKey(0)
    k_x, k_p = jax.random.split(key)

    N, Cin, H, W = 2, 4, 16, 16
    Cout = 8
    kernel_size = (3, 3)
    num_convs = 2

    x = jax.random.normal(k_x, (N, Cin, H, W), jnp.float32)
    params = init_stacked_conv_block(k_p, Cin, Cout, kernel_size, num_convs)

    out = jax.block_until_ready(stacked_conv_block_forward(x, params))
    ref_f32 = jax.block_until_ready(_reference_forward(x, params))
    ref_bf16 = jax.block_until_ready(
        _reference_forward(x, params, conv_dtype=jnp.bfloat16))

    assert out.shape == (N, Cout, H, W), out.shape
    # Tight check against a reference using the same bf16-MXU precision.
    err_bf16 = float(jnp.max(jnp.abs(out - ref_bf16)))
    assert jnp.allclose(out, ref_bf16, atol=1e-2, rtol=1e-2), err_bf16
    # Looser check against the full-f32 module semantics (bf16 MXU rounding).
    err_f32 = float(jnp.max(jnp.abs(out - ref_f32)))
    assert jnp.allclose(out, ref_f32, atol=1e-1, rtol=1e-1), err_f32

    print("KERNEL_OK")
</pallas_src>

<mosaic_0001>
module attributes {stable_mosaic.version = 11 : i64} {
  func.func @_stacked_cnda_kernel(%arg0: i32, %arg1: memref<1x16x16x128xf32, #tpu.memory_space<vmem>>, %arg2: memref<18x128x128xbf16, #tpu.memory_space<vmem>>, %arg3: memref<2x128xf32, #tpu.memory_space<vmem>>, %arg4: memref<2x128xf32, #tpu.memory_space<vmem>>, %arg5: memref<1x16x16x128xf32, #tpu.memory_space<vmem>>, %arg6: memref<18x24x128xbf16, #tpu.memory_space<vmem>>) attributes {dimension_semantics = [#tpu.dimension_semantics<parallel>], iteration_bounds = array<i64: 2>, scalar_prefetch = 0 : i64, scratch_operands = 1 : i64, tpu.core_type = #tpu.core_type<tc>, window_params = [{transform_indices = @transform_0, window_bounds = array<i64: 1, 16, 16, 128>}, {pipeline_mode = #tpu.pipeline_mode<synchronous>, transform_indices = @transform_1, window_bounds = array<i64: 18, 128, 128>}, {pipeline_mode = #tpu.pipeline_mode<synchronous>, transform_indices = @transform_2, window_bounds = array<i64: 2, 128>}, {pipeline_mode = #tpu.pipeline_mode<synchronous>, transform_indices = @transform_3, window_bounds = array<i64: 2, 128>}, {transform_indices = @transform_4, window_bounds = array<i64: 1, 16, 16, 128>}]} {
    %cst = arith.constant 0.000000e+00 : bf16
    %0 = vector.broadcast %cst : bf16 to vector<1x18x128xbf16>
    %c0 = arith.constant 0 : index
    %c0_0 = arith.constant 0 : index
    %c0_1 = arith.constant 0 : index
    %1 = vector.load %arg6[%c0, %c0_0, %c0_1] : memref<18x24x128xbf16, #tpu.memory_space<vmem>>, vector<1x18x128xbf16>
    tpu.vector_store %arg6[%c0, %c0_0, %c0_1], %0 {strides = array<i32>} : memref<18x24x128xbf16, #tpu.memory_space<vmem>>, vector<1x18x128xbf16>,
    %cst_2 = arith.constant 0.000000e+00 : bf16
    %2 = vector.broadcast %cst_2 : bf16 to vector<1x18x128xbf16>
    %c17 = arith.constant 17 : index
    %c0_3 = arith.constant 0 : index
    %c0_4 = arith.constant 0 : index
    %3 = vector.load %arg6[%c17, %c0_3, %c0_4] : memref<18x24x128xbf16, #tpu.memory_space<vmem>>, vector<1x18x128xbf16>
    tpu.vector_store %arg6[%c17, %c0_3, %c0_4], %2 {strides = array<i32>} : memref<18x24x128xbf16, #tpu.memory_space<vmem>>, vector<1x18x128xbf16>,
    %cst_5 = arith.constant 0.000000e+00 : bf16
    %4 = vector.broadcast %cst_5 : bf16 to vector<16x1x128xbf16>
    %c1 = arith.constant 1 : index
    %c0_6 = arith.constant 0 : index
    %c0_7 = arith.constant 0 : index
    %5 = vector.load %arg6[%c1, %c0_6, %c0_7] : memref<18x24x128xbf16, #tpu.memory_space<vmem>>, vector<16x1x128xbf16>
    tpu.vector_store %arg6[%c1, %c0_6, %c0_7], %4 {strides = array<i32>} : memref<18x24x128xbf16, #tpu.memory_space<vmem>>, vector<16x1x128xbf16>,
    %cst_8 = arith.constant 0.000000e+00 : bf16
    %6 = vector.broadcast %cst_8 : bf16 to vector<16x1x128xbf16>
    %c1_9 = arith.constant 1 : index
    %c17_10 = arith.constant 17 : index
    %c0_11 = arith.constant 0 : index
    %7 = vector.load %arg6[%c1_9, %c17_10, %c0_11] : memref<18x24x128xbf16, #tpu.memory_space<vmem>>, vector<16x1x128xbf16>
    tpu.vector_store %arg6[%c1_9, %c17_10, %c0_11], %6 {strides = array<i32>} : memref<18x24x128xbf16, #tpu.memory_space<vmem>>, vector<16x1x128xbf16>,
    %c0_12 = arith.constant 0 : index
    %c0_13 = arith.constant 0 : index
    %c0_14 = arith.constant 0 : index
    %c0_15 = arith.constant 0 : index
    %8 = vector.load %arg1[%c0_12, %c0_13, %c0_14, %c0_15] : memref<1x16x16x128xf32, #tpu.memory_space<vmem>>, vector<1x16x16x128xf32>
    %9 = vector.shape_cast %8 : vector<1x16x16x128xf32> to vector<16x16x128xf32>
    %10 = arith.truncf %9 : vector<16x16x128xf32> to vector<16x16x128xbf16>
    %c1_16 = arith.constant 1 : index
    %c1_17 = arith.constant 1 : index
    %c0_18 = arith.constant 0 : index
    %11 = vector.load %arg6[%c1_16, %c1_17, %c0_18] : memref<18x24x128xbf16, #tpu.memory_space<vmem>>, vector<16x16x128xbf16>
    tpu.vector_store %arg6[%c1_16, %c1_17, %c0_18], %10 {strides = array<i32>} : memref<18x24x128xbf16, #tpu.memory_space<vmem>>, vector<16x16x128xbf16>,
    %c0_19 = arith.constant 0 : index
    %c0_20 = arith.constant 0 : index
    %c0_21 = arith.constant 0 : index
    %12 = vector.load %arg6[%c0_19, %c0_20, %c0_21] : memref<18x24x128xbf16, #tpu.memory_space<vmem>>, vector<16x16x128xbf16>
    %c0_22 = arith.constant 0 : index
    %c0_23 = arith.constant 0 : index
    %c0_24 = arith.constant 0 : index
    %13 = vector.load %arg2[%c0_22, %c0_23, %c0_24] : memref<18x128x128xbf16, #tpu.memory_space<vmem>>, vector<1x128x128xbf16>
    %14 = vector.shape_cast %13 : vector<1x128x128xbf16> to vector<128x128xbf16>
    %cst_25 = arith.constant dense<0.000000e+00> : vector<16x16x128xf32>
    %15 = tpu.matmul %12, %14, %cst_25 {dimension_numbers = #tpu.dot_dimension_numbers<[2], [0], [0, 1], [1], [0, 0, 0, 1, 1, 1], [], []>} : vector<16x16x128xbf16>, vector<128x128xbf16>, vector<16x16x128xf32> -> vector<16x16x128xf32>
    %c0_26 = arith.constant 0 : index
    %c1_27 = arith.constant 1 : index
    %c0_28 = arith.constant 0 : index
    %16 = vector.load %arg6[%c0_26, %c1_27, %c0_28] : memref<18x24x128xbf16, #tpu.memory_space<vmem>>, vector<16x16x128xbf16>
    %c1_29 = arith.constant 1 : index
    %c0_30 = arith.constant 0 : index
    %c0_31 = arith.constant 0 : index
    %17 = vector.load %arg2[%c1_29, %c0_30, %c0_31] : memref<18x128x128xbf16, #tpu.memory_space<vmem>>, vector<1x128x128xbf16>
    %18 = vector.shape_cast %17 : vector<1x128x128xbf16> to vector<128x128xbf16>
    %cst_32 = arith.constant dense<0.000000e+00> : vector<16x16x128xf32>
    %19 = tpu.matmul %16, %18, %cst_32 {dimension_numbers = #tpu.dot_dimension_numbers<[2], [0], [0, 1], [1], [0, 0, 0, 1, 1, 1], [], []>} : vector<16x16x128xbf16>, vector<128x128xbf16>, vector<16x16x128xf32> -> vector<16x16x128xf32>
    %20 = arith.addf %15, %19 : vector<16x16x128xf32>
    %c0_33 = arith.constant 0 : index
    %c2 = arith.constant 2 : index
    %c0_34 = arith.constant 0 : index
    %21 = vector.load %arg6[%c0_33, %c2, %c0_34] : memref<18x24x128xbf16, #tpu.memory_space<vmem>>, vector<16x16x128xbf16>
    %c2_35 = arith.constant 2 : index
    %c0_36 = arith.constant 0 : index
    %c0_37 = arith.constant 0 : index
    %22 = vector.load %arg2[%c2_35, %c0_36, %c0_37] : memref<18x128x128xbf16, #tpu.memory_space<vmem>>, vector<1x128x128xbf16>
    %23 = vector.shape_cast %22 : vector<1x128x128xbf16> to vector<128x128xbf16>
    %cst_38 = arith.constant dense<0.000000e+00> : vector<16x16x128xf32>
    %24 = tpu.matmul %21, %23, %cst_38 {dimension_numbers = #tpu.dot_dimension_numbers<[2], [0], [0, 1], [1], [0, 0, 0, 1, 1, 1], [], []>} : vector<16x16x128xbf16>, vector<128x128xbf16>, vector<16x16x128xf32> -> vector<16x16x128xf32>
    %25 = arith.addf %20, %24 : vector<16x16x128xf32>
    %c1_39 = arith.constant 1 : index
    %c0_40 = arith.constant 0 : index
    %c0_41 = arith.constant 0 : index
    %26 = vector.load %arg6[%c1_39, %c0_40, %c0_41] : memref<18x24x128xbf16, #tpu.memory_space<vmem>>, vector<16x16x128xbf16>
    %c3 = arith.constant 3 : index
    %c0_42 = arith.constant 0 : index
    %c0_43 = arith.constant 0 : index
    %27 = vector.load %arg2[%c3, %c0_42, %c0_43] : memref<18x128x128xbf16, #tpu.memory_space<vmem>>, vector<1x128x128xbf16>
    %28 = vector.shape_cast %27 : vector<1x128x128xbf16> to vector<128x128xbf16>
    %cst_44 = arith.constant dense<0.000000e+00> : vector<16x16x128xf32>
    %29 = tpu.matmul %26, %28, %cst_44 {dimension_numbers = #tpu.dot_dimension_numbers<[2], [0], [0, 1], [1], [0, 0, 0, 1, 1, 1], [], []>} : vector<16x16x128xbf16>, vector<128x128xbf16>, vector<16x16x128xf32> -> vector<16x16x128xf32>
    %30 = arith.addf %25, %29 : vector<16x16x128xf32>
    %c1_45 = arith.constant 1 : index
    %c1_46 = arith.constant 1 : index
    %c0_47 = arith.constant 0 : index
    %31 = vector.load %arg6[%c1_45, %c1_46, %c0_47] : memref<18x24x128xbf16, #tpu.memory_space<vmem>>, vector<16x16x128xbf16>
    %c4 = arith.constant 4 : index
    %c0_48 = arith.constant 0 : index
    %c0_49 = arith.constant 0 : index
    %32 = vector.load %arg2[%c4, %c0_48, %c0_49] : memref<18x128x128xbf16, #tpu.memory_space<vmem>>, vector<1x128x128xbf16>
    %33 = vector.shape_cast %32 : vector<1x128x128xbf16> to vector<128x128xbf16>
    %cst_50 = arith.constant dense<0.000000e+00> : vector<16x16x128xf32>
    %34 = tpu.matmul %31, %33, %cst_50 {dimension_numbers = #tpu.dot_dimension_numbers<[2], [0], [0, 1], [1], [0, 0, 0, 1, 1, 1], [], []>} : vector<16x16x128xbf16>, vector<128x128xbf16>, vector<16x16x128xf32> -> vector<16x16x128xf32>
    %35 = arith.addf %30, %34 : vector<16x16x128xf32>
    %c1_51 = arith.constant 1 : index
    %c2_52 = arith.constant 2 : index
    %c0_53 = arith.constant 0 : index
    %36 = vector.load %arg6[%c1_51, %c2_52, %c0_53] : memref<18x24x128xbf16, #tpu.memory_space<vmem>>, vector<16x16x128xbf16>
    %c5 = arith.constant 5 : index
    %c0_54 = arith.constant 0 : index
    %c0_55 = arith.constant 0 : index
    %37 = vector.load %arg2[%c5, %c0_54, %c0_55] : memref<18x128x128xbf16, #tpu.memory_space<vmem>>, vector<1x128x128xbf16>
    %38 = vector.shape_cast %37 : vector<1x128x128xbf16> to vector<128x128xbf16>
    %cst_56 = arith.constant dense<0.000000e+00> : vector<16x16x128xf32>
    %39 = tpu.matmul %36, %38, %cst_56 {dimension_numbers = #tpu.dot_dimension_numbers<[2], [0], [0, 1], [1], [0, 0, 0, 1, 1, 1], [], []>} : vector<16x16x128xbf16>, vector<128x128xbf16>, vector<16x16x128xf32> -> vector<16x16x128xf32>
    %40 = arith.addf %35, %39 : vector<16x16x128xf32>
    %c2_57 = arith.constant 2 : index
    %c0_58 = arith.constant 0 : index
    %c0_59 = arith.constant 0 : index
    %41 = vector.load %arg6[%c2_57, %c0_58, %c0_59] : memref<18x24x128xbf16, #tpu.memory_space<vmem>>, vector<16x16x128xbf16>
    %c6 = arith.constant 6 : index
    %c0_60 = arith.constant 0 : index
    %c0_61 = arith.constant 0 : index
    %42 = vector.load %arg2[%c6, %c0_60, %c0_61] : memref<18x128x128xbf16, #tpu.memory_space<vmem>>, vector<1x128x128xbf16>
    %43 = vector.shape_cast %42 : vector<1x128x128xbf16> to vector<128x128xbf16>
    %cst_62 = arith.constant dense<0.000000e+00> : vector<16x16x128xf32>
    %44 = tpu.matmul %41, %43, %cst_62 {dimension_numbers = #tpu.dot_dimension_numbers<[2], [0], [0, 1], [1], [0, 0, 0, 1, 1, 1], [], []>} : vector<16x16x128xbf16>, vector<128x128xbf16>, vector<16x16x128xf32> -> vector<16x16x128xf32>
    %45 = arith.addf %40, %44 : vector<16x16x128xf32>
    %c2_63 = arith.constant 2 : index
    %c1_64 = arith.constant 1 : index
    %c0_65 = arith.constant 0 : index
    %46 = vector.load %arg6[%c2_63, %c1_64, %c0_65] : memref<18x24x128xbf16, #tpu.memory_space<vmem>>, vector<16x16x128xbf16>
    %c7 = arith.constant 7 : index
    %c0_66 = arith.constant 0 : index
    %c0_67 = arith.constant 0 : index
    %47 = vector.load %arg2[%c7, %c0_66, %c0_67] : memref<18x128x128xbf16, #tpu.memory_space<vmem>>, vector<1x128x128xbf16>
    %48 = vector.shape_cast %47 : vector<1x128x128xbf16> to vector<128x128xbf16>
    %cst_68 = arith.constant dense<0.000000e+00> : vector<16x16x128xf32>
    %49 = tpu.matmul %46, %48, %cst_68 {dimension_numbers = #tpu.dot_dimension_numbers<[2], [0], [0, 1], [1], [0, 0, 0, 1, 1, 1], [], []>} : vector<16x16x128xbf16>, vector<128x128xbf16>, vector<16x16x128xf32> -> vector<16x16x128xf32>
    %50 = arith.addf %45, %49 : vector<16x16x128xf32>
    %c2_69 = arith.constant 2 : index
    %c2_70 = arith.constant 2 : index
    %c0_71 = arith.constant 0 : index
    %51 = vector.load %arg6[%c2_69, %c2_70, %c0_71] : memref<18x24x128xbf16, #tpu.memory_space<vmem>>, vector<16x16x128xbf16>
    %c8 = arith.constant 8 : index
    %c0_72 = arith.constant 0 : index
    %c0_73 = arith.constant 0 : index
    %52 = vector.load %arg2[%c8, %c0_72, %c0_73] : memref<18x128x128xbf16, #tpu.memory_space<vmem>>, vector<1x128x128xbf16>
    %53 = vector.shape_cast %52 : vector<1x128x128xbf16> to vector<128x128xbf16>
    %cst_74 = arith.constant dense<0.000000e+00> : vector<16x16x128xf32>
    %54 = tpu.matmul %51, %53, %cst_74 {dimension_numbers = #tpu.dot_dimension_numbers<[2], [0], [0, 1], [1], [0, 0, 0, 1, 1, 1], [], []>} : vector<16x16x128xbf16>, vector<128x128xbf16>, vector<16x16x128xf32> -> vector<16x16x128xf32>
    %55 = arith.addf %50, %54 : vector<16x16x128xf32>
    %cst_75 = arith.constant dense<0.000000e+00> : vector<128xf32>
    %56 = vector.multi_reduction <add>, %55, %cst_75 [0, 1] : vector<16x16x128xf32> to vector<128xf32>
    %57 = vector.shape_cast %56 : vector<128xf32> to vector<1x1x128xf32>
    %cst_76 = arith.constant 3.906250e-03 : f32
    %58 = vector.broadcast %cst_76 : f32 to vector<1x1x128xf32>
    %59 = arith.mulf %57, %58 : vector<1x1x128xf32>
    %60 = arith.mulf %55, %55 : vector<16x16x128xf32>
    %cst_77 = arith.constant dense<0.000000e+00> : vector<128xf32>
    %61 = vector.multi_reduction <add>, %60, %cst_77 [0, 1] : vector<16x16x128xf32> to vector<128xf32>
    %62 = vector.shape_cast %61 : vector<128xf32> to vector<1x1x128xf32>
    %cst_78 = arith.constant 3.906250e-03 : f32
    %63 = vector.broadcast %cst_78 : f32 to vector<1x1x128xf32>
    %64 = arith.mulf %62, %63 : vector<1x1x128xf32>
    %65 = arith.mulf %59, %59 : vector<1x1x128xf32>
    %66 = arith.subf %64, %65 : vector<1x1x128xf32>
    %cst_79 = arith.constant 0.000000e+00 : f32
    %67 = vector.broadcast %cst_79 : f32 to vector<1x1x128xf32>
    %68 = arith.maximumf %66, %67 : vector<1x1x128xf32>
    %c0_80 = arith.constant 0 : index
    %c0_81 = arith.constant 0 : index
    %69 = vector.load %arg3[%c0_80, %c0_81] : memref<2x128xf32, #tpu.memory_space<vmem>>, vector<1x128xf32>
    %cst_82 = arith.constant 9.99999974E-6 : f32
    %70 = vector.broadcast %cst_82 : f32 to vector<1x1x128xf32>
    %71 = arith.addf %68, %70 : vector<1x1x128xf32>
    %72 = math.rsqrt %71 : vector<1x1x128xf32>
    %73 = vector.shape_cast %69 : vector<1x128xf32> to vector<1x1x128xf32>
    %74 = arith.mulf %73, %72 : vector<1x1x128xf32>
    %c0_83 = arith.constant 0 : index
    %c0_84 = arith.constant 0 : index
    %75 = vector.load %arg4[%c0_83, %c0_84] : memref<2x128xf32, #tpu.memory_space<vmem>>, vector<1x128xf32>
    %76 = arith.mulf %59, %74 : vector<1x1x128xf32>
    %77 = vector.shape_cast %75 : vector<1x128xf32> to vector<1x1x128xf32>
    %78 = arith.subf %77, %76 : vector<1x1x128xf32>
    %79 = vector.broadcast %74 : vector<1x1x128xf32> to vector<16x16x128xf32>
    %80 = arith.mulf %55, %79 : vector<16x16x128xf32>
    %81 = vector.broadcast %78 : vector<1x1x128xf32> to vector<16x16x128xf32>
    %82 = arith.addf %80, %81 : vector<16x16x128xf32>
    %cst_85 = arith.constant 0.00999999977 : f32
    %83 = vector.broadcast %cst_85 : f32 to vector<16x16x128xf32>
    %84 = arith.mulf %83, %82 : vector<16x16x128xf32>
    %85 = arith.maximumf %82, %84 : vector<16x16x128xf32>
    %86 = arith.truncf %85 : vector<16x16x128xf32> to vector<16x16x128xbf16>
    %c1_86 = arith.constant 1 : index
    %c1_87 = arith.constant 1 : index
    %c0_88 = arith.constant 0 : index
    %87 = vector.load %arg6[%c1_86, %c1_87, %c0_88] : memref<18x24x128xbf16, #tpu.memory_space<vmem>>, vector<16x16x128xbf16>
    tpu.vector_store %arg6[%c1_86, %c1_87, %c0_88], %86 {strides = array<i32>} : memref<18x24x128xbf16, #tpu.memory_space<vmem>>, vector<16x16x128xbf16>,
    %c0_89 = arith.constant 0 : index
    %c0_90 = arith.constant 0 : index
    %c0_91 = arith.constant 0 : index
    %88 = vector.load %arg6[%c0_89, %c0_90, %c0_91] : memref<18x24x128xbf16, #tpu.memory_space<vmem>>, vector<16x16x128xbf16>
    %c9 = arith.constant 9 : index
    %c0_92 = arith.constant 0 : index
    %c0_93 = arith.constant 0 : index
    %89 = vector.load %arg2[%c9, %c0_92, %c0_93] : memref<18x128x128xbf16, #tpu.memory_space<vmem>>, vector<1x128x128xbf16>
    %90 = vector.shape_cast %89 : vector<1x128x128xbf16> to vector<128x128xbf16>
    %cst_94 = arith.constant dense<0.000000e+00> : vector<16x16x128xf32>
    %91 = tpu.matmul %88, %90, %cst_94 {dimension_numbers = #tpu.dot_dimension_numbers<[2], [0], [0, 1], [1], [0, 0, 0, 1, 1, 1], [], []>} : vector<16x16x128xbf16>, vector<128x128xbf16>, vector<16x16x128xf32> -> vector<16x16x128xf32>
    %c0_95 = arith.constant 0 : index
    %c1_96 = arith.constant 1 : index
    %c0_97 = arith.constant 0 : index
    %92 = vector.load %arg6[%c0_95, %c1_96, %c0_97] : memref<18x24x128xbf16, #tpu.memory_space<vmem>>, vector<16x16x128xbf16>
    %c10 = arith.constant 10 : index
    %c0_98 = arith.constant 0 : index
    %c0_99 = arith.constant 0 : index
    %93 = vector.load %arg2[%c10, %c0_98, %c0_99] : memref<18x128x128xbf16, #tpu.memory_space<vmem>>, vector<1x128x128xbf16>
    %94 = vector.shape_cast %93 : vector<1x128x128xbf16> to vector<128x128xbf16>
    %cst_100 = arith.constant dense<0.000000e+00> : vector<16x16x128xf32>
    %95 = tpu.matmul %92, %94, %cst_100 {dimension_numbers = #tpu.dot_dimension_numbers<[2], [0], [0, 1], [1], [0, 0, 0, 1, 1, 1], [], []>} : vector<16x16x128xbf16>, vector<128x128xbf16>, vector<16x16x128xf32> -> vector<16x16x128xf32>
    %96 = arith.addf %91, %95 : vector<16x16x128xf32>
    %c0_101 = arith.constant 0 : index
    %c2_102 = arith.constant 2 : index
    %c0_103 = arith.constant 0 : index
    %97 = vector.load %arg6[%c0_101, %c2_102, %c0_103] : memref<18x24x128xbf16, #tpu.memory_space<vmem>>, vector<16x16x128xbf16>
    %c11 = arith.constant 11 : index
    %c0_104 = arith.constant 0 : index
    %c0_105 = arith.constant 0 : index
    %98 = vector.load %arg2[%c11, %c0_104, %c0_105] : memref<18x128x128xbf16, #tpu.memory_space<vmem>>, vector<1x128x128xbf16>
    %99 = vector.shape_cast %98 : vector<1x128x128xbf16> to vector<128x128xbf16>
    %cst_106 = arith.constant dense<0.000000e+00> : vector<16x16x128xf32>
    %100 = tpu.matmul %97, %99, %cst_106 {dimension_numbers = #tpu.dot_dimension_numbers<[2], [0], [0, 1], [1], [0, 0, 0, 1, 1, 1], [], []>} : vector<16x16x128xbf16>, vector<128x128xbf16>, vector<16x16x128xf32> -> vector<16x16x128xf32>
    %101 = arith.addf %96, %100 : vector<16x16x128xf32>
    %c1_107 = arith.constant 1 : index
    %c0_108 = arith.constant 0 : index
    %c0_109 = arith.constant 0 : index
    %102 = vector.load %arg6[%c1_107, %c0_108, %c0_109] : memref<18x24x128xbf16, #tpu.memory_space<vmem>>, vector<16x16x128xbf16>
    %c12 = arith.constant 12 : index
    %c0_110 = arith.constant 0 : index
    %c0_111 = arith.constant 0 : index
    %103 = vector.load %arg2[%c12, %c0_110, %c0_111] : memref<18x128x128xbf16, #tpu.memory_space<vmem>>, vector<1x128x128xbf16>
    %104 = vector.shape_cast %103 : vector<1x128x128xbf16> to vector<128x128xbf16>
    %cst_112 = arith.constant dense<0.000000e+00> : vector<16x16x128xf32>
    %105 = tpu.matmul %102, %104, %cst_112 {dimension_numbers = #tpu.dot_dimension_numbers<[2], [0], [0, 1], [1], [0, 0, 0, 1, 1, 1], [], []>} : vector<16x16x128xbf16>, vector<128x128xbf16>, vector<16x16x128xf32> -> vector<16x16x128xf32>
    %106 = arith.addf %101, %105 : vector<16x16x128xf32>
    %c1_113 = arith.constant 1 : index
    %c1_114 = arith.constant 1 : index
    %c0_115 = arith.constant 0 : index
    %107 = vector.load %arg6[%c1_113, %c1_114, %c0_115] : memref<18x24x128xbf16, #tpu.memory_space<vmem>>, vector<16x16x128xbf16>
    %c13 = arith.constant 13 : index
    %c0_116 = arith.constant 0 : index
    %c0_117 = arith.constant 0 : index
    %108 = vector.load %arg2[%c13, %c0_116, %c0_117] : memref<18x128x128xbf16, #tpu.memory_space<vmem>>, vector<1x128x128xbf16>
    %109 = vector.shape_cast %108 : vector<1x128x128xbf16> to vector<128x128xbf16>
    %cst_118 = arith.constant dense<0.000000e+00> : vector<16x16x128xf32>
    %110 = tpu.matmul %107, %109, %cst_118 {dimension_numbers = #tpu.dot_dimension_numbers<[2], [0], [0, 1], [1], [0, 0, 0, 1, 1, 1], [], []>} : vector<16x16x128xbf16>, vector<128x128xbf16>, vector<16x16x128xf32> -> vector<16x16x128xf32>
    %111 = arith.addf %106, %110 : vector<16x16x128xf32>
    %c1_119 = arith.constant 1 : index
    %c2_120 = arith.constant 2 : index
    %c0_121 = arith.constant 0 : index
    %112 = vector.load %arg6[%c1_119, %c2_120, %c0_121] : memref<18x24x128xbf16, #tpu.memory_space<vmem>>, vector<16x16x128xbf16>
    %c14 = arith.constant 14 : index
    %c0_122 = arith.constant 0 : index
    %c0_123 = arith.constant 0 : index
    %113 = vector.load %arg2[%c14, %c0_122, %c0_123] : memref<18x128x128xbf16, #tpu.memory_space<vmem>>, vector<1x128x128xbf16>
    %114 = vector.shape_cast %113 : vector<1x128x128xbf16> to vector<128x128xbf16>
    %cst_124 = arith.constant dense<0.000000e+00> : vector<16x16x128xf32>
    %115 = tpu.matmul %112, %114, %cst_124 {dimension_numbers = #tpu.dot_dimension_numbers<[2], [0], [0, 1], [1], [0, 0, 0, 1, 1, 1], [], []>} : vector<16x16x128xbf16>, vector<128x128xbf16>, vector<16x16x128xf32> -> vector<16x16x128xf32>
    %116 = arith.addf %111, %115 : vector<16x16x128xf32>
    %c2_125 = arith.constant 2 : index
    %c0_126 = arith.constant 0 : index
    %c0_127 = arith.constant 0 : index
    %117 = vector.load %arg6[%c2_125, %c0_126, %c0_127] : memref<18x24x128xbf16, #tpu.memory_space<vmem>>, vector<16x16x128xbf16>
    %c15 = arith.constant 15 : index
    %c0_128 = arith.constant 0 : index
    %c0_129 = arith.constant 0 : index
    %118 = vector.load %arg2[%c15, %c0_128, %c0_129] : memref<18x128x128xbf16, #tpu.memory_space<vmem>>, vector<1x128x128xbf16>
    %119 = vector.shape_cast %118 : vector<1x128x128xbf16> to vector<128x128xbf16>
    %cst_130 = arith.constant dense<0.000000e+00> : vector<16x16x128xf32>
    %120 = tpu.matmul %117, %119, %cst_130 {dimension_numbers = #tpu.dot_dimension_numbers<[2], [0], [0, 1], [1], [0, 0, 0, 1, 1, 1], [], []>} : vector<16x16x128xbf16>, vector<128x128xbf16>, vector<16x16x128xf32> -> vector<16x16x128xf32>
    %121 = arith.addf %116, %120 : vector<16x16x128xf32>
    %c2_131 = arith.constant 2 : index
    %c1_132 = arith.constant 1 : index
    %c0_133 = arith.constant 0 : index
    %122 = vector.load %arg6[%c2_131, %c1_132, %c0_133] : memref<18x24x128xbf16, #tpu.memory_space<vmem>>, vector<16x16x128xbf16>
    %c16 = arith.constant 16 : index
    %c0_134 = arith.constant 0 : index
    %c0_135 = arith.constant 0 : index
    %123 = vector.load %arg2[%c16, %c0_134, %c0_135] : memref<18x128x128xbf16, #tpu.memory_space<vmem>>, vector<1x128x128xbf16>
    %124 = vector.shape_cast %123 : vector<1x128x128xbf16> to vector<128x128xbf16>
    %cst_136 = arith.constant dense<0.000000e+00> : vector<16x16x128xf32>
    %125 = tpu.matmul %122, %124, %cst_136 {dimension_numbers = #tpu.dot_dimension_numbers<[2], [0], [0, 1], [1], [0, 0, 0, 1, 1, 1], [], []>} : vector<16x16x128xbf16>, vector<128x128xbf16>, vector<16x16x128xf32> -> vector<16x16x128xf32>
    %126 = arith.addf %121, %125 : vector<16x16x128xf32>
    %c2_137 = arith.constant 2 : index
    %c2_138 = arith.constant 2 : index
    %c0_139 = arith.constant 0 : index
    %127 = vector.load %arg6[%c2_137, %c2_138, %c0_139] : memref<18x24x128xbf16, #tpu.memory_space<vmem>>, vector<16x16x128xbf16>
    %c17_140 = arith.constant 17 : index
    %c0_141 = arith.constant 0 : index
    %c0_142 = arith.constant 0 : index
    %128 = vector.load %arg2[%c17_140, %c0_141, %c0_142] : memref<18x128x128xbf16, #tpu.memory_space<vmem>>, vector<1x128x128xbf16>
    %129 = vector.shape_cast %128 : vector<1x128x128xbf16> to vector<128x128xbf16>
    %cst_143 = arith.constant dense<0.000000e+00> : vector<16x16x128xf32>
    %130 = tpu.matmul %127, %129, %cst_143 {dimension_numbers = #tpu.dot_dimension_numbers<[2], [0], [0, 1], [1], [0, 0, 0, 1, 1, 1], [], []>} : vector<16x16x128xbf16>, vector<128x128xbf16>, vector<16x16x128xf32> -> vector<16x16x128xf32>
    %131 = arith.addf %126, %130 : vector<16x16x128xf32>
    %cst_144 = arith.constant dense<0.000000e+00> : vector<128xf32>
    %132 = vector.multi_reduction <add>, %131, %cst_144 [0, 1] : vector<16x16x128xf32> to vector<128xf32>
    %133 = vector.shape_cast %132 : vector<128xf32> to vector<1x1x128xf32>
    %cst_145 = arith.constant 3.906250e-03 : f32
    %134 = vector.broadcast %cst_145 : f32 to vector<1x1x128xf32>
    %135 = arith.mulf %133, %134 : vector<1x1x128xf32>
    %136 = arith.mulf %131, %131 : vector<16x16x128xf32>
    %cst_146 = arith.constant dense<0.000000e+00> : vector<128xf32>
    %137 = vector.multi_reduction <add>, %136, %cst_146 [0, 1] : vector<16x16x128xf32> to vector<128xf32>
    %138 = vector.shape_cast %137 : vector<128xf32> to vector<1x1x128xf32>
    %cst_147 = arith.constant 3.906250e-03 : f32
    %139 = vector.broadcast %cst_147 : f32 to vector<1x1x128xf32>
    %140 = arith.mulf %138, %139 : vector<1x1x128xf32>
    %141 = arith.mulf %135, %135 : vector<1x1x128xf32>
    %142 = arith.subf %140, %141 : vector<1x1x128xf32>
    %cst_148 = arith.constant 0.000000e+00 : f32
    %143 = vector.broadcast %cst_148 : f32 to vector<1x1x128xf32>
    %144 = arith.maximumf %142, %143 : vector<1x1x128xf32>
    %c1_149 = arith.constant 1 : index
    %c0_150 = arith.constant 0 : index
    %145 = vector.load %arg3[%c1_149, %c0_150] : memref<2x128xf32, #tpu.memory_space<vmem>>, vector<1x128xf32>
    %cst_151 = arith.constant 9.99999974E-6 : f32
    %146 = vector.broadcast %cst_151 : f32 to vector<1x1x128xf32>
    %147 = arith.addf %144, %146 : vector<1x1x128xf32>
    %148 = math.rsqrt %147 : vector<1x1x128xf32>
    %149 = vector.shape_cast %145 : vector<1x128xf32> to vector<1x1x128xf32>
    %150 = arith.mulf %149, %148 : vector<1x1x128xf32>
    %c1_152 = arith.constant 1 : index
    %c0_153 = arith.constant 0 : index
    %151 = vector.load %arg4[%c1_152, %c0_153] : memref<2x128xf32, #tpu.memory_space<vmem>>, vector<1x128xf32>
    %152 = arith.mulf %135, %150 : vector<1x1x128xf32>
    %153 = vector.shape_cast %151 : vector<1x128xf32> to vector<1x1x128xf32>
    %154 = arith.subf %153, %152 : vector<1x1x128xf32>
    %155 = vector.broadcast %150 : vector<1x1x128xf32> to vector<16x16x128xf32>
    %156 = arith.mulf %131, %155 : vector<16x16x128xf32>
    %157 = vector.broadcast %154 : vector<1x1x128xf32> to vector<16x16x128xf32>
    %158 = arith.addf %156, %157 : vector<16x16x128xf32>
    %cst_154 = arith.constant 0.00999999977 : f32
    %159 = vector.broadcast %cst_154 : f32 to vector<16x16x128xf32>
    %160 = arith.mulf %159, %158 : vector<16x16x128xf32>
    %161 = arith.maximumf %158, %160 : vector<16x16x128xf32>
    %c0_155 = arith.constant 0 : index
    %c0_156 = arith.constant 0 : index
    %c0_157 = arith.constant 0 : index
    %c0_158 = arith.constant 0 : index
    %162 = vector.load %arg5[%c0_155, %c0_156, %c0_157, %c0_158] : memref<1x16x16x128xf32, #tpu.memory_space<vmem>>, vector<1x16x16x128xf32>
    %163 = vector.shape_cast %162 : vector<1x16x16x128xf32> to vector<16x16x128xf32>
    %164 = vector.shape_cast %161 : vector<16x16x128xf32> to vector<1x16x16x128xf32>
    tpu.vector_store %arg5[%c0_155, %c0_156, %c0_157, %c0_158], %164 {strides = array<i32>} : memref<1x16x16x128xf32, #tpu.memory_space<vmem>>, vector<1x16x16x128xf32>,
    return
  }
  func.func @transform_0(%arg0: i32) -> (i32, i32, i32, i32) {
    %c0_i32 = arith.constant 0 : i32
    %c0_i32_0 = arith.constant 0 : i32
    %c0_i32_1 = arith.constant 0 : i32
    %c0_i32_2 = arith.constant 0 : i32
    return %arg0, %c0_i32, %c0_i32_0, %c0_i32_1 : i32, i32, i32, i32
  }
  func.func @transform_1(%arg0: i32) -> (i32, i32, i32) {
    %c0_i32 = arith.constant 0 : i32
    %c0_i32_0 = arith.constant 0 : i32
    %c0_i32_1 = arith.constant 0 : i32
    %c0_i32_2 = arith.constant 0 : i32
    return %c0_i32, %c0_i32_0, %c0_i32_1 : i32, i32, i32
  }
  func.func @transform_2(%arg0: i32) -> (i32, i32) {
    %c0_i32 = arith.constant 0 : i32
    %c0_i32_0 = arith.constant 0 : i32
    %c0_i32_1 = arith.constant 0 : i32
    return %c0_i32, %c0_i32_0 : i32, i32
  }
  func.func @transform_3(%arg0: i32) -> (i32, i32) {
    %c0_i32 = arith.constant 0 : i32
    %c0_i32_0 = arith.constant 0 : i32
    %c0_i32_1 = arith.constant 0 : i32
    return %c0_i32, %c0_i32_0 : i32, i32
  }
  func.func @transform_4(%arg0: i32) -> (i32, i32, i32, i32) {
    %c0_i32 = arith.constant 0 : i32
    %c0_i32_0 = arith.constant 0 : i32
    %c0_i32_1 = arith.constant 0 : i32
    %c0_i32_2 = arith.constant 0 : i32
    return %arg0, %c0_i32, %c0_i32_0, %c0_i32_1 : i32, i32, i32, i32
  }
}

</mosaic_0001>

<bundles_post_ra>
// kernel: tpu_custom_call.1
= control target key start
LH: loop header
LB: loop body
LE: loop exit
PB: predicated region body
PF: predicated region fallthrough
CT: control target
= control target key end

     0   :  { %9 = vsyncpa [#allocation4], 0  ;;  %s19367_s0 = inlined_call_operand.hbm [shape: f32[2,16,16,128], index: 0, kind: input, shape index: {}]   ;;  %s19368_s1 = inlined_call_operand.hbm [shape: bf16[18,128,128], index: 1, kind: input, shape index: {}]   ;;  %s19369_s2 = inlined_call_operand.vmem [shape: f32[2,128], index: 2, kind: input, shape index: {}]   ;;  %s19370_s3 = inlined_call_operand.vmem [shape: f32[2,128], index: 3, kind: input, shape index: {}]   ;;  %s19371_s4 = inlined_call_operand.hbm [shape: f32[2,16,16,128], index: 4, kind: output, shape index: {}]  }
   0x1   :  { %11 = vsyncpa [#allocation4 + $0x1], 0 }
   0x2   :  { %12 = vsyncpa [#allocation7], 0 }
   0x3   :  { %13 = vsyncpa [#allocation5], 0 }
   0x4   :  { %15 = vsyncpa [#allocation5 + $0x1], 0  ;;  %s14141_s15 = smov 0   ;;  %s14143_s16 = smov 0  }
   0x5   :  { %s14145_s17 = smov 0   ;;  %s14147_s18 = smov 0  }
   0x6 LB: > { %s14162_s19 = sadd.s32 4294967295, %s14104_s18   ;;  %s11679_s20 = sadd.s32 4294967294, %s14104_s18   ;;  %s14104_s18 = sphi %s14147_s18, %s19765_s18   ;;  %s14100_s17 = sphi %s14145_s17, %s19764_s17   ;;  %s14096_s16 = sphi %s14143_s16, %s19763_s16   ;;  %s14092_s15 = sphi %s14141_s15, %s19762_s15  }
   0x7   : > { %p41_p0 = scmp.ne.s32.totalorder %s14096_s16, %s14092_s15  ;;  %p19372_p1 = scmp.eq.s32.totalorder %s14162_s19, 0 }
   0x8   : > { %p134_p3 = scmp.eq.s32.totalorder %s11679_s20, 1  ;;  %p11680_p5 = scmp.ge.s32.totalorder %s14104_s18, 1 }
   0x9   : > { %p14171_p4 = por %p19372_p1, %p41_p0  ;;  %p141_p7 = scmp.lt.s32.totalorder %s14104_s18, 3 }
   0xa   : > { %p14176_p6 = por %p134_p3, %p41_p0  ;;  %s14106_s24 = smov [#allocation6]  }
   0xb   : > { %s19405_s21 = scalar_select %p14171_p4, 1, 0 }
   0xc   : > { %s19406_s22 = scalar_select %p14176_p6, 1, 0 }
   0xd   : > { %p14181_p8 = pnand %p11680_p5, %p141_p7  ;;  %s153_s25 = sshll.u32 %s14106_s24, 4  ;;  %s154_s25 = int_to_ptr.vmem [resolvable:$true] %s153_s25 }
   0xe   : > { %s14195_s27 = sadd.s32 1, %s14104_s18   ;;  %s28_s28 = sadd.s32 1, %s14100_s17 }
   0xf   : > { %s19407_s23 = scalar_select %p14181_p8, 1, 0 }
  0x10   : > { %p13657_p9 = pneg %p14181_p8  ;;  %s25_s29 = ssub.s32 %s14104_s18, %s14195_s27 }
  0x11   : > { %s13993_s30 = scalar_lea.vmem %s154_s25, 18432  ;;  %p14001_p5 = scmp.lt.s32.totalorder %s154_s25, %s154_s25 }
  0x12   : > { %p14190_p11 = pnand %p13657_p9, %p19372_p1  ;;  %p13994_p13 = scmp.ne.s32.totalorder %s154_s25, %s13993_s30 }
  0x13   : > { %p14002_p7 = scmp.lt.s32.totalorder %s13993_s30, %s13993_s30 }
  0x14   : > { %p13984_p12 = pneg %p14190_p11 }
  0x15   : > { %p14003_p10 = por %p14002_p7, %p14001_p5 }
  0x16   : > { %p13996_p0 = pnand %p13994_p13, %p13984_p12 }
  0x18   : > { %p13997_p3 = pneg %p13996_p0 }
  0x1a   : > { %p14004_p2 = pnand %p14003_p10, %p13997_p3 }
  0x1c   : > { %14007 = shalt.err (!%p14004_p2)
}
  0x1d   : > { %s14107_s5 = smov 64   ;;  %s14108_s6 = smov 4  }
  0x1e   : > { %13660 = dma.hbm_to_vmem [thread:$0]  (!%p14190_p11), %s19368_s1, 18432, %s154_s25, [#allocation7], %s14107_s5, %s14107_s5, %s14108_s6  }
  0x1f   : > { %p26_p9 = scmp.eq.s32.totalorder %s25_s29, 0  ;;  %p35_p12 = scmp.ne.s32.totalorder %s14100_s17, %s14096_s16 }
  0x20   : > { %p36_p10 = scmp.eq.s32.totalorder %s14104_s18, 0  ;;  %p13670_p2 = scmp.lt.s32.totalorder %s14104_s18, 2 }
  0x21   : > { %s14212_s9 = scalar_select %p26_p9, %s14100_s17, %s28_s28  }
  0x22   : > { %p37_p13 = por %p36_p10, %p35_p12  ;;  %p19409_p0 = scmp.eq.s32.totalorder %s14162_s19, 1 }
  0x23   : > { %s173_s11 = sand.u32 1, %s14100_s17   ;;  %s12287_s12 = sshll.u32 %s14104_s18, 12 }
  0x24   : > { %p14216_p3 = por %p19409_p0, %p35_p12  ;;  %s11683_s13 = sshll.u32 %s173_s11, 8 }
  0x25   : > { %s14225_s24 = scalar_lea.hbm %s19367_s0, %s12287_s12  ;;  %s177_s25 = scalar_lea.vmem [#allocation3], %s11683_s13 }
  0x26   : > { %s19410_s10 = scalar_select %p14216_p3, 1, 0 }
  0x27   : > { %s184_s26 = sshll.u32 %s177_s25, 4  ;;  %p14227_p11 = pnand %p13670_p2, %p37_p13  ;;  %s14231_s26 = int_to_ptr.vmem [resolvable:$true] %s184_s26 }
  0x28   : > { %s14233_s29 = scalar_lea.sflag [#allocation4], %s173_s11  ;;  %s14008_s30 = scalar_lea.hbm %s14225_s24, 4096 }
  0x29   : > { %p14009_p5 = scmp.ne.s32.totalorder %s14225_s24, %s14008_s30  ;;  %p14010_p7 = pneg %p14227_p11 }
  0x2a   : > { %s14013_s7 = scalar_lea.hbm %s19367_s0, 8192  ;;  %p14014_p10 = scmp.lt.s32.totalorder %s14225_s24, %s19367_s0 }
  0x2b   : > { %p14011_p9 = pnand %p14010_p7, %p14009_p5  ;;  %p14015_p2 = scmp.lt.s32.totalorder %s14013_s7, %s14008_s30 }
  0x2d   : > { %p14012_p12 = pneg %p14011_p9  ;;  %p14016_p13 = por %p14015_p2, %p14014_p10 }
  0x2f   : > { %p14017_p0 = pnand %p14016_p13, %p14012_p12 }
  0x31   : > { %14020 = shalt.err (!%p14017_p0)
}
  0x32   : > { %s14021_s11 = scalar_lea.vmem %s14231_s26, 4096  ;;  %s14109_s13 = smov [#allocation3]  }
  0x33   : > { %p14022_p1 = scmp.ne.s32.totalorder %s14231_s26, %s14021_s11  ;;  %s14026_s14 = sshll.u32 %s14109_s13, 4  ;;  %s14027_s14 = int_to_ptr.vmem [resolvable:$false] %s14026_s14 }
  0x34   : > { %s14028_s20 = scalar_lea.vmem %s14027_s14, 8192  ;;  %p14029_p9 = scmp.lt.s32.totalorder %s14231_s26, %s14027_s14 }
  0x35   : > { %p14024_p6 = pnand %p14022_p1, %p14010_p7  ;;  %p14030_p3 = scmp.lt.s32.totalorder %s14028_s20, %s14021_s11 }
  0x37   : > { %p14025_p5 = pneg %p14024_p6  ;;  %p14031_p4 = por %p14030_p3, %p14029_p9 }
  0x39   : > { %p14032_p8 = pnand %p14031_p4, %p14025_p5 }
  0x3b   : > { %14035 = shalt.err (!%p14032_p8)
}
  0x3c   : > { %s14110_s25 = smov 128   ;;  %s14111_s30 = smov 8  }
  0x3d   : > { %13664 = dma.hbm_to_vmem [thread:$0]  (!%p14227_p11), %s14225_s24, 4096, %s14231_s26, %s14233_s29, %s14110_s25, %s14110_s25, %s14111_s30  }
  0x3e   : > { %p19412_p1 = scmp.ne.s32.totalorder %s19407_s23, 0 }
  0x40   : > { %196 = sbr.rel (%p19412_p1) target bundleno = 1479 (0x5c7), region = 36 }
  0x45   : > { %s14257_s5 = sand.u32 1, %s14096_s16   ;;  %p19413_p4 = scmp.ne.s32.totalorder %s19405_s21, 0 }
  0x46   : > { %s11687_s6 = sshll.u32 %s14257_s5, 8  ;;  %s199_s7 = scalar_lea.sflag [#allocation4], %s14257_s5 }
  0x47   : > { %s14263_s8 = scalar_lea.vmem [#allocation3], %s11687_s6 }
  0x48   : > { %14079 = dma.done.wait (%p19413_p4), %s199_s7, 4096  }
  0x49   : > { %14081 = vsyncadd (%p19413_p4), %s199_s7, 4294963200  ;;  %p19414_p6 = scmp.eq.s32.totalorder %s14162_s19, 0 }
  0x4b   : > { %14083 = dma.done.wait (%p19414_p6), [#allocation7], 18432   ;;  %p19415_p8 = pmov %p19414_p6 }
  0x4c   : > { %v14112_v0 = vmov 0   ;;  %v13713_v1 = vld [vmem:[#allocation6 + $0x78] sm:$0xff]   ;;  %v13715_v3 = vld [vmem:[#allocation6 + $0x70] sm:$0xff]   ;;  %v13717_v5 = vld [vmem:[#allocation6 + $0x68] sm:$0xff]   ;;  %vm241_vm0 = vsmask.f32 256 }
  0x4d   : > { %14085 = vsyncadd (%p19415_p8), [#allocation7], 4294948864  ;;  %232 = vst [vmem:[#allocation2] sm:$0xf] %v14112_v0  ;;  %v13714_v2 = vld [vmem:[#allocation6 + $0x38] sm:$0xff]   ;;  %12785 = vmatprep.subr.bf16.mxu0 %v13713_v1  ;;  %v13716_v4 = vld [vmem:[#allocation6 + $0x30] sm:$0xff]  }
  0x4e   : > { %233 = vst [vmem:[#allocation2 + $0x4] sm:$0xf] %v14112_v0  ;;  %234 = vst [vmem:[#allocation2 + $0x8] sm:$0x1] %v14112_v0  ;;  %12833 = vmatprep.subr.bf16.mxu1 %v13714_v2  ;;  %12786 = vmatpush3.bf16.msra.mxu0 %v13713_v1  ;;  %v13718_v6 = vld [vmem:[#allocation6 + $0x28] sm:$0xff]   ;;  %v13719_v7 = vld [vmem:[#allocation6 + $0x60] sm:$0xff]  }
  0x4f   : > { %236 = vst [vmem:[#allocation2 + $0xcc] sm:$0xf] %v14112_v0  ;;  %237 = vst [vmem:[#allocation2 + $0xd0] sm:$0xf] %v14112_v0  ;;  %12834 = vmatpush3.bf16.msra.mxu1 %v13714_v2  ;;  %12787 = vmatprep.subr.bf16.mxu0 %v13715_v3  ;;  %vm240_vm1 = vcmask 1040384   ;;  %v13720_v8 = vld [vmem:[#allocation6 + $0x20] sm:$0xff]  }
  0x50   : > { %238 = vst [vmem:[#allocation2 + $0xd4] sm:$0x1] %v14112_v0  ;;  %12835 = vmatprep.subr.bf16.mxu1 %v13716_v4  ;;  %vm986_vm2 = vsmask.f32 3328  ;;  %vm987_vm3 = vsmask.f32 7440  ;;  %vm14275_vm4 = vmand %vm240_vm1, %vm241_vm0 }
  0x51   : > { %v19416_v9 = vmov 0  ;;  %vm291_vm5 = vsmask.f32 7938  ;;  %v13721_v10 = vld [vmem:[#allocation6 + $0x58] sm:$0xff]   ;;  %vm469_vm6 = vsmask.f32 4368  ;;  %vm14296_vm9 = vmor %vm986_vm2, %vm987_vm3 }
  0x52   : > { %12788 = vmatpush3.bf16.msra.mxu0 %v13715_v3  ;;  %v19417_v9 = vsel %vm14275_vm4, 4294967295, %v19416_v9  ;;  %v13722_v11 = vld [vmem:[#allocation6 + $0x18] sm:$0xff]   ;;  %v13723_v12 = vld [vmem:[#allocation6 + $0x50] sm:$0xff]   ;;  %vm14281_vm7 = vmand %vm240_vm1, %vm291_vm5  ;;  %vm791_vm8 = vcmask 1043456   ;;  %v19421_v45 = vmov 0  ;;  %v19424_v53 = vmov 0 }
  0x53   : > { %12836 = vmatpush3.bf16.msra.mxu1 %v13716_v4  ;;  %12789 = vmatprep.subr.bf16.mxu0 %v13717_v5  ;;  %19418 = vst [vmem:[#allocation12_spill] sm:$0xff] %v19417_v9  ;;  %v13724_v13 = vld [vmem:[#allocation6 + $0x10] sm:$0xff]   ;;  %v293_v26 = vld [vmem:[#allocation2 + $0x14] sm:$0x1]  ;;  %v341_v27 = vld [vmem:[%s14263_s8] sm:$0xff]  ;;  %v19422_v45 = vsel %vm14296_vm9, 4294967295, %v19421_v45 }
  0x54   : > { %12837 = vmatprep.subr.bf16.mxu1 %v13718_v6  ;;  %v905_v14 = vld [vmem:[#allocation2] sm:$0xf]  ;;  %v243_v21 = vld [vmem:[#allocation2 + $0xc] sm:$0x1]  ;;  %v294_v35 = vsel %vm14281_vm7, 0, %v293_v26  ;;  %v12288_v36 = vpack.c.bf16 %v341_v27, %v341_v27  ;;  %v14292_v44 = vld [vmem:[#allocation6 + $0x40] sm:$0xff]  }
  0x55   : > { %v906_v15 = vld [vmem:[#allocation2 + $0x4] sm:$0xf]  ;;  %v953_v16 = vld [vmem:[#allocation2 + $0x8] sm:$0x1]  ;;  %v990_v17 = vshrl.u32 %v905_v14, 16  ;;  %v993_v18 = vshll.u32 %v905_v14, 16  ;;  %vm14303_vm10 = vmor %vm241_vm0, %vm469_vm6 }
  0x56   : > { %12790 = vmatpush3.bf16.msra.mxu0 %v13717_v5  ;;  %v999_v19 = vshll.u32 %v906_v15, 16  ;;  %v1003_v20 = vshrl.u32 %v906_v15, 16  ;;  %v1009_v23 = vshll.u32 %v953_v16, 16  ;;  %v11746_v24 = vcombine.low %v905_v14, %v906_v15  ;;  %v13725_v28 = vld [vmem:[#allocation6 + $0x48] sm:$0xff]   ;;  %295 = vst [vmem:[#allocation2 + $0x14] sm:$0x1] %v294_v35  ;;  %vm14318_vm11 = vmand %vm791_vm8, %vm291_vm5 }
  0x57   : > { %12838 = vmatpush3.bf16.msra.mxu1 %v13718_v6  ;;  %12791 = vmatprep.subr.bf16.mxu0 %v13719_v7  ;;  %v244_v25 = vsel %vm14275_vm4, 0, %v243_v21  ;;  %v992_v29 = vrot.slane %v990_v17, 4  ;;  %v995_v30 = vrot.slane %v993_v18, 5  ;;  %v342_v33 = vld [vmem:[%s14263_s8 + $0x8] sm:$0xff]  ;;  %v246_v41 = vld [vmem:[#allocation2 + $0x18] sm:$0x1] }
  0x58   : > { %12839 = vmatprep.subr.bf16.mxu1 %v13720_v8  ;;  %v1001_v31 = vrot.slane %v999_v19, 5  ;;  %v1005_v32 = vrot.slane %v1003_v20, 4  ;;  %245 = vst [vmem:[#allocation2 + $0xc] sm:$0x1] %v244_v25  ;;  %v13726_v34 = vld [vmem:[#allocation6 + $0x8] sm:$0xff]   ;;  %v12289_v37 = vpack.c.bf16 %v342_v33, %v342_v33  ;;  %v1011_v40 = vrot.slane %v1009_v23, 5  ;;  %12849 = vmatprep.mubr.bf16.mxu1 %v11746_v24 }
  0x59   : > { %v996_v38 = vor.u32 %v995_v30, %v992_v29  ;;  %v296_v42 = vld [vmem:[#allocation2 + $0x20] sm:$0x1]  ;;  %v343_v43 = vld [vmem:[%s14263_s8 + $0x10] sm:$0xff]  ;;  %19423 = vst [vmem:[#allocation13_spill] sm:$0xff] %v19422_v45  ;;  %v472_v46 = vshrl.u32 %v12288_v36, 16  ;;  %v475_v47 = vshll.u32 %v12288_v36, 16 }
  0x5a   : > { %12792 = vmatpush3.bf16.msra.mxu0 %v13719_v7  ;;  %v1006_v39 = vor.u32 %v1005_v32, %v1001_v31  ;;  %v480_v48 = vshrl.u32 %v12289_v37, 16  ;;  %v483_v49 = vshll.u32 %v12289_v37, 16  ;;  %v344_v50 = vld [vmem:[%s14263_s8 + $0x18] sm:$0xff]  ;;  %v19425_v53 = vsel %vm14303_vm10, 4294967295, %v19424_v53  ;;  %v249_v56 = vld [vmem:[#allocation2 + $0x24] sm:$0x1] }
  0x5b   : > { %12840 = vmatpush3.bf16.msra.mxu1 %v13720_v8  ;;  %12793 = vmatprep.subr.bf16.mxu0 %v13721_v10  ;;  %v997_v51 = vrot.slane %v996_v38, 4  ;;  %19426 = vst [vmem:[#allocation14_spill] sm:$0xff] %v19425_v53  ;;  %v247_v54 = vsel %vm14275_vm4, 0, %v246_v41  ;;  %v297_v55 = vsel %vm14281_vm7, 0, %v296_v42  ;;  %v13728_v57 = vld [vmem:[#allocation6] sm:$0xff]   ;;  %v474_v58 = vrot.slane %v472_v46, 7 }
  0x5c   : > { %12841 = vmatprep.subr.bf16.mxu1 %v13722_v11  ;;  %v1007_v52 = vrot.slane %v1006_v39, 4  ;;  %v482_v59 = vrot.slane %v480_v48, 7  ;;  %248 = vst [vmem:[#allocation2 + $0x18] sm:$0x1] %v247_v54  ;;  %298 = vst [vmem:[#allocation2 + $0x20] sm:$0x1] %v297_v55  ;;  %v12290_v60 = vpack.c.bf16 %v343_v43, %v343_v43  ;;  %v12291_v61 = vpack.c.bf16 %v344_v50, %v344_v50 }
  0x5d   : > { %v299_v62 = vld [vmem:[#allocation2 + $0x2c] sm:$0x1]  ;;  %v345_v63 = vld [vmem:[%s14263_s8 + $0x20] sm:$0xff]  ;;  %v1002_v0 = vsel %vm14296_vm9, %v997_v51, %v1001_v31  ;;  %v19427_v2 = vmov 0  ;;  %v250_v3 = vsel %vm14275_vm4, 0, %v249_v56  ;;  %v477_v6 = vor.u32 %v475_v47, %v474_v58  ;;  %v14332_v21 = vld [vmem:[#allocation6 + $0xb8] sm:$0xff]  }
  0x5e   : > { %12794 = vmatpush3.bf16.msra.mxu0 %v13721_v10  ;;  %v1012_v1 = vsel %vm14296_vm9, %v1007_v52, %v1011_v40  ;;  %v19428_v2 = vsel %vm14318_vm11, 4294967295, %v19427_v2  ;;  %v300_v4 = vsel %vm14281_vm7, 0, %v299_v62  ;;  %v478_v7 = vrot.slane %v474_v58, 4  ;;  %251 = vst [vmem:[#allocation2 + $0x24] sm:$0x1] %v250_v3  ;;  %v347_v29 = vld [vmem:[%s14263_s8 + $0x30] sm:$0xff] }
  0x5f   : > { %12842 = vmatpush3.bf16.msra.mxu1 %v13722_v11  ;;  %12795 = vmatprep.subr.bf16.mxu0 %v13723_v12  ;;  %19429 = vst [vmem:[#allocation15_spill] sm:$0xff] %v19428_v2  ;;  %v11722_v5 = vcombine.low %v1002_v0, %v1012_v1  ;;  %v485_v8 = vor.u32 %v483_v49, %v482_v59  ;;  %v793_v10 = vld [vmem:[#allocation2 + $0xc] sm:$0xf]  ;;  %301 = vst [vmem:[#allocation2 + $0x2c] sm:$0x1] %v300_v4  ;;  %v346_v11 = vld [vmem:[%s14263_s8 + $0x28] sm:$0xff] }
  0x60   : > { %12843 = vmatprep.subr.bf16.mxu1 %v13724_v13  ;;  %v489_v14 = vshrl.u32 %v12290_v60, 16  ;;  %v492_v15 = vshll.u32 %v12290_v60, 16  ;;  %v497_v16 = vshrl.u32 %v12291_v61, 16  ;;  %v302_v17 = vld [vmem:[#allocation2 + $0x38] sm:$0x1]  ;;  %v794_v19 = vsel %vm14318_vm11, %v477_v6, %v793_v10  ;;  %v348_v30 = vld [vmem:[%s14263_s8 + $0x38] sm:$0xff] }
  0x61   : > { %v486_v18 = vsel %vm14303_vm10, %v478_v7, %v485_v8  ;;  %v797_v20 = vld [vmem:[#allocation2 + $0x14] sm:$0x1]  ;;  %v500_v23 = vshll.u32 %v12291_v61, 16  ;;  %v12292_v24 = vpack.c.bf16 %v345_v63, %v345_v63  ;;  %12801 = vmatprep.mubr.bf16.mxu0 %v11722_v5  ;;  %795 = vst [vmem:[#allocation2 + $0xc] sm:$0xf] %v794_v19  ;;  %v12294_v47 = vpack.c.bf16 %v347_v29, %v347_v29  ;;  %s19175_s13 = scalar_lea.vmem [#allocation8], %s11687_s6 }
  0x62   : > { %12796 = vmatpush3.bf16.msra.mxu0 %v13723_v12  ;;  %v252_v12 = vld [vmem:[#allocation2 + $0x30] sm:$0x1]  ;;  %796 = vst [vmem:[#allocation2 + $0x10] sm:$0xf] %v486_v18  ;;  %v491_v26 = vrot.slane %v489_v14, 7  ;;  %v499_v27 = vrot.slane %v497_v16, 7  ;;  %v14350_v51 = vpack.c.bf16 %v348_v30, %v348_v30 }
  0x63   : > { %12844 = vmatpush3.bf16.msra.mxu1 %v13724_v13  ;;  %12797 = vmatprep.subr.bf16.mxu0 %v13725_v28  ;;  %v487_v13 = vrot.slane %v482_v59, 4  ;;  %v506_v31 = vshrl.u32 %v12292_v24, 16  ;;  %v509_v32 = vshll.u32 %v12292_v24, 16  ;;  %v253_v33 = vsel %vm14275_vm4, 0, %v252_v12  ;;  %v255_v35 = vld [vmem:[#allocation2 + $0x3c] sm:$0x1] }
  0x64   : > { %12845 = vmatprep.subr.bf16.mxu1 %v13726_v34  ;;  %v494_v36 = vor.u32 %v492_v15, %v491_v26  ;;  %v495_v37 = vrot.slane %v491_v26, 4  ;;  %v502_v38 = vor.u32 %v500_v23, %v499_v27  ;;  %v504_v39 = vrot.slane %v499_v27, 4  ;;  %v800_v40 = vld [vmem:[#allocation2 + $0x18] sm:$0xf]  ;;  %v804_v41 = vld [vmem:[#allocation2 + $0x20] sm:$0x1] }
  0x65   : > { %v798_v25 = vsel %vm14275_vm4, %v487_v13, %v797_v20  ;;  %254 = vst [vmem:[#allocation2 + $0x30] sm:$0x1] %v253_v33  ;;  %v508_v42 = vrot.slane %v506_v31, 7  ;;  %v807_v50 = vld [vmem:[#allocation2 + $0x24] sm:$0xf]  ;;  %v523_v56 = vshrl.u32 %v12294_v47, 16 }
  0x66   : > { %12798 = vmatpush3.bf16.msra.mxu0 %v13725_v28  ;;  %v12293_v28 = vpack.c.bf16 %v346_v11, %v346_v11  ;;  %799 = vst [vmem:[#allocation2 + $0x14] sm:$0x1] %v798_v25  ;;  %v503_v48 = vsel %vm14303_vm10, %v495_v37, %v502_v38  ;;  %v805_v49 = vsel %vm14275_vm4, %v504_v39, %v804_v41  ;;  %v526_v58 = vshll.u32 %v12294_v47, 16  ;;  %v349_v14 = vld [vmem:[%s14263_s8 + $0x40] sm:$0xff]  ;;  %v350_v15 = vld [vmem:[%s14263_s8 + $0x48] sm:$0xff]  ;;  %v13823_v53 = vld [vmem:[#allocation6 + $0x218] sm:$0xff]  }
  0x67   : > { %12846 = vmatpush3.bf16.msra.mxu1 %v13726_v34  ;;  %12799 = vmatprep.subr.bf16.mxu0 %v14292_v44  ;;  %v303_v34 = vsel %vm14281_vm7, 0, %v302_v17  ;;  %803 = vst [vmem:[#allocation2 + $0x1c] sm:$0xf] %v503_v48  ;;  %806 = vst [vmem:[#allocation2 + $0x20] sm:$0x1] %v805_v49  ;;  %v511_v52 = vor.u32 %v509_v32, %v508_v42  ;;  %v512_v54 = vrot.slane %v508_v42, 4 }
  0x68   : > { %12847 = vmatprep.subr.bf16.mxu1 %v13728_v57  ;;  %304 = vst [vmem:[#allocation2 + $0x38] sm:$0x1] %v303_v34  ;;  %v514_v43 = vshrl.u32 %v12293_v28, 16  ;;  %v517_v46 = vshll.u32 %v12293_v28, 16  ;;  %v531_v59 = vshrl.u32 %v14350_v51, 16  ;;  %v256_v60 = vsel %vm14275_vm4, 0, %v255_v35 }
  0x69   : > { %v907_v61 = vld [vmem:[#allocation2 + $0xc] sm:$0xf]  ;;  %v908_v62 = vld [vmem:[#allocation2 + $0x10] sm:$0xf]  ;;  %v808_v1 = vsel %vm14318_vm11, %v511_v52, %v807_v50  ;;  %v14357_v3 = vrot.slane %v523_v56, 7  ;;  %v534_v13 = vshll.u32 %v14350_v51, 16  ;;  %v14368_v31 = vpack.c.bf16 %v349_v14, %v349_v14 }
  0x6a   : > { %12800 = vmatpush3.bf16.msra.mxu0 %v14292_v44  ;;  %v801_v44 = vsel %vm14318_vm11, %v494_v36, %v800_v40  ;;  %v516_v55 = vrot.slane %v514_v43, 7  ;;  %257 = vst [vmem:[#allocation2 + $0x3c] sm:$0x1] %v256_v60  ;;  %v1014_v5 = vshrl.u32 %v907_v61, 16  ;;  %v1017_v6 = vshll.u32 %v907_v61, 16  ;;  %s12352_s14 = sshll.u32 %s14162_s19, 12 }
  0x6b   : > { %12848 = vmatpush3.bf16.msra.mxu1 %v13728_v57  ;;  %12881 = vmatprep.subr.bf16.mxu0 %v14332_v21  ;;  %802 = vst [vmem:[#allocation2 + $0x18] sm:$0xf] %v801_v44  ;;  %v811_v57 = vld [vmem:[#allocation2 + $0x2c] sm:$0x1]  ;;  %v1023_v7 = vshll.u32 %v908_v62, 16  ;;  %v1027_v8 = vshrl.u32 %v908_v62, 16  ;;  %v11747_v11 = vcombine.low %v907_v61, %v908_v62  ;;  %v528_v24 = vor.u32 %v526_v58, %v14357_v3  ;;  %s19306_s30 = scalar_lea.hbm %s19371_s4, %s12352_s14 }
  0x6c   : > { %v519_v63 = vor.u32 %v517_v46, %v516_v55  ;;  %v521_v0 = vrot.slane %v516_v55, 4  ;;  %809 = vst [vmem:[#allocation2 + $0x24] sm:$0xf] %v808_v1  ;;  %v1016_v16 = vrot.slane %v1014_v5, 4  ;;  %v1019_v17 = vrot.slane %v1017_v6, 5  ;;  %v13734_v58 = vld [vmem:[#allocation6 + $0xb0] sm:$0xff]  }
  0x6d   : > { %v954_v4 = vld [vmem:[#allocation2 + $0x14] sm:$0x1]  ;;  %v1025_v18 = vrot.slane %v1023_v7, 5  ;;  %v1029_v19 = vrot.slane %v1027_v8, 4  ;;  %v529_v25 = vrot.slane %v14357_v3, 4  ;;  %v14370_v32 = vpack.c.bf16 %v350_v15, %v350_v15  ;;  %v13737_v15 = vld [vmem:[#allocation6 + $0xa8] sm:$0xff]  }
  0x6e   : > { %v1033_v10 = vshll.u32 %v954_v4, 16  ;;  %v520_v12 = vsel %vm14303_vm10, %v512_v54, %v519_v63  ;;  %12850 = vmatmul.mubr.bf16.vlgmr.msra.gmra.mxu1 %v11747_v11  ;;  %v812_v23 = vsel %vm14275_vm4, %v521_v0, %v811_v57  ;;  %v1020_v26 = vor.u32 %v1019_v17, %v1016_v16  ;;  %v910_v29 = vld [vmem:[#allocation2 + $0x1c] sm:$0xf]  ;;  %v955_v30 = vld [vmem:[#allocation2 + $0x20] sm:$0x1]  ;;  %s11596_s20 = sshll.u32 %s19175_s13, 4  ;;  %s19308_s20 = int_to_ptr.vmem [resolvable:$true] %s11596_s20 }
  0x6f   : > { %810 = vst [vmem:[#allocation2 + $0x28] sm:$0xf] %v520_v12  ;;  %v1030_v27 = vor.u32 %v1029_v19, %v1025_v18  ;;  %813 = vst [vmem:[#allocation2 + $0x2c] sm:$0x1] %v812_v23  ;;  %v1047_v35 = vshll.u32 %v910_v29, 16  ;;  %v1051_v36 = vshrl.u32 %v910_v29, 16 }
  0x70   : > { %v1035_v20 = vrot.slane %v1033_v10, 5  ;;  %v1021_v37 = vrot.slane %v1020_v26, 4  ;;  %v1057_v39 = vshll.u32 %v955_v30, 16  ;;  %v814_v60 = vld [vmem:[#allocation2 + $0x30] sm:$0xf]  ;;  %v533_v8 = vrot.slane %v531_v59, 7 }
  0x71   : > { %v1031_v38 = vrot.slane %v1030_v27, 4  ;;  %v1049_v43 = vrot.slane %v1047_v35, 5  ;;  %v1053_v46 = vrot.slane %v1051_v36, 4  ;;  %v305_v1 = vld [vmem:[#allocation2 + $0x44] sm:$0x1]  ;;  %v815_v14 = vsel %vm14318_vm11, %v528_v24, %v814_v60  ;;  %v351_v23 = vld [vmem:[%s14263_s8 + $0x50] sm:$0xff] }
  0x72   : > { %v909_v28 = vld [vmem:[#allocation2 + $0x18] sm:$0xf]  ;;  %v1026_v48 = vsel %vm14296_vm9, %v1021_v37, %v1025_v18  ;;  %v1059_v49 = vrot.slane %v1057_v39, 5  ;;  %v258_v16 = vld [vmem:[#allocation2 + $0x48] sm:$0x1]  ;;  %v540_v51 = vshrl.u32 %v14368_v31, 16 }
  0x73   : > { %v1038_v33 = vshrl.u32 %v909_v28, 16  ;;  %v1041_v34 = vshll.u32 %v909_v28, 16  ;;  %v11748_v40 = vcombine.low %v909_v28, %v910_v29  ;;  %v911_v47 = vld [vmem:[#allocation2 + $0x24] sm:$0xf]  ;;  %v1036_v44 = vsel %vm14296_vm9, %v1031_v38, %v1035_v20  ;;  %816 = vst [vmem:[#allocation2 + $0x30] sm:$0xf] %v815_v14 }
  0x74   : > { %v1062_v50 = vshrl.u32 %v911_v47, 16  ;;  %v11723_v52 = vcombine.low %v1026_v48, %v1036_v44  ;;  %v1054_v55 = vor.u32 %v1053_v46, %v1049_v43  ;;  %v1065_v57 = vshll.u32 %v911_v47, 16  ;;  %v818_v19 = vld [vmem:[#allocation2 + $0x38] sm:$0x1]  ;;  %v308_v20 = vld [vmem:[#allocation2 + $0x50] sm:$0x1] }
  0x75   : > { %v1040_v41 = vrot.slane %v1038_v33, 4  ;;  %v1043_v42 = vrot.slane %v1041_v34, 5  ;;  %12853 = vmatprep.mubr.bf16.mxu1 %v11748_v40  ;;  %v538_v28 = vrot.slane %v533_v8, 4  ;;  %v352_v29 = vld [vmem:[%s14263_s8 + $0x58] sm:$0xff]  ;;  %v306_v34 = vsel %vm14281_vm7, 0, %v305_v1  ;;  %v13745_v38 = vld [vmem:[#allocation6 + $0xf0] sm:$0xff]  }
  0x76   : > { %v912_v56 = vld [vmem:[#allocation2 + $0x28] sm:$0xf]  ;;  %v1064_v61 = vrot.slane %v1062_v50, 4  ;;  %12802 = vmatmul.mubr.bf16.vlgmr.msra.gmra.mxu0 %v11723_v52  ;;  %v1055_v5 = vrot.slane %v1054_v55, 4  ;;  %v956_v6 = vld [vmem:[#allocation2 + $0x2c] sm:$0x1]  ;;  %v12298_v48 = vpack.c.bf16 %v351_v23, %v351_v23  ;;  %v14409_v50 = vpack.c.bf16 %v352_v29, %v352_v29 }
  0x77   : > { %v1044_v54 = vor.u32 %v1043_v42, %v1040_v41  ;;  %v1071_v62 = vshll.u32 %v912_v56, 16  ;;  %v1075_v63 = vshrl.u32 %v912_v56, 16  ;;  %v11749_v0 = vcombine.low %v911_v47, %v912_v56  ;;  %12882 = vmatpush3.bf16.msra.mxu0 %v14332_v21  ;;  %307 = vst [vmem:[#allocation2 + $0x44] sm:$0x1] %v306_v34  ;;  %v13740_v42 = vld [vmem:[#allocation6 + $0xa0] sm:$0xff]   ;;  %v354_v55 = vld [vmem:[%s14263_s8 + $0x68] sm:$0xff] }
  0x78   : > { %v1067_v7 = vrot.slane %v1065_v57, 5  ;;  %v1081_v12 = vshll.u32 %v956_v6, 16  ;;  %v1060_v18 = vsel %vm14296_vm9, %v1055_v5, %v1059_v49  ;;  %12883 = vmatprep.subr.bf16.mxu0 %v13734_v58  ;;  %v536_v21 = vor.u32 %v534_v13, %v533_v8  ;;  %v13744_v13 = vld [vmem:[#allocation6 + $0xf8] sm:$0xff]   ;;  %v821_v46 = vld [vmem:[#allocation2 + $0x3c] sm:$0xf]  ;;  %v13749_v6 = vld [vmem:[#allocation6 + $0xe8] sm:$0xff]  }
  0x79   : > { %v1045_v4 = vrot.slane %v1044_v54, 4  ;;  %v1073_v10 = vrot.slane %v1071_v62, 5  ;;  %v1077_v11 = vrot.slane %v1075_v63, 4  ;;  %12854 = vmatmul.mubr.bf16.gmra.mxu1 %v11749_v0  ;;  %v819_v36 = vsel %vm14275_vm4, %v538_v28, %v818_v19  ;;  %12929 = vmatprep.subr.bf16.mxu1 %v13744_v13  ;;  %v261_v52 = vld [vmem:[#allocation2 + $0x54] sm:$0x1]  ;;  %v353_v54 = vld [vmem:[%s14263_s8 + $0x60] sm:$0xff] }
  0x7a   : > { %v1068_v59 = vor.u32 %v1067_v7, %v1064_v61  ;;  %v1083_v27 = vrot.slane %v1081_v12, 5  ;;  %v537_v33 = vsel %vm14303_vm10, %v529_v25, %v536_v21  ;;  %v543_v37 = vshll.u32 %v14368_v31, 16  ;;  %820 = vst [vmem:[#allocation2 + $0x38] sm:$0x1] %v819_v36  ;;  %12930 = vmatpush3.bf16.msra.mxu1 %v13744_v13  ;;  %v913_v56 = vld [vmem:[#allocation2 + $0x30] sm:$0xf] }
  0x7b   : > { %v1050_v17 = vsel %vm14296_vm9, %v1045_v4, %v1049_v43  ;;  %v1078_v24 = vor.u32 %v1077_v11, %v1073_v10  ;;  %12884 = vmatpush3.bf16.msra.mxu0 %v13734_v58  ;;  %817 = vst [vmem:[#allocation2 + $0x34] sm:$0xf] %v537_v33  ;;  %v548_v3 = vshrl.u32 %v14370_v32, 16  ;;  %v542_v39 = vrot.slane %v540_v51, 7  ;;  %12931 = vmatprep.subr.bf16.mxu1 %v13745_v38  ;;  %v13743_v62 = vld [vmem:[#allocation6 + $0x98] sm:$0xff]   ;;  %v13750_v12 = vld [vmem:[#allocation6 + $0xe0] sm:$0xff]  }
  0x7c   : > { %v11724_v26 = vcombine.low %v1050_v17, %v1060_v18  ;;  %v1069_v30 = vrot.slane %v1068_v59, 4  ;;  %v551_v40 = vshll.u32 %v14370_v32, 16  ;;  %12885 = vmatprep.subr.bf16.mxu0 %v13737_v15  ;;  %v259_v41 = vsel %vm14275_vm4, 0, %v258_v16  ;;  %v311_v5 = vld [vmem:[#allocation2 + $0x5c] sm:$0x1]  ;;  %v13748_v21 = vld [vmem:[#allocation6 + $0x90] sm:$0xff]  }
  0x7d   : > { %v1079_v35 = vrot.slane %v1078_v24, 4  ;;  %v550_v43 = vrot.slane %v548_v3, 7  ;;  %260 = vst [vmem:[#allocation2 + $0x48] sm:$0x1] %v259_v41  ;;  %v309_v47 = vsel %vm14281_vm7, 0, %v308_v20  ;;  %v545_v44 = vor.u32 %v543_v37, %v542_v39  ;;  %s11583_s6 = scalar_lea.sflag [#allocation5], %s14257_s5 }
  0x7e   : > { %12805 = vmatprep.mubr.bf16.mxu0 %v11724_v26  ;;  %v1074_v25 = vsel %vm14296_vm9, %v1069_v30, %v1073_v10  ;;  %v546_v49 = vrot.slane %v542_v39, 4  ;;  %310 = vst [vmem:[#allocation2 + $0x50] sm:$0x1] %v309_v47  ;;  %v557_v60 = vshrl.u32 %v12298_v48, 16  ;;  %v560_v61 = vshll.u32 %v12298_v48, 16  ;;  %12932 = vmatpush3.bf16.msra.mxu1 %v13745_v38  ;;  %s14036_s7 = scalar_lea.vmem %s19308_s20, 4096 }
  0x7f   : > { %v1084_v31 = vsel %vm14296_vm9, %v1079_v35, %v1083_v27  ;;  %v553_v57 = vor.u32 %v551_v40, %v550_v43  ;;  %v555_v58 = vrot.slane %v550_v43, 4  ;;  %12886 = vmatpush3.bf16.msra.mxu0 %v13737_v15  ;;  %v1086_v63 = vshrl.u32 %v913_v56, 16  ;;  %v825_v17 = vld [vmem:[#allocation2 + $0x44] sm:$0x1]  ;;  %12933 = vmatprep.subr.bf16.mxu1 %v13749_v6  ;;  %p14037_p3 = scmp.ne.s32.totalorder %s19308_s20, %s14036_s7  ;;  %p19759_p11 = scmp.ne.s32.totalorder %s19410_s10, 0 }
  0x80   : > { %v11725_v32 = vcombine.low %v1074_v25, %v1084_v31  ;;  %v1089_v0 = vshll.u32 %v913_v56, 16  ;;  %v822_v1 = vsel %vm14318_vm11, %v545_v44, %v821_v46  ;;  %v565_v4 = vshrl.u32 %v14409_v50, 16  ;;  %12887 = vmatprep.subr.bf16.mxu0 %v13740_v42 }
  0x81   : > { %v554_v7 = vsel %vm14303_vm10, %v546_v49, %v553_v57  ;;  %823 = vst [vmem:[#allocation2 + $0x3c] sm:$0xf] %v822_v1  ;;  %v559_v8 = vrot.slane %v557_v60, 7  ;;  %v568_v10 = vshll.u32 %v14409_v50, 16  ;;  %v262_v11 = vsel %vm14275_vm4, 0, %v261_v52  ;;  %p14038_p7 = pnand %p14037_p3, %p19759_p11 }
  0x82   : > { %12806 = vmatmul.mubr.bf16.gmra.mxu0 %v11725_v32  ;;  %v914_v14 = vld [vmem:[#allocation2 + $0x34] sm:$0xf]  ;;  %v1088_v15 = vrot.slane %v1086_v63, 4  ;;  %v1091_v16 = vrot.slane %v1089_v0, 5  ;;  %824 = vst [vmem:[#allocation2 + $0x40] sm:$0xf] %v554_v7  ;;  %v12300_v18 = vpack.c.bf16 %v353_v54, %v353_v54  ;;  %v14421_v59 = vpack.c.bf16 %v354_v55, %v354_v55  ;;  %12934 = vmatpush3.bf16.msra.mxu1 %v13749_v6 }
  0x83   : > { %263 = vst [vmem:[#allocation2 + $0x54] sm:$0x1] %v262_v11  ;;  %v957_v19 = vld [vmem:[#allocation2 + $0x38] sm:$0x1]  ;;  %v1095_v20 = vshll.u32 %v914_v14, 16  ;;  %v1099_v23 = vshrl.u32 %v914_v14, 16  ;;  %v11750_v26 = vcombine.low %v913_v56, %v914_v14  ;;  %v826_v24 = vsel %vm14275_vm4, %v555_v58, %v825_v17  ;;  %12888 = vmatpush3.bf16.msra.mxu0 %v13740_v42  ;;  %12935 = vmatprep.subr.bf16.mxu1 %v13750_v12  ;;  %p14039_p12 = pneg %p14038_p7 }
  0x84   : > { %v1092_v27 = vor.u32 %v1091_v16, %v1088_v15  ;;  %v1105_v28 = vshll.u32 %v957_v19, 16  ;;  %827 = vst [vmem:[#allocation2 + $0x44] sm:$0x1] %v826_v24  ;;  %v562_v29 = vor.u32 %v560_v61, %v559_v8  ;;  %v563_v30 = vrot.slane %v559_v8, 4  ;;  %v828_v33 = vld [vmem:[#allocation2 + $0x48] sm:$0xf]  ;;  %12889 = vmatprep.subr.bf16.mxu0 %v13743_v62 }
  0x85   : > { %v1097_v34 = vrot.slane %v1095_v20, 5  ;;  %v1101_v51 = vrot.slane %v1099_v23, 4  ;;  %12857 = vmatprep.mubr.bf16.mxu1 %v11750_v26  ;;  %v567_v13 = vrot.slane %v565_v4, 7  ;;  %v312_v35 = vsel %vm14281_vm7, 0, %v311_v5  ;;  %v832_v41 = vld [vmem:[#allocation2 + $0x50] sm:$0x1] }
  0x86   : > { %v1093_v36 = vrot.slane %v1092_v27, 4  ;;  %v1107_v37 = vrot.slane %v1105_v28, 5  ;;  %v829_v3 = vsel %vm14318_vm11, %v562_v29, %v828_v33  ;;  %313 = vst [vmem:[#allocation2 + $0x5c] sm:$0x1] %v312_v35  ;;  %v574_v38 = vshrl.u32 %v12300_v18, 16  ;;  %12936 = vmatpush3.bf16.msra.mxu1 %v13750_v12  ;;  %v355_v15 = vld [vmem:[%s14263_s8 + $0x70] sm:$0xff] }
  0x87   : > { %v1102_v25 = vor.u32 %v1101_v51, %v1097_v34  ;;  %v570_v39 = vor.u32 %v568_v10, %v567_v13  ;;  %v572_v40 = vrot.slane %v567_v13, 4  ;;  %830 = vst [vmem:[#allocation2 + $0x48] sm:$0xf] %v829_v3  ;;  %v577_v42 = vshll.u32 %v12300_v18, 16  ;;  %12890 = vmatpush3.bf16.msra.mxu0 %v13743_v62  ;;  %v264_v60 = vld [vmem:[#allocation2 + $0x60] sm:$0x1] }
  0x88   : > { %v1098_v31 = vsel %vm14296_vm9, %v1093_v36, %v1097_v34  ;;  %v915_v43 = vld [vmem:[#allocation2 + $0x3c] sm:$0xf]  ;;  %v14431_v46 = vrot.slane %v574_v38, 7  ;;  %v582_v47 = vshrl.u32 %v14421_v59, 16  ;;  %v585_v48 = vshll.u32 %v14421_v59, 16  ;;  %12891 = vmatprep.subr.bf16.mxu0 %v13748_v21  ;;  %v356_v16 = vld [vmem:[%s14263_s8 + $0x78] sm:$0xff] }
  0x89   : > { %v1103_v32 = vrot.slane %v1102_v25, 4  ;;  %v916_v44 = vld [vmem:[#allocation2 + $0x40] sm:$0xf]  ;;  %v1110_v49 = vshrl.u32 %v915_v43, 16  ;;  %v1113_v50 = vshll.u32 %v915_v43, 16  ;;  %v571_v52 = vsel %vm14303_vm10, %v563_v30, %v570_v39  ;;  %v13754_v29 = vld [vmem:[#allocation6 + $0xd8] sm:$0xff]  }
  0x8a   : > { %v1119_v54 = vshll.u32 %v916_v44, 16  ;;  %v1123_v55 = vshrl.u32 %v916_v44, 16  ;;  %v11751_v56 = vcombine.low %v915_v43, %v916_v44  ;;  %831 = vst [vmem:[#allocation2 + $0x4c] sm:$0xf] %v571_v52  ;;  %v833_v57 = vsel %vm14275_vm4, %v572_v40, %v832_v41  ;;  %v835_v58 = vld [vmem:[#allocation2 + $0x54] sm:$0xf]  ;;  %12937 = vmatprep.subr.bf16.mxu1 %v13754_v29 }
  0x8b   : > { %v1108_v61 = vsel %vm14296_vm9, %v1103_v32, %v1107_v37  ;;  %v958_v62 = vld [vmem:[#allocation2 + $0x44] sm:$0x1]  ;;  %v1112_v63 = vrot.slane %v1110_v49, 4  ;;  %v1115_v0 = vrot.slane %v1113_v50, 5  ;;  %834 = vst [vmem:[#allocation2 + $0x50] sm:$0x1] %v833_v57  ;;  %v579_v1 = vor.u32 %v577_v42, %v14431_v46  ;;  %12892 = vmatpush3.bf16.msra.mxu0 %v13748_v21  ;;  %12938 = vmatpush3.bf16.msra.mxu1 %v13754_v29 }
  0x8c   : > { %v314_v4 = vld [vmem:[#allocation2 + $0x68] sm:$0x1]  ;;  %v11726_v5 = vcombine.low %v1098_v31, %v1108_v61  ;;  %v1121_v6 = vrot.slane %v1119_v54, 5  ;;  %v1125_v7 = vrot.slane %v1123_v55, 4  ;;  %v1129_v8 = vshll.u32 %v958_v62, 16  ;;  %12858 = vmatmul.mubr.bf16.gmra.mxu1 %v11751_v56  ;;  %v13753_v23 = vld [vmem:[#allocation6 + $0x88] sm:$0xff]  }
  0x8d   : > { %v1116_v10 = vor.u32 %v1115_v0, %v1112_v63  ;;  %v580_v11 = vrot.slane %v14431_v46, 4  ;;  %v584_v12 = vrot.slane %v582_v47, 7  ;;  %v836_v14 = vsel %vm14318_vm11, %v579_v1, %v835_v58  ;;  %v839_v21 = vld [vmem:[#allocation2 + $0x5c] sm:$0x1]  ;;  %12893 = vmatprep.subr.bf16.mxu0 %v13753_v23  ;;  %v267_v47 = vld [vmem:[#allocation2 + $0x6c] sm:$0x1] }
  0x8e   : > { %12809 = vmatprep.mubr.bf16.mxu0 %v11726_v5  ;;  %v1126_v17 = vor.u32 %v1125_v7, %v1121_v6  ;;  %v1131_v18 = vrot.slane %v1129_v8, 5  ;;  %v917_v59 = vld [vmem:[#allocation2 + $0x48] sm:$0xf]  ;;  %837 = vst [vmem:[#allocation2 + $0x54] sm:$0xf] %v836_v14  ;;  %v265_v19 = vsel %vm14275_vm4, 0, %v264_v60  ;;  %v12302_v34 = vpack.c.bf16 %v355_v15, %v355_v15 }
  0x8f   : > { %v315_v20 = vsel %vm14281_vm7, 0, %v314_v4  ;;  %v1117_v26 = vrot.slane %v1116_v10, 4  ;;  %v1134_v24 = vshrl.u32 %v917_v59, 16  ;;  %v1137_v27 = vshll.u32 %v917_v59, 16  ;;  %266 = vst [vmem:[#allocation2 + $0x60] sm:$0x1] %v265_v19  ;;  %12894 = vmatpush3.bf16.msra.mxu0 %v13753_v23 }
  0x90   : > { %v587_v28 = vor.u32 %v585_v48, %v584_v12  ;;  %316 = vst [vmem:[#allocation2 + $0x68] sm:$0x1] %v315_v20  ;;  %v1127_v30 = vrot.slane %v1126_v17, 4  ;;  %v589_v33 = vrot.slane %v584_v12, 4  ;;  %v12303_v51 = vpack.c.bf16 %v356_v16, %v356_v16  ;;  %v13755_v48 = vld [vmem:[#allocation6 + $0xd0] sm:$0xff]   ;;  %v357_v0 = vld [vmem:[%s14263_s8 + $0x80] sm:$0xff] }
  0x91   : > { %v1122_v13 = vsel %vm14296_vm9, %v1117_v26, %v1121_v6  ;;  %v918_v35 = vld [vmem:[#allocation2 + $0x4c] sm:$0xf]  ;;  %v1136_v36 = vrot.slane %v1134_v24, 4  ;;  %v1139_v37 = vrot.slane %v1137_v27, 5  ;;  %v591_v49 = vshrl.u32 %v12302_v34, 16  ;;  %12939 = vmatprep.subr.bf16.mxu1 %v13755_v48  ;;  %v358_v14 = vld [vmem:[%s14263_s8 + $0x88] sm:$0xff] }
  0x92   : > { %v588_v3 = vsel %vm14303_vm10, %v580_v11, %v587_v28  ;;  %v1132_v38 = vsel %vm14296_vm9, %v1127_v30, %v1131_v18  ;;  %v959_v25 = vld [vmem:[#allocation2 + $0x50] sm:$0x1]  ;;  %v1143_v39 = vshll.u32 %v918_v35, 16  ;;  %v1147_v40 = vshrl.u32 %v918_v35, 16  ;;  %v317_v52 = vld [vmem:[#allocation2 + $0x74] sm:$0x1]  ;;  %12940 = vmatpush3.bf16.msra.mxu1 %v13755_v48 }
  0x93   : > { %v11752_v41 = vcombine.low %v917_v59, %v918_v35  ;;  %838 = vst [vmem:[#allocation2 + $0x58] sm:$0xf] %v588_v3  ;;  %v11727_v42 = vcombine.low %v1122_v13, %v1132_v38  ;;  %v1140_v31 = vor.u32 %v1139_v37, %v1136_v36  ;;  %v1153_v43 = vshll.u32 %v959_v25, 16  ;;  %v13758_v15 = vld [vmem:[#allocation6 + $0x80] sm:$0xff]   ;;  %v320_v28 = vld [vmem:[#allocation2 + $0x80] sm:$0x1] }
  0x94   : > { %v840_v46 = vsel %vm14275_vm4, %v589_v33, %v839_v21  ;;  %v1145_v32 = vrot.slane %v1143_v39, 5  ;;  %v1149_v44 = vrot.slane %v1147_v40, 4  ;;  %v594_v50 = vshll.u32 %v12302_v34, 16  ;;  %v270_v20 = vld [vmem:[#allocation2 + $0x78] sm:$0x1]  ;;  %12895 = vmatprep.subr.bf16.mxu0 %v13758_v15  ;;  %v359_v13 = vld [vmem:[%s14263_s8 + $0x90] sm:$0xff] }
  0x95   : > { %12861 = vmatprep.mubr.bf16.mxu1 %v11752_v41  ;;  %841 = vst [vmem:[#allocation2 + $0x5c] sm:$0x1] %v840_v46  ;;  %12810 = vmatmul.mubr.bf16.gmra.mxu0 %v11727_v42  ;;  %v1141_v54 = vrot.slane %v1140_v31, 4  ;;  %v1155_v55 = vrot.slane %v1153_v43, 5  ;;  %v919_v56 = vld [vmem:[#allocation2 + $0x54] sm:$0xf]  ;;  %v12304_v19 = vpack.c.bf16 %v357_v0, %v357_v0  ;;  %v12305_v42 = vpack.c.bf16 %v358_v14, %v358_v14 }
  0x96   : > { %v599_v57 = vshrl.u32 %v12303_v51, 16  ;;  %v602_v58 = vshll.u32 %v12303_v51, 16  ;;  %v1150_v60 = vor.u32 %v1149_v44, %v1145_v32  ;;  %v1158_v61 = vshrl.u32 %v919_v56, 16  ;;  %v842_v12 = vld [vmem:[#allocation2 + $0x60] sm:$0xf]  ;;  %v360_v35 = vld [vmem:[%s14263_s8 + $0x98] sm:$0xff]  ;;  %12896 = vmatpush3.bf16.msra.mxu0 %v13758_v15 }
  0x97   : > { %v1161_v62 = vshll.u32 %v919_v56, 16  ;;  %v593_v63 = vrot.slane %v591_v49, 7  ;;  %v1146_v1 = vsel %vm14296_vm9, %v1141_v54, %v1145_v32  ;;  %v268_v5 = vsel %vm14275_vm4, 0, %v267_v47  ;;  %v846_v21 = vld [vmem:[#allocation2 + $0x68] sm:$0x1]  ;;  %v13759_v39 = vld [vmem:[#allocation6 + $0xc8] sm:$0xff]  }
  0x98   : > { %v601_v4 = vrot.slane %v599_v57, 7  ;;  %v318_v6 = vsel %vm14281_vm7, 0, %v317_v52  ;;  %v1151_v7 = vrot.slane %v1150_v60, 4  ;;  %v1160_v8 = vrot.slane %v1158_v61, 4  ;;  %269 = vst [vmem:[#allocation2 + $0x6c] sm:$0x1] %v268_v5  ;;  %12941 = vmatprep.subr.bf16.mxu1 %v13759_v39 }
  0x99   : > { %v1163_v10 = vrot.slane %v1161_v62, 5  ;;  %v596_v11 = vor.u32 %v594_v50, %v593_v63  ;;  %319 = vst [vmem:[#allocation2 + $0x74] sm:$0x1] %v318_v6  ;;  %v597_v17 = vrot.slane %v593_v63, 4  ;;  %v273_v36 = vld [vmem:[#allocation2 + $0x84] sm:$0x1]  ;;  %12942 = vmatpush3.bf16.msra.mxu1 %v13759_v39  ;;  %v12307_v60 = vpack.c.bf16 %v360_v35, %v360_v35 }
  0x9a   : > { %v920_v16 = vld [vmem:[#allocation2 + $0x58] sm:$0xf]  ;;  %v604_v18 = vor.u32 %v602_v58, %v601_v4  ;;  %v606_v59 = vrot.slane %v601_v4, 4  ;;  %v1156_v23 = vsel %vm14296_vm9, %v1151_v7, %v1155_v55  ;;  %v608_v31 = vshrl.u32 %v12304_v19, 16  ;;  %v323_v44 = vld [vmem:[#allocation2 + $0x8c] sm:$0x1] }
  0x9b   : > { %v1164_v26 = vor.u32 %v1163_v10, %v1160_v8  ;;  %v1167_v24 = vshll.u32 %v920_v16, 16  ;;  %v1171_v27 = vshrl.u32 %v920_v16, 16  ;;  %v11728_v29 = vcombine.low %v1146_v1, %v1156_v23  ;;  %v13760_v40 = vld [vmem:[#allocation6 + $0xc0] sm:$0xff]   ;;  %v13761_v4 = vld [vmem:[#allocation6 + $0x138] sm:$0xff]  }
  0x9c   : > { %v960_v30 = vld [vmem:[#allocation2 + $0x5c] sm:$0x1]  ;;  %v11753_v33 = vcombine.low %v919_v56, %v920_v16  ;;  %v605_v34 = vsel %vm14303_vm10, %v597_v17, %v604_v18  ;;  %v843_v51 = vsel %vm14318_vm11, %v596_v11, %v842_v12  ;;  %v847_v41 = vsel %vm14275_vm4, %v606_v59, %v846_v21  ;;  %12943 = vmatprep.subr.bf16.mxu1 %v13760_v40 }
  0x9d   : > { %v1165_v37 = vrot.slane %v1164_v26, 4  ;;  %v1169_v3 = vrot.slane %v1167_v24, 5  ;;  %v1173_v38 = vrot.slane %v1171_v27, 4  ;;  %v1177_v25 = vshll.u32 %v960_v30, 16  ;;  %844 = vst [vmem:[#allocation2 + $0x60] sm:$0xf] %v843_v51  ;;  %12813 = vmatprep.mubr.bf16.mxu0 %v11728_v29  ;;  %12944 = vmatpush3.bf16.msra.mxu1 %v13760_v40 }
  0x9e   : > { %845 = vst [vmem:[#allocation2 + $0x64] sm:$0xf] %v605_v34  ;;  %12862 = vmatmul.mubr.bf16.gmra.mxu1 %v11753_v33  ;;  %v611_v43 = vshll.u32 %v12304_v19, 16  ;;  %848 = vst [vmem:[#allocation2 + $0x68] sm:$0x1] %v847_v41  ;;  %v271_v32 = vsel %vm14275_vm4, 0, %v270_v20  ;;  %v12306_v58 = vpack.c.bf16 %v359_v13, %v359_v13  ;;  %12977 = vmatprep.subr.bf16.mxu0 %v13761_v4 }
  0x9f   : > { %v1170_v46 = vsel %vm14296_vm9, %v1165_v37, %v1169_v3  ;;  %v1174_v47 = vor.u32 %v1173_v38, %v1169_v3  ;;  %v1179_v48 = vrot.slane %v1177_v25, 5  ;;  %v610_v49 = vrot.slane %v608_v31, 7  ;;  %v849_v54 = vld [vmem:[#allocation2 + $0x6c] sm:$0xf]  ;;  %272 = vst [vmem:[#allocation2 + $0x78] sm:$0x1] %v271_v32 }
  0xa0   : > { %v616_v50 = vshrl.u32 %v12305_v42, 16  ;;  %v619_v52 = vshll.u32 %v12305_v42, 16  ;;  %v321_v55 = vsel %vm14281_vm7, 0, %v320_v28  ;;  %v853_v57 = vld [vmem:[#allocation2 + $0x74] sm:$0x1]  ;;  %v274_v61 = vsel %vm14275_vm4, 0, %v273_v36 }
  0xa1   : > { %v1175_v56 = vrot.slane %v1174_v47, 4  ;;  %322 = vst [vmem:[#allocation2 + $0x80] sm:$0x1] %v321_v55  ;;  %v613_v62 = vor.u32 %v611_v43, %v610_v49  ;;  %v614_v63 = vrot.slane %v610_v49, 4  ;;  %275 = vst [vmem:[#allocation2 + $0x84] sm:$0x1] %v274_v61 }
  0xa2   : > { %v618_v0 = vrot.slane %v616_v50, 7  ;;  %v324_v1 = vsel %vm14281_vm7, 0, %v323_v44  ;;  %v625_v6 = vshrl.u32 %v12306_v58, 16  ;;  %v628_v7 = vshll.u32 %v12306_v58, 16  ;;  %v361_v17 = vld [vmem:[%s14263_s8 + $0xa0] sm:$0xff]  ;;  %v362_v28 = vld [vmem:[%s14263_s8 + $0xa8] sm:$0xff] }
  0xa3   : > { %v1180_v5 = vsel %vm14296_vm9, %v1175_v56, %v1179_v48  ;;  %v633_v8 = vshrl.u32 %v12307_v60, 16  ;;  %325 = vst [vmem:[#allocation2 + $0x8c] sm:$0x1] %v324_v1  ;;  %v850_v16 = vsel %vm14318_vm11, %v613_v62, %v849_v54  ;;  %v636_v25 = vshll.u32 %v12307_v60, 16  ;;  %v276_v61 = vld [vmem:[#allocation2 + $0x90] sm:$0x1] }
  0xa4   : > { %v11729_v10 = vcombine.low %v1170_v46, %v1180_v5  ;;  %v921_v11 = vld [vmem:[#allocation2 + $0x60] sm:$0xf]  ;;  %v621_v14 = vor.u32 %v619_v52, %v618_v0  ;;  %v623_v15 = vrot.slane %v618_v0, 4  ;;  %851 = vst [vmem:[#allocation2 + $0x6c] sm:$0xf] %v850_v16  ;;  %v627_v27 = vrot.slane %v625_v6, 7 }
  0xa5   : > { %v14489_v12 = vld [vmem:[#allocation2 + $0x64] sm:$0xf]  ;;  %v1182_v18 = vshrl.u32 %v921_v11, 16  ;;  %v1185_v59 = vshll.u32 %v921_v11, 16  ;;  %v14496_v20 = vld [vmem:[#allocation2 + $0x68] sm:$0x1]  ;;  %v12308_v40 = vpack.c.bf16 %v361_v17, %v361_v17  ;;  %v12309_v43 = vpack.c.bf16 %v362_v28, %v362_v28 }
  0xa6   : > { %v1191_v21 = vshll.u32 %v14489_v12, 16  ;;  %v1195_v19 = vshrl.u32 %v14489_v12, 16  ;;  %12814 = vmatmul.mubr.bf16.gmra.mxu0 %v11729_v10  ;;  %v11754_v23 = vcombine.low %v921_v11, %v14489_v12  ;;  %v622_v26 = vsel %vm14303_vm10, %v614_v63, %v621_v14  ;;  %v856_v51 = vld [vmem:[#allocation2 + $0x78] sm:$0xf]  ;;  %v363_v14 = vld [vmem:[%s14263_s8 + $0xb0] sm:$0xff] }
  0xa7   : > { %v854_v24 = vsel %vm14275_vm4, %v623_v15, %v853_v57  ;;  %v1184_v29 = vrot.slane %v1182_v18, 4  ;;  %v1187_v30 = vrot.slane %v1185_v59, 5  ;;  %852 = vst [vmem:[#allocation2 + $0x70] sm:$0xf] %v622_v26  ;;  %v1201_v13 = vshll.u32 %v14496_v20, 16 }
  0xa8   : > { %v1193_v33 = vrot.slane %v1191_v21, 5  ;;  %v1197_v34 = vrot.slane %v1195_v19, 4  ;;  %855 = vst [vmem:[#allocation2 + $0x74] sm:$0x1] %v854_v24  ;;  %12865 = vmatprep.mubr.bf16.mxu1 %v11754_v23  ;;  %v630_v35 = vor.u32 %v628_v7, %v627_v27  ;;  %v631_v36 = vrot.slane %v627_v27, 4 }
  0xa9   : > { %v635_v37 = vrot.slane %v633_v8, 7  ;;  %v1188_v3 = vor.u32 %v1187_v30, %v1184_v29  ;;  %v860_v39 = vld [vmem:[#allocation2 + $0x80] sm:$0x1]  ;;  %v1203_v41 = vrot.slane %v1201_v13, 5  ;;  %v642_v32 = vshrl.u32 %v12308_v40, 16 }
  0xaa   : > { %v1198_v38 = vor.u32 %v1197_v34, %v1193_v33  ;;  %v857_v31 = vsel %vm14318_vm11, %v630_v35, %v856_v51  ;;  %v645_v50 = vshll.u32 %v12308_v40, 16  ;;  %v650_v52 = vshrl.u32 %v12309_v43, 16  ;;  %v863_v60 = vld [vmem:[#allocation2 + $0x84] sm:$0xf]  ;;  %v326_v11 = vld [vmem:[#allocation2 + $0x98] sm:$0x1] }
  0xab   : > { %v640_v42 = vrot.slane %v635_v37, 4  ;;  %v1189_v46 = vrot.slane %v1188_v3, 4  ;;  %v638_v48 = vor.u32 %v636_v25, %v635_v37  ;;  %858 = vst [vmem:[#allocation2 + $0x78] sm:$0xf] %v857_v31  ;;  %v923_v44 = vld [vmem:[#allocation2 + $0x6c] sm:$0xf]  ;;  %v12310_v25 = vpack.c.bf16 %v363_v14, %v363_v14 }
  0xac   : > { %v1199_v47 = vrot.slane %v1198_v38, 4  ;;  %v653_v54 = vshll.u32 %v12309_v43, 16  ;;  %v1206_v57 = vshrl.u32 %v923_v44, 16  ;;  %v1209_v58 = vshll.u32 %v923_v44, 16  ;;  %v867_v26 = vld [vmem:[#allocation2 + $0x8c] sm:$0x1] }
  0xad   : > { %v861_v49 = vsel %vm14275_vm4, %v640_v42, %v860_v39  ;;  %v1194_v55 = vsel %vm14296_vm9, %v1189_v46, %v1193_v33  ;;  %v639_v1 = vsel %vm14303_vm10, %v631_v36, %v638_v48  ;;  %v644_v4 = vrot.slane %v642_v32, 7  ;;  %v364_v35 = vld [vmem:[%s14263_s8 + $0xb8] sm:$0xff]  ;;  %v365_v32 = vld [vmem:[%s14263_s8 + $0xc0] sm:$0xff] }
  0xae   : > { %v1204_v56 = vsel %vm14296_vm9, %v1199_v47, %v1203_v41  ;;  %862 = vst [vmem:[#allocation2 + $0x80] sm:$0x1] %v861_v49  ;;  %v14513_v63 = vld [vmem:[#allocation2 + $0x70] sm:$0xf]  ;;  %v652_v5 = vrot.slane %v650_v52, 7  ;;  %v1208_v6 = vrot.slane %v1206_v57, 4  ;;  %v12311_v46 = vpack.c.bf16 %v364_v35, %v364_v35 }
  0xaf   : > { %v11730_v62 = vcombine.low %v1194_v55, %v1204_v56  ;;  %v14515_v0 = vld [vmem:[#allocation2 + $0x74] sm:$0x1]  ;;  %v1211_v7 = vrot.slane %v1209_v58, 5  ;;  %v1215_v8 = vshll.u32 %v14513_v63, 16  ;;  %v1219_v10 = vshrl.u32 %v14513_v63, 16 }
  0xb0   : > { %859 = vst [vmem:[#allocation2 + $0x7c] sm:$0xf] %v639_v1  ;;  %v1225_v15 = vshll.u32 %v14515_v0, 16  ;;  %v11755_v16 = vcombine.low %v923_v44, %v14513_v63  ;;  %v647_v17 = vor.u32 %v645_v50, %v644_v4  ;;  %v648_v18 = vrot.slane %v644_v4, 4  ;;  %v366_v4 = vld [vmem:[%s14263_s8 + $0xc8] sm:$0xff] }
  0xb1   : > { %12817 = vmatprep.mubr.bf16.mxu0 %v11730_v62  ;;  %v1212_v59 = vor.u32 %v1211_v7, %v1208_v6  ;;  %v1217_v21 = vrot.slane %v1215_v8, 5  ;;  %v1221_v19 = vrot.slane %v1219_v10, 4  ;;  %v655_v23 = vor.u32 %v653_v54, %v652_v5  ;;  %v279_v54 = vld [vmem:[#allocation2 + $0x9c] sm:$0x1]  ;;  %v15618_v2 = vld [vmem:[#allocation2 + $0x70] sm:$0xf] }
  0xb2   : > { %v1227_v24 = vrot.slane %v1225_v15, 5  ;;  %12866 = vmatmul.mubr.bf16.gmra.mxu1 %v11755_v16  ;;  %v925_v27 = vld [vmem:[#allocation2 + $0x78] sm:$0xf]  ;;  %v657_v28 = vrot.slane %v652_v5, 4  ;;  %v864_v29 = vsel %vm14318_vm11, %v647_v17, %v863_v60  ;;  %v277_v30 = vsel %vm14275_vm4, 0, %v276_v61 }
  0xb3   : > { %v1213_v33 = vrot.slane %v1212_v59, 4  ;;  %v1222_v34 = vor.u32 %v1221_v19, %v1217_v21  ;;  %v1230_v51 = vshrl.u32 %v925_v27, 16  ;;  %v1233_v13 = vshll.u32 %v925_v27, 16  ;;  %865 = vst [vmem:[#allocation2 + $0x84] sm:$0xf] %v864_v29 }
  0xb4   : > { %278 = vst [vmem:[#allocation2 + $0x90] sm:$0x1] %v277_v30  ;;  %v656_v37 = vsel %vm14303_vm10, %v648_v18, %v655_v23  ;;  %v868_v3 = vsel %vm14275_vm4, %v657_v28, %v867_v26  ;;  %v327_v38 = vsel %vm14281_vm7, 0, %v326_v11  ;;  %v659_v47 = vshrl.u32 %v12310_v25, 16  ;;  %v329_v26 = vld [vmem:[#allocation2 + $0xa4] sm:$0x1] }
  0xb5   : > { %v14529_v36 = vld [vmem:[#allocation2 + $0x80] sm:$0x1]  ;;  %v1218_v39 = vsel %vm14296_vm9, %v1213_v33, %v1217_v21  ;;  %v1223_v40 = vrot.slane %v1222_v34, 4  ;;  %v1232_v41 = vrot.slane %v1230_v51, 4  ;;  %v1235_v42 = vrot.slane %v1233_v13, 5 }
  0xb6   : > { %866 = vst [vmem:[#allocation2 + $0x88] sm:$0xf] %v656_v37  ;;  %869 = vst [vmem:[#allocation2 + $0x8c] sm:$0x1] %v868_v3  ;;  %v1249_v43 = vshll.u32 %v14529_v36, 16  ;;  %v662_v48 = vshll.u32 %v12310_v25, 16  ;;  %v14549_v11 = vpack.c.bf16 %v365_v32, %v365_v32 }
  0xb7   : > { %328 = vst [vmem:[#allocation2 + $0x98] sm:$0x1] %v327_v38  ;;  %v14539_v31 = vld [vmem:[#allocation2 + $0x7c] sm:$0xf]  ;;  %v1228_v44 = vsel %vm14296_vm9, %v1223_v40, %v1227_v24  ;;  %v1236_v49 = vor.u32 %v1235_v42, %v1232_v41  ;;  %v661_v58 = vrot.slane %v659_v47, 7  ;;  %v667_v1 = vshrl.u32 %v12311_v46, 16 }
  0xb8   : > { %v1239_v50 = vshll.u32 %v14539_v31, 16  ;;  %v1243_v52 = vshrl.u32 %v14539_v31, 16  ;;  %v11731_v55 = vcombine.low %v1218_v39, %v1228_v44  ;;  %v1251_v56 = vrot.slane %v1249_v43, 5  ;;  %v282_v37 = vld [vmem:[#allocation2 + $0xa8] sm:$0x1] }
  0xb9   : > { %v11756_v57 = vcombine.low %v925_v27, %v14539_v31  ;;  %v1237_v60 = vrot.slane %v1236_v49, 4  ;;  %v664_v6 = vor.u32 %v662_v48, %v661_v58  ;;  %v665_v7 = vrot.slane %v661_v58, 4  ;;  %v367_v49 = vld [vmem:[%s14263_s8 + $0xd0] sm:$0xff] }
  0xba   : > { %v1241_v61 = vrot.slane %v1239_v50, 5  ;;  %v1245_v62 = vrot.slane %v1243_v52, 4  ;;  %12818 = vmatmul.mubr.bf16.gmra.mxu0 %v11731_v55  ;;  %v927_v5 = vld [vmem:[#allocation2 + $0x84] sm:$0xf]  ;;  %v670_v8 = vshll.u32 %v12311_v46, 16  ;;  %v669_v21 = vrot.slane %v667_v1, 7 }
  0xbb   : > { %12869 = vmatprep.mubr.bf16.mxu1 %v11756_v57  ;;  %v870_v10 = vld [vmem:[#allocation2 + $0x90] sm:$0xf]  ;;  %v1254_v16 = vshrl.u32 %v927_v5, 16  ;;  %v1257_v17 = vshll.u32 %v927_v5, 16  ;;  %v280_v23 = vsel %vm14275_vm4, 0, %v279_v54  ;;  %v12313_v24 = vpack.c.bf16 %v366_v4, %v366_v4 }
  0xbc   : > { %v1242_v14 = vsel %vm14296_vm9, %v1237_v60, %v1241_v61  ;;  %v1246_v15 = vor.u32 %v1245_v62, %v1241_v61  ;;  %v871_v19 = vsel %vm14318_vm11, %v664_v6, %v870_v10  ;;  %281 = vst [vmem:[#allocation2 + $0x9c] sm:$0x1] %v280_v23  ;;  %v672_v35 = vor.u32 %v670_v8, %v669_v21  ;;  %v332_v46 = vld [vmem:[#allocation2 + $0xb0] sm:$0x1] }
  0xbd   : > { %v14553_v18 = vld [vmem:[#allocation2 + $0x88] sm:$0xf]  ;;  %v14555_v59 = vld [vmem:[#allocation2 + $0x8c] sm:$0x1]  ;;  %v1256_v28 = vrot.slane %v1254_v16, 4  ;;  %v1259_v29 = vrot.slane %v1257_v17, 5 }
  0xbe   : > { %v1247_v27 = vrot.slane %v1246_v15, 4  ;;  %v1263_v30 = vshll.u32 %v14553_v18, 16  ;;  %872 = vst [vmem:[#allocation2 + $0x90] sm:$0xf] %v871_v19  ;;  %v874_v33 = vld [vmem:[#allocation2 + $0x98] sm:$0x1]  ;;  %v11757_v13 = vcombine.low %v927_v5, %v14553_v18  ;;  %v673_v43 = vsel %vm14303_vm10, %v665_v7, %v672_v35 }
  0xbf   : > { %v1267_v34 = vshrl.u32 %v14553_v18, 16  ;;  %v1273_v51 = vshll.u32 %v14555_v59, 16  ;;  %v1260_v38 = vor.u32 %v1259_v29, %v1256_v28  ;;  %v674_v39 = vrot.slane %v669_v21, 4  ;;  %873 = vst [vmem:[#allocation2 + $0x94] sm:$0xf] %v673_v43  ;;  %v368_v50 = vld [vmem:[%s14263_s8 + $0xd8] sm:$0xff] }
  0xc0   : > { %v1252_v3 = vsel %vm14296_vm9, %v1247_v27, %v1251_v56  ;;  %v1265_v25 = vrot.slane %v1263_v30, 5  ;;  %12870 = vmatmul.mubr.bf16.gmra.mxu1 %v11757_v13  ;;  %v330_v32 = vsel %vm14281_vm7, 0, %v329_v26  ;;  %v676_v44 = vshrl.u32 %v14549_v11, 16  ;;  %v14583_v62 = vld [vmem:[#allocation6 + $0x178] sm:$0xff]   ;;  %v335_v13 = vld [vmem:[#allocation2 + $0xbc] sm:$0x1] }
  0xc1   : > { %v11732_v40 = vcombine.low %v1242_v14, %v1252_v3  ;;  %v1269_v41 = vrot.slane %v1267_v34, 4  ;;  %v1275_v42 = vrot.slane %v1273_v51, 5  ;;  %v1261_v47 = vrot.slane %v1260_v38, 4  ;;  %331 = vst [vmem:[#allocation2 + $0xa4] sm:$0x1] %v330_v32  ;;  %13025 = vmatprep.subr.bf16.mxu1 %v14583_v62  ;;  %v369_v43 = vld [vmem:[%s14263_s8 + $0xe0] sm:$0xff] }
  0xc2   : > { %v875_v48 = vsel %vm14275_vm4, %v674_v39, %v874_v33  ;;  %v679_v54 = vshll.u32 %v14549_v11, 16  ;;  %v684_v55 = vshrl.u32 %v12313_v24, 16  ;;  %v687_v56 = vshll.u32 %v12313_v24, 16  ;;  %v285_v28 = vld [vmem:[#allocation2 + $0xb4] sm:$0x1] }
  0xc3   : > { %12821 = vmatprep.mubr.bf16.mxu0 %v11732_v40  ;;  %v1270_v52 = vor.u32 %v1269_v41, %v1265_v25  ;;  %876 = vst [vmem:[#allocation2 + $0x98] sm:$0x1] %v875_v48  ;;  %v1266_v57 = vsel %vm14296_vm9, %v1261_v47, %v1265_v25  ;;  %v678_v58 = vrot.slane %v676_v44, 7  ;;  %v283_v60 = vsel %vm14275_vm4, 0, %v282_v37  ;;  %v877_v6 = vld [vmem:[#allocation2 + $0x9c] sm:$0xf] }
  0xc4   : > { %v333_v61 = vsel %vm14281_vm7, 0, %v332_v46  ;;  %v686_v5 = vrot.slane %v684_v55, 7  ;;  %284 = vst [vmem:[#allocation2 + $0xa8] sm:$0x1] %v283_v60  ;;  %v12314_v7 = vpack.c.bf16 %v367_v49, %v367_v49  ;;  %v12315_v8 = vpack.c.bf16 %v368_v50, %v368_v50 }
  0xc5   : > { %v1271_v1 = vrot.slane %v1270_v52, 4  ;;  %v929_v4 = vld [vmem:[#allocation2 + $0x90] sm:$0xf]  ;;  %334 = vst [vmem:[#allocation2 + $0xb0] sm:$0x1] %v333_v61  ;;  %v681_v14 = vor.u32 %v679_v54, %v678_v58  ;;  %v682_v15 = vrot.slane %v678_v58, 4 }
  0xc6   : > { %v1278_v10 = vshrl.u32 %v929_v4, 16  ;;  %v1281_v11 = vshll.u32 %v929_v4, 16  ;;  %v689_v17 = vor.u32 %v687_v56, %v686_v5  ;;  %v691_v21 = vrot.slane %v686_v5, 4  ;;  %v14590_v29 = vld [vmem:[#allocation2 + $0x94] sm:$0xf]  ;;  %v370_v56 = vld [vmem:[%s14263_s8 + $0xe8] sm:$0xff] }
  0xc7   : > { %v1276_v16 = vsel %vm14296_vm9, %v1271_v1, %v1275_v42  ;;  %v693_v19 = vshrl.u32 %v12314_v7, 16  ;;  %v878_v27 = vsel %vm14318_vm11, %v681_v14, %v877_v6  ;;  %v696_v34 = vshll.u32 %v12314_v7, 16  ;;  %v14610_v1 = vld [vmem:[#allocation2 + $0x8] sm:$0x1]  ;;  %v14613_v5 = vld [vmem:[#allocation2 + $0x14] sm:$0x1] }
  0xc8   : > { %v11733_v23 = vcombine.low %v1266_v57, %v1276_v16  ;;  %v1280_v26 = vrot.slane %v1278_v10, 4  ;;  %v1283_v24 = vrot.slane %v1281_v11, 5  ;;  %v690_v30 = vsel %vm14303_vm10, %v682_v15, %v689_v17  ;;  %879 = vst [vmem:[#allocation2 + $0x9c] sm:$0xf] %v878_v27  ;;  %v881_v39 = vld [vmem:[#allocation2 + $0xa4] sm:$0x1] }
  0xc9   : > { %v695_v33 = vrot.slane %v693_v19, 7  ;;  %v701_v51 = vshrl.u32 %v12315_v8, 16  ;;  %v1287_v3 = vshll.u32 %v14590_v29, 16  ;;  %v1291_v38 = vshrl.u32 %v14590_v29, 16  ;;  %880 = vst [vmem:[#allocation2 + $0xa0] sm:$0xf] %v690_v30 }
  0xca   : > { %12822 = vmatmul.mubr.bf16.gmra.mxu0 %v11733_v23  ;;  %v14594_v35 = vld [vmem:[#allocation2 + $0x98] sm:$0x1]  ;;  %v1284_v37 = vor.u32 %v1283_v24, %v1280_v26  ;;  %v11758_v25 = vcombine.low %v929_v4, %v14590_v29  ;;  %v882_v41 = vsel %vm14275_vm4, %v691_v21, %v881_v39  ;;  %v704_v50 = vshll.u32 %v12315_v8, 16  ;;  %v14620_v17 = vld [vmem:[#allocation2] sm:$0xe] }
  0xcb   : > { %v1297_v40 = vshll.u32 %v14594_v35, 16  ;;  %v698_v42 = vor.u32 %v696_v34, %v695_v33  ;;  %v1289_v47 = vrot.slane %v1287_v3, 5  ;;  %v1293_v48 = vrot.slane %v1291_v38, 4  ;;  %883 = vst [vmem:[#allocation2 + $0xa4] sm:$0x1] %v882_v41 }
  0xcc   : > { %v1285_v46 = vrot.slane %v1284_v37, 4  ;;  %12873 = vmatprep.mubr.bf16.mxu1 %v11758_v25  ;;  %v703_v32 = vrot.slane %v701_v51, 7  ;;  %v884_v44 = vld [vmem:[#allocation2 + $0xa8] sm:$0xf]  ;;  %v699_v49 = vrot.slane %v695_v33, 4  ;;  %v286_v55 = vsel %vm14275_vm4, 0, %v285_v28 }
  0xcd   : > { %v885_v52 = vsel %vm14318_vm11, %v698_v42, %v884_v44  ;;  %v888_v54 = vld [vmem:[#allocation2 + $0xb0] sm:$0x1]  ;;  %v1294_v57 = vor.u32 %v1293_v48, %v1289_v47  ;;  %v1299_v58 = vrot.slane %v1297_v40, 5  ;;  %287 = vst [vmem:[#allocation2 + $0xb4] sm:$0x1] %v286_v55  ;;  %v336_v61 = vsel %vm14281_vm7, 0, %v335_v13 }
  0xce   : > { %v708_v60 = vrot.slane %v703_v32, 4  ;;  %886 = vst [vmem:[#allocation2 + $0xa8] sm:$0xf] %v885_v52  ;;  %v2024_v4 = vrot.slane %v14610_v1, 5  ;;  %v2031_v6 = vrot.slane %v14613_v5, 5  ;;  %v706_v7 = vor.u32 %v704_v50, %v703_v32 }
  0xcf   : > { %337 = vst [vmem:[#allocation2 + $0xbc] sm:$0x1] %v336_v61  ;;  %v12316_v8 = vpack.c.bf16 %v369_v43, %v369_v43  ;;  %v1290_v10 = vsel %vm14296_vm9, %v1285_v46, %v1289_v47  ;;  %v1295_v11 = vrot.slane %v1294_v57, 4  ;;  %v931_v14 = vld [vmem:[#allocation2 + $0x9c] sm:$0xf]  ;;  %v12317_v16 = vpack.c.bf16 %v370_v56, %v370_v56 }
  0xd0   : > { %v889_v15 = vsel %vm14275_vm4, %v708_v60, %v888_v54  ;;  %v14622_v21 = vld [vmem:[#allocation2 + $0xa0] sm:$0xf]  ;;  %v1302_v19 = vshrl.u32 %v931_v14, 16  ;;  %v1305_v23 = vshll.u32 %v931_v14, 16  ;;  %v707_v26 = vsel %vm14303_vm10, %v699_v49, %v706_v7  ;;  %v1952_v50 = vld [vmem:[#allocation2 + $0xc] sm:$0xe] }
  0xd1   : > { %890 = vst [vmem:[#allocation2 + $0xb0] sm:$0x1] %v889_v15  ;;  %v710_v24 = vshrl.u32 %v12316_v8, 16  ;;  %vm2016_vm12 = vcmask 1042432   ;;  %vm2017_vm13 = vcmask 1046532   ;;  %v1300_v27 = vsel %vm14296_vm9, %v1295_v11, %v1299_v58 }
  0xd2   : > { %v1311_v28 = vshll.u32 %v14622_v21, 16  ;;  %v1315_v30 = vshrl.u32 %v14622_v21, 16  ;;  %v11759_v33 = vcombine.low %v931_v14, %v14622_v21  ;;  %887 = vst [vmem:[#allocation2 + $0xac] sm:$0xf] %v707_v26  ;;  %v11734_v34 = vcombine.low %v1290_v10, %v1300_v27  ;;  %v14631_v51 = vld [vmem:[#allocation2 + $0xa4] sm:$0x1]  ;;  %vm14653_vm14 = vmor %vm2016_vm12, %vm2017_vm13 }
  0xd3   : > { %v1304_v13 = vrot.slane %v1302_v19, 4  ;;  %v1307_v37 = vrot.slane %v1305_v23, 5  ;;  %v712_v3 = vrot.slane %v710_v24, 7  ;;  %v1321_v39 = vshll.u32 %v14631_v51, 16  ;;  %v13959_v10 = vld [vmem:[#allocation2 + $0x4] sm:$0xf] }
  0xd4   : > { %v1313_v38 = vrot.slane %v1311_v28, 5  ;;  %v1317_v25 = vrot.slane %v1315_v30, 4  ;;  %12874 = vmatmul.mubr.bf16.gmra.mxu1 %v11759_v33  ;;  %v713_v40 = vshll.u32 %v12316_v8, 16  ;;  %12825 = vmatprep.mubr.bf16.mxu0 %v11734_v34  ;;  %v718_v43 = vshrl.u32 %v12317_v16, 16  ;;  %v891_v57 = vld [vmem:[#allocation2 + $0xb4] sm:$0xf] }
  0xd5   : > { %v1308_v41 = vor.u32 %v1307_v37, %v1304_v13  ;;  %v933_v42 = vld [vmem:[#allocation2 + $0xa8] sm:$0xf]  ;;  %v721_v46 = vshll.u32 %v12317_v16, 16  ;;  %v11770_v47 = vrot.slane %v14620_v17, 9  ;;  %v1323_v32 = vrot.slane %v1321_v39, 5 }
  0xd6   : > { %v1318_v48 = vor.u32 %v1317_v25, %v1313_v38  ;;  %v1326_v44 = vshrl.u32 %v933_v42, 16  ;;  %v1329_v49 = vshll.u32 %v933_v42, 16  ;;  %v715_v54 = vor.u32 %v713_v40, %v712_v3  ;;  %v895_v8 = vld [vmem:[#allocation2 + $0xbc] sm:$0x1]  ;;  %v1953_v23 = vld [vmem:[#allocation2 + $0x18] sm:$0xe] }
  0xd7   : > { %v1309_v52 = vrot.slane %v1308_v41, 4  ;;  %v716_v55 = vrot.slane %v712_v3, 4  ;;  %v720_v56 = vrot.slane %v718_v43, 7  ;;  %v2021_v11 = vrot.slane %v13959_v10, 5  ;;  %v13960_v43 = vld [vmem:[#allocation2 + $0x10] sm:$0xf] }
  0xd8   : > { %v1319_v58 = vrot.slane %v1318_v48, 4  ;;  %v14635_v60 = vld [vmem:[#allocation2 + $0xb0] sm:$0x1]  ;;  %v1328_v61 = vrot.slane %v1326_v44, 4  ;;  %v1331_v7 = vrot.slane %v1329_v49, 5  ;;  %v11771_v13 = vrot.slane %v1952_v50, 9 }
  0xd9   : > { %v1314_v14 = vsel %vm14296_vm9, %v1309_v52, %v1313_v38  ;;  %v14639_v15 = vld [vmem:[#allocation2 + $0xac] sm:$0xf]  ;;  %v1345_v16 = vshll.u32 %v14635_v60, 16  ;;  %v723_v17 = vor.u32 %v721_v46, %v720_v56  ;;  %v725_v19 = vrot.slane %v720_v56, 4  ;;  %v13961_v44 = vld [vmem:[#allocation2 + $0x1c] sm:$0xf] }
  0xda   : > { %v1324_v26 = vsel %vm14296_vm9, %v1319_v58, %v1323_v32  ;;  %v1332_v24 = vor.u32 %v1331_v7, %v1328_v61  ;;  %v1335_v27 = vshll.u32 %v14639_v15, 16  ;;  %v1339_v28 = vshrl.u32 %v14639_v15, 16  ;;  %v1954_v50 = vld [vmem:[#allocation2 + $0x24] sm:$0xe]  ;;  %v13962_v56 = vld [vmem:[#allocation2 + $0x20] sm:$0x1] }
  0xdb   : > { %v11735_v30 = vcombine.low %v1314_v14, %v1324_v26  ;;  %v11760_v33 = vcombine.low %v933_v42, %v14639_v15  ;;  %v724_v34 = vsel %vm14303_vm10, %v716_v55, %v723_v17  ;;  %v892_v25 = vsel %vm14318_vm11, %v715_v54, %v891_v57  ;;  %v13963_v14 = vld [vmem:[#allocation2 + $0x28] sm:$0xf] }
  0xdc   : > { %v1333_v37 = vrot.slane %v1332_v24, 4  ;;  %v1337_v3 = vrot.slane %v1335_v27, 5  ;;  %v1341_v38 = vrot.slane %v1339_v28, 4  ;;  %894 = vst [vmem:[#allocation2 + $0xb8] sm:$0xf] %v724_v34  ;;  %v19430_v39 = vmov 0 }
  0xdd   : > { %v19431_v39 = vsel %vm14653_vm14, 4294967295, %v19430_v39  ;;  %12826 = vmatmul.mubr.bf16.gmra.mxu0 %v11735_v30  ;;  %v1347_v40 = vrot.slane %v1345_v16, 5  ;;  %12877 = vmatprep.mubr.bf16.mxu1 %v11760_v33  ;;  %893 = vst [vmem:[#allocation2 + $0xb4] sm:$0xf] %v892_v25  ;;  %v896_v41 = vsel %vm14275_vm4, %v725_v19, %v895_v8  ;;  %v2023_v42 = vrot.slane %v2021_v11, 4  ;;  %v13762_v33 = vld [vmem:[#allocation2 + $0xc] sm:$0xff]  }
  0xde   : > { %19432 = vst [vmem:[#allocation16_spill] sm:$0xff] %v19431_v39  ;;  %v2028_v46 = vrot.slane %v13960_v43, 5  ;;  %v1342_v48 = vor.u32 %v1341_v38, %v1337_v3  ;;  %897 = vst [vmem:[#allocation2 + $0xbc] sm:$0x1] %v896_v41  ;;  %v11772_v32 = vrot.slane %v1953_v23, 9  ;;  %v2035_v49 = vrot.slane %v13961_v44, 5 }
  0xdf   : > { %v14661_v52 = vsel %vm14653_vm14, %v11770_v47, %v2021_v11  ;;  %v14667_v54 = vsel %vm14653_vm14, %v2023_v42, %v2024_v4  ;;  %v2038_v57 = vrot.slane %v13962_v56, 5  ;;  %v1338_v58 = vsel %vm14296_vm9, %v1333_v37, %v1337_v3  ;;  %v1955_v4 = vld [vmem:[#allocation2 + $0x30] sm:$0xe]  ;;  %v13964_v23 = vld [vmem:[#allocation2 + $0x2c] sm:$0x1] }
  0xe0   : > { %v2030_v55 = vrot.slane %v2028_v46, 4  ;;  %v1343_v61 = vrot.slane %v1342_v48, 4  ;;  %v14673_v7 = vsel %vm14653_vm14, %v11771_v13, %v2028_v46  ;;  %v2037_v8 = vrot.slane %v2035_v49, 4  ;;  %v1956_v24 = vld [vmem:[#allocation2 + $0x3c] sm:$0xe] }
  0xe1   : > { %v11786_v10 = vcombine.low %v14661_v52, %v14667_v54  ;;  %v14687_v11 = vsel %vm14653_vm14, %v11772_v32, %v2035_v49  ;;  %v2042_v16 = vrot.slane %v13963_v14, 5  ;;  %v2045_v26 = vrot.slane %v13964_v23, 5  ;;  %v13965_v13 = vld [vmem:[#allocation2 + $0x34] sm:$0xf]  ;;  %v1957_v32 = vld [vmem:[#allocation2 + $0x48] sm:$0xe] }
  0xe2   : > { %v14679_v1 = vsel %vm14653_vm14, %v2030_v55, %v2031_v6  ;;  %v1348_v47 = vsel %vm14296_vm9, %v1343_v61, %v1347_v40  ;;  %v11773_v6 = vrot.slane %v1954_v50, 9  ;;  %v14697_v34 = vsel %vm14653_vm14, %v2037_v8, %v2038_v57  ;;  %v13966_v55 = vld [vmem:[#allocation2 + $0x38] sm:$0x1]  ;;  %v13967_v8 = vld [vmem:[#allocation2 + $0x40] sm:$0xf] }
  0xe3   : > { %v11736_v17 = vcombine.low %v1338_v58, %v1348_v47  ;;  %v14689_v19 = vld [vmem:[#allocation2 + $0xb8] sm:$0xf]  ;;  %v11787_v5 = vcombine.low %v14673_v7, %v14679_v1  ;;  %v2049_v37 = vrot.slane %v13965_v13, 5  ;;  %v11774_v41 = vrot.slane %v1955_v4, 9  ;;  %v13968_v23 = vld [vmem:[#allocation2 + $0x44] sm:$0x1] }
  0xe4   : > { %v935_v27 = vld [vmem:[#allocation2 + $0xb4] sm:$0xf]  ;;  %v1359_v28 = vshll.u32 %v14689_v19, 16  ;;  %v1363_v30 = vshrl.u32 %v14689_v19, 16  ;;  %v2044_v48 = vrot.slane %v2042_v16, 4  ;;  %v2052_v56 = vrot.slane %v13966_v55, 5 }
  0xe5   : > { %12829 = vmatprep.mubr.bf16.mxu0 %v11736_v17  ;;  %v14699_v3 = vld [vmem:[#allocation2 + $0xbc] sm:$0x1]  ;;  %v1350_v38 = vshrl.u32 %v935_v27, 16  ;;  %v1353_v25 = vshll.u32 %v935_v27, 16  ;;  %v11761_v40 = vcombine.low %v935_v27, %v14689_v19  ;;  %v2051_v50 = vrot.slane %v2049_v37, 4 }
  0xe6   : > { %v1361_v42 = vrot.slane %v1359_v28, 5  ;;  %v1365_v43 = vrot.slane %v1363_v30, 4  ;;  %v1369_v46 = vshll.u32 %v14699_v3, 16  ;;  %v11775_v61 = vrot.slane %v1956_v24, 9  ;;  %v1958_v13 = vld [vmem:[#allocation2 + $0x54] sm:$0xe] }
  0xe7   : > { %v1352_v44 = vrot.slane %v1350_v38, 4  ;;  %v1355_v49 = vrot.slane %v1353_v25, 5  ;;  %12878 = vmatmul.mubr.bf16.gmra.mxu1 %v11761_v40  ;;  %v2056_v47 = vrot.slane %v13967_v8, 5  ;;  %v11788_v4 = vcombine.low %v14687_v11, %v14697_v34  ;;  %v13763_v25 = vld [vmem:[#allocation2 + $0x18] sm:$0xff]  }
  0xe8   : > { %v1366_v57 = vor.u32 %v1365_v43, %v1361_v42  ;;  %v1371_v58 = vrot.slane %v1369_v46, 5  ;;  %12945 = vmatprep.mubr.bf16.mxu1 %v13762_v33  ;;  %v14707_v17 = vsel %vm14653_vm14, %v11773_v6, %v2042_v16  ;;  %v2059_v27 = vrot.slane %v13968_v23, 5  ;;  %v13969_v6 = vld [vmem:[#allocation2 + $0x4c] sm:$0xf]  ;;  %v14862_v7 = vld [vmem:[#allocation2 + $0x1c] sm:$0xf] }
  0xe9   : > { %v1356_v14 = vor.u32 %v1355_v49, %v1352_v44  ;;  %v14711_v30 = vsel %vm14653_vm14, %v2044_v48, %v2045_v26  ;;  %v14715_v24 = vsel %vm14653_vm14, %v11774_v41, %v2049_v37  ;;  %v2058_v33 = vrot.slane %v2056_v47, 4  ;;  %v13765_v26 = vld [vmem:[#allocation2 + $0x24] sm:$0xff]   ;;  %v13970_v41 = vld [vmem:[#allocation2 + $0x58] sm:$0xf] }
  0xea   : > { %v1367_v28 = vrot.slane %v1366_v57, 4  ;;  %v14719_v40 = vsel %vm14653_vm14, %v2051_v50, %v2052_v56  ;;  %v11776_v16 = vrot.slane %v1957_v32, 9  ;;  %v2063_v43 = vrot.slane %v13969_v6, 5  ;;  %v13971_v50 = vld [vmem:[#allocation2 + $0x50] sm:$0x1] }
  0xeb   : > { %v1357_v38 = vrot.slane %v1356_v14, 4  ;;  %v14725_v48 = vsel %vm14653_vm14, %v11775_v61, %v2056_v47  ;;  %v14729_v37 = vsel %vm14653_vm14, %v2058_v33, %v2059_v27  ;;  %v2070_v44 = vrot.slane %v13970_v41, 5  ;;  %v1959_v57 = vld [vmem:[#allocation2 + $0x60] sm:$0xe]  ;;  %v13972_v14 = vld [vmem:[#allocation2 + $0x5c] sm:$0x1] }
  0xec   : > { %v1372_v46 = vsel %vm14296_vm9, %v1367_v28, %v1371_v58  ;;  %v11789_v32 = vcombine.low %v14707_v17, %v14711_v30  ;;  %v2066_v55 = vrot.slane %v13971_v50, 5  ;;  %v11777_v56 = vrot.slane %v1958_v13, 9  ;;  %v1960_v58 = vld [vmem:[#allocation2 + $0x6c] sm:$0xe]  ;;  %v1961_v28 = vld [vmem:[#allocation2 + $0x78] sm:$0xe] }
  0xed   : > { %v1362_v49 = vsel %vm14296_vm9, %v1357_v38, %v1361_v42  ;;  %v2065_v61 = vrot.slane %v2063_v43, 4  ;;  %v2072_v47 = vrot.slane %v2070_v44, 4  ;;  %v2073_v23 = vrot.slane %v13972_v14, 5  ;;  %v13777_v27 = vld [vmem:[#allocation6 + $0x170] sm:$0xff]   ;;  %v1962_v6 = vld [vmem:[#allocation2 + $0x84] sm:$0xe] }
  0xee   : > { %v11737_v8 = vcombine.low %v1362_v49, %v1372_v46  ;;  %v11790_v33 = vcombine.low %v14715_v24, %v14719_v40  ;;  %v11791_v42 = vcombine.low %v14725_v48, %v14729_v37  ;;  %v14741_v38 = vsel %vm14653_vm14, %v11776_v16, %v2063_v43  ;;  %v13772_v17 = vld [vmem:[#allocation2 + $0x60] sm:$0xff]   ;;  %v13773_v30 = vld [vmem:[#allocation6 + $0x118] sm:$0xff]  }
  0xef   : > { %12946 = vmatmul.mubr.bf16.vlgmr.msra.gmra.mxu1 %v13763_v25  ;;  %v2077_v13 = vrot.slane %v14489_v12, 5  ;;  %v11778_v46 = vrot.slane %v1959_v57, 9  ;;  %v2080_v41 = vrot.slane %v14496_v20, 5  ;;  %v11779_v49 = vrot.slane %v1960_v58, 9  ;;  %v1964_v58 = vld [vmem:[#allocation2 + $0x9c] sm:$0xe] }
  0xf0   : > { %12830 = vmatmul.mubr.bf16.gmra.mxu0 %v11737_v8  ;;  %12949 = vmatprep.mubr.bf16.mxu1 %v13765_v26  ;;  %v2084_v25 = vrot.slane %v14513_v63, 5  ;;  %v14751_v50 = vsel %vm14653_vm14, %v11777_v56, %v2070_v44  ;;  %v2087_v12 = vrot.slane %v14515_v0, 5  ;;  %v11780_v43 = vrot.slane %v1961_v28, 9  ;;  %v13766_v26 = vld [vmem:[#allocation2 + $0x30] sm:$0xff]  }
  0xf1   : > { %12897 = vmatprep.mubr.bf16.mxu0 %v11786_v10  ;;  %v2079_v16 = vrot.slane %v2077_v13, 4  ;;  %13026 = vmatpush3.bf16.msra.mxu1 %v14583_v62  ;;  %v14757_v20 = vsel %vm14653_vm14, %v2065_v61, %v2066_v55  ;;  %v14761_v63 = vsel %vm14653_vm14, %v2072_v47, %v2073_v23  ;;  %v2091_v54 = vrot.slane %v14539_v31, 5  ;;  %v13781_v10 = vld [vmem:[#allocation6 + $0x168] sm:$0xff]   ;;  %v1963_v44 = vld [vmem:[#allocation2 + $0x90] sm:$0xe]  ;;  %v13764_v47 = vld [vmem:[#allocation6 + $0x130] sm:$0xff]  }
  0xf2   : > { %v2086_v52 = vrot.slane %v2084_v25, 4  ;;  %13027 = vmatprep.subr.bf16.mxu1 %v13777_v27  ;;  %v2094_v0 = vrot.slane %v14529_v36, 5  ;;  %v11781_v56 = vrot.slane %v1962_v6, 9  ;;  %v2098_v62 = vrot.slane %v14553_v18, 5  ;;  %v13768_v55 = vld [vmem:[#allocation2 + $0x3c] sm:$0xff]  }
  0xf3   : > { %v2101_v57 = vrot.slane %v14555_v59, 5  ;;  %v14769_v8 = vsel %vm14653_vm14, %v11778_v46, %v2077_v13  ;;  %v14773_v61 = vsel %vm14653_vm14, %v2079_v16, %v2080_v41  ;;  %v14777_v31 = vsel %vm14653_vm14, %v11779_v49, %v2084_v25  ;;  %v13782_v13 = vld [vmem:[#allocation6 + $0x160] sm:$0xff]   ;;  %v1965_v49 = vld [vmem:[#allocation2 + $0xa8] sm:$0xe] }
  0xf4   : > { %v2093_v36 = vrot.slane %v2091_v54, 4  ;;  %v14781_v18 = vsel %vm14653_vm14, %v2086_v52, %v2087_v12  ;;  %v14785_v59 = vsel %vm14653_vm14, %v11780_v43, %v2091_v54  ;;  %v2100_v14 = vrot.slane %v2098_v62, 4  ;;  %v1966_v52 = vld [vmem:[#allocation2 + $0xb4] sm:$0xe] }
  0xf5   : > { %13028 = vmatpush3.bf16.msra.mxu1 %v13777_v27  ;;  %v11782_v23 = vrot.slane %v1963_v44, 9  ;;  %v14789_v28 = vsel %vm14653_vm14, %v11781_v56, %v2098_v62  ;;  %v2105_v6 = vrot.slane %v14590_v29, 5  ;;  %v2108_v46 = vrot.slane %v14594_v35, 5  ;;  %v288_v44 = vld [vmem:[#allocation2 + $0xc0] sm:$0x1]  ;;  %v372_v62 = vld [vmem:[%s14263_s8 + $0xf8] sm:$0xff] }
  0xf6   : > { %13029 = vmatprep.subr.bf16.mxu1 %v13781_v10  ;;  %v11783_v41 = vrot.slane %v1964_v58, 9  ;;  %v14795_v25 = vsel %vm14653_vm14, %v2093_v36, %v2094_v0  ;;  %v14799_v27 = vsel %vm14653_vm14, %v2100_v14, %v2101_v57  ;;  %v2112_v16 = vrot.slane %v14622_v21, 5  ;;  %v13973_v21 = vld [vmem:[#allocation6 + $0x138] sm:$0xff]   ;;  %v2822_v57 = vld [vmem:[#allocation2 + $0xc] sm:$0xf] }
  0xf7   : > { %12950 = vmatmul.mubr.bf16.gmra.mxu1 %v13766_v26  ;;  %v2115_v12 = vrot.slane %v14631_v51, 5  ;;  %v2107_v26 = vrot.slane %v2105_v6, 4  ;;  %v13767_v51 = vld [vmem:[#allocation6 + $0x128] sm:$0xff]   ;;  %v14819_v1 = vsel %vm14653_vm14, %v11782_v23, %v2105_v6  ;;  %v11784_v54 = vrot.slane %v1965_v49, 9  ;;  %v13769_v58 = vld [vmem:[#allocation2 + $0x48] sm:$0xff]  }
  0xf8   : > { %12898 = vmatmul.mubr.bf16.vlgmr.msra.gmra.mxu0 %v11787_v5  ;;  %12953 = vmatprep.mubr.bf16.mxu1 %v13768_v55  ;;  %v2114_v5 = vrot.slane %v2112_v16, 4  ;;  %v2119_v34 = vrot.slane %v14639_v15, 5  ;;  %v14834_v55 = vsel %vm14653_vm14, %v11783_v41, %v2112_v16  ;;  %v2122_v14 = vrot.slane %v14635_v60, 5  ;;  %v14841_v6 = vld [vmem:[#allocation2 + $0x10] sm:$0xf]  ;;  %v13771_v15 = vld [vmem:[#allocation2 + $0x54] sm:$0xff]  }
  0xf9   : > { %12978 = vmatpush3.bf16.msra.mxu0 %v13973_v21  ;;  %12901 = vmatprep.mubr.bf16.mxu0 %v11788_v4  ;;  %v14827_v11 = vsel %vm14653_vm14, %v2107_v26, %v2108_v46  ;;  %v371_v4 = vld [vmem:[%s14263_s8 + $0xf0] sm:$0xff]  ;;  %v11785_v23 = vrot.slane %v1966_v52, 9  ;;  %v2126_v49 = vrot.slane %v14689_v19, 5  ;;  %v2129_v26 = vrot.slane %v14699_v3, 5  ;;  %v14849_v16 = vld [vmem:[#allocation2 + $0x14] sm:$0x1] }
  0xfa   : > { %12979 = vmatprep.subr.bf16.mxu0 %v13764_v47  ;;  %13030 = vmatpush3.bf16.msra.mxu1 %v13781_v10  ;;  %v14838_v36 = vsel %vm14653_vm14, %v2114_v5, %v2115_v12  ;;  %v13786_v10 = vld [vmem:[#allocation6 + $0x158] sm:$0xff]   ;;  %v289_v41 = vsel %vm14275_vm4, 0, %v288_v44  ;;  %v14853_v60 = vsel %vm14653_vm14, %v11784_v54, %v2119_v34  ;;  %v12318_v12 = vpack.c.bf16 %v371_v4, %v371_v4  ;;  %v13770_v5 = vld [vmem:[#allocation6 + $0x120] sm:$0xff]   ;;  %v13778_v29 = vld [vmem:[#allocation6 + $0x110] sm:$0xff]   ;;  %s14113_s8 = smov [#allocation8]  }
  0xfb   : > { %13031 = vmatprep.subr.bf16.mxu1 %v13782_v13  ;;  %290 = vst [vmem:[#allocation2 + $0xc0] sm:$0x1] %v289_v41  ;;  %v12319_v52 = vpack.c.bf16 %v372_v62, %v372_v62  ;;  %v2888_v21 = vshrl.u32 %v2822_v57, 16  ;;  %v2121_v46 = vrot.slane %v2119_v34, 4  ;;  %v2891_v56 = vshll.u32 %v2822_v57, 16  ;;  %s14040_s21 = sshll.u32 %s14113_s8, 4  ;;  %s14041_s21 = int_to_ptr.vmem [resolvable:$false] %s14040_s21 }
  0xfc   : > { %v2897_v44 = vshll.u32 %v14841_v6, 16  ;;  %v2825_v0 = vld [vmem:[#allocation2 + $0x18] sm:$0xf]  ;;  %v14860_v54 = vsel %vm14653_vm14, %v11785_v23, %v2126_v49  ;;  %v727_v4 = vshrl.u32 %v12318_v12, 16  ;;  %v730_v62 = vshll.u32 %v12318_v12, 16  ;;  %s14042_s23 = scalar_lea.vmem %s14041_s21, 8192  ;;  %p14043_p10 = scmp.lt.s32.totalorder %s19308_s20, %s14041_s21 }
  0xfd   : > { %12980 = vmatpush3.bf16.msra.mxu0 %v13764_v47  ;;  %v13787_v47 = vld [vmem:[#allocation6 + $0x150] sm:$0xff]   ;;  %v735_v41 = vshrl.u32 %v12319_v52, 16  ;;  %v2890_v34 = vrot.slane %v2888_v21, 4  ;;  %v2893_v57 = vrot.slane %v2891_v56, 5  ;;  %v2901_v19 = vshrl.u32 %v14841_v6, 16  ;;  %p14044_p2 = scmp.lt.s32.totalorder %s14042_s23, %s14036_s7 }
  0xfe   : > { %12981 = vmatprep.subr.bf16.mxu0 %v13767_v51  ;;  %13032 = vmatpush3.bf16.msra.mxu1 %v13782_v13  ;;  %v738_v13 = vshll.u32 %v12319_v52, 16  ;;  %v729_v23 = vrot.slane %v727_v4, 7  ;;  %v2907_v43 = vshll.u32 %v14849_v16, 16  ;;  %v2915_v52 = vshll.u32 %v2825_v0, 16  ;;  %v3576_v4 = vld [vmem:[#allocation2 + $0xc] sm:$0xe] }
  0xff   : > { %12954 = vmatmul.mubr.bf16.gmra.mxu1 %v13769_v58  ;;  %13033 = vmatprep.subr.bf16.mxu1 %v13786_v10  ;;  %v14867_v58 = vrot.slane %v2897_v44, 5  ;;  %v14872_v12 = vrot.slane %v735_v41, 7  ;;  %v2894_v56 = vor.u32 %v2893_v57, %v2890_v34  ;;  %v2921_v21 = vshll.u32 %v14862_v7, 16  ;;  %v14878_v44 = vld [vmem:[#allocation2 + $0x20] sm:$0x1]  ;;  %v13774_v41 = vld [vmem:[#allocation2 + $0x6c] sm:$0xff]   ;;  %p14045_p13 = por %p14044_p2, %p14043_p10 }
 0x100   : > { %12902 = vmatmul.mubr.bf16.gmra.mxu0 %v11789_v32  ;;  %12957 = vmatprep.mubr.bf16.mxu1 %v13771_v15  ;;  %v13791_v32 = vld [vmem:[#allocation6 + $0x148] sm:$0xff]   ;;  %v2912_v15 = vshrl.u32 %v2825_v0, 16  ;;  %v2128_v24 = vrot.slane %v2126_v49, 4  ;;  %v732_v40 = vor.u32 %v730_v62, %v729_v23  ;;  %v14882_v35 = vsel %vm14653_vm14, %v2121_v46, %v2122_v14 }
 0x101   : > { %12905 = vmatprep.mubr.bf16.mxu0 %v11790_v33  ;;  %12982 = vmatpush3.bf16.msra.mxu0 %v13767_v51  ;;  %v733_v33 = vrot.slane %v729_v23, 4  ;;  %v740_v51 = vor.u32 %v738_v13, %v14872_v12  ;;  %v14884_v34 = vrot.slane %v2894_v56, 4  ;;  %v2903_v0 = vrot.slane %v2901_v19, 4  ;;  %v3577_v56 = vld [vmem:[#allocation2 + $0x18] sm:$0xe]  ;;  %p14046_p0 = pnand %p14045_p13, %p14039_p12 }
 0x102   : > { %12983 = vmatprep.subr.bf16.mxu0 %v13770_v5  ;;  %13034 = vmatpush3.bf16.msra.mxu1 %v13786_v10  ;;  %v898_v10 = vld [vmem:[#allocation2 + $0xc0] sm:$0xf]  ;;  %v2914_v57 = vrot.slane %v2912_v15, 4  ;;  %v2909_v13 = vrot.slane %v2907_v43, 5  ;;  %v2917_v23 = vrot.slane %v2915_v52, 5  ;;  %v14891_v46 = vrot.slane %v2921_v21, 5 }
 0x103   : > { %13035 = vmatprep.subr.bf16.mxu1 %v13787_v47  ;;  %v741_v49 = vsel %vm14303_vm10, %v733_v33, %v740_v51  ;;  %v899_v62 = vsel %vm14318_vm11, %v732_v40, %v898_v10  ;;  %v2904_v14 = vor.u32 %v2903_v0, %v14867_v58  ;;  %v2925_v19 = vshrl.u32 %v14862_v7, 16  ;;  %v13792_v15 = vld [vmem:[#allocation6 + $0x140] sm:$0xff]   ;;  %v2828_v33 = vld [vmem:[#allocation2 + $0x24] sm:$0xf]  ;;  %v14923_v10 = vld [vmem:[#allocation2 + $0x2c] sm:$0x1] }
 0x104   : > { %900 = vst [vmem:[#allocation2 + $0xc0] sm:$0xf] %v899_v62  ;;  %901 = vst [vmem:[#allocation2 + $0xc4] sm:$0xf] %v741_v49  ;;  %v2918_v40 = vor.u32 %v2917_v23, %v2914_v57  ;;  %v11858_v43 = vrot.slane %v3576_v4, 9  ;;  %v3659_v52 = vrot.slane %v14841_v6, 5  ;;  %v11800_v21 = vcombine.low %v14853_v60, %v14882_v35 }
 0x105   : > { %12984 = vmatpush3.bf16.msra.mxu0 %v13770_v5  ;;  %v2931_v5 = vshll.u32 %v14878_v44, 16  ;;  %v2905_v51 = vrot.slane %v2904_v14, 4  ;;  %v2927_v4 = vrot.slane %v2925_v19, 4  ;;  %v19433_v6 = vcombine.low %v14741_v38, %v14757_v20  ;;  %v2831_v49 = vld [vmem:[#allocation2 + $0x30] sm:$0xf] }
 0x106   : > { %12985 = vmatprep.subr.bf16.mxu0 %v13773_v30  ;;  %13036 = vmatpush3.bf16.msra.mxu1 %v13787_v47  ;;  %v3662_v47 = vrot.slane %v14849_v16, 5  ;;  %v13775_v16 = vld [vmem:[#allocation2 + $0x78] sm:$0xff]   ;;  %v2900_v48 = vsel %vm14296_vm9, %v14884_v34, %v14867_v58  ;;  %v14915_v37 = vrot.slane %v2918_v40, 4  ;;  %v3661_v3 = vrot.slane %v3659_v52, 4  ;;  %v14925_v34 = vld [vmem:[#allocation6 + $0x1f8] sm:$0xff]  }
 0x107   : > { %12958 = vmatmul.mubr.bf16.gmra.mxu1 %v13772_v17  ;;  %13037 = vmatprep.subr.bf16.mxu1 %v13791_v32  ;;  %v14906_v17 = vsel %vm14653_vm14, %v2128_v24, %v2129_v26  ;;  %v14918_v26 = vld [vmem:[#allocation2 + $0x28] sm:$0xf]  ;;  %v2910_v38 = vsel %vm14296_vm9, %v2905_v51, %v2909_v13  ;;  %v2928_v20 = vor.u32 %v2927_v4, %v14891_v46  ;;  %v2936_v58 = vshrl.u32 %v2828_v33, 16  ;;  %v13788_v13 = vld [vmem:[#allocation6 + $0x100] sm:$0xff]   ;;  %v14986_v62 = vld [vmem:[#allocation2 + $0x40] sm:$0xf] }
 0x108   : > { %12906 = vmatmul.mubr.bf16.gmra.mxu0 %v11791_v42  ;;  %12961 = vmatprep.mubr.bf16.mxu1 %v13774_v41  ;;  %v3666_v42 = vrot.slane %v14862_v7, 5  ;;  %v13779_v24 = vld [vmem:[#allocation2 + $0x84] sm:$0xff]   ;;  %v14927_v0 = vrot.slane %v2931_v5, 5  ;;  %v14931_v7 = vsel %vm14653_vm14, %v11858_v43, %v3659_v52  ;;  %v3669_v57 = vrot.slane %v14878_v44, 5  ;;  %v14943_v5 = vld [vmem:[#allocation2 + $0x34] sm:$0xf] }
 0x109   : > { %12909 = vmatprep.mubr.bf16.mxu0 %v19433_v6  ;;  %12986 = vmatpush3.bf16.msra.mxu0 %v13773_v30  ;;  %v13783_v41 = vld [vmem:[#allocation6 + $0x108] sm:$0xff]   ;;  %v11859_v30 = vrot.slane %v3577_v56, 9  ;;  %v14941_v14 = vrot.slane %v2928_v20, 4  ;;  %v14945_v56 = vcombine.low %v2900_v48, %v2910_v38  ;;  %v2924_v44 = vsel %vm14296_vm9, %v14915_v37, %v14891_v46  ;;  %v14951_v52 = vld [vmem:[#allocation2 + $0x38] sm:$0x1] }
 0x10a   : > { %12987 = vmatprep.subr.bf16.mxu0 %v13778_v29  ;;  %13038 = vmatpush3.bf16.msra.mxu1 %v13791_v32  ;;  %v14935_v32 = vsel %vm14653_vm14, %v3661_v3, %v3662_v47  ;;  %v3668_v19 = vrot.slane %v3666_v42, 4  ;;  %v2938_v40 = vrot.slane %v2936_v58, 4  ;;  %v2939_v43 = vshll.u32 %v2828_v33, 16  ;;  %v3578_v6 = vld [vmem:[#allocation2 + $0x24] sm:$0xe] }
 0x10b   : > { %13039 = vmatprep.subr.bf16.mxu1 %v13792_v15  ;;  %v11874_v47 = vcombine.low %v14931_v7, %v14935_v32  ;;  %v14957_v51 = vsel %vm14653_vm14, %v11859_v30, %v3666_v42  ;;  %v2949_v4 = vshrl.u32 %v14918_v26, 16  ;;  %v2934_v46 = vsel %vm14296_vm9, %v14941_v14, %v14927_v0  ;;  %v14979_v14 = vld [vmem:[#allocation6 + $0x1b8] sm:$0xff]   ;;  %v2834_v23 = vld [vmem:[#allocation2 + $0x3c] sm:$0xf] }
 0x10c   : > { %v2941_v33 = vrot.slane %v2939_v43, 5  ;;  %v2955_v48 = vshll.u32 %v14923_v10, 16  ;;  %v19434_v37 = vcombine.low %v14751_v50, %v14761_v63  ;;  %v2960_v42 = vshrl.u32 %v2831_v49, 16  ;;  %v13780_v43 = vld [vmem:[#allocation2 + $0x90] sm:$0xff]  }
 0x10d   : > { %12988 = vmatpush3.bf16.msra.mxu0 %v13778_v29  ;;  %v2945_v29 = vshll.u32 %v14918_v26, 16  ;;  %v2951_v3 = vrot.slane %v2949_v4, 4  ;;  %v2963_v38 = vshll.u32 %v2831_v49, 16  ;;  %v19435_v20 = vcombine.low %v14769_v8, %v14773_v61  ;;  %v3579_v49 = vld [vmem:[#allocation2 + $0x30] sm:$0xe] }
 0x10e   : > { %12989 = vmatprep.subr.bf16.mxu0 %v13783_v41  ;;  %13040 = vmatpush3.bf16.msra.mxu1 %v13792_v15  ;;  %v14967_v15 = vsel %vm14653_vm14, %v3668_v19, %v3669_v57  ;;  %v2942_v30 = vor.u32 %v2941_v33, %v2938_v40  ;;  %v2957_v58 = vrot.slane %v2955_v48, 5  ;;  %v2969_v0 = vshll.u32 %v14943_v5, 16  ;;  %v13784_v40 = vld [vmem:[#allocation2 + $0x9c] sm:$0xff]  }
 0x10f   : > { %12962 = vmatmul.mubr.bf16.gmra.mxu1 %v13775_v16  ;;  %13121 = vmatprep.subr.bf16.mxu1 %v14925_v34  ;;  %v2947_v16 = vrot.slane %v2945_v29, 5  ;;  %v2973_v57 = vshrl.u32 %v14943_v5, 16  ;;  %v2962_v63 = vrot.slane %v2960_v42, 4  ;;  %v2979_v19 = vshll.u32 %v14951_v52, 16 }
 0x110   : > { %12910 = vmatmul.mubr.bf16.gmra.mxu0 %v19434_v37  ;;  %12965 = vmatprep.mubr.bf16.mxu1 %v13779_v24  ;;  %v2965_v24 = vrot.slane %v2963_v38, 5  ;;  %v2943_v29 = vrot.slane %v2942_v30, 4  ;;  %v2971_v8 = vrot.slane %v2969_v0, 5  ;;  %v3673_v37 = vrot.slane %v14918_v26, 5 }
 0x111   : > { %12913 = vmatprep.mubr.bf16.mxu0 %v19435_v20  ;;  %12990 = vmatpush3.bf16.msra.mxu0 %v13783_v41  ;;  %v2952_v50 = vor.u32 %v2951_v3, %v2947_v16  ;;  %v2975_v61 = vrot.slane %v2973_v57, 4  ;;  %v11860_v41 = vrot.slane %v3578_v6, 9  ;;  %v2981_v48 = vrot.slane %v2979_v19, 5 }
 0x112   : > { %12991 = vmatprep.subr.bf16.mxu0 %v13788_v13  ;;  %v2966_v33 = vor.u32 %v2965_v24, %v2962_v63  ;;  %v2948_v3 = vsel %vm14296_vm9, %v2943_v29, %v2947_v16  ;;  %v3676_v38 = vrot.slane %v14923_v10, 5  ;;  %v11861_v20 = vrot.slane %v3579_v49, 9  ;;  %v2837_v63 = vld [vmem:[#allocation2 + $0x48] sm:$0xf]  ;;  %v15011_v49 = vld [vmem:[#allocation2 + $0x4c] sm:$0xf] }
 0x113   : > { %v2953_v4 = vrot.slane %v2952_v50, 4  ;;  %v2976_v42 = vor.u32 %v2975_v61, %v2971_v8  ;;  %v14993_v26 = vsel %vm14653_vm14, %v11860_v41, %v3673_v37  ;;  %v14995_v16 = vcombine.low %v2924_v44, %v2934_v46  ;;  %v15000_v50 = vld [vmem:[#allocation2 + $0x44] sm:$0x1]  ;;  %v13785_v61 = vld [vmem:[#allocation2 + $0xa8] sm:$0xff]  }
 0x114   : > { %v2967_v30 = vrot.slane %v2966_v33, 4  ;;  %v11875_v10 = vcombine.low %v14957_v51, %v14967_v15  ;;  %v3680_v57 = vrot.slane %v14943_v5, 5  ;;  %v2984_v46 = vshrl.u32 %v2834_v23, 16  ;;  %v15030_v33 = vld [vmem:[#allocation2 + $0x50] sm:$0x1] }
 0x115   : > { %12992 = vmatpush3.bf16.msra.mxu0 %v13788_v13  ;;  %v2958_v6 = vsel %vm14296_vm9, %v2953_v4, %v2957_v58  ;;  %v3675_v13 = vrot.slane %v3673_v37, 4  ;;  %v2977_v0 = vrot.slane %v2976_v42, 4  ;;  %v19436_v58 = vcombine.low %v14777_v31, %v14781_v18  ;;  %v13789_v37 = vld [vmem:[#allocation2 + $0xb4] sm:$0xff]  }
 0x116   : > { %13073 = vmatprep.subr.bf16.mxu0 %v14979_v14  ;;  %v15005_v24 = vcombine.low %v2948_v3, %v2958_v6  ;;  %v2987_v19 = vshll.u32 %v2834_v23, 16  ;;  %v19437_v5 = vcombine.low %v14785_v59, %v14795_v25  ;;  %v3683_v29 = vrot.slane %v14951_v52, 5 }
 0x117   : > { %12966 = vmatmul.mubr.bf16.gmra.mxu1 %v13780_v43  ;;  %v15009_v44 = vsel %vm14653_vm14, %v3675_v13, %v3676_v38  ;;  %v2972_v43 = vsel %vm14296_vm9, %v2967_v30, %v2971_v8  ;;  %v2982_v31 = vsel %vm14296_vm9, %v2977_v0, %v2981_v48  ;;  %v15025_v23 = vsel %vm14653_vm14, %v11861_v20, %v3680_v57  ;;  %v3580_v20 = vld [vmem:[#allocation2 + $0x3c] sm:$0xe] }
 0x118   : > { %12914 = vmatmul.mubr.bf16.gmra.mxu0 %v19436_v58  ;;  %12969 = vmatprep.mubr.bf16.mxu1 %v13784_v40  ;;  %v2986_v41 = vrot.slane %v2984_v46, 4  ;;  %v2989_v40 = vrot.slane %v2987_v19, 5  ;;  %v2993_v59 = vshll.u32 %v14986_v62, 16  ;;  %v3682_v25 = vrot.slane %v3680_v57, 4 }
 0x119   : > { %12917 = vmatprep.mubr.bf16.mxu0 %v19437_v5  ;;  %v2997_v8 = vshrl.u32 %v14986_v62, 16  ;;  %v3003_v4 = vshll.u32 %v15000_v50, 16  ;;  %v3008_v48 = vshrl.u32 %v2837_v63, 16  ;;  %v15032_v3 = vcombine.low %v2972_v43, %v2982_v31  ;;  %v3581_v5 = vld [vmem:[#allocation2 + $0x48] sm:$0xe] }
 0x11a   : > { %v2990_v52 = vor.u32 %v2989_v40, %v2986_v41  ;;  %v2995_v42 = vrot.slane %v2993_v59, 5  ;;  %v3011_v38 = vshll.u32 %v2837_v63, 16  ;;  %v3017_v0 = vshll.u32 %v15011_v49, 16  ;;  %v2840_v41 = vld [vmem:[#allocation2 + $0x54] sm:$0xf] }
 0x11b   : > { %v2999_v6 = vrot.slane %v2997_v8, 4  ;;  %v3005_v30 = vrot.slane %v3003_v4, 5  ;;  %v3010_v13 = vrot.slane %v3008_v48, 4  ;;  %v3021_v46 = vshrl.u32 %v15011_v49, 16 }
 0x11c   : > { %v2991_v57 = vrot.slane %v2990_v52, 4  ;;  %v3013_v58 = vrot.slane %v3011_v38, 5  ;;  %v3027_v19 = vshll.u32 %v15030_v33, 16  ;;  %v15037_v43 = vrot.slane %v3017_v0, 5 }
 0x11d   : > { %v3000_v18 = vor.u32 %v2999_v6, %v2995_v42  ;;  %v11862_v31 = vrot.slane %v3580_v20, 9  ;;  %v3687_v63 = vrot.slane %v14986_v62, 5  ;;  %v19438_v40 = vcombine.low %v14789_v28, %v14799_v27  ;;  %v2841_v27 = vld [vmem:[#allocation2 + $0x58] sm:$0xf] }
 0x11e   : > { %v15045_v59 = vsel %vm14653_vm14, %v3682_v25, %v3683_v29  ;;  %v2996_v8 = vsel %vm14296_vm9, %v2991_v57, %v2995_v42  ;;  %v3023_v4 = vrot.slane %v3021_v46, 4  ;;  %v19439_v48 = vcombine.low %v14819_v1, %v14827_v11  ;;  %v13790_v29 = vld [vmem:[#allocation2 + $0xc0] sm:$0xff]  }
 0x11f   : > { %12970 = vmatmul.mubr.bf16.gmra.mxu1 %v13785_v61  ;;  %v3014_v61 = vor.u32 %v3013_v58, %v3010_v13  ;;  %v3001_v62 = vrot.slane %v3000_v18, 4  ;;  %v15052_v52 = vrot.slane %v3027_v19, 5  ;;  %v3689_v38 = vrot.slane %v3687_v63, 4  ;;  %v2843_v11 = vld [vmem:[#allocation2 + $0x60] sm:$0xf] }
 0x120   : > { %12918 = vmatmul.mubr.bf16.gmra.mxu0 %v19438_v40  ;;  %12973 = vmatprep.mubr.bf16.mxu1 %v13789_v37  ;;  %v3690_v28 = vrot.slane %v15000_v50, 5  ;;  %v15055_v37 = vld [vmem:[#allocation2 + $0x5c] sm:$0x1]  ;;  %v3024_v42 = vor.u32 %v3023_v4, %v15037_v43  ;;  %v15062_v20 = vsel %vm14653_vm14, %v11862_v31, %v3687_v63  ;;  %v3694_v1 = vrot.slane %v15011_v49, 5 }
 0x121   : > { %12921 = vmatprep.mubr.bf16.mxu0 %v19439_v48  ;;  %v15057_v25 = vrot.slane %v3014_v61, 4  ;;  %v3006_v18 = vsel %vm14296_vm9, %v3001_v62, %v3005_v30  ;;  %v11863_v6 = vrot.slane %v3581_v5, 9  ;;  %v3032_v13 = vshrl.u32 %v2840_v41, 16  ;;  %v3582_v62 = vld [vmem:[#allocation2 + $0x54] sm:$0xe] }
 0x122   : > { %v15069_v50 = vsel %vm14653_vm14, %v3689_v38, %v3690_v28  ;;  %v11877_v0 = vcombine.low %v15025_v23, %v15045_v59  ;;  %v15073_v57 = vcombine.low %v2996_v8, %v3006_v18  ;;  %v3025_v58 = vrot.slane %v3024_v42, 4  ;;  %v15083_v8 = vld [vmem:[#allocation2 + $0x64] sm:$0xf] }
 0x123   : > { %v3697_v46 = vrot.slane %v15030_v33, 5  ;;  %v3020_v49 = vsel %vm14296_vm9, %v15057_v25, %v15037_v43  ;;  %v3696_v30 = vrot.slane %v3694_v1, 4  ;;  %v3034_v19 = vrot.slane %v3032_v13, 4 }
 0x124   : > { %v3035_v31 = vshll.u32 %v2840_v41, 16  ;;  %v11878_v5 = vcombine.low %v15062_v20, %v15069_v50  ;;  %v3041_v63 = vshll.u32 %v2841_v27, 16  ;;  %v3045_v40 = vshrl.u32 %v2841_v27, 16  ;;  %v15092_v41 = vld [vmem:[#allocation2 + $0x68] sm:$0x1] }
 0x125   : > { %v3051_v61 = vshll.u32 %v15055_v37, 16  ;;  %v3030_v33 = vsel %vm14296_vm9, %v3025_v58, %v15052_v52  ;;  %v15090_v43 = vsel %vm14653_vm14, %v11863_v6, %v3694_v1  ;;  %v3056_v48 = vshrl.u32 %v2843_v11, 16 }
 0x126   : > { %v3037_v4 = vrot.slane %v3035_v31, 5  ;;  %v19440_v38 = vcombine.low %v14834_v55, %v14838_v36  ;;  %v15102_v52 = vsel %vm14653_vm14, %v3696_v30, %v3697_v46  ;;  %v3043_v28 = vrot.slane %v3041_v63, 5  ;;  %v3583_v36 = vld [vmem:[#allocation2 + $0x60] sm:$0xe] }
 0x127   : > { %12974 = vmatmul.mubr.bf16.gmra.mxu1 %v13790_v29  ;;  %v3047_v29 = vrot.slane %v3045_v40, 4  ;;  %v3053_v25 = vrot.slane %v3051_v61, 5  ;;  %v3058_v1 = vrot.slane %v3056_v48, 4  ;;  %v3059_v18 = vshll.u32 %v2843_v11, 16  ;;  %v2846_v11 = vld [vmem:[#allocation2 + $0x6c] sm:$0xf] }
 0x128   : > { %12922 = vmatmul.mubr.bf16.gmra.mxu0 %v19440_v38  ;;  %13041 = vmatprep.mubr.bf16.mxu1 %v11874_v47  ;;  %v3038_v42 = vor.u32 %v3037_v4, %v3034_v19  ;;  %v3065_v55 = vshll.u32 %v15083_v8, 16  ;;  %v3069_v7 = vshrl.u32 %v15083_v8, 16  ;;  %v3075_v32 = vshll.u32 %v15092_v41, 16  ;;  %v15115_v19 = vld [vmem:[#allocation2 + $0x70] sm:$0xf] }
 0x129   : > { %12925 = vmatprep.mubr.bf16.mxu0 %v11800_v21  ;;  %v3048_v6 = vor.u32 %v3047_v29, %v3043_v28  ;;  %v11864_v47 = vrot.slane %v3582_v62, 9  ;;  %v3061_v58 = vrot.slane %v3059_v18, 5  ;;  %v3701_v30 = vrot.slane %v2841_v27, 5  ;;  %v15123_v48 = vld [vmem:[#allocation2 + $0x74] sm:$0x1]  ;;  %v13799_v27 = vld [vmem:[#allocation6 + $0x1f0] sm:$0xff]  }
 0x12a   : > { %v3039_v13 = vrot.slane %v3038_v42, 4  ;;  %v15110_v46 = vrot.slane %v3065_v55, 5  ;;  %v3071_v35 = vrot.slane %v3069_v7, 4  ;;  %v15112_v60 = vrot.slane %v3075_v32, 5 }
 0x12b   : > { %v3049_v31 = vrot.slane %v3048_v6, 4  ;;  %v3704_v21 = vrot.slane %v15055_v37, 5  ;;  %v3062_v40 = vor.u32 %v3061_v58, %v3058_v1  ;;  %v15121_v61 = vsel %vm14653_vm14, %v11864_v47, %v3701_v30  ;;  %v15175_v58 = vld [vmem:[#allocation2 + $0x80] sm:$0x1] }
 0x12c   : > { %v3044_v63 = vsel %vm14296_vm9, %v3039_v13, %v3043_v28  ;;  %v3703_v4 = vrot.slane %v3701_v30, 4  ;;  %v3072_v37 = vor.u32 %v3071_v35, %v15110_v46  ;;  %v11865_v38 = vrot.slane %v3583_v36, 9 }
 0x12d   : > { %v3054_v62 = vsel %vm14296_vm9, %v3049_v31, %v3053_v25  ;;  %v3708_v29 = vrot.slane %v15083_v8, 5  ;;  %v15132_v28 = vcombine.low %v3020_v49, %v3030_v33  ;;  %v15134_v42 = vrot.slane %v3062_v40, 4  ;;  %v2849_v25 = vld [vmem:[#allocation2 + $0x78] sm:$0xf]  ;;  %v15151_v33 = vld [vmem:[#allocation2 + $0x7c] sm:$0xf] }
 0x12e   : > { %v15138_v1 = vsel %vm14653_vm14, %v3703_v4, %v3704_v21  ;;  %v3711_v18 = vrot.slane %v15092_v41, 5  ;;  %v19441_v55 = vcombine.low %v14860_v54, %v14906_v17  ;;  %v19442_v8 = vcombine.low %v14993_v26, %v15009_v44  ;;  %v13801_v26 = vld [vmem:[#allocation6 + $0x1e8] sm:$0xff]  }
 0x12f   : > { %13042 = vmatmul.mubr.bf16.vlgmr.msra.gmra.mxu1 %v11875_v10  ;;  %v11879_v51 = vcombine.low %v15090_v43, %v15102_v52  ;;  %v15149_v15 = vcombine.low %v3044_v63, %v3054_v62  ;;  %v3073_v10 = vrot.slane %v3072_v37, 4  ;;  %v3710_v49 = vrot.slane %v3708_v29, 4  ;;  %v13797_v43 = vld [vmem:[#allocation6 + $0x198] sm:$0xff]  }
 0x130   : > { %12926 = vmatmul.mubr.bf16.gmra.mxu0 %v19441_v55  ;;  %13045 = vmatprep.mubr.bf16.mxu1 %v19442_v8  ;;  %v11880_v41 = vcombine.low %v15121_v61, %v15138_v1  ;;  %v3080_v54 = vshrl.u32 %v2846_v11, 16  ;;  %v3083_v17 = vshll.u32 %v2846_v11, 16  ;;  %v3089_v36 = vshll.u32 %v15115_v19, 16  ;;  %v13794_v11 = vld [vmem:[#allocation6 + $0x1b0] sm:$0xff]   ;;  %v3587_v1 = vld [vmem:[#allocation2 + $0x90] sm:$0xe] }
 0x131   : > { %12993 = vmatprep.mubr.bf16.mxu0 %v14945_v56  ;;  %13122 = vmatpush3.bf16.msra.mxu1 %v14925_v34  ;;  %v3068_v44 = vsel %vm14296_vm9, %v15134_v42, %v15110_v46  ;;  %v15164_v6 = vsel %vm14653_vm14, %v11865_v38, %v3708_v29  ;;  %v3093_v56 = vshrl.u32 %v15115_v19, 16  ;;  %v3099_v7 = vshll.u32 %v15123_v48, 16  ;;  %v3584_v46 = vld [vmem:[#allocation2 + $0x6c] sm:$0xe]  ;;  %v3585_v42 = vld [vmem:[#allocation2 + $0x78] sm:$0xe] }
 0x132   : > { %13123 = vmatprep.subr.bf16.mxu1 %v13799_v27  ;;  %v3078_v32 = vsel %vm14296_vm9, %v3073_v10, %v15112_v60  ;;  %v15173_v34 = vsel %vm14653_vm14, %v3710_v49, %v3711_v18  ;;  %v3082_v47 = vrot.slane %v3080_v54, 4  ;;  %v3085_v13 = vrot.slane %v3083_v17, 5  ;;  %v13802_v18 = vld [vmem:[#allocation6 + $0x1e0] sm:$0xff]   ;;  %v2852_v49 = vld [vmem:[#allocation2 + $0x84] sm:$0xf]  ;;  %v15183_v54 = vpop.f32.mrf.mxu1 }
 0x133   : > { %v3091_v30 = vrot.slane %v3089_v36, 5  ;;  %v3095_v31 = vrot.slane %v3093_v56, 4  ;;  %v3101_v35 = vrot.slane %v3099_v7, 5  ;;  %v3104_v21 = vshrl.u32 %v2849_v25, 16 }
 0x134   : > { %v3086_v63 = vor.u32 %v3085_v13, %v3082_v47  ;;  %v3107_v40 = vshll.u32 %v2849_v25, 16  ;;  %v3113_v4 = vshll.u32 %v15151_v33, 16  ;;  %v3117_v60 = vshrl.u32 %v15151_v33, 16  ;;  %v15197_v47 = vld [vmem:[#allocation6 + $0x1d8] sm:$0xff]  }
 0x135   : > { %13124 = vmatpush3.bf16.msra.mxu1 %v13799_v27  ;;  %v3096_v62 = vor.u32 %v3095_v31, %v3091_v30  ;;  %v3106_v37 = vrot.slane %v3104_v21, 4  ;;  %v3123_v38 = vshll.u32 %v15175_v58, 16  ;;  %v11866_v29 = vrot.slane %v3584_v46, 9  ;;  %v15186_v27 = vld [vmem:[#allocation6 + $0x1a8] sm:$0xff]   ;;  %v15210_v46 = vld [vmem:[#allocation2 + $0x88] sm:$0xf] }
 0x136   : > { %13125 = vmatprep.subr.bf16.mxu1 %v13801_v26  ;;  %v3087_v55 = vrot.slane %v3086_v63, 4  ;;  %v3109_v8 = vrot.slane %v3107_v40, 5  ;;  %v3115_v25 = vrot.slane %v3113_v4, 5  ;;  %v3119_v10 = vrot.slane %v3117_v60, 4  ;;  %v15221_v31 = vld [vmem:[#allocation2 + $0x8c] sm:$0x1] }
 0x137   : > { %13046 = vmatmul.mubr.bf16.gmra.mxu1 %v11877_v0  ;;  %v3097_v17 = vrot.slane %v3096_v62, 4  ;;  %v3125_v36 = vrot.slane %v3123_v38, 5  ;;  %v3715_v23 = vrot.slane %v15115_v19, 5  ;;  %v3718_v59 = vrot.slane %v15123_v48, 5  ;;  %v2855_v60 = vld [vmem:[#allocation2 + $0x90] sm:$0xf] }
 0x138   : > { %12994 = vmatmul.mubr.bf16.vlgmr.msra.gmra.mxu0 %v14995_v16  ;;  %13049 = vmatprep.mubr.bf16.mxu1 %v11878_v5  ;;  %v3092_v0 = vsel %vm14296_vm9, %v3087_v55, %v3091_v30  ;;  %v3110_v16 = vor.u32 %v3109_v8, %v3106_v37  ;;  %v3120_v56 = vor.u32 %v3119_v10, %v3115_v25  ;;  %v11867_v7 = vrot.slane %v3585_v42, 9  ;;  %v15227_v62 = vld [vmem:[#allocation2 + $0x94] sm:$0xf]  ;;  %v15229_v37 = vpop.f32.mrf.mxu0  ;;  %v15239_v42 = vld [vmem:[#allocation2 + $0x98] sm:$0x1] }
 0x139   : > { %13074 = vmatpush3.bf16.msra.mxu0 %v14979_v14  ;;  %12997 = vmatprep.mubr.bf16.mxu0 %v15005_v24  ;;  %v15199_v20 = vcombine.low %v3068_v44, %v3078_v32  ;;  %v3102_v50 = vsel %vm14296_vm9, %v3097_v17, %v3101_v35  ;;  %v3717_v5 = vrot.slane %v3715_v23, 4  ;;  %v3722_v19 = vrot.slane %v15151_v33, 5  ;;  %v15212_v44 = vpop.f32.mrf.mxu1  ;;  %v13796_v32 = vld [vmem:[#allocation6 + $0x1a0] sm:$0xff]   ;;  %v3586_v55 = vld [vmem:[#allocation2 + $0x84] sm:$0xe]  ;;  %v13805_v17 = vld [vmem:[#allocation6 + $0x1d0] sm:$0xff]  }
 0x13a   : > { %13075 = vmatprep.subr.bf16.mxu0 %v13794_v11  ;;  %13126 = vmatpush3.bf16.msra.mxu1 %v13801_v26  ;;  %v11881_v14 = vcombine.low %v15164_v6, %v15173_v34  ;;  %v3111_v24 = vrot.slane %v3110_v16, 4  ;;  %v3121_v48 = vrot.slane %v3120_v56, 4  ;;  %v15208_v13 = vsel %vm14653_vm14, %v11866_v29, %v3715_v23 }
 0x13b   : > { %13127 = vmatprep.subr.bf16.mxu1 %v13802_v18  ;;  %v15214_v30 = vcombine.low %v3092_v0, %v3102_v50  ;;  %v15218_v33 = vsel %vm14653_vm14, %v3717_v5, %v3718_v59  ;;  %v3725_v26 = vrot.slane %v15175_v58, 5  ;;  %v3128_v35 = vshrl.u32 %v2852_v49, 16  ;;  %v15270_v50 = vld [vmem:[#allocation2 + $0x9c] sm:$0xf] }
 0x13c   : > { %v3116_v21 = vsel %vm14296_vm9, %v3111_v24, %v3115_v25  ;;  %v3126_v63 = vsel %vm14296_vm9, %v3121_v48, %v3125_v36  ;;  %v3724_v40 = vrot.slane %v3722_v19, 4  ;;  %v3131_v4 = vshll.u32 %v2852_v49, 16  ;;  %v15249_v36 = vpop.f32.mrf.mxu1  ;;  %v13807_v48 = vld [vmem:[#allocation6 + $0x1c8] sm:$0xff]  }
 0x13d   : > { %13076 = vmatpush3.bf16.msra.mxu0 %v13794_v11  ;;  %v11882_v58 = vcombine.low %v15208_v13, %v15218_v33  ;;  %v15236_v11 = vsel %vm14653_vm14, %v11867_v7, %v3722_v19  ;;  %v3130_v38 = vrot.slane %v3128_v35, 4  ;;  %v3137_v29 = vshll.u32 %v15210_v46, 16  ;;  %v2864_v13 = vld [vmem:[#allocation2 + $0xb4] sm:$0xf] }
 0x13e   : > { %13077 = vmatprep.subr.bf16.mxu0 %v15186_v27  ;;  %13128 = vmatpush3.bf16.msra.mxu1 %v13802_v18  ;;  %v15244_v8 = vcombine.low %v3116_v21, %v3126_v63  ;;  %v3133_v25 = vrot.slane %v3131_v4, 5  ;;  %v3141_v10 = vshrl.u32 %v15210_v46, 16  ;;  %v3147_v49 = vshll.u32 %v15221_v31, 16 }
 0x13f   : > { %13050 = vmatmul.mubr.bf16.gmra.mxu1 %v11879_v51  ;;  %13129 = vmatprep.subr.bf16.mxu1 %v15197_v47  ;;  %v15255_v52 = vrot.slane %v3137_v29, 5  ;;  %v3152_v51 = vshrl.u32 %v2855_v60, 16  ;;  %v3155_v18 = vshll.u32 %v2855_v60, 16  ;;  %v3161_v23 = vshll.u32 %v15227_v62, 16 }
 0x140   : > { %12998 = vmatmul.mubr.bf16.gmra.mxu0 %v15032_v3  ;;  %13053 = vmatprep.mubr.bf16.mxu1 %v11880_v41  ;;  %v15262_v59 = vsel %vm14653_vm14, %v3724_v40, %v3725_v26  ;;  %v3134_v3 = vor.u32 %v3133_v25, %v3130_v38  ;;  %v3143_v0 = vrot.slane %v3141_v10, 4  ;;  %v3165_v61 = vshrl.u32 %v15227_v62, 16  ;;  %v15265_v41 = vpop.f32.mrf.mxu0  ;;  %v15276_v26 = vpop.f32.mrf.mxu1  ;;  %v13800_v10 = vld [vmem:[#allocation6 + $0x190] sm:$0xff]  }
 0x141   : > { %13001 = vmatprep.mubr.bf16.mxu0 %v15073_v57  ;;  %13078 = vmatpush3.bf16.msra.mxu0 %v15186_v27  ;;  %v3154_v16 = vrot.slane %v3152_v51, 4  ;;  %v3157_v56 = vrot.slane %v3155_v18, 5  ;;  %v15267_v7 = vrot.slane %v3161_v23, 5  ;;  %v3171_v57 = vshll.u32 %v15239_v42, 16  ;;  %19443 = vst [vmem:[#allocation17_spill] sm:$0xff] %v15276_v26 }
 0x142   : > { %13079 = vmatprep.subr.bf16.mxu0 %v13796_v32  ;;  %13130 = vmatpush3.bf16.msra.mxu1 %v15197_v47  ;;  %v3144_v27 = vor.u32 %v3143_v0, %v15255_v52  ;;  %v15274_v5 = vrot.slane %v3147_v49, 5  ;;  %v3167_v19 = vrot.slane %v3165_v61, 4  ;;  %v11868_v24 = vrot.slane %v3586_v55, 9  ;;  %v15287_v29 = vpop.f32.mrf.mxu0  ;;  %v15304_v18 = vld [vmem:[#allocation2 + $0xa4] sm:$0x1] }
 0x143   : > { %13131 = vmatprep.subr.bf16.mxu1 %v13805_v17  ;;  %v15278_v35 = vrot.slane %v3134_v3, 4  ;;  %v3158_v21 = vor.u32 %v3157_v56, %v3154_v16  ;;  %v3729_v63 = vrot.slane %v15210_v46, 5  ;;  %v3732_v40 = vrot.slane %v15221_v31, 5  ;;  %v15338_v0 = vld [vmem:[#allocation2 + $0xb0] sm:$0x1]  ;;  %v13803_v61 = vld [vmem:[#allocation6 + $0x188] sm:$0xff]  }
 0x144   : > { %v15282_v4 = vrot.slane %v3144_v27, 4  ;;  %v3168_v47 = vor.u32 %v3167_v19, %v15267_v7  ;;  %v15285_v60 = vrot.slane %v3171_v57, 5  ;;  %v11869_v38 = vrot.slane %v3587_v1, 9  ;;  %v3588_v57 = vld [vmem:[#allocation2 + $0x9c] sm:$0xe] }
 0x145   : > { %13080 = vmatpush3.bf16.msra.mxu0 %v13796_v32  ;;  %v11883_v55 = vcombine.low %v15236_v11, %v15262_v59  ;;  %v15291_v25 = vrot.slane %v3158_v21, 4  ;;  %v3731_v46 = vrot.slane %v3729_v63, 4  ;;  %v3736_v31 = vrot.slane %v15227_v62, 5  ;;  %v15294_v32 = vld [vmem:[#allocation2 + $0xa0] sm:$0xf]  ;;  %v13808_v62 = vld [vmem:[#allocation6 + $0x1c0] sm:$0xff]   ;;  %v15307_v59 = vpop.f32.mrf.mxu1 }
 0x146   : > { %13081 = vmatprep.subr.bf16.mxu0 %v13797_v43  ;;  %13132 = vmatpush3.bf16.msra.mxu1 %v13805_v17  ;;  %v15299_v49 = vrot.slane %v3168_v47, 4  ;;  %v3730_v51 = vsel %vm14653_vm14, %v11868_v24, %v3729_v63  ;;  %v3739_v11 = vrot.slane %v15239_v42, 5  ;;  %v3176_v23 = vshrl.u32 %v15270_v50, 16  ;;  %v2861_v17 = vld [vmem:[#allocation2 + $0xa8] sm:$0xf] }
 0x147   : > { %13054 = vmatmul.mubr.bf16.gmra.mxu1 %v11881_v14  ;;  %13133 = vmatprep.subr.bf16.mxu1 %v13807_v48  ;;  %v3140_v6 = vsel %vm14296_vm9, %v15278_v35, %v15255_v52  ;;  %v3150_v34 = vsel %vm14296_vm9, %v15282_v4, %v15274_v5  ;;  %v3733_v14 = vsel %vm14653_vm14, %v3731_v46, %v3732_v40  ;;  %v3738_v42 = vrot.slane %v3736_v31, 4  ;;  %v15352_v63 = vpop.f32.mrf.mxu1 }
 0x148   : > { %13002 = vmatmul.mubr.bf16.gmra.mxu0 %v15132_v28  ;;  %13057 = vmatprep.mubr.bf16.mxu1 %v11882_v58  ;;  %v15323_v28 = vld [vmem:[#allocation2 + $0xac] sm:$0xf]  ;;  %v3174_v33 = vsel %vm14296_vm9, %v15299_v49, %v15285_v60  ;;  %v15336_v58 = vsel %vm14653_vm14, %v11869_v38, %v3736_v31  ;;  %v3178_v3 = vrot.slane %v3176_v23, 4  ;;  %v3179_v16 = vshll.u32 %v15270_v50, 16 }
 0x149   : > { %13005 = vmatprep.mubr.bf16.mxu0 %v15149_v15  ;;  %13082 = vmatpush3.bf16.msra.mxu0 %v13797_v43  ;;  %v15340_v15 = vpop.f32.mrf.mxu0  ;;  %v11884_v43 = vcombine.low %v3730_v51, %v3733_v14  ;;  %v15344_v1 = vsel %vm14653_vm14, %v3738_v42, %v3739_v11  ;;  %v3185_v56 = vshll.u32 %v15294_v32, 16  ;;  %v3189_v19 = vshrl.u32 %v15294_v32, 16 }
 0x14a   : > { %19444 = vst [vmem:[#allocation18_spill] sm:$0xff] %v15340_v15  ;;  %13083 = vmatprep.subr.bf16.mxu0 %v13800_v10  ;;  %13134 = vmatpush3.bf16.msra.mxu1 %v13807_v48  ;;  %v3195_v24 = vshll.u32 %v15304_v18, 16  ;;  %v3200_v21 = vshrl.u32 %v2861_v17, 16  ;;  %v3181_v40 = vrot.slane %v3179_v16, 5  ;;  %v3203_v38 = vshll.u32 %v2861_v17, 16  ;;  %v13806_v16 = vld [vmem:[#allocation6 + $0x180] sm:$0xff]  }
 0x14b   : > { %13135 = vmatprep.subr.bf16.mxu1 %v13808_v62  ;;  %v3187_v47 = vrot.slane %v3185_v56, 5  ;;  %v3209_v50 = vshll.u32 %v15323_v28, 16  ;;  %v3191_v46 = vrot.slane %v3189_v19, 4  ;;  %v3213_v51 = vshrl.u32 %v15323_v28, 16  ;;  %v15356_v11 = vpop.f32.mrf.mxu0 }
 0x14c   : > { %v3197_v31 = vrot.slane %v3195_v24, 5  ;;  %v3202_v48 = vrot.slane %v3200_v21, 4  ;;  %v3182_v23 = vor.u32 %v3181_v40, %v3178_v3  ;;  %v3205_v14 = vrot.slane %v3203_v38, 5  ;;  %v3589_v24 = vld [vmem:[#allocation2 + $0xa8] sm:$0xe]  ;;  %v15362_v21 = vpop.f32.mrf.mxu1 }
 0x14d   : > { %13084 = vmatpush3.bf16.msra.mxu0 %v13800_v10  ;;  %v15358_v42 = vrot.slane %v3209_v50, 5  ;;  %v3219_v27 = vshll.u32 %v15338_v0, 16  ;;  %v3192_v17 = vor.u32 %v3191_v46, %v3187_v47  ;;  %v3215_v56 = vrot.slane %v3213_v51, 4  ;;  %v15372_v46 = vld [vmem:[#allocation2 + $0xb8] sm:$0xf] }
 0x14e   : > { %13085 = vmatprep.subr.bf16.mxu0 %v13803_v61  ;;  %13136 = vmatpush3.bf16.msra.mxu1 %v13808_v62  ;;  %v11870_v10 = vrot.slane %v3588_v57, 9  ;;  %v3743_v19 = vrot.slane %v15294_v32, 5  ;;  %v3183_v3 = vrot.slane %v3182_v23, 4  ;;  %v3206_v40 = vor.u32 %v3205_v14, %v3202_v48  ;;  %v338_v51 = vld [vmem:[#allocation2 + $0xc8] sm:$0x1]  ;;  %v15383_v23 = vld [vmem:[#allocation6 + $0x238] sm:$0xff]  }
 0x14f   : > { %13058 = vmatmul.mubr.bf16.gmra.mxu1 %v11883_v55  ;;  %v15365_v38 = vrot.slane %v3219_v27, 5  ;;  %v3746_v50 = vrot.slane %v15304_v18, 5  ;;  %v3193_v55 = vrot.slane %v3192_v17, 4  ;;  %v3216_v62 = vor.u32 %v3215_v56, %v15358_v42 }
 0x150   : > { %13006 = vmatmul.mubr.bf16.gmra.mxu0 %v15199_v20  ;;  %13061 = vmatprep.mubr.bf16.mxu1 %v11884_v43  ;;  %v3744_v32 = vsel %vm14653_vm14, %v11870_v10, %v3743_v19  ;;  %v3745_v57 = vrot.slane %v3743_v19, 4  ;;  %v15374_v20 = vld [vmem:[#allocation2 + $0xbc] sm:$0x1]  ;;  %v15376_v43 = vpop.f32.mrf.mxu0  ;;  %v3188_v18 = vsel %vm14296_vm9, %v3183_v3, %v3187_v47  ;;  %v15380_v27 = vrot.slane %v3206_v40, 4  ;;  %v15392_v47 = vpop.f32.mrf.mxu1  ;;  %v3590_v40 = vld [vmem:[#allocation2 + $0xb4] sm:$0xe] }
 0x151   : > { %13009 = vmatprep.mubr.bf16.mxu0 %v15214_v30  ;;  %13086 = vmatpush3.bf16.msra.mxu0 %v13803_v61  ;;  %v11871_v30 = vrot.slane %v3589_v24, 9  ;;  %v3750_v48 = vrot.slane %v15323_v28, 5  ;;  %v3198_v61 = vsel %vm14296_vm9, %v3193_v55, %v3197_v31  ;;  %v15387_v14 = vrot.slane %v3216_v62, 4  ;;  %19445 = vst [vmem:[#allocation19_spill] sm:$0xff] %v15392_v47  ;;  %v13826_v47 = vld [vmem:[#allocation6 + $0x210] sm:$0xff]  }
 0x152   : > { %13087 = vmatprep.subr.bf16.mxu0 %v13806_v16  ;;  %v3747_v17 = vsel %vm14653_vm14, %v3745_v57, %v3746_v50  ;;  %v3753_v56 = vrot.slane %v15338_v0, 5  ;;  %v11844_v28 = vcombine.low %v3140_v6, %v3150_v34  ;;  %v19446_v0 = vsel %vm14296_vm9, %v15291_v25, %v15267_v7  ;;  %v2867_v34 = vld [vmem:[#allocation2 + $0xc0] sm:$0xf]  ;;  %v15420_v19 = vpop.f32.mrf.mxu0  ;;  %v15439_v50 = vpop.f32.mrf.mxu1 }
 0x153   : > { %v15414_v31 = vcombine.low %v19446_v0, %v3174_v33  ;;  %v15416_v10 = vcombine.low %v3188_v18, %v3198_v61  ;;  %v11886_v5 = vcombine.low %v3744_v32, %v3747_v17  ;;  %v3751_v4 = vsel %vm14653_vm14, %v11871_v30, %v3750_v48  ;;  %v15429_v33 = vld [vmem:[#allocation2 + $0xc4] sm:$0xf]  ;;  %v3591_v61 = vld [vmem:[#allocation2 + $0xc0] sm:$0xe]  ;;  %v4461_v17 = vld [vmem:[#allocation2 + $0x18] sm:$0xf] }
 0x154   : > { %v3752_v52 = vrot.slane %v3750_v48, 4  ;;  %v3224_v35 = vshrl.u32 %v2864_v13, 16  ;;  %v3227_v6 = vshll.u32 %v2864_v13, 16  ;;  %v3212_v7 = vsel %vm14296_vm9, %v15380_v27, %v15358_v42  ;;  %v15443_v30 = vpop.f32.mrf.mxu0 }
 0x155   : > { %13088 = vmatpush3.bf16.msra.mxu0 %v13806_v16  ;;  %v3233_v60 = vshll.u32 %v15372_v46, 16  ;;  %v3237_v25 = vshrl.u32 %v15372_v46, 16  ;;  %v3243_v49 = vshll.u32 %v15374_v20, 16  ;;  %v19447_v13 = vcombine.low %v15336_v58, %v15344_v1  ;;  %19448 = vst [vmem:[#allocation20_spill] sm:$0xff] %v15443_v30 }
 0x156   : > { %13169 = vmatprep.subr.bf16.mxu0 %v15383_v23  ;;  %v3754_v16 = vsel %vm14653_vm14, %v3752_v52, %v3753_v56  ;;  %v3226_v24 = vrot.slane %v3224_v35, 4  ;;  %v3229_v3 = vrot.slane %v3227_v6, 5  ;;  %v339_v42 = vsel %vm14281_vm7, 0, %v338_v51 }
 0x157   : > { %13062 = vmatmul.mubr.bf16.gmra.mxu1 %v19447_v13  ;;  %v11887_v55 = vcombine.low %v3751_v4, %v3754_v16  ;;  %v3235_v62 = vrot.slane %v3233_v60, 5  ;;  %v3239_v32 = vrot.slane %v3237_v25, 4  ;;  %v3245_v57 = vrot.slane %v3243_v49, 5  ;;  %340 = vst [vmem:[#allocation2 + $0xc8] sm:$0x1] %v339_v42  ;;  %v15460_v13 = vpop.f32.mrf.mxu0 }
 0x158   : > { %13010 = vmatmul.mubr.bf16.gmra.mxu0 %v15244_v8  ;;  %13065 = vmatprep.mubr.bf16.mxu1 %v11886_v5  ;;  %v3230_v58 = vor.u32 %v3229_v3, %v3226_v24  ;;  %v3248_v1 = vshrl.u32 %v2867_v34, 16  ;;  %v3251_v18 = vshll.u32 %v2867_v34, 16  ;;  %v3257_v27 = vshll.u32 %v15429_v33, 16 }
 0x159   : > { %13013 = vmatprep.mubr.bf16.mxu0 %v11844_v28  ;;  %v3240_v22 = vor.u32 %v3239_v32, %v3235_v62  ;;  %v3261_v48 = vshrl.u32 %v15429_v33, 16  ;;  %v11872_v51 = vrot.slane %v3590_v40, 9  ;;  %v3757_v8 = vrot.slane %v15372_v46, 5  ;;  %v15449_v28 = vpop.f32.mrf.mxu1 }
 0x15a   : > { %v3231_v56 = vrot.slane %v3230_v58, 4  ;;  %v3250_v0 = vrot.slane %v3248_v1, 4  ;;  %v3253_v5 = vrot.slane %v3251_v18, 5  ;;  %v15447_v4 = vrot.slane %v3257_v27, 5  ;;  %v4465_v18 = vld [vmem:[#allocation2 + $0x28] sm:$0xf] }
 0x15b   : > { %v3222_v52 = vsel %vm14296_vm9, %v15387_v14, %v15365_v38  ;;  %v3241_v35 = vrot.slane %v3240_v22, 4  ;;  %v3263_v6 = vrot.slane %v3261_v48, 4  ;;  %v3759_v34 = vrot.slane %v3757_v8, 4  ;;  %v4462_v14 = vld [vmem:[#allocation2 + $0x1c] sm:$0xf]  ;;  %v15471_v58 = vpop.f32.mrf.mxu1 }
 0x15c   : > { %v3236_v46 = vsel %vm14296_vm9, %v3231_v56, %v3235_v62  ;;  %v3254_v60 = vor.u32 %v3253_v5, %v3250_v0  ;;  %v3758_v25 = vsel %vm14653_vm14, %v11872_v51, %v3757_v8  ;;  %v3760_v49 = vrot.slane %v15374_v20, 5  ;;  %v4463_v20 = vld [vmem:[#allocation2 + $0x20] sm:$0x1]  ;;  %v15484_v51 = vpop.f32.mrf.mxu0  ;;  %v15490_v0 = vld [vmem:[#allocation2 + $0x2c] sm:$0x1] }
 0x15d   : > { %v3246_v16 = vsel %vm14296_vm9, %v3241_v35, %v3245_v57  ;;  %v3264_v24 = vor.u32 %v3263_v6, %v15447_v4  ;;  %v15467_v38 = vadd.f32 %v15183_v54, %v15229_v37  ;;  %v11847_v3 = vcombine.low %v3212_v7, %v3222_v52  ;;  %v15492_v35 = vpop.f32.mrf.mxu1 }
 0x15e   : > { %v902_v42 = vld [vmem:[#allocation2 + $0xc8] sm:$0x1]  ;;  %v3761_v40 = vsel %vm14653_vm14, %v3759_v34, %v3760_v49  ;;  %v11873_v62 = vrot.slane %v3591_v61, 9  ;;  %v4527_v32 = vshrl.u32 %v4461_v17, 16  ;;  %v11848_v57 = vcombine.low %v3236_v46, %v3246_v16  ;;  %19450 = vst [vmem:[#allocation21_spill] sm:$0xff] %v15492_v35 }
 0x15f   : > { %13066 = vmatmul.mubr.bf16.gmra.mxu1 %v11887_v55  ;;  %v19449_v1 = vrot.slane %v14872_v12, 4  ;;  %v11888_v37 = vcombine.low %v3758_v25, %v3761_v40  ;;  %v3764_v7 = vrot.slane %v15429_v33, 5  ;;  %v4464_v55 = vld [vmem:[#allocation2 + $0x24] sm:$0xf]  ;;  %v15480_v27 = vrot.slane %v3254_v60, 4 }
 0x160   : > { %13014 = vmatmul.mubr.bf16.gmra.mxu0 %v15414_v31  ;;  %v15482_v22 = vrot.slane %v3264_v24, 4  ;;  %v4529_v48 = vrot.slane %v4527_v32, 4  ;;  %v4530_v31 = vshll.u32 %v4461_v17, 16  ;;  %v4536_v12 = vshll.u32 %v4462_v14, 16 }
 0x161   : > { %v903_v54 = vsel %vm14275_vm4, %v19449_v1, %v902_v42  ;;  %13017 = vmatprep.mubr.bf16.mxu0 %v15416_v10  ;;  %13069 = vmatprep.mubr.bf16.mxu1 %v11888_v37  ;;  %v4540_v8 = vshrl.u32 %v4462_v14, 16  ;;  %v4546_v61 = vshll.u32 %v4463_v20, 16  ;;  %v15488_v33 = vadd.f32 %v15212_v44, %v15265_v41  ;;  %v4467_v44 = vld [vmem:[#allocation2 + $0x30] sm:$0xf]  ;;  %v15498_v41 = vpop.f32.mrf.mxu0 }
 0x162   : > { %904 = vst [vmem:[#allocation2 + $0xc8] sm:$0x1] %v903_v54  ;;  %v4532_v56 = vrot.slane %v4530_v31, 5  ;;  %v4551_v10 = vshrl.u32 %v4464_v55, 16  ;;  %v4554_v5 = vshll.u32 %v4464_v55, 16  ;;  %v4560_v52 = vshll.u32 %v4465_v18, 16  ;;  %v15505_v54 = vpop.f32.mrf.mxu1 }
 0x163   : > { %v3765_v17 = vsel %vm14653_vm14, %v11873_v62, %v3764_v7  ;;  %v4538_v6 = vrot.slane %v4536_v12, 5  ;;  %v4542_v34 = vrot.slane %v4540_v8, 4  ;;  %v4564_v46 = vshrl.u32 %v4465_v18, 16 }
 0x164   : > { %v4533_v60 = vor.u32 %v4532_v56, %v4529_v48  ;;  %v4553_v25 = vrot.slane %v4551_v10, 4  ;;  %v4556_v49 = vrot.slane %v4554_v5, 5  ;;  %v15496_v16 = vrot.slane %v4560_v52, 5  ;;  %v15518_v56 = vld [vmem:[#allocation2 + $0x34] sm:$0xf]  ;;  %v13809_v52 = vld [vmem:[#allocation2 + $0x18] sm:$0xff]  }
 0x165   : > { %v4543_v24 = vor.u32 %v4542_v34, %v4538_v6  ;;  %v4548_v14 = vrot.slane %v4546_v61, 5  ;;  %v4566_v42 = vrot.slane %v4564_v46, 4  ;;  %v4570_v40 = vshll.u32 %v15490_v0, 16  ;;  %v15526_v34 = vld [vmem:[#allocation2 + $0x38] sm:$0x1] }
 0x166   : > { %v3766_v20 = vrot.slane %v3764_v7, 4  ;;  %v4534_v32 = vrot.slane %v4533_v60, 4  ;;  %v4557_v1 = vor.u32 %v4556_v49, %v4553_v25  ;;  %v15503_v62 = vadd.f32 %v15249_v36, %v15287_v29  ;;  %v15514_v29 = vpop.f32.mrf.mxu0  ;;  %v4470_v46 = vld [vmem:[#allocation2 + $0x3c] sm:$0xf]  ;;  %v15528_v60 = vpop.f32.mrf.mxu1 }
 0x167   : > { %v4544_v55 = vrot.slane %v4543_v24, 4  ;;  %v4567_v18 = vor.u32 %v4566_v42, %v15496_v16  ;;  %v4572_v48 = vrot.slane %v4570_v40, 5  ;;  %v15510_v31 = vadd.f32 %v15307_v59, %v15356_v11  ;;  %19451 = vst [vmem:[#allocation22_spill] sm:$0xff] %v15514_v29  ;;  %v13816_v29 = vld [vmem:[#allocation2 + $0x54] sm:$0xff]  }
 0x168   : > { %13018 = vmatmul.mubr.bf16.gmra.mxu0 %v11847_v3  ;;  %v4539_v8 = vsel %vm14296_vm9, %v4534_v32, %v4538_v6  ;;  %v4558_v36 = vrot.slane %v4557_v1, 4  ;;  %v4575_v10 = vshrl.u32 %v4467_v44, 16  ;;  %v4578_v5 = vshll.u32 %v4467_v44, 16 }
 0x169   : > { %v2869_v37 = vld [vmem:[#allocation2 + $0xc8] sm:$0x1]  ;;  %13021 = vmatprep.mubr.bf16.mxu0 %v11848_v57  ;;  %v4549_v3 = vsel %vm14296_vm9, %v4544_v55, %v4548_v14  ;;  %v4568_v61 = vrot.slane %v4567_v18, 4  ;;  %v3260_v59 = vsel %vm14296_vm9, %v15480_v27, %v15447_v4  ;;  %v15533_v14 = vld [vmem:[#allocation2 + $0x40] sm:$0xf]  ;;  %v4584_v40 = vshll.u32 %v15518_v56, 16 }
 0x16a   : > { %v3267_v7 = vshll.u32 %v2869_v37, 16  ;;  %v3767_v12 = vrot.slane %v2869_v37, 5  ;;  %v11922_v6 = vcombine.low %v4539_v8, %v4549_v3  ;;  %v4563_v49 = vsel %vm14296_vm9, %v4558_v36, %v15496_v16  ;;  %v4472_v4 = vld [vmem:[#allocation2 + $0x44] sm:$0x1] }
 0x16b   : > { %v4577_v44 = vrot.slane %v4575_v10, 4  ;;  %v4580_v24 = vrot.slane %v4578_v5, 5  ;;  %v4573_v42 = vsel %vm14296_vm9, %v4568_v61, %v4572_v48  ;;  %v4594_v1 = vshll.u32 %v15526_v34, 16 }
 0x16c   : > { %v3269_v11 = vrot.slane %v3267_v7, 5  ;;  %v3768_v57 = vsel %vm14653_vm14, %v3766_v20, %v3767_v12  ;;  %v15542_v20 = vpop.f32.mrf.mxu0  ;;  %v15547_v37 = vadd.f32 %v15352_v63, %v15376_v43  ;;  %v4599_v18 = vshrl.u32 %v4470_v46, 16  ;;  %v15549_v7 = vpop.f32.mrf.mxu1  ;;  %v4473_v43 = vld [vmem:[#allocation2 + $0x48] sm:$0xf] }
 0x16d   : > { %v11889_v25 = vcombine.low %v3765_v17, %v3768_v57  ;;  %v4588_v17 = vshrl.u32 %v15518_v56, 16  ;;  %v4581_v16 = vor.u32 %v4580_v24, %v4577_v44  ;;  %v4602_v48 = vshll.u32 %v4470_v46, 16 }
 0x16e   : > { %v3270_v27 = vsel %vm14296_vm9, %v15482_v22, %v3269_v11  ;;  %v4586_v22 = vrot.slane %v4584_v40, 5  ;;  %v4596_v8 = vrot.slane %v4594_v1, 5  ;;  %v4608_v36 = vshll.u32 %v15533_v14, 16  ;;  %v15563_v40 = vpop.f32.mrf.mxu1 }
 0x16f   : > { %v11849_v32 = vcombine.low %v3260_v59, %v3270_v27  ;;  %13070 = vmatmul.mubr.bf16.gmra.mxu1 %v11889_v25  ;;  %v4590_v55 = vrot.slane %v4588_v17, 4  ;;  %v4582_v12 = vrot.slane %v4581_v16, 4  ;;  %v4612_v3 = vshrl.u32 %v15533_v14, 16  ;;  %v15553_v59 = vpop.f32.mrf.mxu0  ;;  %v15559_v25 = vld [vmem:[#allocation2 + $0x4c] sm:$0xf]  ;;  %19452 = vst [vmem:[#allocation23_spill] sm:$0xff] %v15563_v40 }
 0x170   : > { %13137 = vmatprep.mubr.bf16.mxu1 %v11922_v6  ;;  %v4601_v10 = vrot.slane %v4599_v18, 4  ;;  %v4604_v5 = vrot.slane %v4602_v48, 5  ;;  %v4618_v63 = vshll.u32 %v4472_v4, 16  ;;  %v11923_v11 = vcombine.low %v4563_v49, %v4573_v42  ;;  %v13810_v4 = vld [vmem:[#allocation2 + $0x24] sm:$0xff]   ;;  %v15569_v42 = vld [vmem:[#allocation2 + $0x50] sm:$0x1] }
 0x171   : > { %13022 = vmatmul.mubr.bf16.gmra.mxu0 %v11849_v32  ;;  %v4591_v61 = vor.u32 %v4590_v55, %v4586_v22  ;;  %v4610_v57 = vrot.slane %v4608_v36, 5  ;;  %v4614_v6 = vrot.slane %v4612_v3, 4  ;;  %v15557_v46 = vadd.f32 %v15362_v21, %v15420_v19  ;;  %v13812_v32 = vld [vmem:[#allocation2 + $0x30] sm:$0xff]   ;;  %v15575_v48 = vpop.f32.mrf.mxu0 }
 0x172   : > { %13089 = vmatprep.mubr.bf16.mxu0 %v13809_v52  ;;  %v4587_v44 = vsel %vm14296_vm9, %v4582_v12, %v4586_v22  ;;  %v4605_v24 = vor.u32 %v4604_v5, %v4601_v10  ;;  %v4620_v27 = vrot.slane %v4618_v63, 5  ;;  %v15567_v49 = vadd.f32 %v15439_v50, %v15460_v13  ;;  %v4476_v18 = vld [vmem:[#allocation2 + $0x54] sm:$0xf]  ;;  %v13814_v12 = vld [vmem:[#allocation6 + $0x230] sm:$0xff]   ;;  %v15580_v63 = vld [vmem:[#allocation2 + $0x58] sm:$0xf] }
 0x173   : > { %v4592_v52 = vrot.slane %v4591_v61, 4  ;;  %v4615_v17 = vor.u32 %v4614_v6, %v4610_v57  ;;  %v4623_v21 = vshrl.u32 %v4473_v43, 16  ;;  %v4626_v19 = vshll.u32 %v4473_v43, 16  ;;  %v15582_v43 = vpop.f32.mrf.mxu1 }
 0x174   : > { %v4606_v1 = vrot.slane %v4605_v24, 4  ;;  %v4632_v22 = vshll.u32 %v15559_v25, 16  ;;  %v4636_v55 = vshrl.u32 %v15559_v25, 16 }
 0x175   : > { %v4597_v16 = vsel %vm14296_vm9, %v4592_v52, %v4596_v8  ;;  %v4616_v13 = vrot.slane %v4615_v17, 4  ;;  %v4625_v36 = vrot.slane %v4623_v21, 4  ;;  %v4628_v3 = vrot.slane %v4626_v19, 5  ;;  %v15590_v52 = vld [vmem:[#allocation2 + $0x5c] sm:$0x1] }
 0x176   : > { %v11924_v50 = vcombine.low %v4587_v44, %v4597_v16  ;;  %v4611_v61 = vsel %vm14296_vm9, %v4606_v1, %v4610_v57  ;;  %v4634_v10 = vrot.slane %v4632_v22, 5  ;;  %v4638_v5 = vrot.slane %v4636_v55, 4  ;;  %v13817_v16 = vld [vmem:[#allocation6 + $0x228] sm:$0xff]  }
 0x177   : > { %13138 = vmatmul.mubr.bf16.vlgmr.msra.gmra.mxu1 %v11923_v11  ;;  %v4642_v8 = vshll.u32 %v15569_v42, 16  ;;  %v4621_v11 = vsel %vm14296_vm9, %v4616_v13, %v4620_v27  ;;  %v4629_v6 = vor.u32 %v4628_v3, %v4625_v36  ;;  %v15588_v44 = vadd.f32 %v15449_v28, %v15484_v51  ;;  %v13813_v51 = vld [vmem:[#allocation2 + $0x3c] sm:$0xff]   ;;  %v15602_v13 = vpop.f32.mrf.mxu1 }
 0x178   : > { %13141 = vmatprep.mubr.bf16.mxu1 %v11924_v50  ;;  %v4647_v57 = vshrl.u32 %v4476_v18, 16  ;;  %v11925_v24 = vcombine.low %v4611_v61, %v4621_v11  ;;  %v4639_v17 = vor.u32 %v4638_v5, %v4634_v10  ;;  %v4650_v19 = vshll.u32 %v4476_v18, 16  ;;  %v4479_v18 = vld [vmem:[#allocation2 + $0x60] sm:$0xf]  ;;  %v15606_v5 = vld [vmem:[#allocation2 + $0x64] sm:$0xf] }
 0x179   : > { %13090 = vmatmul.mubr.bf16.vlgmr.msra.gmra.mxu0 %v13810_v4  ;;  %v4644_v21 = vrot.slane %v4642_v8, 5  ;;  %v15593_v4 = vpop.f32.mrf.mxu0  ;;  %v4630_v27 = vrot.slane %v4629_v6, 4  ;;  %v4656_v22 = vshll.u32 %v15580_v63, 16  ;;  %v4660_v28 = vshrl.u32 %v15580_v63, 16  ;;  %v15608_v8 = vld [vmem:[#allocation2 + $0x68] sm:$0x1] }
 0x17a   : > { %13170 = vmatpush3.bf16.msra.mxu0 %v15383_v23  ;;  %13093 = vmatprep.mubr.bf16.mxu0 %v13812_v32  ;;  %19453 = vst [vmem:[#allocation24_spill] sm:$0xff] %v15593_v4  ;;  %v4649_v1 = vrot.slane %v4647_v57, 4  ;;  %v4640_v55 = vrot.slane %v4639_v17, 4  ;;  %v4652_v50 = vrot.slane %v4650_v19, 5  ;;  %v4666_v23 = vshll.u32 %v15590_v52, 16  ;;  %v13815_v11 = vld [vmem:[#allocation2 + $0x48] sm:$0xff]  }
 0x17b   : > { %13171 = vmatprep.subr.bf16.mxu0 %v13814_v12  ;;  %v15600_v32 = vadd.f32 %v15471_v58, %v15498_v41  ;;  %v4635_v36 = vsel %vm14296_vm9, %v4630_v27, %v4634_v10  ;;  %v4658_v3 = vrot.slane %v4656_v22, 5  ;;  %v4662_v61 = vrot.slane %v4660_v28, 4  ;;  %v13820_v17 = vld [vmem:[#allocation6 + $0x220] sm:$0xff]   ;;  %v15616_v19 = vpop.f32.mrf.mxu0 }
 0x17c   : > { %v4645_v6 = vsel %vm14296_vm9, %v4640_v55, %v4644_v21  ;;  %v4653_v57 = vor.u32 %v4652_v50, %v4649_v1  ;;  %v4668_v58 = vrot.slane %v4666_v23, 5  ;;  %v15614_v41 = vadd.f32 %v15505_v54, %v15542_v20  ;;  %v15623_v20 = vld [vmem:[#allocation2 + $0x74] sm:$0x1]  ;;  %v15625_v55 = vpop.f32.mrf.mxu1 }
 0x17d   : > { %v11926_v10 = vcombine.low %v4635_v36, %v4645_v6  ;;  %v4663_v27 = vor.u32 %v4662_v61, %v4658_v3  ;;  %v4671_v22 = vshrl.u32 %v4479_v18, 16  ;;  %v4674_v28 = vshll.u32 %v4479_v18, 16  ;;  %v1583_v35 = vpop.f32.mrf.mxu0 }
 0x17e   : > { %13172 = vmatpush3.bf16.msra.mxu0 %v13814_v12  ;;  %19454 = vst [vmem:[#allocation25_spill] sm:$0xff] %v15614_v41  ;;  %v4482_v12 = vld [vmem:[#allocation2 + $0x6c] sm:$0xf]  ;;  %v4654_v9 = vrot.slane %v4653_v57, 4  ;;  %v4680_v21 = vshll.u32 %v15606_v5, 16  ;;  %v4684_v1 = vshrl.u32 %v15606_v5, 16  ;;  %v15629_v18 = vadd.f32 %v15528_v60, %v15553_v59 }
 0x17f   : > { %13142 = vmatmul.mubr.bf16.gmra.mxu1 %v11925_v24  ;;  %13173 = vmatprep.subr.bf16.mxu0 %v13817_v16  ;;  %v4690_v54 = vshll.u32 %v15608_v8, 16  ;;  %v4664_v24 = vrot.slane %v4663_v27, 4  ;;  %v4673_v50 = vrot.slane %v4671_v22, 4  ;;  %v4676_v23 = vrot.slane %v4674_v28, 5  ;;  %v4485_v60 = vld [vmem:[#allocation2 + $0x78] sm:$0xf]  ;;  %v15639_v28 = vpop.f32.mrf.mxu1 }
 0x180   : > { %13145 = vmatprep.mubr.bf16.mxu1 %v11926_v10  ;;  %19455 = vst [vmem:[#allocation26_spill] sm:$0xff] %v15629_v18  ;;  %v4659_v36 = vsel %vm14296_vm9, %v4654_v9, %v4658_v3  ;;  %v4682_v61 = vrot.slane %v4680_v21, 5  ;;  %v4686_v6 = vrot.slane %v4684_v1, 4  ;;  %v4695_v27 = vshrl.u32 %v4482_v12, 16  ;;  %v15637_v3 = vld [vmem:[#allocation2 + $0x7c] sm:$0xf] }
 0x181   : > { %13094 = vmatmul.mubr.bf16.gmra.mxu0 %v13813_v51  ;;  %v4692_v57 = vrot.slane %v4690_v54, 5  ;;  %v4669_v51 = vsel %vm14296_vm9, %v4664_v24, %v4668_v58  ;;  %v4677_v10 = vor.u32 %v4676_v23, %v4673_v50  ;;  %v4698_v22 = vshll.u32 %v4482_v12, 16  ;;  %19456 = vst [vmem:[#allocation27_spill] sm:$0xff] %v15639_v28  ;;  %v15642_v24 = vld [vmem:[#allocation2 + $0x80] sm:$0x1] }
 0x182   : > { %13097 = vmatprep.mubr.bf16.mxu0 %v13815_v11  ;;  %13174 = vmatpush3.bf16.msra.mxu0 %v13817_v16  ;;  %v11927_v59 = vcombine.low %v4659_v36, %v4669_v51  ;;  %v4687_v11 = vor.u32 %v4686_v6, %v4682_v61  ;;  %v4704_v16 = vshll.u32 %v15618_v2, 16  ;;  %v4708_v9 = vshrl.u32 %v15618_v2, 16  ;;  %v13818_v50 = vld [vmem:[#allocation2 + $0x60] sm:$0xff]   ;;  %v12820_v51 = vpop.f32.mrf.mxu0 }
 0x183   : > { %13175 = vmatprep.subr.bf16.mxu0 %v13820_v17  ;;  %v4678_v21 = vrot.slane %v4677_v10, 4  ;;  %v4697_v1 = vrot.slane %v4695_v27, 4  ;;  %v4700_v54 = vrot.slane %v4698_v22, 5  ;;  %v4714_v58 = vshll.u32 %v15623_v20, 16  ;;  %v4488_v28 = vld [vmem:[#allocation2 + $0x84] sm:$0xf] }
 0x184   : > { %v4688_v12 = vrot.slane %v4687_v11, 4  ;;  %v4706_v23 = vrot.slane %v4704_v16, 5  ;;  %v4710_v36 = vrot.slane %v4708_v9, 4  ;;  %v15646_v6 = vadd.f32 %v15549_v7, %v15575_v48  ;;  %v15656_v48 = vld [vmem:[#allocation2 + $0x88] sm:$0xf] }
 0x185   : > { %v4683_v10 = vsel %vm14296_vm9, %v4678_v21, %v4682_v61  ;;  %v4701_v27 = vor.u32 %v4700_v54, %v4697_v1  ;;  %v4716_v22 = vrot.slane %v4714_v58, 5  ;;  %v15654_v16 = vadd.f32 %v15582_v43, %v15616_v19  ;;  %v15659_v54 = vld [vmem:[#allocation2 + $0x8c] sm:$0x1]  ;;  %v13829_v58 = vld [vmem:[#allocation6 + $0x208] sm:$0xff]   ;;  %v15663_v19 = vpop.f32.mrf.mxu0 }
 0x186   : > { %13176 = vmatpush3.bf16.msra.mxu0 %v13820_v17  ;;  %19457 = vst [vmem:[#allocation28_spill] sm:$0xff] %v15646_v6  ;;  %v4693_v11 = vsel %vm14296_vm9, %v4688_v12, %v4692_v57  ;;  %v4711_v17 = vor.u32 %v4710_v36, %v4706_v23  ;;  %v4719_v7 = vshrl.u32 %v4485_v60, 16  ;;  %v4722_v21 = vshll.u32 %v4485_v60, 16  ;;  %19459 = vst [vmem:[#allocation30_spill] sm:$0xff] %v15663_v19 }
 0x187   : > { %13146 = vmatmul.mubr.bf16.gmra.mxu1 %v11927_v59  ;;  %13177 = vmatprep.subr.bf16.mxu0 %v13823_v53  ;;  %19458 = vst [vmem:[#allocation29_spill] sm:$0xff] %v15654_v16  ;;  %v12871_v59 = vpop.f32.mrf.mxu1  ;;  %v11928_v9 = vcombine.low %v4683_v10, %v4693_v11  ;;  %v4702_v61 = vrot.slane %v4701_v27, 4  ;;  %v4728_v1 = vshll.u32 %v15637_v3, 16  ;;  %v4732_v36 = vshrl.u32 %v15637_v3, 16  ;;  %v4494_v16 = vld [vmem:[#allocation2 + $0x9c] sm:$0xf] }
 0x188   : > { %v4712_v57 = vrot.slane %v4711_v17, 4  ;;  %v4721_v12 = vrot.slane %v4719_v7, 4  ;;  %v4738_v43 = vshll.u32 %v15642_v24, 16  ;;  %v4724_v60 = vrot.slane %v4722_v21, 5  ;;  %v13821_v21 = vld [vmem:[#allocation2 + $0x78] sm:$0xff]  }
 0x189   : > { %13098 = vmatmul.mubr.bf16.gmra.mxu0 %v13816_v29  ;;  %13149 = vmatprep.mubr.bf16.mxu1 %v11928_v9  ;;  %v4707_v29 = vsel %vm14296_vm9, %v4702_v61, %v4706_v23  ;;  %v4730_v10 = vrot.slane %v4728_v1, 5  ;;  %v15668_v27 = vadd.f32 %v15602_v13, %v1583_v35  ;;  %v4734_v17 = vrot.slane %v4732_v36, 4  ;;  %v1904_v26 = vpop.f32.mrf.mxu1  ;;  %v15673_v61 = vld [vmem:[#allocation2 + $0x94] sm:$0xf] }
 0x18a   : > { %13101 = vmatprep.mubr.bf16.mxu0 %v13818_v50  ;;  %13178 = vmatpush3.bf16.msra.mxu0 %v13823_v53  ;;  %v13819_v50 = vld [vmem:[#allocation2 + $0x6c] sm:$0xff]   ;;  %v4717_v11 = vsel %vm14296_vm9, %v4712_v57, %v4716_v22  ;;  %v4740_v7 = vrot.slane %v4738_v43, 5  ;;  %v4743_v30 = vshrl.u32 %v4488_v28, 16  ;;  %v4725_v9 = vor.u32 %v4724_v60, %v4721_v12  ;;  %v12823_v22 = vpop.f32.mrf.mxu0 }
 0x18b   : > { %19460 = vst [vmem:[#allocation31_spill] sm:$0xff] %v15668_v27  ;;  %13179 = vmatprep.subr.bf16.mxu0 %v13826_v47  ;;  %v4491_v53 = vld [vmem:[#allocation2 + $0x90] sm:$0xf]  ;;  %v11929_v19 = vcombine.low %v4707_v29, %v4717_v11  ;;  %v4746_v15 = vshll.u32 %v4488_v28, 16  ;;  %v4752_v23 = vshll.u32 %v15656_v48, 16  ;;  %v4735_v35 = vor.u32 %v4734_v17, %v4730_v10  ;;  %v13832_v29 = vld [vmem:[#allocation6 + $0x200] sm:$0xff]   ;;  %v12872_v6 = vpop.f32.mrf.mxu1 }
 0x18c   : > { %v4745_v13 = vrot.slane %v4743_v30, 4  ;;  %v4756_v1 = vshrl.u32 %v15656_v48, 16  ;;  %v4762_v27 = vshll.u32 %v15659_v54, 16  ;;  %v4726_v57 = vrot.slane %v4725_v9, 4  ;;  %v15680_v28 = vld [vmem:[#allocation2 + $0x98] sm:$0x1] }
 0x18d   : > { %v4748_v36 = vrot.slane %v4746_v15, 5  ;;  %v4754_v43 = vrot.slane %v4752_v23, 5  ;;  %v15678_v12 = vadd.f32 %v15625_v55, %v12820_v51  ;;  %v4736_v30 = vrot.slane %v4735_v35, 4 }
 0x18e   : > { %13180 = vmatpush3.bf16.msra.mxu0 %v13826_v47  ;;  %v4758_v11 = vrot.slane %v4756_v1, 4  ;;  %v4764_v17 = vrot.slane %v4762_v27, 5  ;;  %v4731_v47 = vsel %vm14296_vm9, %v4726_v57, %v4730_v10  ;;  %v4767_v55 = vshrl.u32 %v4491_v53, 16  ;;  %v1599_v1 = vpop.f32.mrf.mxu0  ;;  %v15690_v27 = vld [vmem:[#allocation2 + $0xa0] sm:$0xf] }
 0x18f   : > { %13150 = vmatmul.mubr.bf16.gmra.mxu1 %v11929_v19  ;;  %19461 = vst [vmem:[#allocation32_spill] sm:$0xff] %v15678_v12  ;;  %13181 = vmatprep.subr.bf16.mxu0 %v13829_v58  ;;  %v4749_v15 = vor.u32 %v4748_v36, %v4745_v13  ;;  %v15685_v19 = vadd.f32 %v12871_v59, %v12823_v22  ;;  %v4770_v23 = vshll.u32 %v4491_v53, 16  ;;  %v4776_v35 = vshll.u32 %v15673_v61, 16  ;;  %v15693_v13 = vld [vmem:[#allocation2 + $0xa4] sm:$0x1]  ;;  %v13824_v22 = vld [vmem:[#allocation2 + $0x90] sm:$0xff]   ;;  %v15696_v36 = vpop.f32.mrf.mxu1 }
 0x190   : > { %v4741_v51 = vsel %vm14296_vm9, %v4736_v30, %v4740_v7  ;;  %v4759_v9 = vor.u32 %v4758_v11, %v4754_v43  ;;  %v4769_v10 = vrot.slane %v4767_v55, 4  ;;  %v4780_v59 = vshrl.u32 %v15673_v61, 16  ;;  %19463 = vst [vmem:[#allocation34_spill] sm:$0xff] %v15696_v36 }
 0x191   : > { %13102 = vmatmul.mubr.bf16.gmra.mxu0 %v13819_v50  ;;  %19462 = vst [vmem:[#allocation33_spill] sm:$0xff] %v15685_v19  ;;  %v13822_v50 = vld [vmem:[#allocation2 + $0x84] sm:$0xff]   ;;  %v11930_v60 = vcombine.low %v4731_v47, %v4741_v51  ;;  %v4750_v12 = vrot.slane %v4749_v15, 4  ;;  %v4772_v7 = vrot.slane %v4770_v23, 5  ;;  %v4778_v57 = vrot.slane %v4776_v35, 5  ;;  %v12824_v23 = vpop.f32.mrf.mxu0 }
 0x192   : > { %13105 = vmatprep.mubr.bf16.mxu0 %v13821_v21  ;;  %13182 = vmatpush3.bf16.msra.mxu0 %v13829_v58  ;;  %v4760_v21 = vrot.slane %v4759_v9, 4  ;;  %v4786_v53 = vshll.u32 %v15680_v28, 16  ;;  %v4782_v30 = vrot.slane %v4780_v59, 4  ;;  %v15700_v11 = vadd.f32 %v1904_v26, %v1599_v1  ;;  %v4497_v35 = vld [vmem:[#allocation2 + $0xa8] sm:$0xf] }
 0x193   : > { %13183 = vmatprep.subr.bf16.mxu0 %v13832_v29  ;;  %13153 = vmatprep.mubr.bf16.mxu1 %v11930_v60  ;;  %v4755_v58 = vsel %vm14296_vm9, %v4750_v12, %v4754_v43  ;;  %v4791_v47 = vshrl.u32 %v4494_v16, 16  ;;  %v4773_v55 = vor.u32 %v4772_v7, %v4769_v10  ;;  %v4794_v9 = vshll.u32 %v4494_v16, 16  ;;  %v15704_v19 = vld [vmem:[#allocation2 + $0xac] sm:$0xf]  ;;  %v15709_v10 = vld [vmem:[#allocation2 + $0xb0] sm:$0x1] }
 0x194   : > { %19464 = vst [vmem:[#allocation35_spill] sm:$0xff] %v15700_v11  ;;  %v4765_v15 = vsel %vm14296_vm9, %v4760_v21, %v4764_v17  ;;  %v4788_v51 = vrot.slane %v4786_v53, 5  ;;  %v4783_v60 = vor.u32 %v4782_v30, %v4778_v57  ;;  %v4800_v43 = vshll.u32 %v15690_v27, 16  ;;  %v12875_v17 = vpop.f32.mrf.mxu1  ;;  %19465 = vst [vmem:[#allocation36_spill] sm:$0xff] %v15709_v10 }
 0x195   : > { %v11931_v36 = vcombine.low %v4755_v58, %v4765_v15  ;;  %v4793_v40 = vrot.slane %v4791_v47, 4  ;;  %v4774_v12 = vrot.slane %v4773_v55, 4  ;;  %v4796_v26 = vrot.slane %v4794_v9, 5  ;;  %v15715_v15 = vpop.f32.mrf.mxu0  ;;  %v13825_v55 = vld [vmem:[#allocation2 + $0x9c] sm:$0xff]  }
 0x196   : > { %13184 = vmatpush3.bf16.msra.mxu0 %v13832_v29  ;;  %v4804_v1 = vshrl.u32 %v15690_v27, 16  ;;  %v4810_v59 = vshll.u32 %v15693_v13, 16  ;;  %v4784_v16 = vrot.slane %v4783_v60, 4  ;;  %v4802_v21 = vrot.slane %v4800_v43, 5  ;;  %v4500_v29 = vld [vmem:[#allocation2 + $0xb4] sm:$0xf] }
 0x197   : > { %13154 = vmatmul.mubr.bf16.gmra.mxu1 %v11931_v36  ;;  %v15711_v7 = vadd.f32 %v12872_v6, %v12824_v23  ;;  %v4779_v53 = vsel %vm14296_vm9, %v4774_v12, %v4778_v57  ;;  %v4797_v58 = vor.u32 %v4796_v26, %v4793_v40  ;;  %19467 = vst [vmem:[#allocation38_spill] sm:$0xff] %v15715_v15  ;;  %v4818_v36 = vshll.u32 %v4497_v35, 16  ;;  %v15720_v6 = vld [vmem:[#allocation2 + $0xb8] sm:$0xf]  ;;  %v1920_v40 = vpop.f32.mrf.mxu1  ;;  %v15724_v15 = vld [vmem:[#allocation2 + $0xbc] sm:$0x1] }
 0x198   : > { %v4806_v30 = vrot.slane %v4804_v1, 4  ;;  %v4812_v47 = vrot.slane %v4810_v59, 5  ;;  %v4789_v9 = vsel %vm14296_vm9, %v4784_v16, %v4788_v51  ;;  %v4824_v60 = vshll.u32 %v15704_v19, 16  ;;  %19468 = vst [vmem:[#allocation39_spill] sm:$0xff] %v15724_v15  ;;  %v13827_v16 = vld [vmem:[#allocation2 + $0xa8] sm:$0xff]  }
 0x199   : > { %13106 = vmatmul.mubr.bf16.gmra.mxu0 %v13822_v50  ;;  %19466 = vst [vmem:[#allocation37_spill] sm:$0xff] %v15711_v7  ;;  %v4815_v50 = vshrl.u32 %v4497_v35, 16  ;;  %v11932_v23 = vcombine.low %v4779_v53, %v4789_v9  ;;  %v4828_v57 = vshrl.u32 %v15704_v19, 16  ;;  %v4820_v26 = vrot.slane %v4818_v36, 5 }
 0x19a   : > { %13109 = vmatprep.mubr.bf16.mxu0 %v13824_v22  ;;  %v4798_v22 = vrot.slane %v4797_v58, 4  ;;  %v4807_v43 = vor.u32 %v4806_v30, %v4802_v21  ;;  %v4826_v1 = vrot.slane %v4824_v60, 5  ;;  %v4834_v59 = vshll.u32 %v15709_v10, 16  ;;  %v4503_v30 = vld [vmem:[#allocation2 + $0xc0] sm:$0xf] }
 0x19b   : > { %v4817_v12 = vrot.slane %v4815_v50, 4  ;;  %13157 = vmatprep.mubr.bf16.mxu1 %v11932_v23  ;;  %v4830_v53 = vrot.slane %v4828_v57, 4  ;;  %v4839_v58 = vshrl.u32 %v4500_v29, 16  ;;  %v4842_v36 = vshll.u32 %v4500_v29, 16 }
 0x19c   : > { %v4803_v51 = vsel %vm14296_vm9, %v4798_v22, %v4802_v21  ;;  %v4808_v35 = vrot.slane %v4807_v43, 4  ;;  %v4836_v50 = vrot.slane %v4834_v59, 5  ;;  %v4848_v18 = vshll.u32 %v15720_v6, 16  ;;  %v12876_v21 = vpop.f32.mrf.mxu1  ;;  %v15739_v59 = vld [vmem:[#allocation2 + $0xc8] sm:$0x1] }
 0x19d   : > { %v12827_v7 = vpop.f32.mrf.mxu0  ;;  %v4821_v11 = vor.u32 %v4820_v26, %v4817_v12  ;;  %v4831_v10 = vor.u32 %v4830_v53, %v4826_v1  ;;  %v4841_v23 = vrot.slane %v4839_v58, 4  ;;  %v4844_v41 = vrot.slane %v4842_v36, 5  ;;  %19472 = vst [vmem:[#allocation43_spill] sm:$0xff] %v15739_v59  ;;  %v15749_v36 = vld [vmem:[#allocation2 + $0xd0] sm:$0xf] }
 0x19e   : > { %v15728_v9 = vadd.f32 %v12875_v17, %v12827_v7  ;;  %v4813_v60 = vsel %vm14296_vm9, %v4808_v35, %v4812_v47  ;;  %v15735_v17 = vld [vmem:[#allocation2 + $0xc4] sm:$0xf]  ;;  %v4850_v29 = vrot.slane %v4848_v18, 5  ;;  %v4852_v12 = vshrl.u32 %v15720_v6, 16  ;;  %v4506_v35 = vld [vmem:[#allocation2 + $0xcc] sm:$0xf]  ;;  %v15747_v53 = vpop.f32.mrf.mxu1 }
 0x19f   : > { %v1615_v4 = vpop.f32.mrf.mxu0  ;;  %v11933_v22 = vcombine.low %v4803_v51, %v4813_v60  ;;  %v4822_v43 = vrot.slane %v4821_v11, 4  ;;  %19471 = vst [vmem:[#allocation42_spill] sm:$0xff] %v15735_v17  ;;  %v4832_v7 = vrot.slane %v4831_v10, 4  ;;  %v4858_v47 = vshll.u32 %v15724_v15, 16  ;;  %v13828_v51 = vld [vmem:[#allocation2 + $0xb4] sm:$0xff]   ;;  %19474 = vst [vmem:[#allocation45_spill] sm:$0xff] %v15747_v53 }
 0x1a0   : > { %19469 = vst [vmem:[#allocation40_spill] sm:$0xff] %v15728_v9  ;;  %v15733_v57 = vadd.f32 %v1920_v40, %v1615_v4  ;;  %v4845_v4 = vor.u32 %v4844_v41, %v4841_v23  ;;  %v4863_v40 = vshrl.u32 %v4503_v30, 16  ;;  %v4854_v10 = vrot.slane %v4852_v12, 4  ;;  %19475 = vst [vmem:[#allocation46_spill] sm:$0xff] %v15749_v36 }
 0x1a1   : > { %13110 = vmatmul.mubr.bf16.gmra.mxu0 %v13825_v55  ;;  %v12828_v26 = vpop.f32.mrf.mxu0  ;;  %13158 = vmatmul.mubr.bf16.gmra.mxu1 %v11933_v22  ;;  %v4827_v11 = vsel %vm14296_vm9, %v4822_v43, %v4826_v1  ;;  %v4837_v18 = vsel %vm14296_vm9, %v4832_v7, %v4836_v50  ;;  %v4866_v58 = vshll.u32 %v4503_v30, 16  ;;  %v13830_v1 = vld [vmem:[#allocation2 + $0xc0] sm:$0xff]   ;;  %v4872_v23 = vshll.u32 %v15735_v17, 16  ;;  %v15753_v43 = vld [vmem:[#allocation2 + $0xd4] sm:$0x1] }
 0x1a2   : > { %19470 = vst [vmem:[#allocation41_spill] sm:$0xff] %v15733_v57  ;;  %13113 = vmatprep.mubr.bf16.mxu0 %v13827_v16  ;;  %v15743_v55 = vadd.f32 %v12876_v21, %v12828_v26  ;;  %v4860_v16 = vrot.slane %v4858_v47, 5  ;;  %v11934_v60 = vcombine.low %v4827_v11, %v4837_v18  ;;  %v4846_v22 = vrot.slane %v4845_v4, 4  ;;  %19476 = vst [vmem:[#allocation47_spill] sm:$0xff] %v15753_v43  ;;  %v5215_v47 = vld [vmem:[#allocation2 + $0x18] sm:$0xe] }
 0x1a3   : > { %v4865_v57 = vrot.slane %v4863_v40, 4  ;;  %v4855_v9 = vor.u32 %v4854_v10, %v4850_v29  ;;  %v4868_v41 = vrot.slane %v4866_v58, 5  ;;  %v4876_v21 = vshrl.u32 %v15735_v17, 16 }
 0x1a4   : > { %19473 = vst [vmem:[#allocation44_spill] sm:$0xff] %v15743_v55  ;;  %13161 = vmatprep.mubr.bf16.mxu1 %v11934_v60  ;;  %v4851_v50 = vsel %vm14296_vm9, %v4846_v22, %v4850_v29  ;;  %v4882_v30 = vshll.u32 %v15739_v59, 16  ;;  %v4887_v7 = vshrl.u32 %v4506_v35, 16  ;;  %v4890_v12 = vshll.u32 %v4506_v35, 16  ;;  %v5216_v60 = vld [vmem:[#allocation2 + $0x24] sm:$0xe] }
 0x1a5   : > { %v4856_v26 = vrot.slane %v4855_v9, 4  ;;  %v4869_v4 = vor.u32 %v4868_v41, %v4865_v57  ;;  %v4874_v40 = vrot.slane %v4872_v23, 5  ;;  %v4878_v18 = vrot.slane %v4876_v21, 4  ;;  %v5217_v23 = vld [vmem:[#allocation2 + $0x30] sm:$0xe] }
 0x1a6   : > { %v4884_v10 = vrot.slane %v4882_v30, 5  ;;  %v4889_v58 = vrot.slane %v4887_v7, 4  ;;  %v4892_v53 = vrot.slane %v4890_v12, 5  ;;  %v4896_v55 = vshll.u32 %v15749_v36, 16  ;;  %v13831_v21 = vld [vmem:[#allocation2 + $0xcc] sm:$0xff]  }
 0x1a7   : > { %v12879_v11 = vpop.f32.mrf.mxu1  ;;  %v4861_v29 = vsel %vm14296_vm9, %v4856_v26, %v4860_v16  ;;  %v4870_v22 = vrot.slane %v4869_v4, 4  ;;  %v4879_v59 = vor.u32 %v4878_v18, %v4874_v40  ;;  %v4900_v9 = vshrl.u32 %v15749_v36, 16  ;;  %v13974_v18 = vld [vmem:[#allocation2 + $0x1c] sm:$0xf] }
 0x1a8   : > { %v11935_v15 = vcombine.low %v4851_v50, %v4861_v29  ;;  %v4893_v57 = vor.u32 %v4892_v53, %v4889_v58  ;;  %v4898_v41 = vrot.slane %v4896_v55, 5  ;;  %v11946_v16 = vrot.slane %v5215_v47, 9  ;;  %v13975_v53 = vld [vmem:[#allocation2 + $0x20] sm:$0x1] }
 0x1a9   : > { %13114 = vmatmul.mubr.bf16.gmra.mxu0 %v13828_v51  ;;  %v1936_v35 = vpop.f32.mrf.mxu1  ;;  %v4906_v51 = vshll.u32 %v15753_v43, 16  ;;  %v4875_v30 = vsel %vm14296_vm9, %v4870_v22, %v4874_v40  ;;  %v4880_v7 = vrot.slane %v4879_v59, 4  ;;  %v4902_v12 = vrot.slane %v4900_v9, 4  ;;  %v13976_v59 = vld [vmem:[#allocation2 + $0x28] sm:$0xf] }
 0x1aa   : > { %13117 = vmatprep.mubr.bf16.mxu0 %v13830_v1  ;;  %13162 = vmatmul.mubr.bf16.gmra.mxu1 %v11935_v15  ;;  %v15765_v1 = vpop.f32.mrf.mxu0  ;;  %v4894_v26 = vrot.slane %v4893_v57, 4  ;;  %v5298_v50 = vrot.slane %v13974_v18, 5  ;;  %v5301_v55 = vrot.slane %v13975_v53, 5  ;;  %v11947_v40 = vrot.slane %v5216_v60, 9 }
 0x1ab   : > { %v12880_v17 = vpop.f32.mrf.mxu1  ;;  %19477 = vst [vmem:[#allocation48_spill] sm:$0xff] %v15765_v1  ;;  %v4908_v4 = vrot.slane %v4906_v51, 5  ;;  %v4885_v58 = vsel %vm14296_vm9, %v4880_v7, %v4884_v10  ;;  %v4903_v29 = vor.u32 %v4902_v12, %v4898_v41  ;;  %v5305_v22 = vrot.slane %v13976_v59, 5  ;;  %v5218_v12 = vld [vmem:[#allocation2 + $0x3c] sm:$0xe] }
 0x1ac   : > { %v11936_v9 = vcombine.low %v4875_v30, %v4885_v58  ;;  %v5299_v15 = vsel %vm14653_vm14, %v11946_v16, %v5298_v50  ;;  %v5300_v47 = vrot.slane %v5298_v50, 4  ;;  %v4899_v57 = vsel %vm14296_vm9, %v4894_v26, %v4898_v41 }
 0x1ad   : > { %v15769_v43 = vpop.f32.mrf.mxu1  ;;  %v4904_v51 = vrot.slane %v4903_v29, 4  ;;  %v5307_v18 = vrot.slane %v5305_v22, 4  ;;  %v11948_v1 = vrot.slane %v5217_v23, 9  ;;  %v5306_v60 = vsel %vm14653_vm14, %v11947_v40, %v5305_v22 }
 0x1ae   : > { %19478 = vst [vmem:[#allocation49_spill] sm:$0xff] %v15769_v43  ;;  %13165 = vmatprep.mubr.bf16.mxu1 %v11936_v9  ;;  %v5302_v10 = vsel %vm14653_vm14, %v5300_v47, %v5301_v55  ;;  %v5312_v30 = vrot.slane %v15518_v56, 5  ;;  %v5315_v7 = vrot.slane %v15526_v34, 5  ;;  %v11949_v22 = vrot.slane %v5218_v12, 9 }
 0x1af   : > { %v12947_v53 = vpop.f32.mrf.mxu1  ;;  %v4909_v41 = vsel %vm14296_vm9, %v4904_v51, %v4908_v4  ;;  %v11962_v23 = vcombine.low %v5299_v15, %v5302_v10  ;;  %v5219_v4 = vld [vmem:[#allocation2 + $0x48] sm:$0xe]  ;;  %v5326_v9 = vrot.slane %v15559_v25, 5 }
 0x1b0   : > { %v12831_v36 = vpop.f32.mrf.mxu0  ;;  %v11937_v58 = vcombine.low %v4899_v57, %v4909_v41  ;;  %v5313_v56 = vsel %vm14653_vm14, %v11948_v1, %v5312_v30  ;;  %v5314_v29 = vrot.slane %v5312_v30, 4  ;;  %v13977_v57 = vld [vmem:[#allocation2 + $0x44] sm:$0x1] }
 0x1b1   : > { %13118 = vmatmul.mubr.bf16.gmra.mxu0 %v13831_v21  ;;  %v15781_v16 = vadd.f32 %v12879_v11, %v12831_v36  ;;  %v19479_v21 = vrot.slane %v15490_v0, 5  ;;  %v2663_v50 = vpop.f32.mrf.mxu1  ;;  %v5319_v11 = vrot.slane %v15533_v14, 5  ;;  %v5322_v51 = vrot.slane %v13977_v57, 5 }
 0x1b2   : > { %v1631_v55 = vpop.f32.mrf.mxu0  ;;  %13185 = vmatprep.mubr.bf16.mxu0 %v11962_v23  ;;  %13166 = vmatmul.mubr.bf16.gmra.mxu1 %v11937_v58  ;;  %v5316_v59 = vsel %vm14653_vm14, %v5314_v29, %v5315_v7  ;;  %v11950_v14 = vrot.slane %v5219_v4, 9  ;;  %v5328_v10 = vrot.slane %v5326_v9, 4  ;;  %v5220_v7 = vld [vmem:[#allocation2 + $0x54] sm:$0xe]  ;;  %v5340_v58 = vrot.slane %v15606_v5, 5 }
 0x1b3   : > { %v5309_v26 = vsel %vm14653_vm14, %v5307_v18, %v19479_v21  ;;  %v15791_v34 = vadd.f32 %v1936_v35, %v1631_v55  ;;  %v12948_v36 = vpop.f32.mrf.mxu1  ;;  %v11964_v1 = vcombine.low %v5313_v56, %v5316_v59  ;;  %v5321_v35 = vrot.slane %v5319_v11, 4  ;;  %v5222_v5 = vld [vmem:[#allocation2 + $0x6c] sm:$0xe] }
 0x1b4   : > { %v12832_v40 = vpop.f32.mrf.mxu0  ;;  %v11963_v0 = vcombine.low %v5306_v60, %v5309_v26  ;;  %v5329_v60 = vrot.slane %v15569_v42, 5  ;;  %v5333_v21 = vrot.slane %v15580_v63, 5  ;;  %v5327_v42 = vsel %vm14653_vm14, %v11950_v14, %v5326_v9 }
 0x1b5   : > { %v15797_v15 = vadd.f32 %v12880_v17, %v12832_v40  ;;  %v15799_v47 = vpop.f32.mrf.mxu1  ;;  %v5320_v17 = vsel %vm14653_vm14, %v11949_v22, %v5319_v11  ;;  %v5323_v12 = vsel %vm14653_vm14, %v5321_v35, %v5322_v51  ;;  %v5221_v11 = vld [vmem:[#allocation2 + $0x60] sm:$0xe]  ;;  %v5336_v63 = vrot.slane %v15590_v52, 5 }
 0x1b6   : > { %v15801_v18 = vpop.f32.mrf.mxu0  ;;  %v5330_v55 = vsel %vm14653_vm14, %v5328_v10, %v5329_v60  ;;  %v11965_v40 = vcombine.low %v5320_v17, %v5323_v12  ;;  %v5335_v35 = vrot.slane %v5333_v21, 4  ;;  %v5343_v51 = vrot.slane %v15608_v8, 5 }
 0x1b7   : > { %19480 = vst [vmem:[#allocation50_spill] sm:$0xff] %v15801_v18  ;;  %v12951_v30 = vpop.f32.mrf.mxu1  ;;  %v11966_v9 = vcombine.low %v5327_v42, %v5330_v55  ;;  %v11953_v12 = vrot.slane %v5222_v5, 9 }
 0x1b8   : > { %v12899_v41 = vpop.f32.mrf.mxu0 }
 0x1b9   : > { %13186 = vmatmul.mubr.bf16.vlgmr.msra.gmra.mxu0 %v11963_v0  ;;  %v2406_v25 = vadd.f32 %v12899_v41, %v15467_v38  ;;  %v2679_v23 = vpop.f32.mrf.mxu1  ;;  %v11951_v0 = vrot.slane %v5220_v7, 9  ;;  %v5337_v41 = vsel %vm14653_vm14, %v5335_v35, %v5336_v63 }
 0x1ba   : > { %13189 = vmatprep.mubr.bf16.mxu0 %v11964_v1  ;;  %v2277_v26 = vpop.f32.mrf.mxu0 }
 0x1bb   : > { %v2404_v38 = vadd.f32 %v2277_v26, %v15488_v33  ;;  %v15816_v56 = vadd.f32 %v12947_v53, %v2406_v25  ;;  %v12952_v29 = vpop.f32.mrf.mxu1  ;;  %v11952_v33 = vrot.slane %v5221_v11, 9  ;;  %v5342_v53 = vrot.slane %v5340_v58, 4  ;;  %v5223_v25 = vld [vmem:[#allocation2 + $0x78] sm:$0xe] }
 0x1bc   : > { %v12900_v4 = vpop.f32.mrf.mxu0  ;;  %v5350_v11 = vrot.slane %v15623_v20, 5 }
 0x1bd   : > { %v2407_v59 = vadd.f32 %v12900_v4, %v15503_v62  ;;  %v15820_v22 = vadd.f32 %v2663_v50, %v2404_v38  ;;  %v15822_v1 = vpop.f32.mrf.mxu1  ;;  %v5347_v62 = vrot.slane %v15618_v2, 5  ;;  %v5334_v50 = vsel %vm14653_vm14, %v11951_v0, %v5333_v21 }
 0x1be   : > { %v15824_v57 = vpop.f32.mrf.mxu0  ;;  %v5341_v8 = vsel %vm14653_vm14, %v11952_v33, %v5340_v58  ;;  %v5354_v2 = vrot.slane %v15637_v3, 5  ;;  %v11967_v55 = vcombine.low %v5334_v50, %v5337_v41  ;;  %v11954_v4 = vrot.slane %v5223_v25, 9  ;;  %v5225_v33 = vld [vmem:[#allocation2 + $0x90] sm:$0xe] }
 0x1bf   : > { %v15827_v14 = vadd.f32 %v12948_v36, %v2407_v59  ;;  %v12955_v10 = vpop.f32.mrf.mxu1  ;;  %v5344_v36 = vsel %vm14653_vm14, %v5342_v53, %v5343_v51  ;;  %v5349_v38 = vrot.slane %v5347_v62, 4  ;;  %v5357_v3 = vrot.slane %v15642_v24, 5  ;;  %v5224_v59 = vld [vmem:[#allocation2 + $0x84] sm:$0xe]  ;;  %v5226_v51 = vld [vmem:[#allocation2 + $0x9c] sm:$0xe] }
 0x1c0   : > { %v12903_v60 = vpop.f32.mrf.mxu0  ;;  %v11968_v0 = vcombine.low %v5341_v8, %v5344_v36  ;;  %v5368_v50 = vrot.slane %v15673_v61, 5  ;;  %v5364_v36 = vrot.slane %v15659_v54, 5  ;;  %v5382_v54 = vrot.slane %v15704_v19, 5 }
 0x1c1   : > { %13190 = vmatmul.mubr.bf16.gmra.mxu0 %v11965_v40  ;;  %v2410_v52 = vadd.f32 %v12903_v60, %v15510_v31  ;;  %v2695_v7 = vpop.f32.mrf.mxu1 }
 0x1c2   : > { %13193 = vmatprep.mubr.bf16.mxu0 %v11966_v9  ;;  %v2293_v17 = vpop.f32.mrf.mxu0  ;;  %v5361_v9 = vrot.slane %v15656_v48, 5  ;;  %v5355_v48 = vsel %vm14653_vm14, %v11954_v4, %v5354_v2  ;;  %v5378_v4 = vrot.slane %v15693_v13, 5 }
 0x1c3   : > { %v2408_v31 = vadd.f32 %v2293_v17, %v15547_v37  ;;  %v15841_v26 = vadd.f32 %v12951_v30, %v2410_v52  ;;  %v12956_v21 = vpop.f32.mrf.mxu1  ;;  %v5356_v30 = vrot.slane %v5354_v2, 4  ;;  %v11955_v52 = vrot.slane %v5224_v59, 9 }
 0x1c4   : > { %v12904_v42 = vpop.f32.mrf.mxu0  ;;  %v11957_v2 = vrot.slane %v5226_v51, 9  ;;  %v19484_v51 = vld [vmem:[#allocation23_spill] sm:$0xff] }
 0x1c5   : > { %v2411_v40 = vadd.f32 %v12904_v42, %v15557_v46  ;;  %v15845_v58 = vadd.f32 %v2679_v23, %v2408_v31  ;;  %v15847_v63 = vpop.f32.mrf.mxu1  ;;  %v5348_v46 = vsel %vm14653_vm14, %v11953_v12, %v5347_v62  ;;  %v5351_v23 = vsel %vm14653_vm14, %v5349_v38, %v5350_v11 }
 0x1c6   : > { %v15850_v37 = vpop.f32.mrf.mxu0  ;;  %v11969_v25 = vcombine.low %v5348_v46, %v5351_v23  ;;  %v11956_v12 = vrot.slane %v5225_v33, 9  ;;  %v5371_v31 = vrot.slane %v15680_v28, 5  ;;  %v5375_v11 = vrot.slane %v15690_v27, 5  ;;  %v5227_v27 = vld [vmem:[#allocation2 + $0xa8] sm:$0xe] }
 0x1c7   : > { %v15853_v35 = vadd.f32 %v12952_v29, %v2411_v40  ;;  %v12959_v5 = vpop.f32.mrf.mxu1  ;;  %v5358_v29 = vsel %vm14653_vm14, %v5356_v30, %v5357_v3  ;;  %v5362_v3 = vsel %vm14653_vm14, %v11955_v52, %v5361_v9 }
 0x1c8   : > { %v12907_v20 = vpop.f32.mrf.mxu0  ;;  %v11970_v38 = vcombine.low %v5355_v48, %v5358_v29  ;;  %v5369_v19 = vsel %vm14653_vm14, %v11956_v12, %v5368_v50  ;;  %v19485_v29 = vld [vmem:[#allocation28_spill] sm:$0xff]  ;;  %v5384_v12 = vrot.slane %v5382_v54, 4 }
 0x1c9   : > { %13194 = vmatmul.mubr.bf16.gmra.mxu0 %v11967_v55  ;;  %v2414_v24 = vadd.f32 %v12907_v20, %v15567_v49  ;;  %v2711_v53 = vpop.f32.mrf.mxu1  ;;  %v5363_v49 = vrot.slane %v5361_v9, 4 }
 0x1ca   : > { %13197 = vmatprep.mubr.bf16.mxu0 %v11968_v0  ;;  %v2309_v60 = vpop.f32.mrf.mxu0 }
 0x1cb   : > { %v2412_v62 = vadd.f32 %v2309_v60, %v15588_v44  ;;  %v15866_v41 = vadd.f32 %v12955_v10, %v2414_v24  ;;  %v12960_v17 = vpop.f32.mrf.mxu1  ;;  %v5370_v10 = vrot.slane %v5368_v50, 4  ;;  %v5365_v59 = vsel %vm14653_vm14, %v5363_v49, %v5364_v36  ;;  %v19483_v24 = vld [vmem:[#allocation24_spill] sm:$0xff] }
 0x1cc   : > { %v12908_v8 = vpop.f32.mrf.mxu0  ;;  %v1876_v9 = vadd.f32 %v19484_v51, %v19483_v24  ;;  %v11971_v48 = vcombine.low %v5362_v3, %v5365_v59  ;;  %v5377_v50 = vrot.slane %v5375_v11, 4  ;;  %v11958_v36 = vrot.slane %v5227_v27, 9  ;;  %v5228_v27 = vld [vmem:[#allocation2 + $0xb4] sm:$0xe] }
 0x1cd   : > { %v2415_v42 = vadd.f32 %v12908_v8, %v15600_v32  ;;  %v15871_v55 = vadd.f32 %v2695_v7, %v2412_v62  ;;  %v15873_v61 = vpop.f32.mrf.mxu1  ;;  %v19481_v32 = vld [vmem:[#allocation25_spill] sm:$0xff]  ;;  %v5372_v13 = vsel %vm14653_vm14, %v5370_v10, %v5371_v31  ;;  %v19487_v31 = vld [vmem:[#allocation36_spill] sm:$0xff]  ;;  %v19490_v24 = vld [vmem:[#allocation31_spill] sm:$0xff] }
 0x1ce   : > { %v15875_v44 = vpop.f32.mrf.mxu0  ;;  %v5379_v3 = vsel %vm14653_vm14, %v5377_v50, %v5378_v4 }
 0x1cf   : > { %v15880_v40 = vadd.f32 %v12956_v21, %v2415_v42  ;;  %v12963_v28 = vpop.f32.mrf.mxu1  ;;  %v19482_v21 = vld [vmem:[#allocation26_spill] sm:$0xff] }
 0x1d0   : > { %v12911_v0 = vpop.f32.mrf.mxu0 }
 0x1d1   : > { %13198 = vmatmul.mubr.bf16.gmra.mxu0 %v11969_v25  ;;  %v2418_v7 = vadd.f32 %v12911_v0, %v19481_v32  ;;  %v2727_v30 = vpop.f32.mrf.mxu1  ;;  %v11972_v25 = vcombine.low %v5369_v19, %v5372_v13  ;;  %v19488_v32 = vld [vmem:[#allocation29_spill] sm:$0xff] }
 0x1d2   : > { %13201 = vmatprep.mubr.bf16.mxu0 %v11970_v38  ;;  %v2325_v20 = vpop.f32.mrf.mxu0 }
 0x1d3   : > { %v2416_v46 = vadd.f32 %v2325_v20, %v19482_v21  ;;  %v15892_v23 = vadd.f32 %v12959_v5, %v2418_v7  ;;  %v12964_v33 = vpop.f32.mrf.mxu1  ;;  %v5385_v5 = vrot.slane %v19487_v31, 5  ;;  %v5389_v20 = vrot.slane %v15720_v6, 5  ;;  %v19489_v21 = vld [vmem:[#allocation42_spill] sm:$0xff] }
 0x1d4   : > { %v12912_v60 = vpop.f32.mrf.mxu0 }
 0x1d5   : > { %v2419_v52 = vadd.f32 %v12912_v60, %v19485_v29  ;;  %v15897_v62 = vadd.f32 %v2711_v53, %v2416_v46  ;;  %v15899_v49 = vpop.f32.mrf.mxu1  ;;  %v5376_v53 = vsel %vm14653_vm14, %v11957_v2, %v5375_v11  ;;  %v5386_v13 = vsel %vm14653_vm14, %v5384_v12, %v5385_v5  ;;  %v5229_v11 = vld [vmem:[#allocation2 + $0xc0] sm:$0xe]  ;;  %v19491_v29 = vld [vmem:[#allocation39_spill] sm:$0xff] }
 0x1d6   : > { %19486 = vst [vmem:[#allocation25_spill] sm:$0xff] %v15899_v49  ;;  %v2328_v8 = vpop.f32.mrf.mxu0  ;;  %v5396_v46 = vrot.slane %v19489_v21, 5  ;;  %v11973_v60 = vcombine.low %v5376_v53, %v5379_v3  ;;  %v5392_v6 = vrot.slane %v19491_v29, 5  ;;  %v11960_v31 = vrot.slane %v5229_v11, 9  ;;  %v19494_v5 = vld [vmem:[#allocation43_spill] sm:$0xff]  ;;  %v19495_v3 = vld [vmem:[#allocation46_spill] sm:$0xff] }
 0x1d7   : > { %v15902_v42 = vadd.f32 %v2328_v8, %v1876_v9  ;;  %v15904_v38 = vadd.f32 %v12960_v17, %v2419_v52  ;;  %v12967_v10 = vpop.f32.mrf.mxu1  ;;  %v5383_v17 = vsel %vm14653_vm14, %v11958_v36, %v5382_v54  ;;  %v19492_v52 = vld [vmem:[#allocation32_spill] sm:$0xff]  ;;  %v5391_v36 = vrot.slane %v5389_v20, 4 }
 0x1d8   : > { %v12915_v0 = vpop.f32.mrf.mxu0  ;;  %v11974_v54 = vcombine.low %v5383_v17, %v5386_v13 }
 0x1d9   : > { %13202 = vmatmul.mubr.bf16.gmra.mxu0 %v11971_v48  ;;  %v2422_v7 = vadd.f32 %v12915_v0, %v19488_v32  ;;  %v2743_v59 = vpop.f32.mrf.mxu1  ;;  %v11959_v48 = vrot.slane %v5228_v27, 9  ;;  %v5399_v0 = vrot.slane %v19494_v5, 5  ;;  %v5403_v27 = vrot.slane %v19495_v3, 5  ;;  %v19498_v5 = vld [vmem:[#allocation37_spill] sm:$0xff] }
 0x1da   : > { %13205 = vmatprep.mubr.bf16.mxu0 %v11972_v25  ;;  %v2341_v19 = vpop.f32.mrf.mxu0  ;;  %v5393_v13 = vsel %vm14653_vm14, %v5391_v36, %v5392_v6 }
 0x1db   : > { %v2420_v51 = vadd.f32 %v2341_v19, %v19490_v24  ;;  %v15918_v9 = vadd.f32 %v12963_v28, %v2422_v7  ;;  %v12968_v2 = vpop.f32.mrf.mxu1  ;;  %v5398_v28 = vrot.slane %v5396_v46, 4  ;;  %v19496_v19 = vld [vmem:[#allocation33_spill] sm:$0xff]  ;;  %v5390_v17 = vsel %vm14653_vm14, %v11959_v48, %v5389_v20  ;;  %v5230_v24 = vld [vmem:[#allocation2 + $0xcc] sm:$0xe] }
 0x1dc   : > { %v12916_v4 = vpop.f32.mrf.mxu0  ;;  %v11961_v20 = vrot.slane %v5230_v24, 9  ;;  %v5405_v48 = vrot.slane %v5403_v27, 4 }
 0x1dd   : > { %v2423_v25 = vadd.f32 %v12916_v4, %v19492_v52  ;;  %v15922_v50 = vadd.f32 %v2727_v30, %v2420_v51  ;;  %v15924_v8 = vpop.f32.mrf.mxu1  ;;  %v5400_v11 = vsel %vm14653_vm14, %v5398_v28, %v5399_v0  ;;  %v19497_v4 = vld [vmem:[#allocation35_spill] sm:$0xff] }
 0x1de   : > { %19493 = vst [vmem:[#allocation26_spill] sm:$0xff] %v15924_v8  ;;  %v15926_v12 = vpop.f32.mrf.mxu0 }
 0x1df   : > { %v15929_v32 = vadd.f32 %v12964_v33, %v2423_v25  ;;  %v12971_v7 = vpop.f32.mrf.mxu1  ;;  %v5397_v33 = vsel %vm14653_vm14, %v11960_v31, %v5396_v46  ;;  %v19500_v46 = vld [vmem:[#allocation47_spill] sm:$0xff] }
 0x1e0   : > { %v12919_v53 = vpop.f32.mrf.mxu0  ;;  %v5406_v31 = vrot.slane %v19500_v46, 5 }
 0x1e1   : > { %13206 = vmatmul.mubr.bf16.gmra.mxu0 %v11973_v60  ;;  %v2426_v30 = vadd.f32 %v12919_v53, %v19496_v19  ;;  %v2759_v21 = vpop.f32.mrf.mxu1  ;;  %v11976_v53 = vcombine.low %v5397_v33, %v5400_v11  ;;  %v19503_v33 = vld [vmem:[#allocation41_spill] sm:$0xff] }
 0x1e2   : > { %13209 = vmatprep.mubr.bf16.mxu0 %v11974_v54  ;;  %v2357_v51 = vpop.f32.mrf.mxu0  ;;  %v11975_v54 = vcombine.low %v5390_v17, %v5393_v13  ;;  %v5404_v13 = vsel %vm14653_vm14, %v11961_v20, %v5403_v27 }
 0x1e3   : > { %v2424_v60 = vadd.f32 %v2357_v51, %v19497_v4  ;;  %v15942_v29 = vadd.f32 %v12967_v10, %v2426_v30  ;;  %v12972_v52 = vpop.f32.mrf.mxu1  ;;  %v19502_v30 = vld [vmem:[#allocation40_spill] sm:$0xff] }
 0x1e4   : > { %v12920_v25 = vpop.f32.mrf.mxu0 }
 0x1e5   : > { %v2427_v6 = vadd.f32 %v12920_v25, %v19498_v5  ;;  %v15945_v36 = vadd.f32 %v2743_v59, %v2424_v60  ;;  %v15947_v3 = vpop.f32.mrf.mxu1  ;;  %v5407_v59 = vsel %vm14653_vm14, %v5405_v48, %v5406_v31  ;;  %v19504_v5 = vld [vmem:[#allocation44_spill] sm:$0xff] }
 0x1e6   : > { %19499 = vst [vmem:[#allocation24_spill] sm:$0xff] %v15947_v3  ;;  %v15950_v19 = vpop.f32.mrf.mxu0  ;;  %v11977_v25 = vcombine.low %v5404_v13, %v5407_v59 }
 0x1e7   : > { %19501 = vst [vmem:[#allocation23_spill] sm:$0xff] %v15950_v19  ;;  %v15952_v28 = vadd.f32 %v12968_v2, %v2427_v6  ;;  %v12975_v10 = vpop.f32.mrf.mxu1 }
 0x1e8   : > { %v12923_v0 = vpop.f32.mrf.mxu0 }
 0x1e9   : > { %13210 = vmatmul.mubr.bf16.gmra.mxu0 %v11975_v54  ;;  %v2430_v17 = vadd.f32 %v12923_v0, %v19502_v30  ;;  %v2775_v24 = vpop.f32.mrf.mxu1 }
 0x1ea   : > { %13213 = vmatprep.mubr.bf16.mxu0 %v11976_v53  ;;  %v2373_v51 = vpop.f32.mrf.mxu0 }
 0x1eb   : > { %v2428_v11 = vadd.f32 %v2373_v51, %v19503_v33  ;;  %v15960_v4 = vadd.f32 %v12971_v7, %v2430_v17  ;;  %v12976_v2 = vpop.f32.mrf.mxu1 }
 0x1ec   : > { %v12924_v60 = vpop.f32.mrf.mxu0 }
 0x1ed   : > { %v2431_v54 = vadd.f32 %v12924_v60, %v19504_v5  ;;  %v15963_v6 = vadd.f32 %v2759_v21, %v2428_v11  ;;  %v15965_v53 = vpop.f32.mrf.mxu1 }
 0x1ee   : > { %19505 = vst [vmem:[#allocation28_spill] sm:$0xff] %v15965_v53  ;;  %v15967_v46 = vpop.f32.mrf.mxu0 }
 0x1ef   : > { %19506 = vst [vmem:[#allocation36_spill] sm:$0xff] %v15967_v46  ;;  %v15969_v27 = vadd.f32 %v12972_v52, %v2431_v54  ;;  %v13043_v20 = vpop.f32.mrf.mxu1 }
 0x1f0   : > { %v12927_v48 = vpop.f32.mrf.mxu0 }
 0x1f1   : > { %13214 = vmatmul.mubr.bf16.gmra.mxu0 %v11977_v25  ;;  %v2434_v31 = vadd.f32 %v12927_v48, %v15781_v16  ;;  %v3915_v7 = vpop.f32.mrf.mxu1 }
 0x1f2   : > { %v2389_v0 = vpop.f32.mrf.mxu0 }
 0x1f3   : > { %v2432_v30 = vadd.f32 %v2389_v0, %v15791_v34  ;;  %v15973_v17 = vadd.f32 %v12975_v10, %v2434_v31  ;;  %v13044_v13 = vpop.f32.mrf.mxu1 }
 0x1f4   : > { %v12928_v21 = vpop.f32.mrf.mxu0 }
 0x1f5   : > { %v2435_v59 = vadd.f32 %v12928_v21, %v15797_v15  ;;  %v15976_v51 = vadd.f32 %v2775_v24, %v2432_v30  ;;  %v15978_v33 = vpop.f32.mrf.mxu1 }
 0x1f6   : > { %v15980_v52 = vpop.f32.mrf.mxu0 }
 0x1f7   : > { %19507 = vst [vmem:[#allocation29_spill] sm:$0xff] %v15980_v52  ;;  %v15982_v11 = vadd.f32 %v12976_v2, %v2435_v59  ;;  %v13047_v60 = vpop.f32.mrf.mxu1 }
 0x1f8   : > { %v12995_v16 = vpop.f32.mrf.mxu0 }
 0x1f9   : > { %v3546_v25 = vadd.f32 %v12995_v16, %v15816_v56  ;;  %v15985_v5 = vpop.f32.mrf.mxu1 }
 0x1fa   : > { %v3417_v34 = vpop.f32.mrf.mxu0 }
 0x1fb   : > { %v3544_v10 = vadd.f32 %v3417_v34, %v15820_v22  ;;  %v15988_v54 = vadd.f32 %v13043_v20, %v3546_v25  ;;  %v13048_v15 = vpop.f32.mrf.mxu1 }
 0x1fc   : > { %v12996_v24 = vpop.f32.mrf.mxu0 }
 0x1fd   : > { %v3547_v48 = vadd.f32 %v12996_v24, %v15827_v14  ;;  %v15991_v31 = vadd.f32 %v3915_v7, %v3544_v10  ;;  %v15993_v0 = vpop.f32.mrf.mxu1 }
 0x1fe   : > { %v15995_v2 = vpop.f32.mrf.mxu0 }
 0x1ff   : > { %v15997_v30 = vadd.f32 %v13044_v13, %v3547_v48  ;;  %v13051_v56 = vpop.f32.mrf.mxu1 }
 0x200   : > { %v12999_v21 = vpop.f32.mrf.mxu0 }
 0x201   : > { %v3550_v59 = vadd.f32 %v12999_v21, %v15841_v26  ;;  %v16000_v16 = vpop.f32.mrf.mxu1 }
 0x202   : > { %v3433_v22 = vpop.f32.mrf.mxu0 }
 0x203   : > { %v16003_v20 = vadd.f32 %v3433_v22, %v15845_v58  ;;  %v16005_v25 = vadd.f32 %v13047_v60, %v3550_v59  ;;  %v13052_v14 = vpop.f32.mrf.mxu1 }
 0x204   : > { %v13000_v7 = vpop.f32.mrf.mxu0 }
 0x205   : > { %v3551_v34 = vadd.f32 %v13000_v7, %v15853_v35  ;;  %v16008_v10 = vpop.f32.mrf.mxu1 }
 0x206   : > { %v16010_v13 = vpop.f32.mrf.mxu0 }
 0x207   : > { %v16012_v24 = vadd.f32 %v13048_v15, %v3551_v34  ;;  %v13055_v48 = vpop.f32.mrf.mxu1 }
 0x208   : > { %v13003_v26 = vpop.f32.mrf.mxu0 }
 0x209   : > { %v3554_v21 = vadd.f32 %v13003_v26, %v15866_v41  ;;  %v16015_v39 = vpop.f32.mrf.mxu1 }
 0x20a   : > { %v3449_v58 = vpop.f32.mrf.mxu0 }
 0x20b   : > { %v16018_v60 = vadd.f32 %v3449_v58, %v15871_v55  ;;  %v16020_v59 = vadd.f32 %v13051_v56, %v3554_v21  ;;  %v13056_v22 = vpop.f32.mrf.mxu1 }
 0x20c   : > { %v13004_v35 = vpop.f32.mrf.mxu0 }
 0x20d   : > { %v3555_v7 = vadd.f32 %v13004_v35, %v15880_v40  ;;  %v16023_v45 = vpop.f32.mrf.mxu1 }
 0x20e   : > { %v16025_v15 = vpop.f32.mrf.mxu0 }
 0x20f   : > { %v16027_v34 = vadd.f32 %v13052_v14, %v3555_v7  ;;  %v13059_v53 = vpop.f32.mrf.mxu1 }
 0x210   : > { %v13007_v41 = vpop.f32.mrf.mxu0 }
 0x211   : > { %v3558_v26 = vadd.f32 %v13007_v41, %v15892_v23  ;;  %v16030_v52 = vpop.f32.mrf.mxu1 }
 0x212   : > { %19508 = vst [vmem:[#allocation42_spill] sm:$0xff] %v16030_v52  ;;  %v3465_v55 = vpop.f32.mrf.mxu0 }
 0x213   : > { %v16033_v56 = vadd.f32 %v3465_v55, %v15897_v62  ;;  %v16035_v21 = vadd.f32 %v13055_v48, %v3558_v26  ;;  %v13060_v58 = vpop.f32.mrf.mxu1 }
 0x214   : > { %v13008_v40 = vpop.f32.mrf.mxu0 }
 0x215   : > { %v3559_v35 = vadd.f32 %v13008_v40, %v15904_v38  ;;  %v16038_v43 = vpop.f32.mrf.mxu1 }
 0x216   : > { %19509 = vst [vmem:[#allocation31_spill] sm:$0xff] %v16038_v43  ;;  %v16040_v14 = vpop.f32.mrf.mxu0 }
 0x217   : > { %v16042_v7 = vadd.f32 %v13056_v22, %v3559_v35  ;;  %v13063_v18 = vpop.f32.mrf.mxu1 }
 0x218   : > { %v13011_v23 = vpop.f32.mrf.mxu0 }
 0x219   : > { %v3562_v41 = vadd.f32 %v13011_v23, %v15918_v9  ;;  %v16045_v3 = vpop.f32.mrf.mxu1 }
 0x21a   : > { %19510 = vst [vmem:[#allocation39_spill] sm:$0xff] %v16045_v3  ;;  %v3481_v62 = vpop.f32.mrf.mxu0 }
 0x21b   : > { %v16048_v48 = vadd.f32 %v3481_v62, %v15922_v50  ;;  %v16050_v26 = vadd.f32 %v13059_v53, %v3562_v41  ;;  %v13064_v55 = vpop.f32.mrf.mxu1 }
 0x21c   : > { %v13012_v38 = vpop.f32.mrf.mxu0 }
 0x21d   : > { %19511 = vst [vmem:[#allocation32_spill] sm:$0xff] %v16048_v48  ;;  %v3563_v40 = vadd.f32 %v13012_v38, %v15929_v32  ;;  %v16053_v46 = vpop.f32.mrf.mxu1 }
 0x21e   : > { %19512 = vst [vmem:[#allocation43_spill] sm:$0xff] %v16053_v46  ;;  %v16055_v22 = vpop.f32.mrf.mxu0 }
 0x21f   : > { %19513 = vst [vmem:[#allocation46_spill] sm:$0xff] %v16055_v22  ;;  %v16057_v35 = vadd.f32 %v13060_v58, %v3563_v40  ;;  %v13067_v8 = vpop.f32.mrf.mxu1 }
 0x220   : > { %v13015_v9 = vpop.f32.mrf.mxu0 }
 0x221   : > { %v3566_v23 = vadd.f32 %v13015_v9, %v15942_v29  ;;  %v16060_v43 = vpop.f32.mrf.mxu1 }
 0x222   : > { %v3497_v3 = vpop.f32.mrf.mxu0  ;;  %19514 = vst [vmem:[#allocation33_spill] sm:$0xff] %v16060_v43 }
 0x223   : > { %v16063_v50 = vadd.f32 %v3497_v3, %v15945_v36  ;;  %v16065_v53 = vadd.f32 %v13063_v18, %v3566_v23  ;;  %v13068_v38 = vpop.f32.mrf.mxu1 }
 0x224   : > { %v13016_v41 = vpop.f32.mrf.mxu0 }
 0x225   : > { %19515 = vst [vmem:[#allocation35_spill] sm:$0xff] %v16063_v50  ;;  %v3567_v32 = vadd.f32 %v13016_v41, %v15952_v28  ;;  %v16073_v9 = vpop.f32.mrf.mxu1 }
 0x226   : > { %v16068_v62 = vpop.f32.mrf.mxu0  ;;  %19517 = vst [vmem:[#allocation47_spill] sm:$0xff] %v16073_v9 }
 0x227   : > { %19516 = vst [vmem:[#allocation37_spill] sm:$0xff] %v16068_v62  ;;  %v16070_v58 = vadd.f32 %v13064_v55, %v3567_v32 }
 0x228   : > { %v13019_v40 = vpop.f32.mrf.mxu0 }
 0x229   : > { %v3570_v46 = vadd.f32 %v13019_v40, %v15960_v4 }
 0x22a   : > { %v3513_v29 = vpop.f32.mrf.mxu0 }
 0x22b   : > { %v16076_v43 = vadd.f32 %v3513_v29, %v15963_v6  ;;  %v16078_v36 = vadd.f32 %v13067_v8, %v3570_v46 }
 0x22c   : > { %v13020_v18 = vpop.f32.mrf.mxu0 }
 0x22d   : > { %19518 = vst [vmem:[#allocation40_spill] sm:$0xff] %v16076_v43  ;;  %v3571_v3 = vadd.f32 %v13020_v18, %v15969_v27 }
 0x22e   : > { %v16081_v28 = vpop.f32.mrf.mxu0 }
 0x22f   : > { %19519 = vst [vmem:[#allocation41_spill] sm:$0xff] %v16081_v28  ;;  %v13071_v23 = vpop.f32.mrf.mxu1  ;;  %v16083_v41 = vadd.f32 %v13068_v38, %v3571_v3 }
 0x231   : > { %v13023_v55 = vpop.f32.mrf.mxu0  ;;  %v16085_v32 = vpop.f32.mrf.mxu1 }
 0x232   : > { %19520 = vst [vmem:[#allocation44_spill] sm:$0xff] %v16085_v32  ;;  %v3574_v4 = vadd.f32 %v13023_v55, %v15973_v17 }
 0x233   : > { %v3529_v40 = vpop.f32.mrf.mxu0  ;;  %v13072_v9 = vpop.f32.mrf.mxu1 }
 0x234   : > { %v16089_v6 = vadd.f32 %v3529_v40, %v15976_v51  ;;  %v16091_v8 = vadd.f32 %v13071_v23, %v3574_v4 }
 0x235   : > { %v13024_v46 = vpop.f32.mrf.mxu0  ;;  %v16093_v29 = vpop.f32.mrf.mxu1 }
 0x236   : > { %19521 = vst [vmem:[#allocation51_spill] sm:$0xff] %v16089_v6  ;;  %19522 = vst [vmem:[#allocation52_spill] sm:$0xff] %v16093_v29  ;;  %v3575_v27 = vadd.f32 %v13024_v46, %v15982_v11 }
 0x237   : > { %v16096_v18 = vpop.f32.mrf.mxu0  ;;  %v16098_v38 = vpop.f32.mrf.mxu1 }
 0x238   : > { %19523 = vst [vmem:[#allocation53_spill] sm:$0xff] %v16096_v18  ;;  %v16100_v3 = vadd.f32 %v13072_v9, %v3575_v27 }
 0x239   : > { %v13091_v32 = vpop.f32.mrf.mxu0  ;;  %v16105_v51 = vpop.f32.mrf.mxu1 }
 0x23a   : > { %v16103_v17 = vadd.f32 %v13091_v32, %v15988_v54 }
 0x23b   : > { %v4302_v55 = vpop.f32.mrf.mxu0  ;;  %v16115_v46 = vpop.f32.mrf.mxu1 }
 0x23c   : > { %v16108_v23 = vadd.f32 %v4302_v55, %v15991_v31 }
 0x23d   : > { %v13092_v4 = vpop.f32.mrf.mxu0  ;;  %v16120_v54 = vpop.f32.mrf.mxu1 }
 0x23e   : > { %v16111_v40 = vadd.f32 %v13092_v4, %v15997_v30 }
 0x23f   : > { %v16113_v11 = vpop.f32.mrf.mxu0  ;;  %v16127_v55 = vpop.f32.mrf.mxu1 }
 0x241   : > { %v13095_v9 = vpop.f32.mrf.mxu0  ;;  %v16134_v6 = vpop.f32.mrf.mxu1 }
 0x242   : > { %v16118_v27 = vadd.f32 %v13095_v9, %v16005_v25 }
 0x243   : > { %v16122_v32 = vpop.f32.mrf.mxu0  ;;  %v16141_v43 = vpop.f32.mrf.mxu1 }
 0x245   : > { %v13096_v29 = vpop.f32.mrf.mxu0  ;;  %v16148_v50 = vpop.f32.mrf.mxu1 }
 0x246   : > { %v16125_v31 = vadd.f32 %v13096_v29, %v16012_v24 }
 0x247   : > { %v16129_v30 = vpop.f32.mrf.mxu0  ;;  %v16155_v22 = vpop.f32.mrf.mxu1 }
 0x249   : > { %v13099_v4 = vpop.f32.mrf.mxu0  ;;  %v16162_v48 = vpop.f32.mrf.mxu1 }
 0x24a   : > { %v16132_v18 = vadd.f32 %v13099_v4, %v16020_v59 }
 0x24b   : > { %v16136_v25 = vpop.f32.mrf.mxu0  ;;  %v16169_v49 = vpop.f32.mrf.mxu1 }
 0x24c   : > { %19531 = vst [vmem:[#allocation61_spill] sm:$0xff] %v16169_v49 }
 0x24d   : > { %v13100_v9 = vpop.f32.mrf.mxu0 }
 0x24e   : > { %v16139_v28 = vadd.f32 %v13100_v9, %v16027_v34 }
 0x24f   : > { %v16143_v24 = vpop.f32.mrf.mxu0 }
 0x250   : > { %19524 = vst [vmem:[#allocation54_spill] sm:$0xff] %v16139_v28 }
 0x251   : > { %v13103_v29 = vpop.f32.mrf.mxu0 }
 0x252   : > { %v16146_v62 = vadd.f32 %v13103_v29, %v16035_v21 }
 0x253   : > { %v16150_v59 = vpop.f32.mrf.mxu0 }
 0x254   : > { %19525 = vst [vmem:[#allocation55_spill] sm:$0xff] %v16146_v62 }
 0x255   : > { %v13104_v4 = vpop.f32.mrf.mxu0 }
 0x256   : > { %v16153_v19 = vadd.f32 %v13104_v4, %v16042_v7 }
 0x257   : > { %v16157_v34 = vpop.f32.mrf.mxu0 }
 0x258   : > { %19526 = vst [vmem:[#allocation56_spill] sm:$0xff] %v16153_v19  ;;  %19527 = vst [vmem:[#allocation57_spill] sm:$0xff] %v16157_v34  ;;  %v16176_v34 = vpop.f32.mrf.mxu1 }
 0x259   : > { %v13107_v9 = vpop.f32.mrf.mxu0 }
 0x25a   : > { %v16160_v52 = vadd.f32 %v13107_v9, %v16050_v26 }
 0x25b   : > { %v16164_v21 = vpop.f32.mrf.mxu0 }
 0x25c   : > { %19528 = vst [vmem:[#allocation58_spill] sm:$0xff] %v16160_v52  ;;  %19529 = vst [vmem:[#allocation59_spill] sm:$0xff] %v16164_v21  ;;  %v16183_v21 = vpop.f32.mrf.mxu1 }
 0x25d   : > { %v13108_v29 = vpop.f32.mrf.mxu0  ;;  %19536 = vst [vmem:[#allocation66_spill] sm:$0xff] %v16183_v21 }
 0x25e   : > { %v16167_v62 = vadd.f32 %v13108_v29, %v16057_v35 }
 0x25f   : > { %v16171_v7 = vpop.f32.mrf.mxu0 }
 0x260   : > { %19530 = vst [vmem:[#allocation60_spill] sm:$0xff] %v16167_v62  ;;  %19532 = vst [vmem:[#allocation62_spill] sm:$0xff] %v16171_v7  ;;  %v16190_v7 = vpop.f32.mrf.mxu1 }
 0x261   : > { %v13111_v4 = vpop.f32.mrf.mxu0 }
 0x262   : > { %v16174_v19 = vadd.f32 %v13111_v4, %v16065_v53  ;;  %v19540_v4 = vld [vmem:[#allocation18_spill] sm:$0xff] }
 0x263   : > { %v16178_v26 = vpop.f32.mrf.mxu0 }
 0x264   : > { %19533 = vst [vmem:[#allocation63_spill] sm:$0xff] %v16174_v19  ;;  %19534 = vst [vmem:[#allocation64_spill] sm:$0xff] %v16178_v26  ;;  %v19541_v19 = vld [vmem:[#allocation17_spill] sm:$0xff] }
 0x265   : > { %v13112_v9 = vpop.f32.mrf.mxu0  ;;  %v1828_v49 = vadd.f32 %v19541_v19, %v19540_v4 }
 0x266   : > { %v16181_v52 = vadd.f32 %v13112_v9, %v16070_v58  ;;  %v16200_v9 = vpop.f32.mrf.mxu1 }
 0x267   : > { %v16185_v35 = vpop.f32.mrf.mxu0  ;;  %v2405_v28 = vadd.f32 %v15824_v57, %v1828_v49 }
 0x268   : > { %19535 = vst [vmem:[#allocation65_spill] sm:$0xff] %v16181_v52  ;;  %19537 = vst [vmem:[#allocation67_spill] sm:$0xff] %v16185_v35  ;;  %v16210_v19 = vpop.f32.mrf.mxu1 }
 0x269   : > { %v13115_v29 = vpop.f32.mrf.mxu0 }
 0x26a   : > { %v16188_v62 = vadd.f32 %v13115_v29, %v16078_v36  ;;  %v2791_v36 = vadd.f32 %v15799_v47, %v2405_v28 }
 0x26b   : > { %v16192_v53 = vpop.f32.mrf.mxu0 }
 0x26c   : > { %19538 = vst [vmem:[#allocation68_spill] sm:$0xff] %v16188_v62  ;;  %19539 = vst [vmem:[#allocation69_spill] sm:$0xff] %v16192_v53  ;;  %v19544_v62 = vld [vmem:[#allocation20_spill] sm:$0xff]  ;;  %v19545_v53 = vld [vmem:[#allocation19_spill] sm:$0xff]  ;;  %v3545_v57 = vadd.f32 %v15995_v2, %v2791_v36 }
 0x26d   : > { %v13116_v26 = vpop.f32.mrf.mxu0  ;;  %v1844_v21 = vadd.f32 %v19545_v53, %v19544_v62  ;;  %v19546_v53 = vld [vmem:[#allocation22_spill] sm:$0xff] }
 0x26e   : > { %v16198_v58 = vadd.f32 %v13116_v26, %v16083_v41  ;;  %v4043_v28 = vadd.f32 %v15978_v33, %v3545_v57 }
 0x26f   : > { %v16202_v52 = vpop.f32.mrf.mxu0  ;;  %v2409_v49 = vadd.f32 %v15850_v37, %v1844_v21  ;;  %v4046_v37 = vadd.f32 %v15985_v5, %v16003_v20 }
 0x270   : > { %19542 = vst [vmem:[#allocation18_spill] sm:$0xff] %v16198_v58  ;;  %v16219_v58 = vpop.f32.mrf.mxu1 }
 0x271   : > { %v13119_v35 = vpop.f32.mrf.mxu0  ;;  %v2795_v62 = vadd.f32 %v15822_v1, %v2409_v49  ;;  %v4433_v1 = vadd.f32 %v16122_v32, %v4046_v37  ;;  %v5189_v37 = vadd.f32 %v16127_v55, %v16118_v27 }
 0x272   : > { %v16206_v29 = vadd.f32 %v13119_v35, %v16091_v8  ;;  %v4430_v35 = vadd.f32 %v16113_v11, %v4043_v28  ;;  %v16231_v21 = vpop.f32.mrf.mxu1  ;;  %v5185_v11 = vadd.f32 %v16098_v38, %v16103_v17 }
 0x273   : > { %v16212_v4 = vpop.f32.mrf.mxu0  ;;  %v5187_v38 = vadd.f32 %v16134_v6, %v4433_v1  ;;  %v5190_v1 = vadd.f32 %v16141_v43, %v16125_v31 }
 0x274   : > { %19543 = vst [vmem:[#allocation17_spill] sm:$0xff] %v16206_v29  ;;  %v19547_v29 = vld [vmem:[#allocation21_spill] sm:$0xff]  ;;  %v16243_v20 = vpop.f32.mrf.mxu1 }
 0x275   : > { %v13120_v41 = vpop.f32.mrf.mxu0  ;;  %v1860_v2 = vadd.f32 %v19547_v29, %v19546_v53  ;;  %v5184_v29 = vadd.f32 %v16120_v54, %v4430_v35 }
 0x276   : > { %v16217_v26 = vadd.f32 %v13120_v41, %v16100_v3  ;;  %v3549_v3 = vadd.f32 %v16010_v13, %v2795_v62  ;;  %v5183_v41 = vadd.f32 %v16105_v51, %v16108_v23  ;;  %v5186_v51 = vadd.f32 %v16115_v46, %v16111_v40  ;;  %v16265_v6 = vpop.f32.mrf.mxu1 }
 0x277   : > { %v16221_v47 = vpop.f32.mrf.mxu0  ;;  %v2413_v33 = vadd.f32 %v15875_v44, %v1860_v2  ;;  %v4050_v46 = vadd.f32 %v16000_v16, %v16018_v60 }
 0x278   : > { %v4047_v5 = vadd.f32 %v15993_v0, %v3549_v3 }
 0x279   : > { %v13187_v8 = vpop.f32.mrf.mxu0  ;;  %v2799_v32 = vadd.f32 %v15847_v63, %v2413_v33  ;;  %v4437_v3 = vadd.f32 %v16136_v25, %v4050_v46 }
 0x27a   : > { %v16247_v23 = vadd.f32 %v13187_v8, %v5185_v11  ;;  %v4434_v17 = vadd.f32 %v16129_v30, %v4047_v5  ;;  %v2803_v5 = vadd.f32 %v15873_v61, %v15902_v42 }
 0x27b   : > { %v5554_v36 = vpop.f32.mrf.mxu0  ;;  %v3553_v63 = vadd.f32 %v16025_v15, %v2799_v32 }
 0x27c   : > { %v16240_v49 = vadd.f32 %v5554_v36, %v5183_v41  ;;  %v5753_v8 = vmul.f32 %v16247_v23, %v16247_v23  ;;  %v5188_v16 = vadd.f32 %v16148_v50, %v4434_v17  ;;  %v19548_v17 = vld [vmem:[#allocation30_spill] sm:$0xff]  ;;  %v3557_v61 = vadd.f32 %v16040_v14, %v2803_v5 }
 0x27d   : > { %v13188_v57 = vpop.f32.mrf.mxu0  ;;  %v4051_v33 = vadd.f32 %v16008_v10, %v3553_v63  ;;  %v5191_v10 = vadd.f32 %v16162_v48, %v4437_v3 }
 0x27e   : > { %v5751_v0 = vmul.f32 %v16240_v49, %v16240_v49  ;;  %v16256_v28 = vadd.f32 %v13188_v57, %v5186_v51  ;;  %v16282_v57 = vpop.f32.mrf.mxu1  ;;  %v4055_v3 = vadd.f32 %v16023_v45, %v3557_v61 }
 0x27f   : > { %v5557_v13 = vpop.f32.mrf.mxu0  ;;  %v4438_v43 = vadd.f32 %v16143_v24, %v4051_v33  ;;  %v19552_v33 = vld [vmem:[#allocation25_spill] sm:$0xff] }
 0x280   : > { %v16249_v44 = vadd.f32 %v5557_v13, %v5184_v29  ;;  %v5754_v60 = vmul.f32 %v16256_v28, %v16256_v28  ;;  %v16305_v42 = vpop.f32.mrf.mxu1 }
 0x281   : > { %v13191_v54 = vpop.f32.mrf.mxu0  ;;  %v5192_v14 = vadd.f32 %v16176_v34, %v4438_v43 }
 0x282   : > { %v5713_v62 = vadd.f32 %v16249_v44, %v16240_v49  ;;  %v5752_v40 = vmul.f32 %v16249_v44, %v16249_v44  ;;  %v16284_v11 = vadd.f32 %v13191_v54, %v5189_v37  ;;  %v19549_v54 = vld [vmem:[#allocation27_spill] sm:$0xff] }
 0x283   : > { %v5570_v30 = vpop.f32.mrf.mxu0 }
 0x284   : > { %v5714_v35 = vadd.f32 %v5713_v62, %v16247_v23  ;;  %v5783_v53 = vadd.f32 %v5752_v40, %v5751_v0  ;;  %v16270_v2 = vadd.f32 %v5570_v30, %v5187_v38  ;;  %v1892_v0 = vadd.f32 %v19549_v54, %v19548_v17  ;;  %v19557_v17 = vld [vmem:[#allocation42_spill] sm:$0xff] }
 0x285   : > { %v13192_v36 = vpop.f32.mrf.mxu0  ;;  %v4054_v62 = vadd.f32 %v16015_v39, %v16033_v56  ;;  %v5757_v24 = vmul.f32 %v16284_v11, %v16284_v11 }
 0x286   : > { %v5784_v15 = vadd.f32 %v5783_v53, %v5753_v8  ;;  %v5715_v41 = vadd.f32 %v5714_v35, %v16256_v28  ;;  %v5755_v50 = vmul.f32 %v16270_v2, %v16270_v2  ;;  %v16295_v51 = vadd.f32 %v13192_v36, %v5190_v1  ;;  %v19550_v36 = vld [vmem:[#allocation54_spill] sm:$0xff] }
 0x287   : > { %v5573_v27 = vpop.f32.mrf.mxu0  ;;  %v2421_v30 = vadd.f32 %v15926_v12, %v1892_v0  ;;  %v5193_v8 = vadd.f32 %v16155_v22, %v16132_v18  ;;  %v4441_v39 = vadd.f32 %v16150_v59, %v4054_v62  ;;  %v16323_v12 = vpop.f32.mrf.mxu1  ;;  %v19558_v0 = vld [vmem:[#allocation46_spill] sm:$0xff] }
 0x288   : > { %v5716_v55 = vadd.f32 %v5715_v41, %v16270_v2  ;;  %v5785_v25 = vadd.f32 %v5784_v15, %v5754_v60  ;;  %v16289_v29 = vadd.f32 %v5573_v27, %v5188_v16  ;;  %v5758_v35 = vmul.f32 %v16295_v51, %v16295_v51  ;;  %v19551_v16 = vld [vmem:[#allocation61_spill] sm:$0xff] }
 0x289   : > { %v13195_v31 = vpop.f32.mrf.mxu0  ;;  %v5194_v60 = vadd.f32 %v19551_v16, %v19550_v36  ;;  %v2807_v1 = vadd.f32 %v19552_v33, %v2421_v30  ;;  %v5195_v45 = vadd.f32 %v16190_v7, %v4441_v39  ;;  %v19553_v27 = vld [vmem:[#allocation57_spill] sm:$0xff]  ;;  %v16345_v7 = vpop.f32.mrf.mxu1  ;;  %v19559_v30 = vld [vmem:[#allocation23_spill] sm:$0xff] }
 0x28a   : > { %v5786_v13 = vadd.f32 %v5785_v25, %v5755_v50  ;;  %v5717_v32 = vadd.f32 %v5716_v55, %v16289_v29  ;;  %v5756_v38 = vmul.f32 %v16289_v29, %v16289_v29  ;;  %v16325_v15 = vadd.f32 %v13195_v31, %v5193_v8  ;;  %v19554_v31 = vld [vmem:[#allocation38_spill] sm:$0xff]  ;;  %v19560_v39 = vld [vmem:[#allocation55_spill] sm:$0xff] }
 0x28b   : > { %v5586_v48 = vpop.f32.mrf.mxu0  ;;  %v4442_v55 = vadd.f32 %v19553_v27, %v4055_v3  ;;  %v3561_v62 = vadd.f32 %v19558_v0, %v2807_v1  ;;  %v16363_v33 = vpop.f32.mrf.mxu1  ;;  %v19567_v0 = vld [vmem:[#allocation48_spill] sm:$0xff] }
 0x28c   : > { %v5718_v40 = vadd.f32 %v5717_v32, %v16284_v11  ;;  %v5787_v46 = vadd.f32 %v5786_v13, %v5756_v38  ;;  %v16310_v63 = vadd.f32 %v5586_v48, %v5191_v10  ;;  %v19555_v13 = vld [vmem:[#allocation34_spill] sm:$0xff]  ;;  %v19556_v38 = vld [vmem:[#allocation32_spill] sm:$0xff]  ;;  %v5761_v48 = vmul.f32 %v16325_v15, %v16325_v15 }
 0x28d   : > { %v13196_v56 = vpop.f32.mrf.mxu0  ;;  %v1908_v32 = vadd.f32 %v19555_v13, %v19554_v31  ;;  %v4058_v54 = vadd.f32 %v19557_v17, %v19556_v38  ;;  %v5196_v3 = vadd.f32 %v16210_v19, %v4442_v55  ;;  %v19566_v13 = vld [vmem:[#allocation62_spill] sm:$0xff] }
 0x28e   : > { %v5788_v53 = vadd.f32 %v5787_v46, %v5757_v24  ;;  %v5719_v37 = vadd.f32 %v5718_v40, %v16295_v51  ;;  %v5759_v59 = vmul.f32 %v16310_v63, %v16310_v63  ;;  %v16335_v5 = vadd.f32 %v13196_v56, %v5194_v60  ;;  %v19561_v56 = vld [vmem:[#allocation66_spill] sm:$0xff] }
 0x28f   : > { %v5589_v22 = vpop.f32.mrf.mxu0  ;;  %v2425_v8 = vadd.f32 %v19559_v30, %v1908_v32  ;;  %v19571_v30 = vld [vmem:[#allocation37_spill] sm:$0xff] }
 0x290   : > { %v5720_v18 = vadd.f32 %v5719_v37, %v16310_v63  ;;  %v5789_v34 = vadd.f32 %v5788_v53, %v5758_v35  ;;  %v16330_v41 = vadd.f32 %v5589_v22, %v5192_v14  ;;  %v5197_v14 = vadd.f32 %v19561_v56, %v19560_v39  ;;  %v19562_v35 = vld [vmem:[#allocation59_spill] sm:$0xff] }
 0x291   : > { %v13199_v50 = vpop.f32.mrf.mxu0  ;;  %v4445_v53 = vadd.f32 %v19562_v35, %v4058_v54  ;;  %v5762_v36 = vmul.f32 %v16335_v5, %v16335_v5  ;;  %v19563_v22 = vld [vmem:[#allocation31_spill] sm:$0xff] }
 0x292   : > { %v5790_v25 = vadd.f32 %v5789_v34, %v5759_v59  ;;  %v5721_v10 = vadd.f32 %v5720_v18, %v16330_v41  ;;  %v5760_v43 = vmul.f32 %v16330_v41, %v16330_v41  ;;  %v4059_v18 = vadd.f32 %v19563_v22, %v3561_v62  ;;  %v19564_v59 = vld [vmem:[#allocation56_spill] sm:$0xff]  ;;  %v19568_v62 = vld [vmem:[#allocation45_spill] sm:$0xff] }
 0x293   : > { %v5602_v61 = vpop.f32.mrf.mxu0  ;;  %v5198_v34 = vadd.f32 %v16200_v9, %v19564_v59  ;;  %v16365_v1 = vadd.f32 %v13199_v50, %v5197_v14  ;;  %v5199_v31 = vadd.f32 %v16231_v21, %v4445_v53  ;;  %v5152_v21 = vpop.f32.mrf.mxu1 }
 0x294   : > { %v5722_v24 = vadd.f32 %v5721_v10, %v16325_v15  ;;  %v5791_v40 = vadd.f32 %v5790_v25, %v5760_v43  ;;  %v16350_v46 = vadd.f32 %v5602_v61, %v5195_v45  ;;  %v19565_v10 = vld [vmem:[#allocation26_spill] sm:$0xff]  ;;  %v4446_v32 = vadd.f32 %v19566_v13, %v4059_v18 }
 0x295   : > { %v13200_v37 = vpop.f32.mrf.mxu0  ;;  %v2811_v43 = vadd.f32 %v19565_v10, %v2425_v8  ;;  %v1924_v61 = vadd.f32 %v19568_v62, %v19567_v0  ;;  %v5765_v56 = vmul.f32 %v16365_v1, %v16365_v1  ;;  %v19576_v10 = vld [vmem:[#allocation60_spill] sm:$0xff] }
 0x296   : > { %v5792_v16 = vadd.f32 %v5791_v40, %v5761_v48  ;;  %v5723_v60 = vadd.f32 %v5722_v24, %v16335_v5  ;;  %v5763_v19 = vmul.f32 %v16350_v46, %v16350_v46  ;;  %v16375_v17 = vadd.f32 %v13200_v37, %v5198_v34  ;;  %v19569_v48 = vld [vmem:[#allocation35_spill] sm:$0xff]  ;;  %v19572_v37 = vld [vmem:[#allocation36_spill] sm:$0xff] }
 0x297   : > { %v5605_v45 = vpop.f32.mrf.mxu0  ;;  %v19570_v24 = vld [vmem:[#allocation39_spill] sm:$0xff]  ;;  %v3565_v8 = vadd.f32 %v19571_v30, %v2811_v43  ;;  %v5200_v59 = vadd.f32 %v16265_v6, %v4446_v32  ;;  %v5202_v43 = vadd.f32 %v16243_v20, %v19576_v10 }
 0x298   : > { %v5724_v27 = vadd.f32 %v5723_v60, %v16350_v46  ;;  %v5793_v55 = vadd.f32 %v5792_v16, %v5762_v36  ;;  %v16370_v25 = vadd.f32 %v5605_v45, %v5196_v3  ;;  %v4062_v40 = vadd.f32 %v19570_v24, %v19569_v48  ;;  %v19573_v36 = vld [vmem:[#allocation58_spill] sm:$0xff]  ;;  %v19574_v60 = vld [vmem:[#allocation64_spill] sm:$0xff] }
 0x299   : > { %v13203_v9 = vpop.f32.mrf.mxu0  ;;  %v2429_v3 = vadd.f32 %v19572_v37, %v1924_v61  ;;  %v5201_v16 = vadd.f32 %v16219_v58, %v19573_v36  ;;  %v5766_v34 = vmul.f32 %v16375_v17, %v16375_v17  ;;  %v19578_v61 = vld [vmem:[#allocation67_spill] sm:$0xff] }
 0x29a   : > { %v5794_v38 = vadd.f32 %v5793_v55, %v5763_v19  ;;  %v5725_v50 = vadd.f32 %v5724_v27, %v16370_v25  ;;  %v5764_v54 = vmul.f32 %v16370_v25, %v16370_v25  ;;  %v4449_v22 = vadd.f32 %v19574_v60, %v4062_v40  ;;  %v19575_v19 = vld [vmem:[#allocation43_spill] sm:$0xff] }
 0x29b   : > { %v5618_v39 = vpop.f32.mrf.mxu0  ;;  %v4063_v55 = vadd.f32 %v19575_v19, %v3565_v8  ;;  %v16403_v13 = vadd.f32 %v13203_v9, %v5201_v16  ;;  %v19579_v8 = vld [vmem:[#allocation50_spill] sm:$0xff] }
 0x29c   : > { %v5726_v14 = vadd.f32 %v5725_v50, %v16365_v1  ;;  %v5795_v35 = vadd.f32 %v5794_v38, %v5764_v54  ;;  %v16388_v53 = vadd.f32 %v5618_v39, %v5199_v31  ;;  %v16401_v31 = vpop.f32.mrf.mxu1  ;;  %v19577_v54 = vld [vmem:[#allocation24_spill] sm:$0xff]  ;;  %v5203_v62 = vadd.f32 %v16305_v42, %v4449_v22  ;;  %v19580_v39 = vld [vmem:[#allocation49_spill] sm:$0xff] }
 0x29d   : > { %v13204_v18 = vpop.f32.mrf.mxu0  ;;  %v2815_v0 = vadd.f32 %v19577_v54, %v2429_v3  ;;  %v4450_v48 = vadd.f32 %v19578_v61, %v4063_v55  ;;  %v19583_v3 = vld [vmem:[#allocation41_spill] sm:$0xff]  ;;  %v5769_v60 = vmul.f32 %v16403_v13, %v16403_v13  ;;  %v19587_v54 = vld [vmem:[#allocation47_spill] sm:$0xff] }
 0x29e   : > { %v5796_v45 = vadd.f32 %v5795_v35, %v5765_v56  ;;  %v5727_v27 = vadd.f32 %v5726_v14, %v16375_v17  ;;  %v5767_v6 = vmul.f32 %v16388_v53, %v16388_v53  ;;  %v16413_v40 = vadd.f32 %v13204_v18, %v5202_v43  ;;  %v19581_v14 = vld [vmem:[#allocation40_spill] sm:$0xff]  ;;  %v19582_v35 = vld [vmem:[#allocation33_spill] sm:$0xff]  ;;  %v5155_v42 = vpop.f32.mrf.mxu1 }
 0x29f   : > { %v5621_v58 = vpop.f32.mrf.mxu0  ;;  %v1940_v56 = vadd.f32 %v19580_v39, %v19579_v8  ;;  %v4066_v37 = vadd.f32 %v19582_v35, %v19581_v14  ;;  %v3569_v36 = vadd.f32 %v19583_v3, %v2815_v0  ;;  %v19586_v55 = vld [vmem:[#allocation69_spill] sm:$0xff]  ;;  %v19589_v39 = vld [vmem:[#allocation28_spill] sm:$0xff] }
 0x2a0   : > { %v5728_v38 = vadd.f32 %v5727_v27, %v16388_v53  ;;  %v5797_v32 = vadd.f32 %v5796_v45, %v5766_v34  ;;  %v16408_v50 = vadd.f32 %v5621_v58, %v5200_v59  ;;  %v19584_v34 = vld [vmem:[#allocation29_spill] sm:$0xff]  ;;  %v19585_v27 = vld [vmem:[#allocation63_spill] sm:$0xff]  ;;  %v5204_v58 = vadd.f32 %v16345_v7, %v4450_v48 }
 0x2a1   : > { %v13207_v20 = vpop.f32.mrf.mxu0  ;;  %v2433_v45 = vadd.f32 %v19584_v34, %v1940_v56  ;;  %v5205_v19 = vadd.f32 %v16282_v57, %v19585_v27  ;;  %v4453_v10 = vadd.f32 %v19586_v55, %v4066_v37  ;;  %v4067_v0 = vadd.f32 %v19587_v54, %v3569_v36 }
 0x2a2   : > { %v5798_v24 = vadd.f32 %v5797_v32, %v5767_v6  ;;  %v5729_v9 = vadd.f32 %v5728_v38, %v16408_v50  ;;  %v5768_v30 = vmul.f32 %v16408_v50, %v16408_v50  ;;  %v5770_v38 = vmul.f32 %v16413_v40, %v16413_v40 }
 0x2a3   : > { %v5634_v16 = vpop.f32.mrf.mxu0  ;;  %v2819_v56 = vadd.f32 %v19589_v39, %v2433_v45  ;;  %v5207_v14 = vadd.f32 %v5152_v21, %v4453_v10  ;;  %v4454_v35 = vadd.f32 %v16202_v52, %v4067_v0  ;;  %v19593_v10 = vld [vmem:[#allocation68_spill] sm:$0xff] }
 0x2a4   : > { %v5730_v22 = vadd.f32 %v5729_v9, %v16403_v13  ;;  %v5799_v18 = vadd.f32 %v5798_v24, %v5768_v30  ;;  %v16426_v59 = vadd.f32 %v5634_v16, %v5203_v62  ;;  %v19588_v62 = vld [vmem:[#allocation65_spill] sm:$0xff]  ;;  %v13167_v24 = vpop.f32.mrf.mxu1  ;;  %v16439_v9 = vadd.f32 %v13207_v20, %v5205_v19  ;;  %v19590_v16 = vld [vmem:[#allocation51_spill] sm:$0xff] }
 0x2a5   : > { %v13208_v43 = vpop.f32.mrf.mxu0  ;;  %v5206_v61 = vadd.f32 %v16323_v12, %v19588_v62 }
 0x2a6   : > { %v5800_v6 = vadd.f32 %v5799_v18, %v5769_v60  ;;  %v5731_v32 = vadd.f32 %v5730_v22, %v16413_v40  ;;  %v5771_v7 = vmul.f32 %v16426_v59, %v16426_v59  ;;  %v19591_v60 = vld [vmem:[#allocation44_spill] sm:$0xff]  ;;  %v19592_v18 = vld [vmem:[#allocation53_spill] sm:$0xff]  ;;  %v5168_v27 = vpop.f32.mrf.mxu1  ;;  %v5773_v21 = vmul.f32 %v16439_v9, %v16439_v9 }
 0x2a7   : > { %v5637_v57 = vpop.f32.mrf.mxu0  ;;  %v16448_v12 = vadd.f32 %v13208_v43, %v5206_v61  ;;  %v4070_v22 = vadd.f32 %v19591_v60, %v19590_v16  ;;  %v3573_v34 = vadd.f32 %v19592_v18, %v2819_v56  ;;  %v5209_v43 = vadd.f32 %v16363_v33, %v19593_v10  ;;  %v19594_v61 = vld [vmem:[#allocation52_spill] sm:$0xff]  ;;  %v13839_v10 = vld [vmem:[#allocation6 + $0x268] sm:$0xff]  }
 0x2a8   : > { %v5732_v30 = vadd.f32 %v5731_v32, %v16426_v59  ;;  %v5801_v48 = vadd.f32 %v5800_v6, %v5770_v38  ;;  %v16444_v8 = vadd.f32 %v5637_v57, %v5204_v58  ;;  %v13836_v6 = vld [vmem:[#allocation6 + $0x278] sm:$0xff]   ;;  %v5208_v32 = vadd.f32 %v5155_v42, %v4454_v35 }
 0x2a9   : > { %v13211_v37 = vpop.f32.mrf.mxu0  ;;  %v4457_v58 = vadd.f32 %v16212_v4, %v4070_v22  ;;  %v5774_v54 = vmul.f32 %v16448_v12, %v16448_v12  ;;  %v4071_v57 = vadd.f32 %v19594_v61, %v3573_v34  ;;  %13265 = vmatprep.subr.bf16.mxu0 %v13836_v6 }
 0x2aa   : > { %v5802_v3 = vadd.f32 %v5801_v48, %v5771_v7  ;;  %v5733_v20 = vadd.f32 %v5732_v30, %v16444_v8  ;;  %v5772_v36 = vmul.f32 %v16444_v8, %v16444_v8  ;;  %v19595_v30 = vld [vmem:[#allocation18_spill] sm:$0xff]  ;;  %v13168_v48 = vpop.f32.mrf.mxu1  ;;  %v16470_v39 = vadd.f32 %v13211_v37, %v5209_v43  ;;  %13266 = vmatpush3.bf16.msra.mxu0 %v13836_v6 }
 0x2ab   : > { %v5650_v19 = vpop.f32.mrf.mxu0  ;;  %v5210_v7 = vadd.f32 %v16401_v31, %v19595_v30  ;;  %v5211_v35 = vadd.f32 %v5168_v27, %v4457_v58 }
 0x2ac   : > { %v5734_v52 = vadd.f32 %v5733_v20, %v16439_v9  ;;  %v5803_v45 = vadd.f32 %v5802_v3, %v5772_v36  ;;  %v16459_v55 = vadd.f32 %v5650_v19, %v5207_v14  ;;  %v4458_v3 = vadd.f32 %v16221_v47, %v4071_v57  ;;  %v13838_v36 = vld [vmem:[#allocation6 + $0x270] sm:$0xff]   ;;  %v5171_v22 = vpop.f32.mrf.mxu1 }
 0x2ad   : > { %v13212_v38 = vpop.f32.mrf.mxu0  ;;  %13267 = vmatprep.subr.bf16.mxu0 %v13838_v36  ;;  %v5777_v34 = vmul.f32 %v16470_v39, %v16470_v39 }
 0x2ae   : > { %v5804_v0 = vadd.f32 %v5803_v45, %v5773_v21  ;;  %v5735_v62 = vadd.f32 %v5734_v52, %v16448_v12  ;;  %v5775_v42 = vmul.f32 %v16459_v55, %v16459_v55  ;;  %v16478_v16 = vadd.f32 %v13212_v38, %v5210_v7  ;;  %13268 = vmatpush3.bf16.msra.mxu0 %v13838_v36  ;;  %v19596_v21 = vld [vmem:[#allocation17_spill] sm:$0xff]  ;;  %v13841_v7 = vld [vmem:[#allocation6 + $0x260] sm:$0xff]  }
 0x2af   : > { %v5653_v33 = vpop.f32.mrf.mxu0  ;;  %v5213_v52 = vadd.f32 %v13167_v24, %v19596_v21  ;;  %v5212_v43 = vadd.f32 %v5171_v22, %v4458_v3  ;;  %13269 = vmatprep.subr.bf16.mxu0 %v13839_v10  ;;  %v13837_v21 = vld [vmem:[#allocation6 + $0x2a0] sm:$0xff]  }
 0x2b0   : > { %v5736_v4 = vadd.f32 %v5735_v62, %v16459_v55  ;;  %v5805_v56 = vadd.f32 %v5804_v0, %v5774_v54  ;;  %v16475_v14 = vadd.f32 %v5653_v33, %v5208_v32  ;;  %v5778_v58 = vmul.f32 %v16478_v16, %v16478_v16  ;;  %v13833_v32 = vld [vmem:[#allocation6 + $0x2b8] sm:$0xff]  }
 0x2b1   : > { %v13215_v20 = vpop.f32.mrf.mxu0  ;;  %v5214_v54 = vadd.f32 %v13168_v48, %v16217_v26  ;;  %13217 = vmatprep.subr.bf16.mxu1 %v13833_v32 }
 0x2b2   : > { %v5806_v31 = vadd.f32 %v5805_v56, %v5775_v42  ;;  %v5737_v37 = vadd.f32 %v5736_v4, %v16475_v14  ;;  %v5776_v60 = vmul.f32 %v16475_v14, %v16475_v14  ;;  %v16493_v0 = vadd.f32 %v13215_v20, %v5213_v52  ;;  %13218 = vmatpush3.bf16.msra.mxu1 %v13833_v32  ;;  %v13834_v42 = vld [vmem:[#allocation6 + $0x2b0] sm:$0xff]   ;;  %v13842_v20 = vld [vmem:[#allocation6 + $0x258] sm:$0xff]   ;;  %v13847_v32 = vld [vmem:[#allocation6 + $0x240] sm:$0xff]  }
 0x2b3   : > { %v5666_v18 = vpop.f32.mrf.mxu0  ;;  %13270 = vmatpush3.bf16.msra.mxu0 %v13839_v10  ;;  %13219 = vmatprep.subr.bf16.mxu1 %v13834_v42  ;;  %v13840_v10 = vld [vmem:[#allocation6 + $0x298] sm:$0xff]  }
 0x2b4   : > { %v5738_v27 = vadd.f32 %v5737_v37, %v16470_v39  ;;  %v5807_v19 = vadd.f32 %v5806_v31, %v5776_v60  ;;  %v16486_v47 = vadd.f32 %v5666_v18, %v5211_v35  ;;  %13271 = vmatprep.subr.bf16.mxu0 %v13841_v7  ;;  %v5781_v56 = vmul.f32 %v16493_v0, %v16493_v0  ;;  %v13835_v60 = vld [vmem:[#allocation6 + $0x2a8] sm:$0xff]  }
 0x2b5   : > { %v13216_v45 = vpop.f32.mrf.mxu0 }
 0x2b6   : > { %v5808_v38 = vadd.f32 %v5807_v19, %v5777_v34  ;;  %v5739_v6 = vadd.f32 %v5738_v27, %v16478_v16  ;;  %v5779_v24 = vmul.f32 %v16486_v47, %v16486_v47  ;;  %v16500_v4 = vadd.f32 %v13216_v45, %v5214_v54  ;;  %13220 = vmatpush3.bf16.msra.mxu1 %v13834_v42  ;;  %v13844_v34 = vld [vmem:[#allocation6 + $0x250] sm:$0xff]   ;;  %v6494_v54 = vld [vmem:[#allocation2] sm:$0xf] }
 0x2b7   : > { %v5669_v62 = vpop.f32.mrf.mxu0  ;;  %13272 = vmatpush3.bf16.msra.mxu0 %v13841_v7  ;;  %13221 = vmatprep.subr.bf16.mxu1 %v13835_v60 }
 0x2b8   : > { %v5740_v61 = vadd.f32 %v5739_v6, %v16486_v47  ;;  %v5809_v57 = vadd.f32 %v5808_v38, %v5778_v58  ;;  %v16498_v30 = vadd.f32 %v5669_v62, %v5212_v43  ;;  %v5782_v36 = vmul.f32 %v16500_v4, %v16500_v4  ;;  %13273 = vmatprep.subr.bf16.mxu0 %v13842_v20  ;;  %v13845_v43 = vld [vmem:[#allocation6 + $0x248] sm:$0xff]   ;;  %v13843_v6 = vld [vmem:[#allocation6 + $0x290] sm:$0xff]  }
 0x2b9   : > { %v6495_v62 = vld [vmem:[#allocation2 + $0x4] sm:$0xf] }
 0x2ba   : > { %v5810_v33 = vadd.f32 %v5809_v57, %v5779_v24  ;;  %v5741_v26 = vadd.f32 %v5740_v61, %v16498_v30  ;;  %v5780_v48 = vmul.f32 %v16498_v30, %v16498_v30  ;;  %13222 = vmatpush3.bf16.msra.mxu1 %v13835_v60  ;;  %v6577_v61 = vshrl.u32 %v6494_v54, 16 }
 0x2bb   : > { %13274 = vmatpush3.bf16.msra.mxu0 %v13842_v20  ;;  %13223 = vmatprep.subr.bf16.mxu1 %v13837_v21  ;;  %v6580_v24 = vshll.u32 %v6494_v54, 16 }
 0x2bc   : > { %v5742_v35 = vadd.f32 %v5741_v26, %v16493_v0  ;;  %v5811_v3 = vadd.f32 %v5810_v33, %v5780_v48  ;;  %13275 = vmatprep.subr.bf16.mxu0 %v13844_v34  ;;  %v6590_v33 = vshrl.u32 %v6495_v62, 16  ;;  %v12042_v26 = vcombine.low %v6494_v54, %v6495_v62  ;;  %v6543_v48 = vld [vmem:[#allocation2 + $0x8] sm:$0x1] }
 0x2bd   : > { %v6579_v42 = vrot.slane %v6577_v61, 4 }
 0x2be   : > { %v5743_v31 = vadd.f32 %v5742_v35, %v16500_v4  ;;  %v5812_v37 = vadd.f32 %v5811_v3, %v5781_v56  ;;  %13224 = vmatpush3.bf16.msra.mxu1 %v13837_v21  ;;  %v6582_v56 = vrot.slane %v6580_v24, 5  ;;  %v6586_v35 = vshll.u32 %v6495_v62, 16  ;;  %13281 = vmatprep.mubr.bf16.mxu0 %v12042_v26 }
 0x2bf   : > { %13276 = vmatpush3.bf16.msra.mxu0 %v13844_v34  ;;  %13225 = vmatprep.subr.bf16.mxu1 %v13840_v10  ;;  %v6596_v3 = vshll.u32 %v6543_v48, 16 }
 0x2c0   : > { %v5744_v22 = vrot.slane %v5743_v31, 4  ;;  %v5813_v18 = vadd.f32 %v5812_v37, %v5782_v36  ;;  %13277 = vmatprep.subr.bf16.mxu0 %v13845_v43  ;;  %v6592_v37 = vrot.slane %v6590_v33, 4  ;;  %v6583_v60 = vor.u32 %v6582_v56, %v6579_v42  ;;  %v5824_v33 = vld [vmem:[%s19369_s2] sm:$0x1] }
 0x2c1   : > { %v6598_v21 = vrot.slane %v6596_v3, 5  ;;  %v5828_v56 = vld [vmem:[%s19370_s3] sm:$0x1] }
 0x2c2   : > { %v5745_v27 = vadd.f32 %v5744_v22, %v5743_v31  ;;  %v5814_v19 = vrot.slane %v5813_v18, 4  ;;  %13226 = vmatpush3.bf16.msra.mxu1 %v13840_v10  ;;  %v13846_v31 = vld [vmem:[#allocation6 + $0x288] sm:$0xff]   ;;  %v6588_v22 = vrot.slane %v6586_v35, 5  ;;  %v13850_v10 = vld [vmem:[#allocation6 + $0x280] sm:$0xff]  }
 0x2c3   : > { %13278 = vmatpush3.bf16.msra.mxu0 %v13845_v43  ;;  %13227 = vmatprep.subr.bf16.mxu1 %v13843_v6 }
 0x2c4   : > { %v5746_v52 = vrot.slane %v5745_v27, 2  ;;  %v5815_v45 = vadd.f32 %v5814_v19, %v5813_v18  ;;  %13279 = vmatprep.subr.bf16.mxu0 %v13847_v32  ;;  %v6593_v19 = vor.u32 %v6592_v37, %v6588_v22 }
 0x2c6   : > { %v5747_v58 = vadd.f32 %v5746_v52, %v5745_v27  ;;  %v5816_v38 = vrot.slane %v5815_v45, 2  ;;  %13228 = vmatpush3.bf16.msra.mxu1 %v13843_v6  ;;  %v6584_v27 = vrot.slane %v6583_v60, 4 }
 0x2c7   : > { %13280 = vmatpush3.bf16.msra.mxu0 %v13847_v32  ;;  %13229 = vmatprep.subr.bf16.mxu1 %v13846_v31  ;;  %v13854_v32 = vld [vmem:[#allocation6 + $0x2f8] sm:$0xff]  }
 0x2c8   : > { %v5748_v57 = vrot.slane %v5747_v58, 1  ;;  %v5817_v7 = vadd.f32 %v5816_v38, %v5815_v45  ;;  %v6594_v38 = vrot.slane %v6593_v19, 4 }
 0x2ca   : > { %v5749_v20 = vadd.f32 %v5748_v57, %v5747_v58  ;;  %v5818_v36 = vrot.slane %v5817_v7, 1  ;;  %v6589_v58 = vsel %vm14296_vm9, %v6584_v27, %v6588_v22  ;;  %13230 = vmatpush3.bf16.msra.mxu1 %v13846_v31  ;;  %v6599_v62 = vsel %vm14296_vm9, %v6594_v38, %v6598_v21 }
 0x2cb   : > { %13231 = vmatprep.subr.bf16.mxu1 %v13850_v10  ;;  %v12018_v6 = vcombine.low %v6589_v58, %v6599_v62  ;;  %v5831_v57 = vlaneseq }
 0x2cc   : > { %v5750_v18 = vmul.f32 0.00390625, %v5749_v20  ;;  %v5819_v34 = vadd.f32 %v5818_v36, %v5817_v7 }
 0x2cd   : > { %13233 = vmatprep.mubr.bf16.mxu1 %v12018_v6  ;;  %v5832_v7 = vshrl.u32 %v5831_v57, 7 }
 0x2ce   : > { %v5820_v52 = vmul.f32 0.00390625, %v5819_v34  ;;  %v5821_v45 = vmul.f32 %v5750_v18, %v5750_v18  ;;  %13232 = vmatpush3.bf16.msra.mxu1 %v13850_v10 }
 0x2cf   : > { %13313 = vmatprep.subr.bf16.mxu1 %v13854_v32  ;;  %v16518_v26 = vsub.s32 0, %v5832_v7 }
 0x2d0   : > { %v5822_v54 = vsub.f32 %v5820_v52, %v5821_v45 }
 0x2d1   : > { %19598 = vst [vmem:[#allocation20_spill] sm:$0xff] %v16518_v26 }
 0x2d2   : > { %v5823_v61 = vmax.f32 %v5822_v54, 0.0 }
 0x2d4   : > { %v5825_v24 = vadd.f32 1e-05, %v5823_v61 }
 0x2d6   : > { %13953 = vrsqrt.f32 %v5825_v24 }
 0x2e3   : > { %v13954_v48 = vpop.eup %13953 }
 0x2e4   : > { %v5827_v42 = vmul.f32 %v13954_v48, %v5824_v33 }
 0x2e6   : > { %v5829_v35 = vmul.f32 %v5827_v42, %v5750_v18  ;;  %v5834_v3 = vrot.slane %v5827_v42, %v16518_v26 }
 0x2e8   : > { %v5830_v20 = vsub.f32 %v5828_v56, %v5829_v35  ;;  %v5863_v36 = vmul.f32 %v5834_v3, %v16486_v47  ;;  %v5864_v31 = vmul.f32 %v5834_v3, %v16498_v30  ;;  %v5835_v37 = vmul.f32 %v5834_v3, %v16240_v49  ;;  %v16537_v30 = vld [vmem:[#allocation6 + $0x338] sm:$0xff]  }
 0x2e9   : > { %v5836_v60 = vmul.f32 %v5834_v3, %v16249_v44  ;;  %v5837_v22 = vmul.f32 %v5834_v3, %v16247_v23  ;;  %v5838_v34 = vmul.f32 %v5834_v3, %v16256_v28  ;;  %v5839_v27 = vmul.f32 %v5834_v3, %v16270_v2  ;;  %19599 = vst [vmem:[#allocation19_spill] sm:$0xff] %v16537_v30 }
 0x2ea   : > { %v16532_v19 = vrot.slane %v5830_v20, %v16518_v26  ;;  %v5840_v18 = vmul.f32 %v5834_v3, %v16289_v29  ;;  %v5841_v21 = vmul.f32 %v5834_v3, %v16284_v11  ;;  %v5842_v47 = vmul.f32 %v5834_v3, %v16295_v51  ;;  %13361 = vmatprep.subr.bf16.mxu0 %v16537_v30 }
 0x2eb   : > { %v5843_v49 = vmul.f32 %v5834_v3, %v16310_v63  ;;  %v5844_v44 = vmul.f32 %v5834_v3, %v16330_v41  ;;  %v5845_v23 = vmul.f32 %v5834_v3, %v16325_v15  ;;  %v5846_v28 = vmul.f32 %v5834_v3, %v16335_v5 }
 0x2ec   : > { %v5899_v2 = vadd.f32 %v16532_v19, %v5863_v36  ;;  %v5900_v52 = vadd.f32 %v16532_v19, %v5864_v31  ;;  %v5847_v29 = vmul.f32 %v5834_v3, %v16350_v46  ;;  %v5848_v11 = vmul.f32 %v5834_v3, %v16370_v25 }
 0x2ed   : > { %v5849_v51 = vmul.f32 %v5834_v3, %v16365_v1  ;;  %v5850_v63 = vmul.f32 %v5834_v3, %v16375_v17  ;;  %v5851_v41 = vmul.f32 %v5834_v3, %v16388_v53  ;;  %v5852_v15 = vmul.f32 %v5834_v3, %v16408_v50 }
 0x2ee   : > { %v5931_v45 = vmul.f32 0.01, %v5899_v2  ;;  %v5932_v5 = vmul.f32 0.01, %v5900_v52  ;;  %v5853_v10 = vmul.f32 %v5834_v3, %v16403_v13  ;;  %v5854_v58 = vmul.f32 %v5834_v3, %v16413_v40 }
 0x2ef   : > { %v5855_v46 = vmul.f32 %v5834_v3, %v16426_v59  ;;  %v5856_v25 = vmul.f32 %v5834_v3, %v16444_v8  ;;  %v5857_v38 = vmul.f32 %v5834_v3, %v16439_v9  ;;  %v5858_v1 = vmul.f32 %v5834_v3, %v16448_v12 }
 0x2f0   : > { %v5963_v54 = vmax.f32 %v5899_v2, %v5931_v45  ;;  %v5964_v17 = vmax.f32 %v5900_v52, %v5932_v5  ;;  %v5859_v53 = vmul.f32 %v5834_v3, %v16459_v55  ;;  %v5860_v50 = vmul.f32 %v5834_v3, %v16475_v14 }
 0x2f1   : > { %v5861_v62 = vmul.f32 %v5834_v3, %v16470_v39  ;;  %v5862_v13 = vmul.f32 %v5834_v3, %v16478_v16  ;;  %v5865_v40 = vmul.f32 %v5834_v3, %v16493_v0  ;;  %v5866_v59 = vmul.f32 %v5834_v3, %v16500_v4  ;;  %v6484_v3 = vld [vmem:[#allocation2 + $0xbc] sm:$0x1] }
 0x2f2   : > { %v12348_v61 = vpack.c.bf16 %v5963_v54, %v5963_v54  ;;  %v12349_v8 = vpack.c.bf16 %v5964_v17, %v5964_v17  ;;  %v5871_v9 = vadd.f32 %v16532_v19, %v5835_v37  ;;  %v5872_v12 = vadd.f32 %v16532_v19, %v5836_v60 }
 0x2f3   : > { %v5873_v6 = vadd.f32 %v16532_v19, %v5837_v22  ;;  %v5874_v55 = vadd.f32 %v16532_v19, %v5838_v34  ;;  %v16569_v14 = vadd.f32 %v16532_v19, %v5839_v27  ;;  %v16572_v39 = vadd.f32 %v16532_v19, %v5840_v18 }
 0x2f4   : > { %v6302_v16 = vshrl.u32 %v12348_v61, 16  ;;  %v6310_v0 = vshrl.u32 %v12349_v8, 16  ;;  %v6313_v32 = vshll.u32 %v12349_v8, 16  ;;  %v6305_v4 = vshll.u32 %v12348_v61, 16 }
 0x2f5   : > { %v16575_v24 = vadd.f32 %v16532_v19, %v5841_v21  ;;  %v16578_v57 = vadd.f32 %v16532_v19, %v5842_v47  ;;  %v16581_v7 = vadd.f32 %v16532_v19, %v5843_v49  ;;  %v16584_v33 = vadd.f32 %v16532_v19, %v5844_v44  ;;  %v6470_v44 = vld [vmem:[#allocation2 + $0xa4] sm:$0x1] }
 0x2f6   : > { %v6304_v48 = vrot.slane %v6302_v16, 7  ;;  %v6312_v42 = vrot.slane %v6310_v0, 7  ;;  %v16587_v56 = vadd.f32 %v16532_v19, %v5845_v23  ;;  %v16590_v35 = vadd.f32 %v16532_v19, %v5846_v28 }
 0x2f7   : > { %v16593_v20 = vadd.f32 %v16532_v19, %v5847_v29  ;;  %v16596_v36 = vadd.f32 %v16532_v19, %v5848_v11  ;;  %v16599_v31 = vadd.f32 %v16532_v19, %v5849_v51  ;;  %v16602_v37 = vadd.f32 %v16532_v19, %v5850_v63 }
 0x2f8   : > { %v6308_v60 = vrot.slane %v6304_v48, 4  ;;  %v6315_v22 = vor.u32 %v6313_v32, %v6312_v42  ;;  %v6317_v34 = vrot.slane %v6312_v42, 4  ;;  %v16605_v27 = vadd.f32 %v16532_v19, %v5851_v41 }
 0x2f9   : > { %v16608_v18 = vadd.f32 %v16532_v19, %v5852_v15  ;;  %v16611_v21 = vadd.f32 %v16532_v19, %v5853_v10  ;;  %v16614_v47 = vadd.f32 %v16532_v19, %v5854_v58  ;;  %v16617_v49 = vadd.f32 %v16532_v19, %v5855_v46 }
 0x2fa   : > { %v6316_v23 = vsel %vm14303_vm10, %v6308_v60, %v6315_v22  ;;  %v6485_v2 = vsel %vm14275_vm4, %v6317_v34, %v6484_v3  ;;  %v16624_v52 = vadd.f32 %v16532_v19, %v5856_v25  ;;  %v16627_v29 = vadd.f32 %v16532_v19, %v5857_v38 }
 0x2fb   : > { %6483 = vst [vmem:[#allocation2 + $0xb8] sm:$0xf] %v6316_v23  ;;  %6486 = vst [vmem:[#allocation2 + $0xbc] sm:$0x1] %v6485_v2  ;;  %v5894_v11 = vadd.f32 %v16532_v19, %v5858_v1  ;;  %v5895_v51 = vadd.f32 %v16532_v19, %v5859_v53  ;;  %v5896_v63 = vadd.f32 %v16532_v19, %v5860_v50  ;;  %v5903_v10 = vmul.f32 0.01, %v5871_v9 }
 0x2fc   : > { %v5897_v41 = vadd.f32 %v16532_v19, %v5861_v62  ;;  %v5898_v15 = vadd.f32 %v16532_v19, %v5862_v13  ;;  %v5901_v45 = vadd.f32 %v16532_v19, %v5865_v40  ;;  %v5902_v5 = vadd.f32 %v16532_v19, %v5866_v59 }
 0x2fd   : > { %v5904_v58 = vmul.f32 0.01, %v5872_v12  ;;  %v5905_v46 = vmul.f32 0.01, %v5873_v6  ;;  %v5906_v25 = vmul.f32 0.01, %v5874_v55  ;;  %v16636_v38 = vor.u32 %v6305_v4, %v6304_v48 }
 0x2fe   : > { %v5907_v1 = vmul.f32 0.01, %v16569_v14  ;;  %v5908_v54 = vmul.f32 0.01, %v16572_v39  ;;  %v5909_v17 = vmul.f32 0.01, %v16575_v24  ;;  %v5935_v53 = vmax.f32 %v5871_v9, %v5903_v10 }
 0x2ff   : > { %19602 = vst [vmem:[#allocation22_spill] sm:$0xff] %v16636_v38  ;;  %v5910_v50 = vmul.f32 0.01, %v16578_v57  ;;  %v5911_v62 = vmul.f32 0.01, %v16581_v7  ;;  %v5936_v19 = vmax.f32 %v5872_v12, %v5904_v58  ;;  %v5937_v8 = vmax.f32 %v5873_v6, %v5905_v46 }
 0x300   : > { %v5912_v13 = vmul.f32 0.01, %v16584_v33  ;;  %v5913_v40 = vmul.f32 0.01, %v16587_v56  ;;  %v5914_v59 = vmul.f32 0.01, %v16590_v35  ;;  %v5938_v32 = vmax.f32 %v5874_v55, %v5906_v25 }
 0x301   : > { %v5915_v61 = vmul.f32 0.01, %v16593_v20  ;;  %v5916_v16 = vmul.f32 0.01, %v16596_v36  ;;  %v5917_v0 = vmul.f32 0.01, %v16599_v31  ;;  %v5939_v42 = vmax.f32 %v16569_v14, %v5907_v1 }
 0x302   : > { %v5918_v9 = vmul.f32 0.01, %v16602_v37  ;;  %v5919_v4 = vmul.f32 0.01, %v16605_v27  ;;  %v5920_v48 = vmul.f32 0.01, %v16608_v18  ;;  %v5940_v22 = vmax.f32 %v16572_v39, %v5908_v54 }
 0x303   : > { %v5921_v12 = vmul.f32 0.01, %v16611_v21  ;;  %v5922_v3 = vmul.f32 0.01, %v16614_v47  ;;  %v5923_v60 = vmul.f32 0.01, %v16617_v49  ;;  %v5941_v2 = vmax.f32 %v16575_v24, %v5909_v17 }
 0x304   : > { %v5924_v6 = vmul.f32 0.01, %v16624_v52  ;;  %v5925_v34 = vmul.f32 0.01, %v16627_v29  ;;  %v5926_v23 = vmul.f32 0.01, %v5894_v11  ;;  %v5942_v25 = vmax.f32 %v16578_v57, %v5910_v50 }
 0x305   : > { %v5927_v55 = vmul.f32 0.01, %v5895_v51  ;;  %v5928_v10 = vmul.f32 0.01, %v5896_v63  ;;  %v5929_v58 = vmul.f32 0.01, %v5897_v41  ;;  %v5943_v26 = vmax.f32 %v16581_v7, %v5911_v62 }
 0x306   : > { %v5930_v46 = vmul.f32 0.01, %v5898_v15  ;;  %v5933_v14 = vmul.f32 0.01, %v5901_v45  ;;  %v5934_v1 = vmul.f32 0.01, %v5902_v5  ;;  %v5944_v43 = vmax.f32 %v16584_v33, %v5912_v13 }
 0x307   : > { %v5945_v30 = vmax.f32 %v16587_v56, %v5913_v40  ;;  %v5946_v39 = vmax.f32 %v16590_v35, %v5914_v59  ;;  %v5947_v54 = vmax.f32 %v16593_v20, %v5915_v61  ;;  %v5948_v38 = vmax.f32 %v16596_v36, %v5916_v16 }
 0x308   : > { %v5949_v24 = vmax.f32 %v16599_v31, %v5917_v0  ;;  %v5950_v17 = vmax.f32 %v16602_v37, %v5918_v9  ;;  %v5951_v57 = vmax.f32 %v16605_v27, %v5919_v4  ;;  %v5952_v50 = vmax.f32 %v16608_v18, %v5920_v48 }
 0x309   : > { %v5953_v7 = vmax.f32 %v16611_v21, %v5921_v12  ;;  %v5954_v33 = vmax.f32 %v16614_v47, %v5922_v3  ;;  %v5955_v56 = vmax.f32 %v16617_v49, %v5923_v60  ;;  %v5956_v35 = vmax.f32 %v16624_v52, %v5924_v6 }
 0x30a   : > { %v5957_v20 = vmax.f32 %v16627_v29, %v5925_v34  ;;  %v5958_v62 = vmax.f32 %v5894_v11, %v5926_v23  ;;  %v5959_v36 = vmax.f32 %v5895_v51, %v5927_v55  ;;  %v5960_v13 = vmax.f32 %v5896_v63, %v5928_v10 }
 0x30b   : > { %v5961_v31 = vmax.f32 %v5897_v41, %v5929_v58  ;;  %v5962_v40 = vmax.f32 %v5898_v15, %v5930_v46  ;;  %v5965_v37 = vmax.f32 %v5901_v45, %v5933_v14  ;;  %v5966_v59 = vmax.f32 %v5902_v5, %v5934_v1 }
 0x30c   : > { %v12320_v27 = vpack.c.bf16 %v5935_v53, %v5935_v53  ;;  %v12321_v61 = vpack.c.bf16 %v5936_v19, %v5936_v19  ;;  %v12322_v18 = vpack.c.bf16 %v5937_v8, %v5937_v8  ;;  %v12323_v16 = vpack.c.bf16 %v5938_v32, %v5938_v32 }
 0x30d   : > { %v12324_v21 = vpack.c.bf16 %v5939_v42, %v5939_v42  ;;  %v12325_v0 = vpack.c.bf16 %v5940_v22, %v5940_v22  ;;  %v16676_v47 = vpack.c.bf16 %v5941_v2, %v5941_v2  ;;  %v16678_v49 = vpack.c.bf16 %v5942_v25, %v5942_v25 }
 0x30e   : > { %v16680_v52 = vpack.c.bf16 %v5943_v26, %v5943_v26  ;;  %v16682_v29 = vpack.c.bf16 %v5944_v43, %v5944_v43  ;;  %v16684_v11 = vpack.c.bf16 %v5945_v30, %v5945_v30  ;;  %v16686_v51 = vpack.c.bf16 %v5946_v39, %v5946_v39 }
 0x30f   : > { %v16688_v63 = vpack.c.bf16 %v5947_v54, %v5947_v54  ;;  %v16690_v41 = vpack.c.bf16 %v5948_v38, %v5948_v38  ;;  %v16692_v15 = vpack.c.bf16 %v5949_v24, %v5949_v24  ;;  %v16694_v45 = vpack.c.bf16 %v5950_v17, %v5950_v17 }
 0x310   : > { %v16696_v5 = vpack.c.bf16 %v5951_v57, %v5951_v57  ;;  %v16698_v53 = vpack.c.bf16 %v5952_v50, %v5952_v50  ;;  %v16700_v26 = vpack.c.bf16 %v5953_v7, %v5953_v7  ;;  %v16702_v43 = vpack.c.bf16 %v5954_v33, %v5954_v33 }
 0x311   : > { %v16704_v30 = vpack.c.bf16 %v5955_v56, %v5955_v56  ;;  %v16706_v19 = vpack.c.bf16 %v5956_v35, %v5956_v35  ;;  %v16708_v8 = vpack.c.bf16 %v5957_v20, %v5957_v20  ;;  %v16710_v38 = vpack.c.bf16 %v5958_v62, %v5958_v62  ;;  %v6452_v35 = vld [vmem:[#allocation2 + $0x84] sm:$0xf] }
 0x312   : > { %v16712_v9 = vpack.c.bf16 %v5959_v36, %v5959_v36  ;;  %v16714_v32 = vpack.c.bf16 %v5960_v13, %v5960_v13  ;;  %v16716_v4 = vpack.c.bf16 %v5961_v31, %v5961_v31  ;;  %v16718_v48 = vpack.c.bf16 %v5962_v40, %v5962_v40 }
 0x313   : > { %v16720_v12 = vpack.c.bf16 %v5965_v37, %v5965_v37  ;;  %v16722_v42 = vpack.c.bf16 %v5966_v59, %v5966_v59  ;;  %v6064_v3 = vshrl.u32 %v12320_v27, 16  ;;  %v6067_v60 = vshll.u32 %v12320_v27, 16 }
 0x314   : > { %v6072_v6 = vshrl.u32 %v12321_v61, 16  ;;  %v6075_v22 = vshll.u32 %v12321_v61, 16  ;;  %v6081_v34 = vshrl.u32 %v12322_v18, 16  ;;  %v6084_v23 = vshll.u32 %v12322_v18, 16 }
 0x315   : > { %v6066_v55 = vrot.slane %v6064_v3, 7  ;;  %v6089_v2 = vshrl.u32 %v12323_v16, 16  ;;  %v6092_v10 = vshll.u32 %v12323_v16, 16  ;;  %v6098_v58 = vshrl.u32 %v12324_v21, 16  ;;  %v13978_v16 = vld [vmem:[#allocation2 + $0xc] sm:$0xf] }
 0x316   : > { %v16724_v46 = vrot.slane %v6072_v6, 7  ;;  %v6083_v25 = vrot.slane %v6081_v34, 7  ;;  %v6101_v14 = vshll.u32 %v12324_v21, 16  ;;  %v6106_v1 = vshrl.u32 %v12325_v0, 16 }
 0x317   : > { %v16726_v39 = vor.u32 %v6067_v60, %v6066_v55  ;;  %v6070_v54 = vrot.slane %v6066_v55, 4  ;;  %v16728_v24 = vrot.slane %v6089_v2, 7  ;;  %v6100_v17 = vrot.slane %v6098_v58, 7 }
 0x318   : > { %v6077_v57 = vor.u32 %v6075_v22, %v16724_v46  ;;  %v16732_v7 = vor.u32 %v6084_v23, %v6083_v25  ;;  %v6087_v33 = vrot.slane %v6083_v25, 4  ;;  %v16740_v13 = vrot.slane %v6106_v1, 7 }
 0x319   : > { %v6094_v56 = vor.u32 %v6092_v10, %v16728_v24  ;;  %v16736_v20 = vor.u32 %v6101_v14, %v6100_v17  ;;  %v6104_v62 = vrot.slane %v6100_v17, 4  ;;  %v6109_v31 = vshll.u32 %v12325_v0, 16 }
 0x31a   : > { %v6078_v36 = vsel %vm14303_vm10, %v6070_v54, %v6077_v57  ;;  %v6115_v40 = vshrl.u32 %v16676_v47, 16  ;;  %v6118_v59 = vshll.u32 %v16676_v47, 16  ;;  %v6123_v27 = vshrl.u32 %v16678_v49, 16 }
 0x31b   : > { %v6095_v37 = vsel %vm14303_vm10, %v6087_v33, %v6094_v56  ;;  %v6126_v61 = vshll.u32 %v16678_v49, 16  ;;  %6385 = vst [vmem:[#allocation2 + $0x10] sm:$0xf] %v6078_v36  ;;  %v6111_v18 = vor.u32 %v6109_v31, %v16740_v13  ;;  %v6132_v3 = vshrl.u32 %v16680_v52, 16 }
 0x31c   : > { %v6117_v21 = vrot.slane %v6115_v40, 7  ;;  %6392 = vst [vmem:[#allocation2 + $0x1c] sm:$0xf] %v6095_v37  ;;  %v16751_v0 = vrot.slane %v6123_v27, 7  ;;  %v6135_v60 = vshll.u32 %v16680_v52, 16  ;;  %v6140_v6 = vshrl.u32 %v16682_v29, 16 }
 0x31d   : > { %v6143_v47 = vshll.u32 %v16682_v29, 16  ;;  %v6112_v49 = vsel %vm14303_vm10, %v6104_v62, %v6111_v18  ;;  %v6134_v23 = vrot.slane %v6132_v3, 7  ;;  %v6149_v58 = vshrl.u32 %v16684_v11, 16  ;;  %v6428_v27 = vld [vmem:[#allocation2 + $0x5c] sm:$0x1] }
 0x31e   : > { %v16758_v22 = vor.u32 %v6118_v59, %v6117_v21  ;;  %v6121_v34 = vrot.slane %v6117_v21, 4  ;;  %v6128_v55 = vor.u32 %v6126_v61, %v16751_v0  ;;  %v16762_v10 = vrot.slane %v6140_v6, 7  ;;  %6399 = vst [vmem:[#allocation2 + $0x28] sm:$0xf] %v6112_v49 }
 0x31f   : > { %v16765_v52 = vor.u32 %v6135_v60, %v6134_v23  ;;  %v6138_v25 = vrot.slane %v6134_v23, 4  ;;  %v6152_v29 = vshll.u32 %v16684_v11, 16  ;;  %v6157_v14 = vshrl.u32 %v16686_v51, 16 }
 0x320   : > { %v6129_v1 = vsel %vm14303_vm10, %v6121_v34, %v6128_v55  ;;  %v6145_v54 = vor.u32 %v6143_v47, %v16762_v10  ;;  %v6151_v57 = vrot.slane %v6149_v58, 7  ;;  %v6160_v56 = vshll.u32 %v16686_v51, 16 }
 0x321   : > { %v16773_v33 = vrot.slane %v6157_v14, 7  ;;  %v6166_v62 = vshrl.u32 %v16688_v63, 16  ;;  %v6169_v36 = vshll.u32 %v16688_v63, 16  ;;  %6406 = vst [vmem:[#allocation2 + $0x34] sm:$0xf] %v6129_v1  ;;  %v6174_v37 = vshrl.u32 %v16690_v41, 16 }
 0x322   : > { %v6146_v11 = vsel %vm14303_vm10, %v6138_v25, %v6145_v54  ;;  %v16780_v31 = vor.u32 %v6152_v29, %v6151_v57  ;;  %v6155_v40 = vrot.slane %v6151_v57, 4  ;;  %v6177_v51 = vshll.u32 %v16690_v41, 16  ;;  %v6421_v57 = vld [vmem:[#allocation2 + $0x50] sm:$0x1]  ;;  %v16882_v41 = vld [vmem:[#allocation2 + $0x60] sm:$0xf] }
 0x323   : > { %v6162_v59 = vor.u32 %v6160_v56, %v16773_v33  ;;  %v6168_v61 = vrot.slane %v6166_v62, 7  ;;  %6413 = vst [vmem:[#allocation2 + $0x40] sm:$0xf] %v6146_v11  ;;  %v16786_v18 = vrot.slane %v6174_v37, 7  ;;  %v6183_v63 = vshrl.u32 %v16692_v15, 16 }
 0x324   : > { %v6186_v21 = vshll.u32 %v16692_v15, 16  ;;  %v6191_v3 = vshrl.u32 %v16694_v45, 16  ;;  %v6194_v49 = vshll.u32 %v16694_v45, 16  ;;  %v6200_v15 = vshrl.u32 %v16696_v5, 16 }
 0x325   : > { %v6163_v60 = vsel %vm14303_vm10, %v6155_v40, %v6162_v59  ;;  %v16793_v6 = vor.u32 %v6169_v36, %v6168_v61  ;;  %v6172_v47 = vrot.slane %v6168_v61, 4  ;;  %v6179_v34 = vor.u32 %v6177_v51, %v16786_v18  ;;  %v6417_v51 = vld [vmem:[#allocation2 + $0x48] sm:$0xf] }
 0x326   : > { %v6185_v23 = vrot.slane %v6183_v63, 7  ;;  %v16798_v55 = vrot.slane %v6191_v3, 7  ;;  %6420 = vst [vmem:[#allocation2 + $0x4c] sm:$0xf] %v6163_v60  ;;  %v6203_v58 = vshll.u32 %v16696_v5, 16  ;;  %v6208_v25 = vshrl.u32 %v16698_v53, 16 }
 0x327   : > { %v6211_v29 = vshll.u32 %v16698_v53, 16  ;;  %v6180_v14 = vsel %vm14303_vm10, %v6172_v47, %v6179_v34  ;;  %v6202_v56 = vrot.slane %v6200_v15, 7  ;;  %v6217_v36 = vshrl.u32 %v16700_v26, 16 }
 0x328   : > { %v16806_v45 = vor.u32 %v6186_v21, %v6185_v23  ;;  %v6189_v1 = vrot.slane %v6185_v23, 4  ;;  %v6196_v54 = vor.u32 %v6194_v49, %v16798_v55  ;;  %v16810_v62 = vrot.slane %v6208_v25, 7  ;;  %6427 = vst [vmem:[#allocation2 + $0x58] sm:$0xf] %v6180_v14 }
 0x329   : > { %v6220_v53 = vshll.u32 %v16700_v26, 16  ;;  %v6225_v11 = vshrl.u32 %v16702_v43, 16  ;;  %v6228_v40 = vshll.u32 %v16702_v43, 16  ;;  %v16818_v37 = vor.u32 %v6203_v58, %v6202_v56 }
 0x32a   : > { %v6197_v5 = vsel %vm14303_vm10, %v6189_v1, %v6196_v54  ;;  %v6206_v59 = vrot.slane %v6202_v56, 4  ;;  %v6213_v61 = vor.u32 %v6211_v29, %v16810_v62  ;;  %v6219_v63 = vrot.slane %v6217_v36, 7 }
 0x32b   : > { %6434 = vst [vmem:[#allocation2 + $0x64] sm:$0xf] %v6197_v5  ;;  %v16822_v21 = vrot.slane %v6225_v11, 7  ;;  %v6234_v3 = vshrl.u32 %v16704_v30, 16  ;;  %v6237_v60 = vshll.u32 %v16704_v30, 16  ;;  %v6242_v43 = vshrl.u32 %v16706_v19, 16 }
 0x32c   : > { %v6214_v26 = vsel %vm14303_vm10, %v6206_v59, %v6213_v61  ;;  %v6245_v47 = vshll.u32 %v16706_v19, 16  ;;  %v6251_v49 = vshrl.u32 %v16708_v8, 16  ;;  %v16831_v34 = vor.u32 %v6220_v53, %v6219_v63  ;;  %v6410_v11 = vld [vmem:[#allocation2 + $0x3c] sm:$0xf] }
 0x32d   : > { %v6223_v23 = vrot.slane %v6219_v63, 4  ;;  %v6230_v15 = vor.u32 %v6228_v40, %v16822_v21  ;;  %6441 = vst [vmem:[#allocation2 + $0x70] sm:$0xf] %v6214_v26  ;;  %v6236_v25 = vrot.slane %v6234_v3, 7  ;;  %v16835_v29 = vrot.slane %v6242_v43, 7 }
 0x32e   : > { %v6253_v30 = vrot.slane %v6251_v49, 7  ;;  %v6254_v14 = vshll.u32 %v16708_v8, 16  ;;  %v6259_v19 = vshrl.u32 %v16710_v38, 16  ;;  %v6262_v54 = vshll.u32 %v16710_v38, 16  ;;  %v6407_v43 = vld [vmem:[#allocation2 + $0x38] sm:$0x1] }
 0x32f   : > { %v6231_v1 = vsel %vm14303_vm10, %v6223_v23, %v6230_v15  ;;  %v6268_v56 = vshrl.u32 %v16712_v9, 16  ;;  %v16843_v36 = vor.u32 %v6237_v60, %v6236_v25  ;;  %v6240_v5 = vrot.slane %v6236_v25, 4 }
 0x330   : > { %v6247_v53 = vor.u32 %v6245_v47, %v16835_v29  ;;  %6448 = vst [vmem:[#allocation2 + $0x7c] sm:$0xf] %v6231_v1  ;;  %v16847_v40 = vor.u32 %v6254_v14, %v6253_v30  ;;  %v6257_v8 = vrot.slane %v6253_v30, 4  ;;  %v16849_v59 = vrot.slane %v6259_v19, 7  ;;  %v6389_v30 = vld [vmem:[#allocation2 + $0x18] sm:$0xf] }
 0x331   : > { %v6270_v61 = vrot.slane %v6268_v56, 7  ;;  %v6271_v38 = vshll.u32 %v16712_v9, 16  ;;  %v6276_v3 = vshrl.u32 %v16714_v32, 16  ;;  %v6279_v60 = vshll.u32 %v16714_v32, 16  ;;  %v6393_v14 = vld [vmem:[#allocation2 + $0x20] sm:$0x1] }
 0x332   : > { %v6248_v63 = vsel %vm14303_vm10, %v6240_v5, %v6247_v53  ;;  %v6264_v26 = vor.u32 %v6262_v54, %v16849_v59  ;;  %v6285_v49 = vshrl.u32 %v16716_v4, 16  ;;  %v6288_v25 = vshll.u32 %v16716_v4, 16  ;;  %v6386_v1 = vld [vmem:[#allocation2 + $0x14] sm:$0x1]  ;;  %v6396_v5 = vld [vmem:[#allocation2 + $0x24] sm:$0xf] }
 0x333   : > { %v6274_v47 = vrot.slane %v6270_v61, 4  ;;  %6455 = vst [vmem:[#allocation2 + $0x88] sm:$0xf] %v6248_v63  ;;  %v16859_v23 = vor.u32 %v6271_v38, %v6270_v61  ;;  %v16861_v15 = vrot.slane %v6276_v3, 7  ;;  %v6293_v9 = vshrl.u32 %v16718_v48, 16 }
 0x334   : > { %v6265_v32 = vsel %vm14303_vm10, %v6257_v8, %v6264_v26  ;;  %v6287_v19 = vrot.slane %v6285_v49, 7  ;;  %v6296_v54 = vshll.u32 %v16718_v48, 16  ;;  %v6319_v56 = vshrl.u32 %v16720_v12, 16  ;;  %v6400_v53 = vld [vmem:[#allocation2 + $0x2c] sm:$0x1] }
 0x335   : > { %v6281_v61 = vor.u32 %v6279_v60, %v16861_v15  ;;  %v16871_v4 = vrot.slane %v6293_v9, 7  ;;  %v6322_v38 = vshll.u32 %v16720_v12, 16  ;;  %6462 = vst [vmem:[#allocation2 + $0x94] sm:$0xf] %v6265_v32  ;;  %v6403_v3 = vld [vmem:[#allocation2 + $0x30] sm:$0xf] }
 0x336   : > { %v6414_v8 = vld [vmem:[#allocation2 + $0x44] sm:$0x1]  ;;  %v16874_v26 = vor.u32 %v6288_v25, %v6287_v19  ;;  %v6291_v48 = vrot.slane %v6287_v19, 4  ;;  %v6321_v49 = vrot.slane %v6319_v56, 7  ;;  %v6327_v58 = vshrl.u32 %v16722_v42, 16 }
 0x337   : > { %19603 = vst [vmem:[#allocation21_spill] sm:$0xff] %v16871_v4  ;;  %v6424_v60 = vld [vmem:[#allocation2 + $0x54] sm:$0xf]  ;;  %v6282_v9 = vsel %vm14303_vm10, %v6274_v47, %v6281_v61  ;;  %v6298_v63 = vor.u32 %v6296_v54, %v16871_v4  ;;  %v6330_v32 = vshll.u32 %v16722_v42, 16  ;;  %v6435_v25 = vld [vmem:[#allocation2 + $0x68] sm:$0x1]  ;;  %v6383_v54 = vsel %vm14318_vm11, %v16726_v39, %v13978_v16 }
 0x338   : > { %v16884_v19 = vld [vmem:[#allocation2 + $0x6c] sm:$0xf]  ;;  %v16886_v56 = vor.u32 %v6322_v38, %v6321_v49  ;;  %v6325_v17 = vrot.slane %v6321_v49, 4  ;;  %v16888_v2 = vrot.slane %v6327_v58, 7  ;;  %6469 = vst [vmem:[#allocation2 + $0xa0] sm:$0xf] %v6282_v9  ;;  %v6390_v49 = vsel %vm14318_vm11, %v16732_v7, %v6389_v30 }
 0x339   : > { %v16893_v61 = vld [vmem:[#allocation2 + $0x78] sm:$0xf]  ;;  %v6449_v42 = vld [vmem:[#allocation2 + $0x80] sm:$0x1]  ;;  %v6442_v12 = vld [vmem:[#allocation2 + $0x74] sm:$0x1]  ;;  %v6299_v50 = vsel %vm14303_vm10, %v6291_v48, %v6298_v63 }
 0x33a   : > { %19604 = vst [vmem:[#allocation30_spill] sm:$0xff] %v16886_v56  ;;  %6384 = vst [vmem:[#allocation2 + $0xc] sm:$0xf] %v6383_v54  ;;  %v19606_v38 = vrot.slane %v16724_v46, 4  ;;  %v19607_v39 = vrot.slane %v16728_v24, 4  ;;  %v6332_v63 = vor.u32 %v6330_v32, %v16888_v2  ;;  %v6334_v46 = vrot.slane %v16888_v2, 4 }
 0x33b   : > { %v16908_v9 = vld [vmem:[#allocation2 + $0x90] sm:$0xf]  ;;  %v6463_v56 = vld [vmem:[#allocation2 + $0x98] sm:$0x1]  ;;  %v6456_v4 = vld [vmem:[#allocation2 + $0x8c] sm:$0x1] }
 0x33c   : > { %v6387_v58 = vsel %vm14275_vm4, %v19606_v38, %v6386_v1  ;;  %v6394_v16 = vsel %vm14275_vm4, %v19607_v39, %v6393_v14  ;;  %v6397_v1 = vsel %vm14318_vm11, %v16736_v20, %v6396_v5  ;;  %v19608_v7 = vrot.slane %v16740_v13, 4  ;;  %6476 = vst [vmem:[#allocation2 + $0xac] sm:$0xf] %v6299_v50  ;;  %6391 = vst [vmem:[#allocation2 + $0x18] sm:$0xf] %v6390_v49  ;;  %v13865_v2 = vld [vmem:[#allocation6 + $0x330] sm:$0xff]  }
 0x33d   : > { %6388 = vst [vmem:[#allocation2 + $0x14] sm:$0x1] %v6387_v58  ;;  %6395 = vst [vmem:[#allocation2 + $0x20] sm:$0x1] %v6394_v16  ;;  %v6473_v30 = vld [vmem:[#allocation2 + $0xa8] sm:$0xf]  ;;  %v6404_v14 = vsel %vm14318_vm11, %v16758_v22, %v6403_v3  ;;  %v6411_v20 = vsel %vm14318_vm11, %v16765_v52, %v6410_v11 }
 0x33e   : > { %v6401_v24 = vsel %vm14275_vm4, %v19608_v7, %v6400_v53  ;;  %v19609_v48 = vrot.slane %v16751_v0, 4  ;;  %v19610_v13 = vrot.slane %v16762_v10, 4  ;;  %6398 = vst [vmem:[#allocation2 + $0x24] sm:$0xf] %v6397_v1  ;;  %v6466_v5 = vld [vmem:[#allocation2 + $0x9c] sm:$0xf]  ;;  %v6333_v53 = vsel %vm14303_vm10, %v6325_v17, %v6332_v63 }
 0x33f   : > { %6402 = vst [vmem:[#allocation2 + $0x2c] sm:$0x1] %v6401_v24  ;;  %v6418_v0 = vsel %vm14318_vm11, %v16780_v31, %v6417_v51  ;;  %v19611_v22 = vrot.slane %v16773_v33, 4  ;;  %v6425_v10 = vsel %vm14318_vm11, %v16793_v6, %v6424_v60  ;;  %6405 = vst [vmem:[#allocation2 + $0x30] sm:$0xf] %v6404_v14  ;;  %v6432_v33 = vsel %vm14318_vm11, %v16806_v45, %v16882_v41 }
 0x340   : > { %v6408_v32 = vsel %vm14275_vm4, %v19609_v48, %v6407_v43  ;;  %v6415_v50 = vsel %vm14275_vm4, %v19610_v13, %v6414_v8  ;;  %6412 = vst [vmem:[#allocation2 + $0x3c] sm:$0xf] %v6411_v20  ;;  %v6477_v11 = vld [vmem:[#allocation2 + $0xb0] sm:$0x1]  ;;  %v6480_v17 = vld [vmem:[#allocation2 + $0xb4] sm:$0xf]  ;;  %v6439_v51 = vsel %vm14318_vm11, %v16818_v37, %v16884_v19  ;;  %v6453_v8 = vsel %vm14318_vm11, %v16843_v36, %v6452_v35 }
 0x341   : > { %6409 = vst [vmem:[#allocation2 + $0x38] sm:$0x1] %v6408_v32  ;;  %6416 = vst [vmem:[#allocation2 + $0x44] sm:$0x1] %v6415_v50  ;;  %v6422_v52 = vsel %vm14275_vm4, %v19611_v22, %v6421_v57  ;;  %v19612_v43 = vrot.slane %v16786_v18, 4  ;;  %v19613_v57 = vrot.slane %v16798_v55, 4  ;;  %v6446_v55 = vsel %vm14318_vm11, %v16831_v34, %v16893_v61 }
 0x342   : > { %6423 = vst [vmem:[#allocation2 + $0x50] sm:$0x1] %v6422_v52  ;;  %6490 = vst [vmem:[#allocation2 + $0xc4] sm:$0xf] %v6333_v53  ;;  %v6487_v18 = vld [vmem:[#allocation2 + $0xc0] sm:$0xf]  ;;  %v6467_v35 = vsel %vm14318_vm11, %v16859_v23, %v6466_v5 }
 0x343   : > { %v6429_v31 = vsel %vm14275_vm4, %v19612_v43, %v6428_v27  ;;  %v6436_v6 = vsel %vm14275_vm4, %v19613_v57, %v6435_v25  ;;  %6419 = vst [vmem:[#allocation2 + $0x48] sm:$0xf] %v6418_v0  ;;  %6426 = vst [vmem:[#allocation2 + $0x54] sm:$0xf] %v6425_v10  ;;  %v6491_v27 = vld [vmem:[#allocation2 + $0xc8] sm:$0x1] }
 0x344   : > { %6430 = vst [vmem:[#allocation2 + $0x5c] sm:$0x1] %v6429_v31  ;;  %6437 = vst [vmem:[#allocation2 + $0x68] sm:$0x1] %v6436_v6  ;;  %v19614_v3 = vrot.slane %v16810_v62, 4  ;;  %v19615_v45 = vrot.slane %v16822_v21, 4  ;;  %v6460_v21 = vsel %vm14318_vm11, %v16847_v40, %v16908_v9 }
 0x345   : > { %6433 = vst [vmem:[#allocation2 + $0x60] sm:$0xf] %v6432_v33  ;;  %6440 = vst [vmem:[#allocation2 + $0x6c] sm:$0xf] %v6439_v51  ;;  %v19616_v62 = vrot.slane %v16835_v29, 4  ;;  %v19617_v34 = vrot.slane %v16849_v59, 4  ;;  %v6474_v59 = vsel %vm14318_vm11, %v16874_v26, %v6473_v30 }
 0x346   : > { %v6443_v41 = vsel %vm14275_vm4, %v19614_v3, %v6442_v12  ;;  %v6450_v37 = vsel %vm14275_vm4, %v19615_v45, %v6449_v42  ;;  %6447 = vst [vmem:[#allocation2 + $0x78] sm:$0xf] %v6446_v55  ;;  %6454 = vst [vmem:[#allocation2 + $0x84] sm:$0xf] %v6453_v8  ;;  %v16991_v29 = vld [vmem:[#allocation2 + $0x10] sm:$0xf]  ;;  %v6492_v42 = vsel %vm14275_vm4, %v6334_v46, %v6491_v27 }
 0x347   : > { %6444 = vst [vmem:[#allocation2 + $0x74] sm:$0x1] %v6443_v41  ;;  %6451 = vst [vmem:[#allocation2 + $0x80] sm:$0x1] %v6450_v37  ;;  %v6457_v60 = vsel %vm14275_vm4, %v19616_v62, %v6456_v4  ;;  %v6464_v12 = vsel %vm14275_vm4, %v19617_v34, %v6463_v56  ;;  %v19618_v36 = vrot.slane %v16861_v15, 4  ;;  %v19619_v4 = vld [vmem:[#allocation21_spill] sm:$0xff] }
 0x348   : > { %6458 = vst [vmem:[#allocation2 + $0x8c] sm:$0x1] %v6457_v60  ;;  %6465 = vst [vmem:[#allocation2 + $0x98] sm:$0x1] %v6464_v12  ;;  %v19620_v25 = vrot.slane %v19619_v4, 4  ;;  %v19621_v19 = vld [vmem:[#allocation22_spill] sm:$0xff] }
 0x349   : > { %v6471_v40 = vsel %vm14275_vm4, %v19618_v36, %v6470_v44  ;;  %v6481_v56 = vsel %vm14318_vm11, %v19621_v19, %v6480_v17  ;;  %6461 = vst [vmem:[#allocation2 + $0x90] sm:$0xf] %v6460_v21  ;;  %6468 = vst [vmem:[#allocation2 + $0x9c] sm:$0xf] %v6467_v35  ;;  %v6496_v54 = vld [vmem:[#allocation2 + $0xc] sm:$0xf] }
 0x34a   : > { %v6478_v23 = vsel %vm14275_vm4, %v19620_v25, %v6477_v11  ;;  %v17007_v15 = vld [vmem:[#allocation2 + $0x1c] sm:$0xf]  ;;  %6472 = vst [vmem:[#allocation2 + $0xa4] sm:$0x1] %v6471_v40  ;;  %v19622_v61 = vld [vmem:[#allocation30_spill] sm:$0xff]  ;;  %v6601_v38 = vshrl.u32 %v6496_v54, 16  ;;  %v12043_v9 = vcombine.low %v6496_v54, %v16991_v29 }
 0x34b   : > { %6479 = vst [vmem:[#allocation2 + $0xb0] sm:$0x1] %v6478_v23  ;;  %v6488_v26 = vsel %vm14318_vm11, %v19622_v61, %v6487_v18  ;;  %6475 = vst [vmem:[#allocation2 + $0xa8] sm:$0xf] %v6474_v59  ;;  %v6604_v58 = vshll.u32 %v6496_v54, 16  ;;  %v6614_v16 = vshrl.u32 %v16991_v29, 16 }
 0x34c   : > { %6482 = vst [vmem:[#allocation2 + $0xb4] sm:$0xf] %v6481_v56  ;;  %v6498_v49 = vld [vmem:[#allocation2 + $0x18] sm:$0xf]  ;;  %v17016_v39 = vld [vmem:[#allocation2 + $0x28] sm:$0xf]  ;;  %13282 = vmatmul.mubr.bf16.vlgmr.msra.gmra.mxu0 %v12043_v9 }
 0x34d   : > { %6493 = vst [vmem:[#allocation2 + $0xc8] sm:$0x1] %v6492_v42  ;;  %6489 = vst [vmem:[#allocation2 + $0xc0] sm:$0xf] %v6488_v26  ;;  %v6625_v47 = vshrl.u32 %v6498_v49, 16  ;;  %v6628_v63 = vshll.u32 %v6498_v49, 16  ;;  %v12044_v24 = vcombine.low %v6498_v49, %v17007_v15 }
 0x34e   : > { %v6500_v1 = vld [vmem:[#allocation2 + $0x24] sm:$0xf]  ;;  %v6603_v7 = vrot.slane %v6601_v38, 4  ;;  %v6606_v28 = vrot.slane %v6604_v58, 5  ;;  %v6638_v46 = vshrl.u32 %v17007_v15, 16  ;;  %v6662_v50 = vshrl.u32 %v17016_v39, 16 }
 0x34f   : > { %v17022_v30 = vld [vmem:[#allocation2 + $0x14] sm:$0x1]  ;;  %v6627_v14 = vrot.slane %v6625_v47, 4  ;;  %v6630_v48 = vrot.slane %v6628_v63, 5  ;;  %v6649_v32 = vshrl.u32 %v6500_v1, 16  ;;  %v6652_v20 = vshll.u32 %v6500_v1, 16  ;;  %13285 = vmatprep.mubr.bf16.mxu0 %v12044_v24 }
 0x350   : > { %v6502_v13 = vld [vmem:[#allocation2 + $0x30] sm:$0xf]  ;;  %v12045_v5 = vcombine.low %v6500_v1, %v17016_v39  ;;  %v6607_v53 = vor.u32 %v6606_v28, %v6603_v7  ;;  %v6610_v0 = vshll.u32 %v16991_v29, 16  ;;  %v17027_v22 = vld [vmem:[#allocation2 + $0x34] sm:$0xf]  ;;  %v6616_v44 = vrot.slane %v6614_v16, 4 }
 0x351   : > { %v19623_v52 = vld [vmem:[#allocation19_spill] sm:$0xff]  ;;  %v6651_v10 = vrot.slane %v6649_v32, 4  ;;  %v6654_v11 = vrot.slane %v6652_v20, 5  ;;  %v6620_v17 = vshll.u32 %v17022_v30, 16  ;;  %v13867_v43 = vld [vmem:[#allocation6 + $0x328] sm:$0xff]   ;;  %v6673_v57 = vshrl.u32 %v6502_v13, 16 }
 0x352   : > { %13362 = vmatpush3.bf16.msra.mxu0 %v19623_v52  ;;  %v6608_v31 = vrot.slane %v6607_v53, 4  ;;  %v6612_v33 = vrot.slane %v6610_v0, 5  ;;  %v6676_v6 = vshll.u32 %v6502_v13, 16  ;;  %v17031_v51 = vld [vmem:[#allocation2 + $0x20] sm:$0x1]  ;;  %v6686_v27 = vshrl.u32 %v17027_v22, 16 }
 0x353   : > { %13363 = vmatprep.subr.bf16.mxu0 %v13865_v2  ;;  %v6622_v18 = vrot.slane %v6620_v17, 5  ;;  %v12046_v3 = vcombine.low %v6502_v13, %v17027_v22  ;;  %v6631_v41 = vor.u32 %v6630_v48, %v6627_v14  ;;  %v17035_v55 = vld [vmem:[#allocation2 + $0x3c] sm:$0xf]  ;;  %v17037_v45 = vld [vmem:[#allocation2 + $0x40] sm:$0xf]  ;;  %v17041_v60 = vrot.slane %v6673_v57, 4 }
 0x354   : > { %v6613_v8 = vsel %vm14296_vm9, %v6608_v31, %v6612_v33  ;;  %v6617_v62 = vor.u32 %v6616_v44, %v6612_v33  ;;  %v17043_v21 = vrot.slane %v6676_v6, 5  ;;  %v6634_v12 = vshll.u32 %v17007_v15, 16  ;;  %v13870_v40 = vld [vmem:[#allocation6 + $0x320] sm:$0xff]   ;;  %13286 = vmatmul.mubr.bf16.gmra.mxu0 %v12045_v5  ;;  %v17052_v61 = vld [vmem:[#allocation2 + $0x2c] sm:$0x1]  ;;  %v13872_v28 = vld [vmem:[#allocation6 + $0x318] sm:$0xff]  }
 0x355   : > { %v6632_v34 = vrot.slane %v6631_v41, 4  ;;  %v6640_v35 = vrot.slane %v6638_v46, 4  ;;  %v6644_v36 = vshll.u32 %v17031_v51, 16  ;;  %v6697_v4 = vshrl.u32 %v17035_v55, 16  ;;  %v6506_v42 = vld [vmem:[#allocation2 + $0x48] sm:$0xf]  ;;  %13289 = vmatprep.mubr.bf16.mxu0 %v12046_v3 }
 0x356   : > { %13364 = vmatpush3.bf16.msra.mxu0 %v13865_v2  ;;  %v6618_v59 = vrot.slane %v6617_v62, 4  ;;  %v6700_v25 = vshll.u32 %v17035_v55, 16  ;;  %v6710_v23 = vshrl.u32 %v17037_v45, 16  ;;  %v6636_v19 = vrot.slane %v6634_v12, 5  ;;  %v17061_v9 = vld [vmem:[#allocation2 + $0x4c] sm:$0xf] }
 0x357   : > { %13365 = vmatprep.subr.bf16.mxu0 %v13867_v43  ;;  %v6646_v56 = vrot.slane %v6644_v36, 5  ;;  %v12047_v54 = vcombine.low %v17035_v55, %v17037_v45  ;;  %v6655_v26 = vor.u32 %v6654_v11, %v6651_v10  ;;  %v17056_v58 = vrot.slane %v6697_v4, 4  ;;  %v13857_v7 = vld [vmem:[#allocation6 + $0x2f0] sm:$0xff]   ;;  %v17068_v53 = vld [vmem:[#allocation2 + $0x38] sm:$0x1]  ;;  %v13979_v0 = vld [vmem:[#allocation6 + $0x2f8] sm:$0xff]  }
 0x358   : > { %v6623_v38 = vsel %vm14296_vm9, %v6618_v59, %v6622_v18  ;;  %v17058_v49 = vrot.slane %v6700_v25, 5  ;;  %v6658_v16 = vshll.u32 %v17016_v39, 16  ;;  %v6637_v63 = vsel %vm14296_vm9, %v6632_v34, %v6636_v19  ;;  %v17074_v44 = vld [vmem:[#allocation2 + $0x54] sm:$0xf]  ;;  %v17083_v57 = vld [vmem:[#allocation2 + $0x58] sm:$0xf] }
 0x359   : > { %v12019_v47 = vcombine.low %v6613_v8, %v6623_v38  ;;  %v6641_v1 = vor.u32 %v6640_v35, %v6636_v19  ;;  %v6656_v2 = vrot.slane %v6655_v26, 4  ;;  %v6664_v24 = vrot.slane %v6662_v50, 4  ;;  %v13860_v55 = vld [vmem:[#allocation6 + $0x2e8] sm:$0xff]   ;;  %v13875_v8 = vld [vmem:[#allocation6 + $0x310] sm:$0xff]   ;;  %v13864_v26 = vld [vmem:[#allocation6 + $0x2e0] sm:$0xff]  }
 0x35a   : > { %13366 = vmatpush3.bf16.msra.mxu0 %v13867_v43  ;;  %v6660_v46 = vrot.slane %v6658_v16, 5  ;;  %v6668_v14 = vshll.u32 %v17052_v61, 16  ;;  %v6721_v48 = vshrl.u32 %v6506_v42, 16  ;;  %v6724_v20 = vshll.u32 %v6506_v42, 16  ;;  %v17092_v35 = vld [vmem:[#allocation2 + $0x64] sm:$0xf] }
 0x35b   : > { %13367 = vmatprep.subr.bf16.mxu0 %v13870_v40  ;;  %13234 = vmatmul.mubr.bf16.vlgmr.msra.gmra.mxu1 %v12019_v47  ;;  %v6642_v32 = vrot.slane %v6641_v1, 4  ;;  %v6734_v13 = vshrl.u32 %v17061_v9, 16  ;;  %v12048_v5 = vcombine.low %v6506_v42, %v17061_v9  ;;  %v6679_v31 = vor.u32 %v17043_v21, %v17041_v60  ;;  %v17090_v21 = vld [vmem:[#allocation2 + $0x44] sm:$0x1]  ;;  %v6510_v4 = vld [vmem:[#allocation2 + $0x60] sm:$0xf] }
 0x35c   : > { %13314 = vmatpush3.bf16.msra.mxu1 %v13979_v0  ;;  %v6661_v52 = vsel %vm14296_vm9, %v6656_v2, %v6660_v46  ;;  %v6665_v10 = vor.u32 %v6664_v24, %v6660_v46  ;;  %v6670_v11 = vrot.slane %v6668_v14, 5  ;;  %v17072_v50 = vrot.slane %v6721_v48, 4  ;;  %13290 = vmatmul.mubr.bf16.gmra.mxu0 %v12047_v54  ;;  %v13877_v1 = vld [vmem:[#allocation6 + $0x308] sm:$0xff]   ;;  %v17113_v24 = vld [vmem:[#allocation2 + $0x70] sm:$0xf] }
 0x35d   : > { %v6647_v17 = vsel %vm14296_vm9, %v6642_v32, %v6646_v56  ;;  %v17078_v43 = vrot.slane %v6724_v20, 5  ;;  %13315 = vmatprep.subr.bf16.mxu1 %v13857_v7  ;;  %v6682_v33 = vshll.u32 %v17027_v22, 16  ;;  %v6688_v3 = vrot.slane %v6686_v27, 4  ;;  %13293 = vmatprep.mubr.bf16.mxu0 %v12048_v5 }
 0x35e   : > { %13368 = vmatpush3.bf16.msra.mxu0 %v13870_v40  ;;  %v12020_v6 = vcombine.low %v6637_v63, %v6647_v17  ;;  %v6666_v18 = vrot.slane %v6665_v10, 4  ;;  %v6692_v41 = vshll.u32 %v17068_v53, 16  ;;  %v6680_v62 = vrot.slane %v6679_v31, 4  ;;  %v17110_v63 = vld [vmem:[#allocation2 + $0x50] sm:$0x1]  ;;  %v13880_v31 = vld [vmem:[#allocation6 + $0x300] sm:$0xff]  }
 0x35f   : > { %13369 = vmatprep.subr.bf16.mxu0 %v13872_v28  ;;  %v6684_v34 = vrot.slane %v6682_v33, 5  ;;  %v6745_v12 = vshrl.u32 %v17074_v44, 16  ;;  %v6748_v60 = vshll.u32 %v17074_v44, 16  ;;  %v6758_v40 = vshrl.u32 %v17083_v57, 16  ;;  %v13869_v17 = vld [vmem:[#allocation6 + $0x2d8] sm:$0xff]  }
 0x360   : > { %13237 = vmatprep.mubr.bf16.mxu1 %v12020_v6  ;;  %v6671_v36 = vsel %vm14296_vm9, %v6666_v18, %v6670_v11  ;;  %v6694_v27 = vrot.slane %v6692_v41, 5  ;;  %v12049_v59 = vcombine.low %v17074_v44, %v17083_v57  ;;  %13316 = vmatpush3.bf16.msra.mxu1 %v13857_v7  ;;  %v6703_v38 = vor.u32 %v17058_v49, %v17056_v58  ;;  %v17134_v41 = vld [vmem:[#allocation2 + $0x5c] sm:$0x1] }
 0x361   : > { %v12021_v25 = vcombine.low %v6661_v52, %v6671_v36  ;;  %v6685_v19 = vsel %vm14296_vm9, %v6680_v62, %v6684_v34  ;;  %v6689_v56 = vor.u32 %v6688_v3, %v6684_v34  ;;  %v17101_v54 = vrot.slane %v6745_v12, 4  ;;  %13317 = vmatprep.subr.bf16.mxu1 %v13860_v55  ;;  %v6514_v62 = vld [vmem:[#allocation2 + $0x78] sm:$0xf]  ;;  %v17142_v36 = vld [vmem:[#allocation6 + $0x3b8] sm:$0xff]  }
 0x362   : > { %13370 = vmatpush3.bf16.msra.mxu0 %v13872_v28  ;;  %v17103_v42 = vrot.slane %v6748_v60, 5  ;;  %v6706_v16 = vshll.u32 %v17037_v45, 16  ;;  %v6712_v47 = vrot.slane %v6710_v23, 4  ;;  %v6716_v7 = vshll.u32 %v17090_v21, 16  ;;  %v17117_v23 = vld [vmem:[#allocation2 + $0x6c] sm:$0xf] }
 0x363   : > { %13371 = vmatprep.subr.bf16.mxu0 %v13875_v8  ;;  %13238 = vmatmul.mubr.bf16.gmra.mxu1 %v12021_v25  ;;  %v6690_v2 = vrot.slane %v6689_v56, 4  ;;  %v6769_v28 = vshrl.u32 %v6510_v4, 16  ;;  %v6772_v46 = vshll.u32 %v6510_v4, 16  ;;  %v6704_v14 = vrot.slane %v6703_v38, 4 }
 0x364   : > { %v6708_v58 = vrot.slane %v6706_v16, 5  ;;  %v6782_v49 = vshrl.u32 %v17092_v35, 16  ;;  %v12050_v48 = vcombine.low %v6510_v4, %v17092_v35  ;;  %v6718_v20 = vrot.slane %v6716_v7, 5  ;;  %13318 = vmatpush3.bf16.msra.mxu1 %v13860_v55  ;;  %13294 = vmatmul.mubr.bf16.gmra.mxu0 %v12049_v59 }
 0x365   : > { %v6695_v32 = vsel %vm14296_vm9, %v6690_v2, %v6694_v27  ;;  %v17121_v5 = vrot.slane %v6769_v28, 4  ;;  %v17123_v0 = vrot.slane %v6772_v46, 5  ;;  %v6727_v44 = vor.u32 %v17078_v43, %v17072_v50  ;;  %13319 = vmatprep.subr.bf16.mxu1 %v13864_v26 }
 0x366   : > { %13372 = vmatpush3.bf16.msra.mxu0 %v13875_v8  ;;  %v12022_v52 = vcombine.low %v6685_v19, %v6695_v32  ;;  %v6709_v10 = vsel %vm14296_vm9, %v6704_v14, %v6708_v58  ;;  %v6713_v11 = vor.u32 %v6712_v47, %v6708_v58  ;;  %v6730_v33 = vshll.u32 %v17061_v9, 16  ;;  %13297 = vmatprep.mubr.bf16.mxu0 %v12050_v48  ;;  %v17151_v19 = vld [vmem:[#allocation2 + $0x7c] sm:$0xf]  ;;  %v13874_v47 = vld [vmem:[#allocation6 + $0x2d0] sm:$0xff]   ;;  %v13878_v48 = vld [vmem:[#allocation6 + $0x2c8] sm:$0xff]  }
 0x367   : > { %v6736_v6 = vrot.slane %v6734_v13, 4  ;;  %v6740_v18 = vshll.u32 %v17110_v63, 16  ;;  %v6793_v3 = vshrl.u32 %v17117_v23, 16  ;;  %13373 = vmatprep.subr.bf16.mxu0 %v13877_v1  ;;  %v6728_v50 = vrot.slane %v6727_v44, 4 }
 0x368   : > { %13241 = vmatprep.mubr.bf16.mxu1 %v12022_v52  ;;  %v6714_v55 = vrot.slane %v6713_v11, 4  ;;  %v6796_v43 = vshll.u32 %v17117_v23, 16  ;;  %v6806_v8 = vshrl.u32 %v17113_v24, 16  ;;  %v6732_v34 = vrot.slane %v6730_v33, 5  ;;  %13320 = vmatpush3.bf16.msra.mxu1 %v13864_v26  ;;  %v6516_v52 = vld [vmem:[#allocation2 + $0x84] sm:$0xf] }
 0x369   : > { %v6742_v12 = vrot.slane %v6740_v18, 5  ;;  %v17138_v60 = vrot.slane %v6793_v3, 4  ;;  %v12051_v13 = vcombine.low %v17117_v23, %v17113_v24  ;;  %v6751_v4 = vor.u32 %v17103_v42, %v17101_v54  ;;  %13321 = vmatprep.subr.bf16.mxu1 %v13869_v17  ;;  %v17158_v42 = vld [vmem:[#allocation2 + $0x68] sm:$0x1] }
 0x36a   : > { %13374 = vmatpush3.bf16.msra.mxu0 %v13877_v1  ;;  %v6719_v27 = vsel %vm14296_vm9, %v6714_v55, %v6718_v20  ;;  %v17146_v59 = vrot.slane %v6796_v43, 5  ;;  %v6754_v25 = vshll.u32 %v17083_v57, 16  ;;  %v6733_v26 = vsel %vm14296_vm9, %v6728_v50, %v6732_v34  ;;  %v17174_v33 = vld [vmem:[#allocation2 + $0x88] sm:$0xf] }
 0x36b   : > { %13375 = vmatprep.subr.bf16.mxu0 %v13880_v31  ;;  %v12023_v56 = vcombine.low %v6709_v10, %v6719_v27  ;;  %v6737_v38 = vor.u32 %v6736_v6, %v6732_v34  ;;  %v6760_v16 = vrot.slane %v6758_v40, 4  ;;  %v6752_v1 = vrot.slane %v6751_v4, 4  ;;  %v17179_v34 = vld [vmem:[#allocation2 + $0x74] sm:$0x1] }
 0x36c   : > { %v6756_v2 = vrot.slane %v6754_v25, 5  ;;  %v6764_v7 = vshll.u32 %v17134_v41, 16  ;;  %v6817_v54 = vshrl.u32 %v6514_v62, 16  ;;  %v6820_v46 = vshll.u32 %v6514_v62, 16  ;;  %13322 = vmatpush3.bf16.msra.mxu1 %v13869_v17  ;;  %13298 = vmatmul.mubr.bf16.gmra.mxu0 %v12051_v13 }
 0x36d   : > { %13242 = vmatmul.mubr.bf16.gmra.mxu1 %v12023_v56  ;;  %v6738_v28 = vrot.slane %v6737_v38, 4  ;;  %v6830_v14 = vshrl.u32 %v17151_v19, 16  ;;  %v12052_v58 = vcombine.low %v6514_v62, %v17151_v19  ;;  %v6775_v44 = vor.u32 %v17123_v0, %v17121_v5  ;;  %13323 = vmatprep.subr.bf16.mxu1 %v13874_v47  ;;  %v17181_v5 = vld [vmem:[#allocation2 + $0x94] sm:$0xf]  ;;  %v13882_v38 = vld [vmem:[#allocation6 + $0x2c0] sm:$0xff]  }
 0x36e   : > { %13376 = vmatpush3.bf16.msra.mxu0 %v13880_v31  ;;  %v6757_v40 = vsel %vm14296_vm9, %v6752_v1, %v6756_v2  ;;  %v6761_v23 = vor.u32 %v6760_v16, %v6756_v2  ;;  %v6766_v32 = vrot.slane %v6764_v7, 5  ;;  %v17164_v20 = vrot.slane %v6817_v54, 4 }
 0x36f   : > { %13457 = vmatprep.subr.bf16.mxu0 %v17142_v36  ;;  %v6743_v10 = vsel %vm14296_vm9, %v6738_v28, %v6742_v12  ;;  %v17169_v11 = vrot.slane %v6820_v46, 5  ;;  %v6778_v31 = vshll.u32 %v17092_v35, 16  ;;  %13301 = vmatprep.mubr.bf16.mxu0 %v12052_v58  ;;  %v6784_v17 = vrot.slane %v6782_v49, 4  ;;  %v6518_v49 = vld [vmem:[#allocation2 + $0x90] sm:$0xf] }
 0x370   : > { %v12024_v6 = vcombine.low %v6733_v26, %v6743_v10  ;;  %v6762_v18 = vrot.slane %v6761_v23, 4  ;;  %v6788_v3 = vshll.u32 %v17158_v42, 16  ;;  %v6776_v55 = vrot.slane %v6775_v44, 4  ;;  %13324 = vmatpush3.bf16.msra.mxu1 %v13874_v47  ;;  %v17195_v58 = vld [vmem:[#allocation2 + $0x80] sm:$0x1] }
 0x371   : > { %v6780_v50 = vrot.slane %v6778_v31, 5  ;;  %v6841_v43 = vshrl.u32 %v6516_v52, 16  ;;  %v6844_v62 = vshll.u32 %v6516_v52, 16  ;;  %v6854_v13 = vshrl.u32 %v17174_v33, 16  ;;  %13325 = vmatprep.subr.bf16.mxu1 %v13878_v48  ;;  %v17201_v31 = vld [vmem:[#allocation2 + $0xa0] sm:$0xf] }
 0x372   : > { %13245 = vmatprep.mubr.bf16.mxu1 %v12024_v6  ;;  %v6767_v0 = vsel %vm14296_vm9, %v6762_v18, %v6766_v32  ;;  %v6790_v12 = vrot.slane %v6788_v3, 5  ;;  %v12053_v27 = vcombine.low %v6516_v52, %v17174_v33  ;;  %v6799_v1 = vor.u32 %v17146_v59, %v17138_v60  ;;  %v6520_v60 = vld [vmem:[#allocation2 + $0x9c] sm:$0xf]  ;;  %v17203_v6 = vld [vmem:[#allocation6 + $0x378] sm:$0xff]  }
 0x373   : > { %v12025_v4 = vcombine.low %v6757_v40, %v6767_v0  ;;  %v6781_v25 = vsel %vm14296_vm9, %v6776_v55, %v6780_v50  ;;  %v6785_v56 = vor.u32 %v6784_v17, %v6780_v50  ;;  %v6843_v26 = vrot.slane %v6841_v43, 4 }
 0x374   : > { %v6846_v16 = vrot.slane %v6844_v62, 5  ;;  %v6802_v2 = vshll.u32 %v17113_v24, 16  ;;  %v6808_v7 = vrot.slane %v6806_v8, 4  ;;  %v6812_v47 = vshll.u32 %v17179_v34, 16  ;;  %13326 = vmatpush3.bf16.msra.mxu1 %v13878_v48  ;;  %13302 = vmatmul.mubr.bf16.gmra.mxu0 %v12053_v27 }
 0x375   : > { %13246 = vmatmul.mubr.bf16.gmra.mxu1 %v12025_v4  ;;  %v6786_v54 = vrot.slane %v6785_v56, 4  ;;  %v6865_v28 = vshrl.u32 %v6518_v49, 16  ;;  %v6868_v46 = vshll.u32 %v6518_v49, 16  ;;  %v6800_v40 = vrot.slane %v6799_v1, 4  ;;  %13327 = vmatprep.subr.bf16.mxu1 %v13882_v38  ;;  %v17214_v4 = vld [vmem:[#allocation2 + $0x8c] sm:$0x1] }
 0x376   : > { %v6804_v23 = vrot.slane %v6802_v2, 5  ;;  %v6878_v32 = vshrl.u32 %v17181_v5, 16  ;;  %v12054_v52 = vcombine.low %v6518_v49, %v17181_v5  ;;  %v6814_v8 = vrot.slane %v6812_v47, 5  ;;  %v6522_v1 = vld [vmem:[#allocation2 + $0xa8] sm:$0xf] }
 0x377   : > { %v6791_v59 = vsel %vm14296_vm9, %v6786_v54, %v6790_v12  ;;  %v6867_v10 = vrot.slane %v6865_v28, 4  ;;  %v6870_v44 = vrot.slane %v6868_v46, 5  ;;  %v6823_v48 = vor.u32 %v17169_v11, %v17164_v20  ;;  %v17223_v47 = vld [vmem:[#allocation2 + $0xac] sm:$0xf] }
 0x378   : > { %v12026_v18 = vcombine.low %v6781_v25, %v6791_v59  ;;  %v6805_v17 = vsel %vm14296_vm9, %v6800_v40, %v6804_v23  ;;  %v6809_v3 = vor.u32 %v6808_v7, %v6804_v23  ;;  %13305 = vmatprep.mubr.bf16.mxu0 %v12054_v52  ;;  %v6826_v55 = vshll.u32 %v17151_v19, 16  ;;  %13328 = vmatpush3.bf16.msra.mxu1 %v13882_v38 }
 0x379   : > { %v6832_v50 = vrot.slane %v6830_v14, 4  ;;  %v6836_v43 = vshll.u32 %v17195_v58, 16  ;;  %v6889_v62 = vshrl.u32 %v6520_v60, 16  ;;  %v6824_v12 = vrot.slane %v6823_v48, 4  ;;  %13409 = vmatprep.subr.bf16.mxu1 %v17203_v6 }
 0x37a   : > { %13249 = vmatprep.mubr.bf16.mxu1 %v12026_v18  ;;  %v6810_v0 = vrot.slane %v6809_v3, 4  ;;  %v6892_v27 = vshll.u32 %v6520_v60, 16  ;;  %v6902_v49 = vshrl.u32 %v17201_v31, 16  ;;  %v6828_v25 = vrot.slane %v6826_v55, 5 }
 0x37b   : > { %v6838_v56 = vrot.slane %v6836_v43, 5  ;;  %v17216_v20 = vrot.slane %v6889_v62, 4  ;;  %v12055_v11 = vcombine.low %v6520_v60, %v17201_v31  ;;  %v6847_v7 = vor.u32 %v6846_v16, %v6843_v26 }
 0x37c   : > { %v6815_v14 = vsel %vm14296_vm9, %v6810_v0, %v6814_v8  ;;  %v6894_v2 = vrot.slane %v6892_v27, 5  ;;  %v6850_v54 = vshll.u32 %v17174_v33, 16  ;;  %v6829_v38 = vsel %vm14296_vm9, %v6824_v12, %v6828_v25  ;;  %v17239_v27 = vld [vmem:[#allocation2 + $0xb8] sm:$0xf] }
 0x37d   : > { %v12027_v28 = vcombine.low %v6805_v17, %v6815_v14  ;;  %v6833_v46 = vor.u32 %v6832_v50, %v6828_v25  ;;  %v6856_v40 = vrot.slane %v6854_v13, 4  ;;  %v6848_v23 = vrot.slane %v6847_v7, 4  ;;  %13306 = vmatmul.mubr.bf16.gmra.mxu0 %v12055_v11  ;;  %v17232_v17 = vld [vmem:[#allocation2 + $0x98] sm:$0x1]  ;;  %v6524_v50 = vld [vmem:[#allocation2 + $0xb4] sm:$0xf] }
 0x37e   : > { %v6852_v52 = vrot.slane %v6850_v54, 5  ;;  %v6860_v60 = vshll.u32 %v17214_v4, 16  ;;  %v6913_v59 = vshrl.u32 %v6522_v1, 16  ;;  %v6916_v26 = vshll.u32 %v6522_v1, 16 }
 0x37f   : > { %13250 = vmatmul.mubr.bf16.gmra.mxu1 %v12027_v28  ;;  %v6834_v8 = vrot.slane %v6833_v46, 4  ;;  %v6926_v16 = vshrl.u32 %v17223_v47, 16  ;;  %v12056_v18 = vcombine.low %v6522_v1, %v17223_v47  ;;  %v6871_v0 = vor.u32 %v6870_v44, %v6867_v10 }
 0x380   : > { %v6853_v3 = vsel %vm14296_vm9, %v6848_v23, %v6852_v52  ;;  %v6857_v48 = vor.u32 %v6856_v40, %v6852_v52  ;;  %v6862_v13 = vrot.slane %v6860_v60, 5  ;;  %v6915_v55 = vrot.slane %v6913_v59, 4  ;;  %v17252_v59 = vld [vmem:[#allocation2 + $0xb0] sm:$0x1] }
 0x381   : > { %v6839_v43 = vsel %vm14296_vm9, %v6834_v8, %v6838_v56  ;;  %v6918_v62 = vrot.slane %v6916_v26, 5  ;;  %13309 = vmatprep.mubr.bf16.mxu0 %v12056_v18  ;;  %v6874_v12 = vshll.u32 %v17181_v5, 16  ;;  %v6880_v1 = vrot.slane %v6878_v32, 4 }
 0x382   : > { %v12028_v25 = vcombine.low %v6829_v38, %v6839_v43  ;;  %v6858_v11 = vrot.slane %v6857_v48, 4  ;;  %v6884_v14 = vshll.u32 %v17232_v17, 16  ;;  %v6872_v7 = vrot.slane %v6871_v0, 4  ;;  %v17248_v38 = vld [vmem:[#allocation2 + $0xa4] sm:$0x1] }
 0x383   : > { %v6876_v54 = vrot.slane %v6874_v12, 5  ;;  %v6937_v28 = vshrl.u32 %v6524_v50, 16  ;;  %v6940_v46 = vshll.u32 %v6524_v50, 16  ;;  %v6950_v44 = vshrl.u32 %v17239_v27, 16 }
 0x384   : > { %13253 = vmatprep.mubr.bf16.mxu1 %v12028_v25  ;;  %v6863_v56 = vsel %vm14296_vm9, %v6858_v11, %v6862_v13  ;;  %v6886_v10 = vrot.slane %v6884_v14, 5  ;;  %v12057_v40 = vcombine.low %v6524_v50, %v17239_v27  ;;  %v6895_v26 = vor.u32 %v6894_v2, %v17216_v20  ;;  %v13879_v13 = vld [vmem:[#allocation2 + $0xc] sm:$0xff]   ;;  %v17259_v14 = vld [vmem:[#allocation2 + $0xbc] sm:$0x1] }
 0x385   : > { %v12029_v23 = vcombine.low %v6853_v3, %v6863_v56  ;;  %v6877_v32 = vsel %vm14296_vm9, %v6872_v7, %v6876_v54  ;;  %v6881_v52 = vor.u32 %v6880_v1, %v6876_v54  ;;  %v6939_v60 = vrot.slane %v6937_v28, 4  ;;  %v7538_v54 = vld [vmem:[#allocation2] sm:$0xe] }
 0x386   : > { %v6942_v8 = vrot.slane %v6940_v46, 5  ;;  %v6898_v18 = vshll.u32 %v17201_v31, 16  ;;  %v6904_v48 = vrot.slane %v6902_v49, 4  ;;  %13310 = vmatmul.mubr.bf16.gmra.mxu0 %v12057_v40  ;;  %v6908_v50 = vshll.u32 %v17248_v38, 16 }
 0x387   : > { %13254 = vmatmul.mubr.bf16.gmra.mxu1 %v12029_v23  ;;  %v6882_v43 = vrot.slane %v6881_v52, 4  ;;  %v6919_v3 = vor.u32 %v6918_v62, %v6915_v55  ;;  %v6922_v0 = vshll.u32 %v17223_v47, 16  ;;  %v6896_v12 = vrot.slane %v6895_v26, 4  ;;  %13377 = vmatprep.mubr.bf16.mxu0 %v13879_v13  ;;  %v7539_v52 = vld [vmem:[#allocation2 + $0xc] sm:$0xe] }
 0x388   : > { %v6900_v25 = vrot.slane %v6898_v18, 5  ;;  %v6928_v11 = vrot.slane %v6926_v16, 4  ;;  %v6932_v1 = vshll.u32 %v17252_v59, 16  ;;  %v6910_v20 = vrot.slane %v6908_v50, 5 }
 0x389   : > { %v6887_v49 = vsel %vm14296_vm9, %v6882_v43, %v6886_v10  ;;  %v6920_v2 = vrot.slane %v6919_v3, 4  ;;  %v6924_v7 = vrot.slane %v6922_v0, 5  ;;  %v6943_v40 = vor.u32 %v6942_v8, %v6939_v60  ;;  %v13881_v43 = vld [vmem:[#allocation2 + $0x18] sm:$0xff]   ;;  %v13883_v8 = vld [vmem:[#allocation2 + $0x24] sm:$0xff]  }
 0x38a   : > { %v12030_v28 = vcombine.low %v6877_v32, %v6887_v49  ;;  %v6901_v55 = vsel %vm14296_vm9, %v6896_v12, %v6900_v25  ;;  %v6905_v62 = vor.u32 %v6904_v48, %v6900_v25  ;;  %v6934_v46 = vrot.slane %v6932_v1, 5  ;;  %v13980_v48 = vld [vmem:[#allocation2 + $0x4] sm:$0xf]  ;;  %v13897_v12 = vld [vmem:[#allocation6 + $0x3b0] sm:$0xff]  }
 0x38b   : > { %v6925_v16 = vsel %vm14296_vm9, %v6920_v2, %v6924_v7  ;;  %v6929_v56 = vor.u32 %v6928_v11, %v6924_v7  ;;  %v6946_v23 = vshll.u32 %v17239_v27, 16  ;;  %v6952_v26 = vrot.slane %v6950_v44, 4  ;;  %v13981_v11 = vld [vmem:[#allocation2 + $0x8] sm:$0x1]  ;;  %v7540_v2 = vld [vmem:[#allocation2 + $0x18] sm:$0xe] }
 0x38c   : > { %13257 = vmatprep.mubr.bf16.mxu1 %v12030_v28  ;;  %v6906_v10 = vrot.slane %v6905_v62, 4  ;;  %v6956_v18 = vshll.u32 %v17259_v14, 16  ;;  %v12066_v13 = vrot.slane %v7538_v54, 9  ;;  %v6944_v50 = vrot.slane %v6943_v40, 4 }
 0x38d   : > { %v6930_v32 = vrot.slane %v6929_v56, 4  ;;  %v6948_v3 = vrot.slane %v6946_v23, 5  ;;  %v7605_v0 = vrot.slane %v13980_v48, 5  ;;  %v7608_v1 = vrot.slane %v13981_v11, 5 }
 0x38e   : > { %v6911_v25 = vsel %vm14296_vm9, %v6906_v10, %v6910_v20  ;;  %v6958_v60 = vrot.slane %v6956_v18, 5  ;;  %v12067_v49 = vrot.slane %v7539_v52, 9  ;;  %13378 = vmatmul.mubr.bf16.vlgmr.msra.gmra.mxu0 %v13881_v43  ;;  %v7612_v23 = vrot.slane %v16991_v29, 5  ;;  %v13899_v52 = vld [vmem:[#allocation6 + $0x3a8] sm:$0xff]  }
 0x38f   : > { %v12031_v44 = vcombine.low %v6901_v55, %v6911_v25  ;;  %v6935_v7 = vsel %vm14296_vm9, %v6930_v32, %v6934_v46  ;;  %v6949_v54 = vsel %vm14296_vm9, %v6944_v50, %v6948_v3  ;;  %v6953_v28 = vor.u32 %v6952_v26, %v6948_v3  ;;  %13381 = vmatprep.mubr.bf16.mxu0 %v13883_v8  ;;  %v7541_v32 = vld [vmem:[#allocation2 + $0x24] sm:$0xe]  ;;  %v7543_v8 = vld [vmem:[#allocation2 + $0x3c] sm:$0xe] }
 0x390   : > { %v12032_v62 = vcombine.low %v6925_v16, %v6935_v7  ;;  %v7606_v20 = vsel %vm14653_vm14, %v12066_v13, %v7605_v0  ;;  %v7607_v40 = vrot.slane %v7605_v0, 4  ;;  %13458 = vmatpush3.bf16.msra.mxu0 %v17142_v36  ;;  %v7615_v46 = vrot.slane %v17022_v30, 5  ;;  %v7542_v13 = vld [vmem:[#allocation2 + $0x30] sm:$0xe]  ;;  %v13885_v7 = vld [vmem:[#allocation2 + $0x3c] sm:$0xff]  }
 0x391   : > { %13258 = vmatmul.mubr.bf16.gmra.mxu1 %v12031_v44  ;;  %v6954_v55 = vrot.slane %v6953_v28, 4  ;;  %v12068_v10 = vrot.slane %v7540_v2, 9  ;;  %v7619_v18 = vrot.slane %v17007_v15, 5  ;;  %13459 = vmatprep.subr.bf16.mxu0 %v13897_v12  ;;  %v17285_v26 = vsel %vm14653_vm14, %v12067_v49, %v7612_v23  ;;  %v7544_v2 = vld [vmem:[#allocation2 + $0x48] sm:$0xe]  ;;  %v13902_v44 = vld [vmem:[#allocation6 + $0x3a0] sm:$0xff]  }
 0x392   : > { %13261 = vmatprep.mubr.bf16.mxu1 %v12032_v62  ;;  %v7609_v16 = vsel %vm14653_vm14, %v7607_v40, %v7608_v1  ;;  %v7614_v29 = vrot.slane %v7612_v23, 4  ;;  %v7622_v36 = vrot.slane %v17031_v51, 5  ;;  %v12069_v0 = vrot.slane %v7541_v32, 9  ;;  %v13884_v51 = vld [vmem:[#allocation2 + $0x30] sm:$0xff]  }
 0x393   : > { %v6959_v30 = vsel %vm14296_vm9, %v6954_v55, %v6958_v60  ;;  %v12082_v43 = vcombine.low %v7606_v20, %v7609_v16  ;;  %v17292_v15 = vsel %vm14653_vm14, %v12068_v10, %v7619_v18  ;;  %v7621_v50 = vrot.slane %v7619_v18, 4  ;;  %v7545_v23 = vld [vmem:[#allocation2 + $0x54] sm:$0xe] }
 0x394   : > { %v12033_v3 = vcombine.low %v6949_v54, %v6959_v30  ;;  %v17296_v48 = vsel %vm14653_vm14, %v7614_v29, %v7615_v46  ;;  %v7626_v25 = vrot.slane %v17016_v39, 5  ;;  %13460 = vmatpush3.bf16.msra.mxu0 %v13897_v12  ;;  %v7629_v1 = vrot.slane %v17052_v61, 5  ;;  %v13904_v32 = vld [vmem:[#allocation6 + $0x398] sm:$0xff]  }
 0x395   : > { %v12083_v60 = vcombine.low %v17285_v26, %v17296_v48  ;;  %v17303_v11 = vsel %vm14653_vm14, %v7621_v50, %v7622_v36  ;;  %v12070_v49 = vrot.slane %v7542_v13, 9  ;;  %13461 = vmatprep.subr.bf16.mxu0 %v13899_v52  ;;  %v7633_v28 = vrot.slane %v17027_v22, 5  ;;  %v7546_v13 = vld [vmem:[#allocation2 + $0x60] sm:$0xe]  ;;  %v7551_v48 = vld [vmem:[#allocation2 + $0x9c] sm:$0xe] }
 0x396   : > { %v12084_v39 = vcombine.low %v17292_v15, %v17303_v11  ;;  %v17310_v12 = vsel %vm14653_vm14, %v12069_v0, %v7626_v25  ;;  %v7628_v54 = vrot.slane %v7626_v25, 4  ;;  %13382 = vmatmul.mubr.bf16.gmra.mxu0 %v13884_v51  ;;  %v7636_v62 = vrot.slane %v17068_v53, 5  ;;  %v13887_v51 = vld [vmem:[#allocation2 + $0x48] sm:$0xff]   ;;  %v13890_v15 = vld [vmem:[#allocation2 + $0x60] sm:$0xff]  }
 0x397   : > { %v12071_v20 = vrot.slane %v7543_v8, 9  ;;  %v7640_v61 = vrot.slane %v17037_v45, 5  ;;  %v7643_v40 = vrot.slane %v17090_v21, 5  ;;  %13385 = vmatprep.mubr.bf16.mxu0 %v13885_v7  ;;  %v17322_v46 = vsel %vm14653_vm14, %v12070_v49, %v7633_v28  ;;  %v13907_v8 = vld [vmem:[#allocation6 + $0x390] sm:$0xff]   ;;  %v13892_v11 = vld [vmem:[#allocation6 + $0x368] sm:$0xff]  }
 0x398   : > { %v17318_v55 = vsel %vm14653_vm14, %v7628_v54, %v7629_v1  ;;  %v7635_v10 = vrot.slane %v7633_v28, 4  ;;  %v12072_v22 = vrot.slane %v7544_v2, 9  ;;  %13462 = vmatpush3.bf16.msra.mxu0 %v13899_v52  ;;  %v7647_v18 = vrot.slane %v17061_v9, 5  ;;  %v7548_v54 = vld [vmem:[#allocation2 + $0x78] sm:$0xe] }
 0x399   : > { %13262 = vmatmul.mubr.bf16.gmra.mxu1 %v12033_v3  ;;  %v12085_v53 = vcombine.low %v17310_v12, %v17318_v55  ;;  %v17328_v45 = vsel %vm14653_vm14, %v12071_v20, %v7640_v61  ;;  %v7642_v21 = vrot.slane %v7640_v61, 4  ;;  %13463 = vmatprep.subr.bf16.mxu0 %v13902_v44  ;;  %v7650_v52 = vrot.slane %v17110_v63, 5  ;;  %v7547_v3 = vld [vmem:[#allocation2 + $0x6c] sm:$0xe]  ;;  %v13888_v28 = vld [vmem:[#allocation2 + $0x54] sm:$0xff]  }
 0x39a   : > { %13329 = vmatprep.mubr.bf16.mxu1 %v12082_v43  ;;  %v17333_v16 = vsel %vm14653_vm14, %v7635_v10, %v7636_v62  ;;  %v12073_v29 = vrot.slane %v7545_v23, 9  ;;  %v7654_v36 = vrot.slane %v17083_v57, 5  ;;  %v17345_v9 = vsel %vm14653_vm14, %v12072_v22, %v7647_v18  ;;  %v7549_v61 = vld [vmem:[#allocation2 + $0x84] sm:$0xe] }
 0x39b   : > { %v12086_v30 = vcombine.low %v17322_v46, %v17333_v16  ;;  %v17341_v50 = vsel %vm14653_vm14, %v7642_v21, %v7643_v40  ;;  %v7649_v43 = vrot.slane %v7647_v18, 4  ;;  %v7657_v25 = vrot.slane %v17134_v41, 5  ;;  %v13889_v40 = vld [vmem:[#allocation6 + $0x370] sm:$0xff]  }
 0x39c   : > { %v12087_v63 = vcombine.low %v17328_v45, %v17341_v50  ;;  %v17351_v57 = vsel %vm14653_vm14, %v12073_v29, %v7654_v36  ;;  %v7656_v0 = vrot.slane %v7654_v36, 4  ;;  %13464 = vmatpush3.bf16.msra.mxu0 %v13902_v44  ;;  %v12074_v49 = vrot.slane %v7546_v13, 9  ;;  %v7550_v13 = vld [vmem:[#allocation2 + $0x90] sm:$0xe] }
 0x39d   : > { %v17356_v1 = vsel %vm14653_vm14, %v7649_v43, %v7650_v52  ;;  %v7661_v2 = vrot.slane %v17092_v35, 5  ;;  %v7664_v7 = vrot.slane %v17158_v42, 5  ;;  %13465 = vmatprep.subr.bf16.mxu0 %v13904_v32  ;;  %v12075_v44 = vrot.slane %v7547_v3, 9  ;;  %v13909_v43 = vld [vmem:[#allocation6 + $0x388] sm:$0xff]  }
 0x39e   : > { %v12088_v62 = vcombine.low %v17345_v9, %v17356_v1  ;;  %v17364_v41 = vsel %vm14653_vm14, %v7656_v0, %v7657_v25  ;;  %v7668_v20 = vrot.slane %v17113_v24, 5  ;;  %13386 = vmatmul.mubr.bf16.gmra.mxu0 %v13887_v51  ;;  %v7671_v10 = vrot.slane %v17179_v34, 5  ;;  %v9160_v0 = vld [vmem:[#allocation2 + $0xc] sm:$0xe] }
 0x39f   : > { %v12089_v35 = vcombine.low %v17351_v57, %v17364_v41  ;;  %v17371_v42 = vsel %vm14653_vm14, %v12074_v49, %v7661_v2  ;;  %v7663_v23 = vrot.slane %v7661_v2, 4  ;;  %13389 = vmatprep.mubr.bf16.mxu0 %v13888_v28  ;;  %v12076_v24 = vrot.slane %v7548_v54, 9  ;;  %v9165_v41 = vld [vmem:[#allocation2 + $0x48] sm:$0xe] }
 0x3a0   : > { %v17376_v22 = vsel %vm14653_vm14, %v12075_v44, %v7668_v20  ;;  %v7670_v21 = vrot.slane %v7668_v20, 4  ;;  %v7675_v18 = vrot.slane %v17151_v19, 5  ;;  %13466 = vmatpush3.bf16.msra.mxu0 %v13904_v32  ;;  %v7678_v34 = vrot.slane %v17195_v58, 5  ;;  %v17424_v20 = vld [vmem:[#allocation2 + $0x14] sm:$0x1] }
 0x3a1   : > { %13330 = vmatmul.mubr.bf16.vlgmr.msra.gmra.mxu1 %v12083_v60  ;;  %v17384_v52 = vsel %vm14653_vm14, %v7663_v23, %v7664_v7  ;;  %v12077_v29 = vrot.slane %v7549_v61, 9  ;;  %v7682_v36 = vrot.slane %v17174_v33, 5  ;;  %13467 = vmatprep.subr.bf16.mxu0 %v13907_v8  ;;  %v17402_v60 = vld [vmem:[#allocation2 + $0x10] sm:$0xf]  ;;  %v7685_v3 = vrot.slane %v17214_v4, 5  ;;  %v13911_v7 = vld [vmem:[#allocation6 + $0x380] sm:$0xff]  }
 0x3a2   : > { %13333 = vmatprep.mubr.bf16.mxu1 %v12084_v39  ;;  %13410 = vmatpush3.bf16.msra.mxu1 %v17203_v6  ;;  %v12090_v19 = vcombine.low %v17371_v42, %v17384_v52  ;;  %v17396_v26 = vsel %vm14653_vm14, %v7670_v21, %v7671_v10  ;;  %v17400_v58 = vsel %vm14653_vm14, %v12076_v24, %v7675_v18  ;;  %v7677_v33 = vrot.slane %v7675_v18, 4  ;;  %v7552_v61 = vld [vmem:[#allocation2 + $0xa8] sm:$0xe]  ;;  %v17433_v21 = vld [vmem:[#allocation2 + $0x1c] sm:$0xf] }
 0x3a3   : > { %13411 = vmatprep.subr.bf16.mxu1 %v13889_v40  ;;  %v12091_v6 = vcombine.low %v17376_v22, %v17396_v26  ;;  %v17408_v39 = vsel %vm14653_vm14, %v12077_v29, %v7682_v36  ;;  %v7684_v32 = vrot.slane %v7682_v36, 4  ;;  %v12078_v51 = vrot.slane %v7550_v13, 9  ;;  %v17440_v29 = vld [vmem:[#allocation2 + $0x20] sm:$0x1] }
 0x3a4   : > { %v17413_v25 = vsel %vm14653_vm14, %v7677_v33, %v7678_v34  ;;  %v7689_v49 = vrot.slane %v17181_v5, 5  ;;  %v7692_v2 = vrot.slane %v17232_v17, 5  ;;  %13468 = vmatpush3.bf16.msra.mxu0 %v13907_v8  ;;  %v12079_v4 = vrot.slane %v7551_v48, 9  ;;  %v13891_v5 = vld [vmem:[#allocation2 + $0x6c] sm:$0xff]   ;;  %v9161_v48 = vld [vmem:[#allocation2 + $0x18] sm:$0xe] }
 0x3a5   : > { %v12092_v54 = vcombine.low %v17400_v58, %v17413_v25  ;;  %v17421_v28 = vsel %vm14653_vm14, %v7684_v32, %v7685_v3  ;;  %13469 = vmatprep.subr.bf16.mxu0 %v13909_v43  ;;  %v7696_v44 = vrot.slane %v17201_v31, 5  ;;  %v7699_v10 = vrot.slane %v17248_v38, 5  ;;  %v13896_v31 = vld [vmem:[#allocation6 + $0x360] sm:$0xff]  }
 0x3a6   : > { %13412 = vmatpush3.bf16.msra.mxu1 %v13889_v40  ;;  %v17430_v8 = vsel %vm14653_vm14, %v12078_v51, %v7689_v49  ;;  %v7691_v23 = vrot.slane %v7689_v49, 4  ;;  %13390 = vmatmul.mubr.bf16.gmra.mxu0 %v13890_v15  ;;  %v12154_v18 = vrot.slane %v9160_v0, 9  ;;  %v9243_v34 = vrot.slane %v17402_v60, 5  ;;  %v7553_v0 = vld [vmem:[#allocation2 + $0xb4] sm:$0xe] }
 0x3a7   : > { %13413 = vmatprep.subr.bf16.mxu1 %v13892_v11  ;;  %v17437_v24 = vsel %vm14653_vm14, %v12079_v4, %v7696_v44  ;;  %v7698_v40 = vrot.slane %v7696_v44, 4  ;;  %13393 = vmatprep.mubr.bf16.mxu0 %v13891_v5  ;;  %v9246_v38 = vrot.slane %v17424_v20, 5  ;;  %v12080_v13 = vrot.slane %v7552_v61, 9  ;;  %v17473_v49 = vld [vmem:[#allocation2 + $0x28] sm:$0xf]  ;;  %v13901_v4 = vld [vmem:[#allocation6 + $0x358] sm:$0xff]  }
 0x3a8   : > { %v17444_v36 = vsel %vm14653_vm14, %v7691_v23, %v7692_v2  ;;  %13470 = vmatpush3.bf16.msra.mxu0 %v13909_v43  ;;  %v7703_v33 = vrot.slane %v17223_v47, 5  ;;  %v17459_v43 = vsel %vm14653_vm14, %v12154_v18, %v9243_v34  ;;  %v9245_v3 = vrot.slane %v9243_v34, 4  ;;  %v17461_v47 = vld [vmem:[#allocation6 + $0x438] sm:$0xff]   ;;  %v17475_v2 = vld [vmem:[#allocation2 + $0x2c] sm:$0x1] }
 0x3a9   : > { %13334 = vmatmul.mubr.bf16.gmra.mxu1 %v12085_v53  ;;  %v17455_v32 = vsel %vm14653_vm14, %v7698_v40, %v7699_v10  ;;  %13471 = vmatprep.subr.bf16.mxu0 %v13911_v7  ;;  %v7706_v51 = vrot.slane %v17252_v59, 5  ;;  %v12155_v16 = vrot.slane %v9161_v48, 9  ;;  %v9162_v44 = vld [vmem:[#allocation2 + $0x24] sm:$0xe]  ;;  %v12081_v5 = vrot.slane %v7553_v0, 9  ;;  %v13893_v40 = vld [vmem:[#allocation2 + $0x78] sm:$0xff]  }
 0x3aa   : > { %13337 = vmatprep.mubr.bf16.mxu1 %v12086_v30  ;;  %13414 = vmatpush3.bf16.msra.mxu1 %v13892_v11  ;;  %v17470_v55 = vsel %vm14653_vm14, %v12080_v13, %v7703_v33  ;;  %v7705_v53 = vrot.slane %v7703_v33, 4  ;;  %v17479_v46 = vsel %vm14653_vm14, %v9245_v3, %v9246_v38  ;;  %v9250_v30 = vrot.slane %v17433_v21, 5  ;;  %v8406_v10 = vld [vmem:[#allocation2 + $0xc] sm:$0xf]  ;;  %v13895_v33 = vld [vmem:[#allocation2 + $0x84] sm:$0xff]  }
 0x3ab   : > { %13415 = vmatprep.subr.bf16.mxu1 %v13896_v31  ;;  %v9253_v11 = vrot.slane %v17440_v29, 5  ;;  %v12170_v61 = vcombine.low %v17459_v43, %v17479_v46  ;;  %v7710_v23 = vrot.slane %v17239_v27, 5  ;;  %v7713_v13 = vrot.slane %v17259_v14, 5  ;;  %v17503_v0 = vld [vmem:[#allocation2 + $0x34] sm:$0xf] }
 0x3ac   : > { %v17487_v59 = vsel %vm14653_vm14, %v7705_v53, %v7706_v51  ;;  %13472 = vmatpush3.bf16.msra.mxu0 %v13911_v7  ;;  %v17494_v34 = vsel %vm14653_vm14, %v12155_v16, %v9250_v30  ;;  %v9252_v38 = vrot.slane %v9250_v30, 4  ;;  %v12156_v48 = vrot.slane %v9162_v44, 9  ;;  %v13906_v53 = vld [vmem:[#allocation6 + $0x350] sm:$0xff]   ;;  %v9163_v30 = vld [vmem:[#allocation2 + $0x30] sm:$0xe] }
 0x3ad   : > { %13553 = vmatprep.subr.bf16.mxu0 %v17461_v47  ;;  %v17500_v7 = vsel %vm14653_vm14, %v12081_v5, %v7710_v23  ;;  %v7712_v27 = vrot.slane %v7710_v23, 4  ;;  %v9257_v3 = vrot.slane %v17473_v49, 5  ;;  %v9260_v51 = vrot.slane %v17475_v2, 5  ;;  %v9164_v15 = vld [vmem:[#allocation2 + $0x3c] sm:$0xe] }
 0x3ae   : > { %13416 = vmatpush3.bf16.msra.mxu1 %v13896_v31  ;;  %13394 = vmatmul.mubr.bf16.gmra.mxu0 %v13893_v40  ;;  %v17507_v14 = vsel %vm14653_vm14, %v9252_v38, %v9253_v11  ;;  %v8472_v31 = vshrl.u32 %v8406_v10, 16  ;;  %v8475_v16 = vshll.u32 %v8406_v10, 16  ;;  %v17520_v11 = vld [vmem:[#allocation2 + $0x38] sm:$0x1]  ;;  %v8491_v45 = vshll.u32 %v17424_v20, 16 }
 0x3af   : > { %13417 = vmatprep.subr.bf16.mxu1 %v13901_v4  ;;  %13397 = vmatprep.mubr.bf16.mxu0 %v13895_v33  ;;  %v17514_v5 = vsel %vm14653_vm14, %v7712_v27, %v7713_v13  ;;  %v17518_v23 = vsel %vm14653_vm14, %v12156_v48, %v9257_v3  ;;  %v9259_v40 = vrot.slane %v9257_v3, 4  ;;  %v8409_v38 = vld [vmem:[#allocation2 + $0x18] sm:$0xf]  ;;  %v8481_v13 = vshll.u32 %v17402_v60, 16  ;;  %v13910_v3 = vld [vmem:[#allocation6 + $0x348] sm:$0xff]  }
 0x3b0   : > { %v8474_v33 = vrot.slane %v8472_v31, 4  ;;  %v8477_v18 = vrot.slane %v8475_v16, 5  ;;  %v8485_v48 = vshrl.u32 %v17402_v60, 16  ;;  %v12157_v50 = vrot.slane %v9163_v30, 9  ;;  %v13900_v60 = vld [vmem:[#allocation2 + $0x9c] sm:$0xff]  }
 0x3b1   : > { %13338 = vmatmul.mubr.bf16.gmra.mxu1 %v12087_v63  ;;  %v17533_v27 = vsel %vm14653_vm14, %v9259_v40, %v9260_v51  ;;  %v13898_v63 = vld [vmem:[#allocation2 + $0x90] sm:$0xff]   ;;  %v8483_v10 = vrot.slane %v8481_v13, 5  ;;  %v9264_v9 = vrot.slane %v17503_v0, 5  ;;  %v8496_v51 = vshrl.u32 %v8409_v38, 16  ;;  %v17541_v40 = vld [vmem:[#allocation2 + $0x40] sm:$0xf] }
 0x3b2   : > { %13341 = vmatprep.mubr.bf16.mxu1 %v12088_v62  ;;  %13418 = vmatpush3.bf16.msra.mxu1 %v13901_v4  ;;  %v8478_v16 = vor.u32 %v8477_v18, %v8474_v33  ;;  %v8487_v1 = vrot.slane %v8485_v48, 4  ;;  %v8493_v62 = vrot.slane %v8491_v45, 5  ;;  %v9267_v4 = vrot.slane %v17520_v11, 5  ;;  %v17547_v31 = vld [vmem:[#allocation2 + $0x44] sm:$0x1]  ;;  %v13912_v18 = vld [vmem:[#allocation6 + $0x340] sm:$0xff]  }
 0x3b3   : > { %13419 = vmatprep.subr.bf16.mxu1 %v13906_v53  ;;  %v17545_v30 = vsel %vm14653_vm14, %v12157_v50, %v9264_v9  ;;  %v9266_v12 = vrot.slane %v9264_v9, 4  ;;  %v8499_v44 = vshll.u32 %v8409_v38, 16  ;;  %v8498_v13 = vrot.slane %v8496_v51, 4  ;;  %v8412_v9 = vld [vmem:[#allocation2 + $0x24] sm:$0xf] }
 0x3b4   : > { %v8479_v20 = vrot.slane %v8478_v16, 4  ;;  %v8488_v33 = vor.u32 %v8487_v1, %v8483_v10  ;;  %v8505_v48 = vshll.u32 %v17433_v21, 16  ;;  %v8509_v45 = vshrl.u32 %v17433_v21, 16 }
 0x3b5   : > { %v17555_v50 = vsel %vm14653_vm14, %v9266_v12, %v9267_v4  ;;  %v8501_v38 = vrot.slane %v8499_v44, 5  ;;  %v9271_v12 = vrot.slane %v17541_v40, 5  ;;  %v9274_v4 = vrot.slane %v17547_v31, 5 }
 0x3b6   : > { %13420 = vmatpush3.bf16.msra.mxu1 %v13906_v53  ;;  %13398 = vmatmul.mubr.bf16.gmra.mxu0 %v13898_v63  ;;  %v8484_v16 = vsel %vm14296_vm9, %v8479_v20, %v8483_v10  ;;  %v8515_v53 = vshll.u32 %v17440_v29, 16  ;;  %v8489_v1 = vrot.slane %v8488_v33, 4  ;;  %v12173_v51 = vcombine.low %v17545_v30, %v17555_v50 }
 0x3b7   : > { %13421 = vmatprep.subr.bf16.mxu1 %v13910_v3  ;;  %13401 = vmatprep.mubr.bf16.mxu0 %v13900_v60  ;;  %v8507_v21 = vrot.slane %v8505_v48, 5  ;;  %v8511_v17 = vrot.slane %v8509_v45, 4  ;;  %v8502_v10 = vor.u32 %v8501_v38, %v8498_v13  ;;  %v12158_v20 = vrot.slane %v9164_v15, 9  ;;  %v17570_v60 = vld [vmem:[#allocation6 + $0x3f8] sm:$0xff]  }
 0x3b8   : > { %v8517_v63 = vrot.slane %v8515_v53, 5  ;;  %v8494_v29 = vsel %vm14296_vm9, %v8489_v1, %v8493_v62  ;;  %v8520_v57 = vshrl.u32 %v8412_v9, 16  ;;  %v9273_v52 = vrot.slane %v9271_v12, 4 }
 0x3b9   : > { %13342 = vmatmul.mubr.bf16.gmra.mxu1 %v12089_v35  ;;  %v8512_v44 = vor.u32 %v8511_v17, %v8507_v21  ;;  %v13903_v35 = vld [vmem:[#allocation2 + $0xa8] sm:$0xff]   ;;  %v17572_v15 = vcombine.low %v8484_v16, %v8494_v29  ;;  %v8503_v33 = vrot.slane %v8502_v10, 4  ;;  %v17576_v42 = vsel %vm14653_vm14, %v12158_v20, %v9271_v12  ;;  %v8415_v17 = vld [vmem:[#allocation2 + $0x30] sm:$0xf]  ;;  %v13905_v10 = vld [vmem:[#allocation2 + $0xb4] sm:$0xff]  }
 0x3ba   : > { %13345 = vmatprep.mubr.bf16.mxu1 %v12090_v19  ;;  %13422 = vmatpush3.bf16.msra.mxu1 %v13910_v3  ;;  %v17578_v19 = vld [vmem:[#allocation2 + $0x4c] sm:$0xf]  ;;  %v17580_v3 = vld [vmem:[#allocation2 + $0x50] sm:$0x1]  ;;  %v8522_v13 = vrot.slane %v8520_v57, 4  ;;  %v8523_v48 = vshll.u32 %v8412_v9, 16  ;;  %v17587_v38 = vsel %vm14653_vm14, %v9273_v52, %v9274_v4  ;;  %v19632_v50 = vcombine.low %v17500_v7, %v17514_v5 }
 0x3bb   : > { %13423 = vmatprep.subr.bf16.mxu1 %v13912_v18  ;;  %v8513_v62 = vrot.slane %v8512_v44, 4  ;;  %v8529_v45 = vshll.u32 %v17473_v49, 16  ;;  %v8508_v16 = vsel %vm14296_vm9, %v8503_v33, %v8507_v21  ;;  %v8533_v53 = vshrl.u32 %v17473_v49, 16  ;;  %v9166_v33 = vld [vmem:[#allocation2 + $0x54] sm:$0xe] }
 0x3bc   : > { %v8539_v1 = vshll.u32 %v17475_v2, 16  ;;  %v12174_v9 = vcombine.low %v17576_v42, %v17587_v38  ;;  %v8525_v12 = vrot.slane %v8523_v48, 5  ;;  %v12159_v49 = vrot.slane %v9165_v41, 9  ;;  %v17741_v42 = vld [vmem:[#allocation2 + $0x88] sm:$0xf]  ;;  %v13922_v38 = vld [vmem:[#allocation6 + $0x418] sm:$0xff]  }
 0x3bd   : > { %v8518_v20 = vsel %vm14296_vm9, %v8513_v62, %v8517_v63  ;;  %v8531_v29 = vrot.slane %v8529_v45, 5  ;;  %v8535_v44 = vrot.slane %v8533_v53, 4  ;;  %v9281_v57 = vrot.slane %v17580_v3, 5  ;;  %v17612_v53 = vld [vmem:[#allocation2 + $0x58] sm:$0xf] }
 0x3be   : > { %13424 = vmatpush3.bf16.msra.mxu1 %v13912_v18  ;;  %13402 = vmatmul.mubr.bf16.gmra.mxu0 %v13903_v35  ;;  %v17595_v21 = vcombine.low %v8508_v16, %v8518_v20  ;;  %v8541_v4 = vrot.slane %v8539_v1, 5  ;;  %v8526_v2 = vor.u32 %v8525_v12, %v8522_v13  ;;  %v9278_v18 = vrot.slane %v17578_v19, 5  ;;  %v17614_v1 = vld [vmem:[#allocation2 + $0x5c] sm:$0x1]  ;;  %v9170_v5 = vld [vmem:[#allocation2 + $0x84] sm:$0xe] }
 0x3bf   : > { %13505 = vmatprep.subr.bf16.mxu1 %v17570_v60  ;;  %13405 = vmatprep.mubr.bf16.mxu0 %v13905_v10  ;;  %v8544_v63 = vshrl.u32 %v8415_v17, 16  ;;  %v8536_v35 = vor.u32 %v8535_v44, %v8531_v29  ;;  %v8547_v52 = vshll.u32 %v8415_v17, 16  ;;  %v8553_v62 = vshll.u32 %v17503_v0, 16  ;;  %v8418_v20 = vld [vmem:[#allocation2 + $0x3c] sm:$0xf] }
 0x3c0   : > { %v8557_v48 = vshrl.u32 %v17503_v0, 16  ;;  %v8527_v41 = vrot.slane %v8526_v2, 4  ;;  %v17610_v13 = vsel %vm14653_vm14, %v12159_v49, %v9278_v18  ;;  %v9280_v45 = vrot.slane %v9278_v18, 4  ;;  %v13908_v0 = vld [vmem:[#allocation2 + $0xc0] sm:$0xff]  }
 0x3c1   : > { %13346 = vmatmul.mubr.bf16.gmra.mxu1 %v12091_v6  ;;  %v8546_v16 = vrot.slane %v8544_v63, 4  ;;  %v8537_v22 = vrot.slane %v8536_v35, 4  ;;  %v8549_v26 = vrot.slane %v8547_v52, 5  ;;  %v8555_v6 = vrot.slane %v8553_v62, 5  ;;  %v17631_v62 = vld [vmem:[#allocation2 + $0x64] sm:$0xf] }
 0x3c2   : > { %13349 = vmatprep.mubr.bf16.mxu1 %v12092_v54  ;;  %v8559_v17 = vrot.slane %v8557_v48, 4  ;;  %v8532_v58 = vsel %vm14296_vm9, %v8527_v41, %v8531_v29  ;;  %v17620_v25 = vsel %vm14653_vm14, %v9280_v45, %v9281_v57  ;;  %v8563_v54 = vshll.u32 %v17520_v11, 16 }
 0x3c3   : > { %v12160_v10 = vrot.slane %v9166_v33, 9  ;;  %v8542_v12 = vsel %vm14296_vm9, %v8537_v22, %v8541_v4  ;;  %v12175_v44 = vcombine.low %v17610_v13, %v17620_v25  ;;  %v8550_v49 = vor.u32 %v8549_v26, %v8546_v16  ;;  %v9167_v16 = vld [vmem:[#allocation2 + $0x60] sm:$0xe] }
 0x3c4   : > { %v8560_v2 = vor.u32 %v8559_v17, %v8555_v6  ;;  %v17627_v18 = vcombine.low %v8532_v58, %v8542_v12  ;;  %v8565_v63 = vrot.slane %v8563_v54, 5  ;;  %v9285_v29 = vrot.slane %v17612_v53, 5  ;;  %v17649_v17 = vld [vmem:[#allocation2 + $0x68] sm:$0x1] }
 0x3c5   : > { %v9288_v57 = vrot.slane %v17614_v1, 5  ;;  %v8551_v35 = vrot.slane %v8550_v49, 4  ;;  %v8568_v33 = vshrl.u32 %v8418_v20, 16  ;;  %v8571_v52 = vshll.u32 %v8418_v20, 16 }
 0x3c6   : > { %13406 = vmatmul.mubr.bf16.gmra.mxu0 %v13908_v0  ;;  %v8561_v11 = vrot.slane %v8560_v2, 4  ;;  %v17638_v4 = vsel %vm14653_vm14, %v12160_v10, %v9285_v29  ;;  %v9287_v48 = vrot.slane %v9285_v29, 4  ;;  %v8577_v41 = vshll.u32 %v17541_v40, 16  ;;  %v8421_v0 = vld [vmem:[#allocation2 + $0x48] sm:$0xf] }
 0x3c7   : > { %13473 = vmatprep.mubr.bf16.mxu0 %v12170_v61  ;;  %v8581_v45 = vshrl.u32 %v17541_v40, 16  ;;  %v19626_v22 = vcombine.low %v17408_v39, %v17421_v28  ;;  %v8556_v26 = vsel %vm14296_vm9, %v8551_v35, %v8555_v6  ;;  %v8570_v46 = vrot.slane %v8568_v33, 4  ;;  %v17666_v33 = vld [vmem:[#allocation2 + $0x70] sm:$0xf] }
 0x3c8   : > { %v8566_v43 = vsel %vm14296_vm9, %v8561_v11, %v8565_v63  ;;  %v8573_v61 = vrot.slane %v8571_v52, 5  ;;  %v19627_v58 = vcombine.low %v17430_v8, %v17444_v36  ;;  %v17658_v39 = vsel %vm14653_vm14, %v9287_v48, %v9288_v57  ;;  %v13918_v63 = vld [vmem:[#allocation6 + $0x430] sm:$0xff]  }
 0x3c9   : > { %13350 = vmatmul.mubr.bf16.gmra.mxu1 %v19626_v22  ;;  %v17654_v40 = vcombine.low %v8556_v26, %v8566_v43  ;;  %v8579_v28 = vrot.slane %v8577_v41, 5  ;;  %v8583_v6 = vrot.slane %v8581_v45, 4  ;;  %v12176_v54 = vcombine.low %v17638_v4, %v17658_v39  ;;  %v9168_v52 = vld [vmem:[#allocation2 + $0x6c] sm:$0xe] }
 0x3ca   : > { %13353 = vmatprep.mubr.bf16.mxu1 %v19627_v58  ;;  %v8574_v10 = vor.u32 %v8573_v61, %v8570_v46  ;;  %v8587_v20 = vshll.u32 %v17547_v31, 16  ;;  %v12161_v12 = vrot.slane %v9167_v16, 9  ;;  %v9292_v2 = vrot.slane %v17631_v62, 5  ;;  %v17672_v16 = vld [vmem:[#allocation2 + $0x74] sm:$0x1] }
 0x3cb   : > { %v8584_v49 = vor.u32 %v8583_v6, %v8579_v28  ;;  %v9295_v8 = vrot.slane %v17649_v17, 5  ;;  %v8592_v36 = vshrl.u32 %v8421_v0, 16  ;;  %v8595_v57 = vshll.u32 %v8421_v0, 16  ;;  %v8424_v0 = vld [vmem:[#allocation2 + $0x54] sm:$0xf] }
 0x3cc   : > { %v8575_v29 = vrot.slane %v8574_v10, 4  ;;  %v8589_v35 = vrot.slane %v8587_v20, 5  ;;  %v8601_v11 = vshll.u32 %v17578_v19, 16  ;;  %v17670_v31 = vsel %vm14653_vm14, %v12161_v12, %v9292_v2  ;;  %v13919_v12 = vld [vmem:[#allocation6 + $0x428] sm:$0xff]  }
 0x3cd   : > { %v8585_v48 = vrot.slane %v8584_v49, 4  ;;  %v9294_v41 = vrot.slane %v9292_v2, 4  ;;  %v8594_v45 = vrot.slane %v8592_v36, 4  ;;  %v19628_v22 = vcombine.low %v17494_v34, %v17507_v14 }
 0x3ce   : > { %v8580_v26 = vsel %vm14296_vm9, %v8575_v29, %v8579_v28  ;;  %v8597_v43 = vrot.slane %v8595_v57, 5  ;;  %v8603_v46 = vrot.slane %v8601_v11, 5  ;;  %v8605_v61 = vshrl.u32 %v17578_v19, 16 }
 0x3cf   : > { %13474 = vmatmul.mubr.bf16.vlgmr.msra.gmra.mxu0 %v19628_v22  ;;  %v19629_v58 = vcombine.low %v17518_v23, %v17533_v27  ;;  %v8590_v6 = vsel %vm14296_vm9, %v8585_v48, %v8589_v35  ;;  %v17687_v10 = vsel %vm14653_vm14, %v9294_v41, %v9295_v8  ;;  %v8611_v34 = vshll.u32 %v17580_v3, 16  ;;  %v9169_v35 = vld [vmem:[#allocation2 + $0x78] sm:$0xe] }
 0x3d0   : > { %v12162_v14 = vrot.slane %v9168_v52, 9  ;;  %13554 = vmatpush3.bf16.msra.mxu0 %v17461_v47  ;;  %v19630_v19 = vcombine.low %v17437_v24, %v17455_v32  ;;  %v17694_v28 = vcombine.low %v8580_v26, %v8590_v6  ;;  %v12177_v23 = vcombine.low %v17670_v31, %v17687_v10  ;;  %v17713_v26 = vld [vmem:[#allocation2 + $0x80] sm:$0x1] }
 0x3d1   : > { %13477 = vmatprep.mubr.bf16.mxu0 %v19629_v58  ;;  %v8598_v27 = vor.u32 %v8597_v43, %v8594_v45  ;;  %v8607_v20 = vrot.slane %v8605_v61, 4  ;;  %13555 = vmatprep.subr.bf16.mxu0 %v13918_v63  ;;  %v19631_v49 = vcombine.low %v17470_v55, %v17487_v59  ;;  %v8613_v3 = vrot.slane %v8611_v34, 5  ;;  %v17709_v59 = vld [vmem:[#allocation2 + $0x7c] sm:$0xf]  ;;  %v8427_v6 = vld [vmem:[#allocation2 + $0x60] sm:$0xf] }
 0x3d2   : > { %13354 = vmatmul.mubr.bf16.gmra.mxu1 %v19630_v19  ;;  %v9299_v47 = vrot.slane %v17666_v33, 5  ;;  %v9302_v2 = vrot.slane %v17672_v16, 5  ;;  %v8616_v24 = vshrl.u32 %v8424_v0, 16  ;;  %v8619_v36 = vshll.u32 %v8424_v0, 16  ;;  %v13921_v43 = vld [vmem:[#allocation6 + $0x420] sm:$0xff]  }
 0x3d3   : > { %13357 = vmatprep.mubr.bf16.mxu1 %v19631_v49  ;;  %v8599_v32 = vrot.slane %v8598_v27, 4  ;;  %v8608_v8 = vor.u32 %v8607_v20, %v8603_v46  ;;  %v8625_v29 = vshll.u32 %v17612_v53, 16  ;;  %v8629_v55 = vshrl.u32 %v17612_v53, 16 }
 0x3d4   : > { %v17706_v57 = vsel %vm14653_vm14, %v12162_v14, %v9299_v47  ;;  %v9301_v11 = vrot.slane %v9299_v47, 4  ;;  %v8618_v52 = vrot.slane %v8616_v24, 4  ;;  %13556 = vmatpush3.bf16.msra.mxu0 %v13918_v63  ;;  %v8621_v45 = vrot.slane %v8619_v36, 5  ;;  %v17753_v36 = vld [vmem:[#allocation2 + $0x8c] sm:$0x1] }
 0x3d5   : > { %v8604_v48 = vsel %vm14296_vm9, %v8599_v32, %v8603_v46  ;;  %v8609_v41 = vrot.slane %v8608_v8, 4  ;;  %v8627_v22 = vrot.slane %v8625_v29, 5  ;;  %13557 = vmatprep.subr.bf16.mxu0 %v13919_v12  ;;  %v8631_v0 = vrot.slane %v8629_v55, 4 }
 0x3d6   : > { %v17717_v61 = vsel %vm14653_vm14, %v9301_v11, %v9302_v2  ;;  %v8635_v53 = vshll.u32 %v17614_v1, 16  ;;  %v12163_v58 = vrot.slane %v9169_v35, 9  ;;  %v8622_v34 = vor.u32 %v8621_v45, %v8618_v52  ;;  %v13924_v45 = vld [vmem:[#allocation6 + $0x410] sm:$0xff]  }
 0x3d7   : > { %13478 = vmatmul.mubr.bf16.gmra.mxu0 %v12173_v51  ;;  %v8614_v63 = vsel %vm14296_vm9, %v8609_v41, %v8613_v3  ;;  %v12178_v46 = vcombine.low %v17706_v57, %v17717_v61  ;;  %v9306_v14 = vrot.slane %v17709_v59, 5  ;;  %v8632_v19 = vor.u32 %v8631_v0, %v8627_v22 }
 0x3d8   : > { %13481 = vmatprep.mubr.bf16.mxu0 %v12174_v9  ;;  %v17731_v1 = vcombine.low %v8604_v48, %v8614_v63  ;;  %v8637_v27 = vrot.slane %v8635_v53, 5  ;;  %v9309_v30 = vrot.slane %v17713_v26, 5  ;;  %13558 = vmatpush3.bf16.msra.mxu0 %v13919_v12  ;;  %v8623_v51 = vrot.slane %v8622_v34, 4 }
 0x3d9   : > { %v17739_v20 = vsel %vm14653_vm14, %v12163_v58, %v9306_v14  ;;  %v9308_v49 = vrot.slane %v9306_v14, 4  ;;  %v8640_v3 = vshrl.u32 %v8427_v6, 16  ;;  %13559 = vmatprep.subr.bf16.mxu0 %v13921_v43  ;;  %v8633_v9 = vrot.slane %v8632_v19, 4  ;;  %v13914_v58 = vld [vmem:[#allocation6 + $0x3f0] sm:$0xff]   ;;  %v17768_v14 = vld [vmem:[#allocation2 + $0x94] sm:$0xf] }
 0x3da   : > { %13358 = vmatmul.mubr.bf16.gmra.mxu1 %v19632_v50  ;;  %v8643_v47 = vshll.u32 %v8427_v6, 16  ;;  %v8649_v12 = vshll.u32 %v17631_v62, 16  ;;  %v8653_v7 = vshrl.u32 %v17631_v62, 16  ;;  %v8628_v2 = vsel %vm14296_vm9, %v8623_v51, %v8627_v22  ;;  %v9171_v19 = vld [vmem:[#allocation2 + $0x90] sm:$0xe] }
 0x3db   : > { %13425 = vmatprep.mubr.bf16.mxu1 %v17572_v15  ;;  %v17750_v24 = vsel %vm14653_vm14, %v9308_v49, %v9309_v30  ;;  %v8642_v32 = vrot.slane %v8640_v3, 4  ;;  %v8659_v8 = vshll.u32 %v17649_v17, 16  ;;  %v8430_v15 = vld [vmem:[#allocation2 + $0x6c] sm:$0xf]  ;;  %v8638_v29 = vsel %vm14296_vm9, %v8633_v9, %v8637_v27  ;;  %v13925_v3 = vld [vmem:[#allocation6 + $0x408] sm:$0xff]  }
 0x3dc   : > { %v12179_v62 = vcombine.low %v17739_v20, %v17750_v24  ;;  %v8645_v35 = vrot.slane %v8643_v47, 5  ;;  %v8651_v11 = vrot.slane %v8649_v12, 5  ;;  %13560 = vmatpush3.bf16.msra.mxu0 %v13921_v43  ;;  %v17759_v52 = vcombine.low %v8628_v2, %v8638_v29  ;;  %v13915_v9 = vld [vmem:[#allocation6 + $0x3e8] sm:$0xff]  }
 0x3dd   : > { %v8655_v55 = vrot.slane %v8653_v7, 4  ;;  %v8661_v48 = vrot.slane %v8659_v8, 5  ;;  %v12164_v41 = vrot.slane %v9170_v5, 9  ;;  %13561 = vmatprep.subr.bf16.mxu0 %v13922_v38  ;;  %v9313_v22 = vrot.slane %v17741_v42, 5 }
 0x3de   : > { %v8646_v17 = vor.u32 %v8645_v35, %v8642_v32  ;;  %v9316_v0 = vrot.slane %v17753_v36, 5  ;;  %v8664_v53 = vshrl.u32 %v8430_v15, 16  ;;  %v8667_v43 = vshll.u32 %v8430_v15, 16  ;;  %v17797_v35 = vld [vmem:[#allocation2 + $0xa0] sm:$0xf] }
 0x3df   : > { %13482 = vmatmul.mubr.bf16.gmra.mxu0 %v12175_v44  ;;  %v8656_v6 = vor.u32 %v8655_v55, %v8651_v11  ;;  %v8673_v63 = vshll.u32 %v17666_v33, 16  ;;  %v8677_v34 = vshrl.u32 %v17666_v33, 16  ;;  %v17775_v30 = vsel %vm14653_vm14, %v12164_v41, %v9313_v22  ;;  %v17777_v44 = vld [vmem:[#allocation2 + $0x98] sm:$0x1] }
 0x3e0   : > { %13485 = vmatprep.mubr.bf16.mxu0 %v12176_v54  ;;  %v8647_v27 = vrot.slane %v8646_v17, 4  ;;  %v9315_v13 = vrot.slane %v9313_v22, 4  ;;  %v8666_v25 = vrot.slane %v8664_v53, 4  ;;  %13562 = vmatpush3.bf16.msra.mxu0 %v13922_v38  ;;  %v8669_v50 = vrot.slane %v8667_v43, 5  ;;  %v8433_v38 = vld [vmem:[#allocation2 + $0x78] sm:$0xf] }
 0x3e1   : > { %v8657_v33 = vrot.slane %v8656_v6, 4  ;;  %v8675_v51 = vrot.slane %v8673_v63, 5  ;;  %v8679_v49 = vrot.slane %v8677_v34, 4  ;;  %13563 = vmatprep.subr.bf16.mxu0 %v13924_v45  ;;  %v8683_v54 = vshll.u32 %v17672_v16, 16  ;;  %v13917_v55 = vld [vmem:[#allocation6 + $0x3e0] sm:$0xff]  }
 0x3e2   : > { %13426 = vmatmul.mubr.bf16.vlgmr.msra.gmra.mxu1 %v17595_v21  ;;  %v8652_v4 = vsel %vm14296_vm9, %v8647_v27, %v8651_v11  ;;  %v17786_v39 = vsel %vm14653_vm14, %v9315_v13, %v9316_v0  ;;  %v12165_v21 = vrot.slane %v9171_v19, 9  ;;  %v9320_v2 = vrot.slane %v17768_v14, 5  ;;  %v13927_v11 = vld [vmem:[#allocation6 + $0x400] sm:$0xff]   ;;  %v17812_v43 = vld [vmem:[#allocation2 + $0xa4] sm:$0x1] }
 0x3e3   : > { %13429 = vmatprep.mubr.bf16.mxu1 %v17627_v18  ;;  %13506 = vmatpush3.bf16.msra.mxu1 %v17570_v60  ;;  %v8662_v47 = vsel %vm14296_vm9, %v8657_v33, %v8661_v48  ;;  %v12180_v18 = vcombine.low %v17775_v30, %v17786_v39  ;;  %v8670_v60 = vor.u32 %v8669_v50, %v8666_v25  ;;  %v8685_v5 = vrot.slane %v8683_v54, 5  ;;  %v8436_v63 = vld [vmem:[#allocation2 + $0x84] sm:$0xf]  ;;  %v13920_v25 = vld [vmem:[#allocation6 + $0x3d8] sm:$0xff]  }
 0x3e4   : > { %13507 = vmatprep.subr.bf16.mxu1 %v13914_v58  ;;  %v8680_v12 = vor.u32 %v8679_v49, %v8675_v51  ;;  %v17793_v7 = vcombine.low %v8652_v4, %v8662_v47  ;;  %v9323_v32 = vrot.slane %v17777_v44, 5  ;;  %13564 = vmatpush3.bf16.msra.mxu0 %v13924_v45  ;;  %v8688_v15 = vshrl.u32 %v8433_v38, 16  ;;  %v9172_v45 = vld [vmem:[#allocation2 + $0x9c] sm:$0xe] }
 0x3e5   : > { %v8671_v16 = vrot.slane %v8670_v60, 4  ;;  %v8691_v29 = vshll.u32 %v8433_v38, 16  ;;  %13565 = vmatprep.subr.bf16.mxu0 %v13925_v3  ;;  %v17801_v48 = vsel %vm14653_vm14, %v12165_v21, %v9320_v2  ;;  %v9322_v41 = vrot.slane %v9320_v2, 4  ;;  %v17837_v38 = vld [vmem:[#allocation2 + $0xb0] sm:$0x1] }
 0x3e6   : > { %v8681_v8 = vrot.slane %v8680_v12, 4  ;;  %v8697_v17 = vshll.u32 %v17709_v59, 16  ;;  %v8701_v22 = vshrl.u32 %v17709_v59, 16  ;;  %v8707_v27 = vshll.u32 %v17713_v26, 16  ;;  %v9173_v26 = vld [vmem:[#allocation2 + $0xa8] sm:$0xe] }
 0x3e7   : > { %13508 = vmatpush3.bf16.msra.mxu1 %v13914_v58  ;;  %13486 = vmatmul.mubr.bf16.gmra.mxu0 %v12177_v23  ;;  %v8676_v0 = vsel %vm14296_vm9, %v8671_v16, %v8675_v51  ;;  %v8690_v58 = vrot.slane %v8688_v15, 4  ;;  %v8693_v6 = vrot.slane %v8691_v29, 5  ;;  %v17821_v31 = vsel %vm14653_vm14, %v9322_v41, %v9323_v32 }
 0x3e8   : > { %13509 = vmatprep.subr.bf16.mxu1 %v13915_v9  ;;  %v8686_v53 = vsel %vm14296_vm9, %v8681_v8, %v8685_v5  ;;  %13489 = vmatprep.mubr.bf16.mxu0 %v12178_v46  ;;  %v8699_v10 = vrot.slane %v8697_v17, 5  ;;  %v8703_v23 = vrot.slane %v8701_v22, 4  ;;  %v12181_v34 = vcombine.low %v17801_v48, %v17821_v31  ;;  %v8439_v5 = vld [vmem:[#allocation2 + $0x90] sm:$0xf] }
 0x3e9   : > { %v17817_v59 = vcombine.low %v8676_v0, %v8686_v53  ;;  %13566 = vmatpush3.bf16.msra.mxu0 %v13925_v3  ;;  %v8694_v19 = vor.u32 %v8693_v6, %v8690_v58  ;;  %v12166_v13 = vrot.slane %v9172_v45, 9  ;;  %v9327_v61 = vrot.slane %v17797_v35, 5  ;;  %v17831_v3 = vld [vmem:[#allocation2 + $0xac] sm:$0xf]  ;;  %v9174_v0 = vld [vmem:[#allocation2 + $0xb4] sm:$0xe] }
 0x3ea   : > { %13430 = vmatmul.mubr.bf16.gmra.mxu1 %v17654_v40  ;;  %13567 = vmatprep.subr.bf16.mxu0 %v13927_v11  ;;  %v8704_v57 = vor.u32 %v8703_v23, %v8699_v10  ;;  %v9330_v46 = vrot.slane %v17812_v43, 5  ;;  %v8712_v33 = vshrl.u32 %v8436_v63, 16  ;;  %v8709_v50 = vrot.slane %v8707_v27, 5  ;;  %v17866_v58 = vld [vmem:[#allocation2 + $0xb8] sm:$0xf] }
 0x3eb   : > { %13433 = vmatprep.mubr.bf16.mxu1 %v17694_v28  ;;  %13510 = vmatpush3.bf16.msra.mxu1 %v13915_v9  ;;  %v8695_v40 = vrot.slane %v8694_v19, 4  ;;  %v8715_v51 = vshll.u32 %v8436_v63, 16  ;;  %v8721_v49 = vshll.u32 %v17741_v42, 16  ;;  %v17835_v28 = vsel %vm14653_vm14, %v12166_v13, %v9327_v61  ;;  %v17870_v23 = vld [vmem:[#allocation2 + $0xbc] sm:$0x1] }
 0x3ec   : > { %13511 = vmatprep.subr.bf16.mxu1 %v13917_v55  ;;  %v8705_v4 = vrot.slane %v8704_v57, 4  ;;  %v9329_v54 = vrot.slane %v9327_v61, 4  ;;  %v8714_v21 = vrot.slane %v8712_v33, 4  ;;  %v8725_v12 = vshrl.u32 %v17741_v42, 16 }
 0x3ed   : > { %13568 = vmatpush3.bf16.msra.mxu0 %v13927_v11  ;;  %v8700_v9 = vsel %vm14296_vm9, %v8695_v40, %v8699_v10  ;;  %v8717_v47 = vrot.slane %v8715_v51, 5  ;;  %v8723_v60 = vrot.slane %v8721_v49, 5  ;;  %v8731_v16 = vshll.u32 %v17753_v36, 16 }
 0x3ee   : > { %v8710_v2 = vsel %vm14296_vm9, %v8705_v4, %v8709_v50  ;;  %v9331_v32 = vsel %vm14653_vm14, %v9329_v54, %v9330_v46  ;;  %v12167_v8 = vrot.slane %v9173_v26, 9  ;;  %v8727_v11 = vrot.slane %v8725_v12, 4  ;;  %v17887_v54 = vld [vmem:[#allocation2 + $0xc4] sm:$0xf] }
 0x3ef   : > { %13512 = vmatpush3.bf16.msra.mxu1 %v13917_v55  ;;  %13490 = vmatmul.mubr.bf16.gmra.mxu0 %v12179_v62  ;;  %v17850_v15 = vcombine.low %v8700_v9, %v8710_v2  ;;  %v12182_v29 = vcombine.low %v17835_v28, %v9331_v32  ;;  %v8718_v42 = vor.u32 %v8717_v47, %v8714_v21  ;;  %v13923_v55 = vld [vmem:[#allocation6 + $0x3d0] sm:$0xff]   ;;  %v8733_v41 = vrot.slane %v8731_v16, 5  ;;  %v13928_v21 = vld [vmem:[#allocation6 + $0x3c0] sm:$0xff]  }
 0x3f0   : > { %13513 = vmatprep.subr.bf16.mxu1 %v13920_v25  ;;  %13493 = vmatprep.mubr.bf16.mxu0 %v12180_v18  ;;  %v9334_v36 = vrot.slane %v17831_v3, 5  ;;  %v9337_v17 = vrot.slane %v17837_v38, 5  ;;  %v8736_v22 = vshrl.u32 %v8439_v5, 16  ;;  %v8728_v24 = vor.u32 %v8727_v11, %v8723_v60  ;;  %v17897_v32 = vld [vmem:[#allocation2 + $0xc8] sm:$0x1] }
 0x3f1   : > { %v8719_v20 = vrot.slane %v8718_v42, 4  ;;  %v8739_v62 = vshll.u32 %v8439_v5, 16  ;;  %v8745_v45 = vshll.u32 %v17768_v14, 16  ;;  %v8749_v53 = vshrl.u32 %v17768_v14, 16  ;;  %v8442_v14 = vld [vmem:[#allocation2 + $0x9c] sm:$0xf] }
 0x3f2   : > { %13434 = vmatmul.mubr.bf16.gmra.mxu1 %v17731_v1  ;;  %v17863_v30 = vsel %vm14653_vm14, %v12167_v8, %v9334_v36  ;;  %v9336_v39 = vrot.slane %v9334_v36, 4  ;;  %v8738_v18 = vrot.slane %v8736_v22, 4  ;;  %v8729_v6 = vrot.slane %v8728_v24, 4  ;;  %v9175_v5 = vld [vmem:[#allocation2 + $0xc0] sm:$0xe]  ;;  %v17904_v36 = vld [vmem:[#allocation6 + $0x478] sm:$0xff]  }
 0x3f3   : > { %13437 = vmatprep.mubr.bf16.mxu1 %v17759_v52  ;;  %13514 = vmatpush3.bf16.msra.mxu1 %v13920_v25  ;;  %v8724_v1 = vsel %vm14296_vm9, %v8719_v20, %v8723_v60  ;;  %v8741_v63 = vrot.slane %v8739_v62, 5  ;;  %v8747_v10 = vrot.slane %v8745_v45, 5  ;;  %v13926_v52 = vld [vmem:[#allocation6 + $0x3c8] sm:$0xff]   ;;  %v8751_v27 = vrot.slane %v8749_v53, 4  ;;  %v8445_v16 = vld [vmem:[#allocation2 + $0xa8] sm:$0xf] }
 0x3f4   : > { %13515 = vmatprep.subr.bf16.mxu1 %v13923_v55  ;;  %v9338_v19 = vsel %vm14653_vm14, %v9336_v39, %v9337_v17  ;;  %v8755_v13 = vshll.u32 %v17777_v44, 16  ;;  %v12168_v57 = vrot.slane %v9174_v0, 9  ;;  %v8734_v61 = vsel %vm14296_vm9, %v8729_v6, %v8733_v41  ;;  %v10044_v0 = vld [vmem:[#allocation2 + $0x18] sm:$0xf] }
 0x3f5   : > { %v12183_v46 = vcombine.low %v17863_v30, %v9338_v19  ;;  %v8742_v25 = vor.u32 %v8741_v63, %v8738_v18  ;;  %v9341_v33 = vrot.slane %v17866_v58, 5  ;;  %v17879_v40 = vcombine.low %v8724_v1, %v8734_v61 }
 0x3f6   : > { %v8752_v50 = vor.u32 %v8751_v27, %v8747_v10  ;;  %v8757_v51 = vrot.slane %v8755_v13, 5  ;;  %v9344_v49 = vrot.slane %v17870_v23, 5  ;;  %v8760_v28 = vshrl.u32 %v8442_v14, 16  ;;  %v17918_v27 = vld [vmem:[#allocation2 + $0x1c] sm:$0xf] }
 0x3f7   : > { %13516 = vmatpush3.bf16.msra.mxu1 %v13923_v55  ;;  %13494 = vmatmul.mubr.bf16.gmra.mxu0 %v12181_v34  ;;  %v8743_v44 = vrot.slane %v8742_v25, 4  ;;  %v9342_v26 = vsel %vm14653_vm14, %v12168_v57, %v9341_v33  ;;  %v9343_v4 = vrot.slane %v9341_v33, 4  ;;  %v8763_v47 = vshll.u32 %v8442_v14, 16  ;;  %v17923_v25 = vld [vmem:[#allocation2 + $0x20] sm:$0x1] }
 0x3f8   : > { %13517 = vmatprep.subr.bf16.mxu1 %v13926_v52  ;;  %13497 = vmatprep.mubr.bf16.mxu0 %v12182_v29  ;;  %v8753_v9 = vrot.slane %v8752_v50, 4  ;;  %v8769_v60 = vshll.u32 %v17797_v35, 16  ;;  %v8773_v12 = vshrl.u32 %v17797_v35, 16  ;;  %v8762_v34 = vrot.slane %v8760_v28, 4  ;;  %v8448_v33 = vld [vmem:[#allocation2 + $0xb4] sm:$0xf] }
 0x3f9   : > { %v8748_v48 = vsel %vm14296_vm9, %v8743_v44, %v8747_v10  ;;  %v9345_v31 = vsel %vm14653_vm14, %v9343_v4, %v9344_v49  ;;  %v8779_v2 = vshll.u32 %v17812_v43, 16  ;;  %v8765_v29 = vrot.slane %v8763_v47, 5 }
 0x3fa   : > { %13438 = vmatmul.mubr.bf16.gmra.mxu1 %v17793_v7  ;;  %v8758_v35 = vsel %vm14296_vm9, %v8753_v9, %v8757_v51  ;;  %v12184_v8 = vcombine.low %v9342_v26, %v9345_v31  ;;  %v8771_v7 = vrot.slane %v8769_v60, 5  ;;  %v8775_v11 = vrot.slane %v8773_v12, 4 }
 0x3fb   : > { %13441 = vmatprep.mubr.bf16.mxu1 %v17817_v59  ;;  %13518 = vmatpush3.bf16.msra.mxu1 %v13926_v52  ;;  %v17902_v42 = vcombine.low %v8748_v48, %v8758_v35  ;;  %v8781_v55 = vrot.slane %v8779_v2, 5  ;;  %v12169_v41 = vrot.slane %v9175_v5, 9  ;;  %v8766_v43 = vor.u32 %v8765_v29, %v8762_v34  ;;  %v10047_v48 = vld [vmem:[#allocation2 + $0x24] sm:$0xf] }
 0x3fc   : > { %13519 = vmatprep.subr.bf16.mxu1 %v13928_v21  ;;  %v9348_v17 = vrot.slane %v17887_v54, 5  ;;  %v9351_v59 = vrot.slane %v17897_v32, 5  ;;  %v8784_v22 = vshrl.u32 %v8445_v16, 16  ;;  %v8776_v20 = vor.u32 %v8775_v11, %v8771_v7 }
 0x3fd   : > { %v8787_v24 = vshll.u32 %v8445_v16, 16  ;;  %v8793_v62 = vshll.u32 %v17831_v3, 16  ;;  %v8797_v45 = vshrl.u32 %v17831_v3, 16  ;;  %v8767_v30 = vrot.slane %v8766_v43, 4 }
 0x3fe   : > { %v9349_v39 = vsel %vm14653_vm14, %v12169_v41, %v9348_v17  ;;  %v9350_v18 = vrot.slane %v9348_v17, 4  ;;  %v8786_v53 = vrot.slane %v8784_v22, 4  ;;  %v8777_v1 = vrot.slane %v8776_v20, 4  ;;  %v17936_v41 = vld [vmem:[#allocation2 + $0x28] sm:$0xf] }
 0x3ff   : > { %13520 = vmatpush3.bf16.msra.mxu1 %v13928_v21  ;;  %13498 = vmatmul.mubr.bf16.gmra.mxu0 %v12183_v46  ;;  %v8789_v6 = vrot.slane %v8787_v24, 5  ;;  %v8795_v63 = vrot.slane %v8793_v62, 5  ;;  %v8799_v10 = vrot.slane %v8797_v45, 4  ;;  %v8772_v52 = vsel %vm14296_vm9, %v8767_v30, %v8771_v7  ;;  %v17939_v62 = vld [vmem:[#allocation2 + $0x2c] sm:$0x1] }
 0x400   : > { %13601 = vmatprep.subr.bf16.mxu1 %v17904_v36  ;;  %13501 = vmatprep.mubr.bf16.mxu0 %v12184_v8  ;;  %v9352_v3 = vsel %vm14653_vm14, %v9350_v18, %v9351_v59  ;;  %v8803_v19 = vshll.u32 %v17837_v38, 16  ;;  %v10110_v13 = vshrl.u32 %v10044_v0, 16  ;;  %v8782_v57 = vsel %vm14296_vm9, %v8777_v1, %v8781_v55 }
 0x401   : > { %v12185_v14 = vcombine.low %v9349_v39, %v9352_v3  ;;  %v8790_v61 = vor.u32 %v8789_v6, %v8786_v53  ;;  %v8800_v46 = vor.u32 %v8799_v10, %v8795_v63  ;;  %v12142_v50 = vcombine.low %v8772_v52, %v8782_v57 }
 0x402   : > { %13442 = vmatmul.mubr.bf16.gmra.mxu1 %v17850_v15  ;;  %v8805_v51 = vrot.slane %v8803_v19, 5  ;;  %v10112_v49 = vrot.slane %v10110_v13, 4  ;;  %v10113_v38 = vshll.u32 %v10044_v0, 16  ;;  %v10119_v4 = vshll.u32 %v17918_v27, 16 }
 0x403   : > { %13445 = vmatprep.mubr.bf16.mxu1 %v17879_v40  ;;  %v8791_v44 = vrot.slane %v8790_v61, 4  ;;  %v8801_v26 = vrot.slane %v8800_v46, 4  ;;  %v10123_v15 = vshrl.u32 %v17918_v27, 16  ;;  %v10129_v21 = vshll.u32 %v17923_v25, 16 }
 0x404   : > { %v10115_v28 = vrot.slane %v10113_v38, 5  ;;  %v8808_v9 = vshrl.u32 %v8448_v33, 16  ;;  %v8811_v47 = vshll.u32 %v8448_v33, 16  ;;  %v10121_v12 = vrot.slane %v10119_v4, 5  ;;  %v10050_v33 = vld [vmem:[#allocation2 + $0x30] sm:$0xf] }
 0x405   : > { %v8796_v60 = vsel %vm14296_vm9, %v8791_v44, %v8795_v63  ;;  %v8806_v40 = vsel %vm14296_vm9, %v8801_v26, %v8805_v51  ;;  %v10125_v5 = vrot.slane %v10123_v15, 4  ;;  %v10131_v2 = vrot.slane %v10129_v21, 5  ;;  %v17956_v26 = vld [vmem:[#allocation2 + $0x34] sm:$0xf] }
 0x406   : > { %v12143_v31 = vcombine.low %v8796_v60, %v8806_v40  ;;  %v10116_v34 = vor.u32 %v10115_v28, %v10112_v49  ;;  %v8810_v16 = vrot.slane %v8808_v9, 4  ;;  %v8813_v8 = vrot.slane %v8811_v47, 5 }
 0x407   : > { %13502 = vmatmul.mubr.bf16.gmra.mxu0 %v12185_v14  ;;  %v10126_v35 = vor.u32 %v10125_v5, %v10121_v12  ;;  %v8817_v29 = vshll.u32 %v17866_v58, 16  ;;  %v8821_v7 = vshrl.u32 %v17866_v58, 16  ;;  %v8827_v55 = vshll.u32 %v17870_v23, 16  ;;  %v8451_v23 = vld [vmem:[#allocation2 + $0xc0] sm:$0xf] }
 0x408   : > { %v10117_v11 = vrot.slane %v10116_v34, 4  ;;  %v10134_v43 = vshrl.u32 %v10047_v48, 16  ;;  %v10137_v17 = vshll.u32 %v10047_v48, 16  ;;  %v8814_v22 = vor.u32 %v8813_v8, %v8810_v16 }
 0x409   : > { %v10127_v59 = vrot.slane %v10126_v35, 4  ;;  %v8819_v20 = vrot.slane %v8817_v29, 5  ;;  %v8823_v24 = vrot.slane %v8821_v7, 4  ;;  %v8829_v58 = vrot.slane %v8827_v55, 5  ;;  %v10053_v7 = vld [vmem:[#allocation2 + $0x3c] sm:$0xf] }
 0x40a   : > { %13446 = vmatmul.mubr.bf16.gmra.mxu1 %v17902_v42  ;;  %v10122_v45 = vsel %vm14296_vm9, %v10117_v11, %v10121_v12  ;;  %v10136_v0 = vrot.slane %v10134_v43, 4  ;;  %v10139_v30 = vrot.slane %v10137_v17, 5  ;;  %v8815_v18 = vrot.slane %v8814_v22, 4  ;;  %v17971_v17 = vld [vmem:[#allocation2 + $0x40] sm:$0xf] }
 0x40b   : > { %13449 = vmatprep.mubr.bf16.mxu1 %v12142_v50  ;;  %v10132_v39 = vsel %vm14296_vm9, %v10127_v59, %v10131_v2  ;;  %v8824_v53 = vor.u32 %v8823_v24, %v8819_v20  ;;  %v10143_v42 = vshll.u32 %v17936_v41, 16  ;;  %v10147_v63 = vshrl.u32 %v17936_v41, 16 }
 0x40c   : > { %v12218_v1 = vcombine.low %v10122_v45, %v10132_v39  ;;  %v10140_v6 = vor.u32 %v10139_v30, %v10136_v0  ;;  %v10153_v10 = vshll.u32 %v17939_v62, 16  ;;  %v8820_v52 = vsel %vm14296_vm9, %v8815_v18, %v8819_v20  ;;  %v17952_v51 = vpop.f32.mrf.mxu0  ;;  %v17978_v30 = vld [vmem:[#allocation2 + $0x44] sm:$0x1] }
 0x40d   : > { %v8825_v3 = vrot.slane %v8824_v53, 4  ;;  %v10145_v19 = vrot.slane %v10143_v42, 5  ;;  %v8832_v13 = vshrl.u32 %v8451_v23, 16  ;;  %v10149_v14 = vrot.slane %v10147_v63, 4  ;;  %v10056_v63 = vld [vmem:[#allocation2 + $0x48] sm:$0xf] }
 0x40e   : > { %13569 = vmatprep.mubr.bf16.mxu0 %v12218_v1  ;;  %v10141_v57 = vrot.slane %v10140_v6, 4  ;;  %v10155_v61 = vrot.slane %v10153_v10, 5  ;;  %v8835_v46 = vshll.u32 %v8451_v23, 16  ;;  %v8841_v38 = vshll.u32 %v17887_v54, 16  ;;  %v17961_v12 = vpop.f32.mrf.mxu0 }
 0x40f   : > { %v8830_v50 = vsel %vm14296_vm9, %v8825_v3, %v8829_v58  ;;  %v8834_v49 = vrot.slane %v8832_v13, 4  ;;  %v8845_v44 = vshrl.u32 %v17887_v54, 16  ;;  %v10150_v28 = vor.u32 %v10149_v14, %v10145_v19  ;;  %v17963_v54 = vld [vmem:[#allocation2 + $0x38] sm:$0x1]  ;;  %v17985_v13 = vld [vmem:[#allocation2 + $0x4c] sm:$0xf] }
 0x410   : > { %v12144_v4 = vcombine.low %v8820_v52, %v8830_v50  ;;  %v10146_v15 = vsel %vm14296_vm9, %v10141_v57, %v10145_v19  ;;  %v8837_v21 = vrot.slane %v8835_v46, 5  ;;  %v8843_v9 = vrot.slane %v8841_v38, 5  ;;  %v17967_v29 = vpop.f32.mrf.mxu0  ;;  %v13929_v14 = vld [vmem:[#allocation2 + $0x18] sm:$0xff]  }
 0x411   : > { %v8847_v47 = vrot.slane %v8845_v44, 4  ;;  %v8851_v60 = vshll.u32 %v17897_v32, 16  ;;  %v10158_v40 = vshrl.u32 %v10050_v33, 16  ;;  %v10151_v5 = vrot.slane %v10150_v28, 4  ;;  %v17993_v44 = vld [vmem:[#allocation2 + $0x50] sm:$0x1] }
 0x412   : > { %13450 = vmatmul.mubr.bf16.gmra.mxu1 %v12143_v31  ;;  %v8838_v48 = vor.u32 %v8837_v21, %v8834_v49  ;;  %v10161_v34 = vshll.u32 %v10050_v33, 16  ;;  %v10167_v2 = vshll.u32 %v17956_v26, 16  ;;  %v10171_v31 = vshrl.u32 %v17956_v26, 16  ;;  %v17974_v45 = vpop.f32.mrf.mxu0 }
 0x413   : > { %13453 = vmatprep.mubr.bf16.mxu1 %v12144_v4  ;;  %v8848_v16 = vor.u32 %v8847_v47, %v8843_v9  ;;  %v8853_v35 = vrot.slane %v8851_v60, 5  ;;  %v10160_v8 = vrot.slane %v10158_v40, 4  ;;  %v10156_v32 = vsel %vm14296_vm9, %v10151_v5, %v10155_v61  ;;  %v10059_v5 = vld [vmem:[#allocation2 + $0x54] sm:$0xf] }
 0x414   : > { %v8839_v11 = vrot.slane %v8838_v48, 4  ;;  %v10163_v55 = vrot.slane %v10161_v34, 5  ;;  %v10169_v43 = vrot.slane %v10167_v2, 5  ;;  %v12219_v59 = vcombine.low %v10146_v15, %v10156_v32  ;;  %v17982_v1 = vpop.f32.mrf.mxu0 }
 0x415   : > { %v8849_v22 = vrot.slane %v8848_v16, 4  ;;  %v10173_v20 = vrot.slane %v10171_v31, 4  ;;  %v10177_v24 = vshll.u32 %v17963_v54, 16  ;;  %v10182_v23 = vshrl.u32 %v10053_v7, 16 }
 0x416   : > { %v8844_v58 = vsel %vm14296_vm9, %v8839_v11, %v8843_v9  ;;  %v10164_v0 = vor.u32 %v10163_v55, %v10160_v8  ;;  %v10185_v39 = vshll.u32 %v10053_v7, 16  ;;  %13570 = vmatmul.mubr.bf16.vlgmr.msra.gmra.mxu0 %v12219_v59  ;;  %v10191_v6 = vshll.u32 %v17971_v17, 16  ;;  %v17989_v50 = vpop.f32.mrf.mxu0  ;;  %v18006_v55 = vld [vmem:[#allocation2 + $0x58] sm:$0xf] }
 0x417   : > { %v8854_v18 = vsel %vm14296_vm9, %v8849_v22, %v8853_v35  ;;  %v10174_v53 = vor.u32 %v10173_v20, %v10169_v43  ;;  %v10179_v42 = vrot.slane %v10177_v24, 5  ;;  %v10184_v3 = vrot.slane %v10182_v23, 4  ;;  %v13930_v24 = vld [vmem:[#allocation2 + $0x24] sm:$0xff]  }
 0x418   : > { %v12145_v10 = vcombine.low %v8844_v58, %v8854_v18  ;;  %v10165_v52 = vrot.slane %v10164_v0, 4  ;;  %v10187_v19 = vrot.slane %v10185_v39, 5  ;;  %v10193_v61 = vrot.slane %v10191_v6, 5  ;;  %v17998_v40 = vpop.f32.mrf.mxu0  ;;  %v18019_v6 = vld [vmem:[#allocation2 + $0x5c] sm:$0x1] }
 0x419   : > { %v10175_v57 = vrot.slane %v10174_v53, 4  ;;  %v10195_v46 = vshrl.u32 %v17971_v17, 16  ;;  %v10201_v33 = vshll.u32 %v17978_v30, 16  ;;  %v10206_v4 = vshrl.u32 %v10056_v63, 16 }
 0x41a   : > { %13454 = vmatmul.mubr.bf16.gmra.mxu1 %v12145_v10  ;;  %v10170_v49 = vsel %vm14296_vm9, %v10165_v52, %v10169_v43  ;;  %v10188_v38 = vor.u32 %v10187_v19, %v10184_v3  ;;  %v10209_v15 = vshll.u32 %v10056_v63, 16  ;;  %v10215_v60 = vshll.u32 %v17985_v13, 16  ;;  %v18004_v11 = vpop.f32.mrf.mxu0 }
 0x41b   : > { %v10180_v28 = vsel %vm14296_vm9, %v10175_v57, %v10179_v42  ;;  %13521 = vmatprep.mubr.bf16.mxu1 %v13929_v14  ;;  %v10197_v21 = vrot.slane %v10195_v46, 4  ;;  %v10203_v9 = vrot.slane %v10201_v33, 5  ;;  %v13235_v47 = vpop.f32.mrf.mxu1  ;;  %v10208_v16 = vrot.slane %v10206_v4, 4  ;;  %v13932_v57 = vld [vmem:[#allocation2 + $0x30] sm:$0xff]   ;;  %v10062_v46 = vld [vmem:[#allocation2 + $0x60] sm:$0xf] }
 0x41c   : > { %v12220_v48 = vcombine.low %v10170_v49, %v10180_v28  ;;  %v10189_v34 = vrot.slane %v10188_v38, 4  ;;  %v18001_v2 = vadd.f32 %v17952_v51, %v13235_v47  ;;  %v10211_v8 = vrot.slane %v10209_v15, 5  ;;  %v18014_v39 = vpop.f32.mrf.mxu0  ;;  %v18030_v15 = vld [vmem:[#allocation2 + $0x64] sm:$0xf] }
 0x41d   : > { %v10198_v35 = vor.u32 %v10197_v21, %v10193_v61  ;;  %v10217_v31 = vrot.slane %v10215_v60, 5  ;;  %v10219_v7 = vshrl.u32 %v17985_v13, 16  ;;  %v7106_v32 = vpop.f32.mrf.mxu1  ;;  %v10225_v59 = vshll.u32 %v17993_v44, 16 }
 0x41e   : > { %13573 = vmatprep.mubr.bf16.mxu0 %v12220_v48  ;;  %v10194_v43 = vsel %vm14296_vm9, %v10189_v34, %v10193_v61  ;;  %v18012_v51 = vadd.f32 %v17961_v12, %v7106_v32  ;;  %v10230_v22 = vshrl.u32 %v10059_v5, 16  ;;  %v10212_v58 = vor.u32 %v10211_v8, %v10208_v16  ;;  %v13934_v12 = vld [vmem:[#allocation6 + $0x470] sm:$0xff]   ;;  %v18024_v33 = vpop.f32.mrf.mxu0  ;;  %v13937_v8 = vld [vmem:[#allocation6 + $0x468] sm:$0xff]  }
 0x41f   : > { %v10199_v20 = vrot.slane %v10198_v35, 4  ;;  %v10221_v0 = vrot.slane %v10219_v7, 4  ;;  %v13236_v23 = vpop.f32.mrf.mxu1  ;;  %v10233_v18 = vshll.u32 %v10059_v5, 16  ;;  %v10227_v53 = vrot.slane %v10225_v59, 5  ;;  %v18041_v34 = vld [vmem:[#allocation2 + $0x68] sm:$0x1] }
 0x420   : > { %v18017_v42 = vadd.f32 %v17967_v29, %v13236_v23  ;;  %v10232_v63 = vrot.slane %v10230_v22, 4  ;;  %v10239_v10 = vshll.u32 %v18006_v55, 16  ;;  %v10213_v3 = vrot.slane %v10212_v58, 4  ;;  %v18036_v5 = vpop.f32.mrf.mxu0  ;;  %v10065_v58 = vld [vmem:[#allocation2 + $0x6c] sm:$0xf] }
 0x421   : > { %v10204_v52 = vsel %vm14296_vm9, %v10199_v20, %v10203_v9  ;;  %v10222_v19 = vor.u32 %v10221_v0, %v10217_v31  ;;  %v7109_v14 = vpop.f32.mrf.mxu1  ;;  %v10235_v61 = vrot.slane %v10233_v18, 5  ;;  %v10243_v4 = vshrl.u32 %v18006_v55, 16 }
 0x422   : > { %v12221_v49 = vcombine.low %v10194_v43, %v10204_v52  ;;  %13522 = vmatmul.mubr.bf16.vlgmr.msra.gmra.mxu1 %v13930_v24  ;;  %v18027_v29 = vadd.f32 %v17974_v45, %v7109_v14  ;;  %v10241_v38 = vrot.slane %v10239_v10, 5  ;;  %v10218_v28 = vsel %vm14296_vm9, %v10213_v3, %v10217_v31  ;;  %v18046_v59 = vpop.f32.mrf.mxu0  ;;  %v18056_v52 = vld [vmem:[#allocation2 + $0x70] sm:$0xf]  ;;  %v13935_v14 = vld [vmem:[#allocation2 + $0x48] sm:$0xff]  }
 0x423   : > { %v10223_v21 = vrot.slane %v10222_v19, 4  ;;  %13525 = vmatprep.mubr.bf16.mxu1 %v13932_v57  ;;  %13602 = vmatpush3.bf16.msra.mxu1 %v17904_v36  ;;  %v10236_v9 = vor.u32 %v10235_v61, %v10232_v63  ;;  %v10249_v47 = vshll.u32 %v18019_v6, 16  ;;  %v13239_v60 = vpop.f32.mrf.mxu1  ;;  %v10245_v45 = vrot.slane %v10243_v4, 4  ;;  %v13933_v19 = vld [vmem:[#allocation2 + $0x3c] sm:$0xff]  }
 0x424   : > { %13574 = vmatmul.mubr.bf16.gmra.mxu0 %v12221_v49  ;;  %v18039_v48 = vadd.f32 %v17982_v1, %v13239_v60  ;;  %v10254_v16 = vshrl.u32 %v10062_v46, 16  ;;  %v10257_v35 = vshll.u32 %v10062_v46, 16  ;;  %13603 = vmatprep.subr.bf16.mxu1 %v13934_v12  ;;  %v10263_v32 = vshll.u32 %v18030_v15, 16  ;;  %v18054_v10 = vpop.f32.mrf.mxu0  ;;  %v13940_v49 = vld [vmem:[#allocation6 + $0x460] sm:$0xff]  }
 0x425   : > { %v10228_v36 = vsel %vm14296_vm9, %v10223_v21, %v10227_v53  ;;  %v10237_v31 = vrot.slane %v10236_v9, 4  ;;  %v10251_v7 = vrot.slane %v10249_v47, 5  ;;  %v7122_v43 = vpop.f32.mrf.mxu1  ;;  %v10246_v20 = vor.u32 %v10245_v45, %v10241_v38 }
 0x426   : > { %v12222_v22 = vcombine.low %v10218_v28, %v10228_v36  ;;  %v10256_v1 = vrot.slane %v10254_v16, 4  ;;  %v10259_v24 = vrot.slane %v10257_v35, 5  ;;  %v18050_v23 = vrot.slane %v10263_v32, 5  ;;  %v18064_v28 = vld [vmem:[#allocation2 + $0x74] sm:$0x1]  ;;  %v18066_v47 = vpop.f32.mrf.mxu0 }
 0x427   : > { %v10242_v0 = vsel %vm14296_vm9, %v10237_v31, %v10241_v38  ;;  %v10267_v18 = vshrl.u32 %v18030_v15, 16  ;;  %v10273_v53 = vshll.u32 %v18041_v34, 16  ;;  %13604 = vmatpush3.bf16.msra.mxu1 %v13934_v12  ;;  %v13240_v63 = vpop.f32.mrf.mxu1  ;;  %v10247_v3 = vrot.slane %v10246_v20, 4  ;;  %v10068_v16 = vld [vmem:[#allocation2 + $0x78] sm:$0xf] }
 0x428   : > { %13577 = vmatprep.mubr.bf16.mxu0 %v12222_v22  ;;  %v10260_v57 = vor.u32 %v10259_v24, %v10256_v1  ;;  %v18059_v61 = vadd.f32 %v17989_v50, %v7122_v43  ;;  %v18062_v46 = vadd.f32 %v17998_v40, %v13240_v63  ;;  %13605 = vmatprep.subr.bf16.mxu1 %v13937_v8  ;;  %v10278_v21 = vshrl.u32 %v10065_v58, 16  ;;  %v18075_v43 = vld [vmem:[#allocation2 + $0x7c] sm:$0xf]  ;;  %v18077_v22 = vpop.f32.mrf.mxu0  ;;  %v13943_v24 = vld [vmem:[#allocation6 + $0x458] sm:$0xff]  }
 0x429   : > { %v10269_v38 = vrot.slane %v10267_v18, 4  ;;  %v10275_v12 = vrot.slane %v10273_v53, 5  ;;  %v7125_v4 = vpop.f32.mrf.mxu1  ;;  %v10281_v9 = vshll.u32 %v10065_v58, 16  ;;  %v10252_v60 = vsel %vm14296_vm9, %v10247_v3, %v10251_v7 }
 0x42a   : > { %19633 = vst [vmem:[#allocation27_spill] sm:$0xff] %v18059_v61  ;;  %19634 = vst [vmem:[#allocation54_spill] sm:$0xff] %v18062_v46  ;;  %13526 = vmatmul.mubr.bf16.gmra.mxu1 %v13933_v19  ;;  %v10261_v50 = vrot.slane %v10260_v57, 4  ;;  %v18071_v45 = vadd.f32 %v18004_v11, %v7125_v4  ;;  %v10287_v40 = vshll.u32 %v18056_v52, 16  ;;  %v12223_v35 = vcombine.low %v10242_v0, %v10252_v60  ;;  %v18086_v63 = vpop.f32.mrf.mxu0  ;;  %v18091_v57 = vld [vmem:[#allocation2 + $0x80] sm:$0x1] }
 0x42b   : > { %v10270_v36 = vor.u32 %v10269_v38, %v18050_v23  ;;  %13529 = vmatprep.mubr.bf16.mxu1 %v13935_v14  ;;  %v10280_v31 = vrot.slane %v10278_v21, 4  ;;  %v10283_v32 = vrot.slane %v10281_v9, 5  ;;  %13606 = vmatpush3.bf16.msra.mxu1 %v13937_v8  ;;  %v10291_v20 = vshrl.u32 %v18056_v52, 16  ;;  %v13952_v61 = vld [vmem:[#allocation6 + $0x440] sm:$0xff]  }
 0x42c   : > { %19635 = vst [vmem:[#allocation61_spill] sm:$0xff] %v18071_v45  ;;  %v10266_v7 = vsel %vm14296_vm9, %v10261_v50, %v18050_v23  ;;  %v18082_v11 = vrot.slane %v10287_v40, 5  ;;  %v10297_v1 = vshll.u32 %v18064_v28, 16  ;;  %13607 = vmatprep.subr.bf16.mxu1 %v13940_v49  ;;  %13578 = vmatmul.mubr.bf16.gmra.mxu0 %v12223_v35  ;;  %v10302_v53 = vshrl.u32 %v10068_v16, 16  ;;  %v18096_v50 = vpop.f32.mrf.mxu0  ;;  %v10071_v40 = vld [vmem:[#allocation2 + $0x84] sm:$0xf] }
 0x42d   : > { %v10271_v58 = vrot.slane %v10270_v36, 4  ;;  %v10284_v0 = vor.u32 %v10283_v32, %v10280_v31  ;;  %v13243_v18 = vpop.f32.mrf.mxu1  ;;  %v10305_v8 = vshll.u32 %v10068_v16, 16  ;;  %v10293_v3 = vrot.slane %v10291_v20, 4  ;;  %v18100_v32 = vld [vmem:[#allocation2 + $0x88] sm:$0xf] }
 0x42e   : > { %v10299_v19 = vrot.slane %v10297_v1, 5  ;;  %v18089_v23 = vadd.f32 %v18014_v39, %v13243_v18  ;;  %v10311_v14 = vshll.u32 %v18075_v43, 16  ;;  %v10304_v21 = vrot.slane %v10302_v53, 4  ;;  %v13936_v39 = vld [vmem:[#allocation2 + $0x54] sm:$0xff]   ;;  %v13946_v20 = vld [vmem:[#allocation6 + $0x450] sm:$0xff]   ;;  %v18109_v18 = vpop.f32.mrf.mxu0 }
 0x42f   : > { %v10276_v38 = vsel %vm14296_vm9, %v10271_v58, %v10275_v12  ;;  %v10285_v4 = vrot.slane %v10284_v0, 4  ;;  %v10307_v9 = vrot.slane %v10305_v8, 5  ;;  %v7138_v60 = vpop.f32.mrf.mxu1  ;;  %13608 = vmatpush3.bf16.msra.mxu1 %v13940_v49  ;;  %v10294_v35 = vor.u32 %v10293_v3, %v18082_v11  ;;  %v13938_v0 = vld [vmem:[#allocation2 + $0x60] sm:$0xff]  }
 0x430   : > { %19636 = vst [vmem:[#allocation25_spill] sm:$0xff] %v18089_v23  ;;  %v12224_v16 = vcombine.low %v10266_v7, %v10276_v38  ;;  %v10313_v36 = vrot.slane %v10311_v14, 5  ;;  %v10315_v31 = vshrl.u32 %v18075_v43, 16  ;;  %13609 = vmatprep.subr.bf16.mxu1 %v13943_v24  ;;  %v10321_v58 = vshll.u32 %v18091_v57, 16  ;;  %v13939_v23 = vld [vmem:[#allocation2 + $0x6c] sm:$0xff]  }
 0x431   : > { %v10290_v12 = vsel %vm14296_vm9, %v10285_v4, %v18082_v11  ;;  %v10308_v1 = vor.u32 %v10307_v9, %v10304_v21  ;;  %v18107_v49 = vadd.f32 %v18024_v33, %v7138_v60  ;;  %v13244_v7 = vpop.f32.mrf.mxu1  ;;  %v10295_v53 = vrot.slane %v10294_v35, 4  ;;  %v18114_v21 = vld [vmem:[#allocation2 + $0x8c] sm:$0x1]  ;;  %v18117_v60 = vpop.f32.mrf.mxu0 }
 0x432   : > { %13581 = vmatprep.mubr.bf16.mxu0 %v12224_v16  ;;  %13530 = vmatmul.mubr.bf16.gmra.mxu1 %v13936_v39  ;;  %v10317_v8 = vrot.slane %v10315_v31, 4  ;;  %v18112_v3 = vadd.f32 %v18036_v5, %v13244_v7  ;;  %v10326_v14 = vshrl.u32 %v10071_v40, 16  ;;  %v10323_v11 = vrot.slane %v10321_v58, 5  ;;  %v10074_v31 = vld [vmem:[#allocation2 + $0x90] sm:$0xf]  ;;  %v13949_v58 = vld [vmem:[#allocation6 + $0x448] sm:$0xff]  }
 0x433   : > { %19637 = vst [vmem:[#allocation57_spill] sm:$0xff] %v18107_v49  ;;  %v10309_v38 = vrot.slane %v10308_v1, 4  ;;  %13533 = vmatprep.mubr.bf16.mxu1 %v13938_v0  ;;  %v7141_v4 = vpop.f32.mrf.mxu1  ;;  %v10329_v9 = vshll.u32 %v10071_v40, 16  ;;  %v10335_v33 = vshll.u32 %v18100_v32, 16  ;;  %13610 = vmatpush3.bf16.msra.mxu1 %v13943_v24  ;;  %v10300_v16 = vsel %vm14296_vm9, %v10295_v53, %v10299_v19  ;;  %v18124_v1 = vld [vmem:[#allocation2 + $0x94] sm:$0xf]  ;;  %v18130_v49 = vpop.f32.mrf.mxu0 }
 0x434   : > { %19638 = vst [vmem:[#allocation38_spill] sm:$0xff] %v18112_v3  ;;  %v10318_v35 = vor.u32 %v10317_v8, %v10313_v36  ;;  %v18122_v5 = vadd.f32 %v18046_v59, %v7141_v4  ;;  %v10328_v39 = vrot.slane %v10326_v14, 4  ;;  %19640 = vst [vmem:[#allocation32_spill] sm:$0xff] %v18124_v1  ;;  %13611 = vmatprep.subr.bf16.mxu1 %v13946_v20  ;;  %v10339_v59 = vshrl.u32 %v18100_v32, 16 }
 0x435   : > { %v12225_v0 = vcombine.low %v10290_v12, %v10300_v16  ;;  %v10314_v40 = vsel %vm14296_vm9, %v10309_v38, %v10313_v36  ;;  %v10331_v7 = vrot.slane %v10329_v9, 5  ;;  %v18128_v3 = vrot.slane %v10335_v33, 5  ;;  %v13247_v24 = vpop.f32.mrf.mxu1  ;;  %v18137_v12 = vld [vmem:[#allocation2 + $0x98] sm:$0x1]  ;;  %v18140_v33 = vpop.f32.mrf.mxu0 }
 0x436   : > { %19639 = vst [vmem:[#allocation34_spill] sm:$0xff] %v18122_v5  ;;  %v10319_v19 = vrot.slane %v10318_v35, 4  ;;  %v10345_v53 = vshll.u32 %v18114_v21, 16  ;;  %v18135_v8 = vadd.f32 %v18054_v10, %v13247_v24  ;;  %19642 = vst [vmem:[#allocation46_spill] sm:$0xff] %v18137_v12  ;;  %v10350_v4 = vshrl.u32 %v10074_v31, 16 }
 0x437   : > { %13582 = vmatmul.mubr.bf16.gmra.mxu0 %v12225_v0  ;;  %v10332_v14 = vor.u32 %v10331_v7, %v10328_v39  ;;  %v10353_v36 = vshll.u32 %v10074_v31, 16  ;;  %v10359_v38 = vshll.u32 %v18124_v1, 16  ;;  %v7154_v9 = vpop.f32.mrf.mxu1  ;;  %13612 = vmatpush3.bf16.msra.mxu1 %v13946_v20  ;;  %v10341_v35 = vrot.slane %v10339_v59, 4  ;;  %v10077_v0 = vld [vmem:[#allocation2 + $0x9c] sm:$0xf]  ;;  %v18145_v46 = vpop.f32.mrf.mxu0 }
 0x438   : > { %19641 = vst [vmem:[#allocation42_spill] sm:$0xff] %v18135_v8  ;;  %v10324_v16 = vsel %vm14296_vm9, %v10319_v19, %v10323_v11  ;;  %v10347_v5 = vrot.slane %v10345_v53, 5  ;;  %v10363_v10 = vshrl.u32 %v18124_v1, 16  ;;  %13613 = vmatprep.subr.bf16.mxu1 %v13949_v58  ;;  %v10352_v24 = vrot.slane %v10350_v4, 4  ;;  %v13941_v8 = vld [vmem:[#allocation2 + $0x78] sm:$0xff]  }
 0x439   : > { %v12226_v39 = vcombine.low %v10314_v40, %v10324_v16  ;;  %v10333_v7 = vrot.slane %v10332_v14, 4  ;;  %v10355_v31 = vrot.slane %v10353_v36, 5  ;;  %v13248_v45 = vpop.f32.mrf.mxu1  ;;  %v10342_v20 = vor.u32 %v10341_v35, %v18128_v3  ;;  %v18155_v36 = vld [vmem:[#allocation2 + $0xa0] sm:$0xf]  ;;  %v18157_v35 = vpop.f32.mrf.mxu0 }
 0x43a   : > { %13534 = vmatmul.mubr.bf16.gmra.mxu1 %v13939_v23  ;;  %v10361_v11 = vrot.slane %v10359_v38, 5  ;;  %v10365_v19 = vrot.slane %v10363_v10, 4  ;;  %v10369_v59 = vshll.u32 %v18137_v12, 16  ;;  %v18153_v14 = vadd.f32 %v18066_v47, %v7154_v9  ;;  %19644 = vst [vmem:[#allocation55_spill] sm:$0xff] %v18155_v36  ;;  %v18162_v12 = vld [vmem:[#allocation2 + $0xa4] sm:$0x1] }
 0x43b   : > { %13585 = vmatprep.mubr.bf16.mxu0 %v12226_v39  ;;  %v10338_v40 = vsel %vm14296_vm9, %v10333_v7, %v18128_v3  ;;  %v10356_v53 = vor.u32 %v10355_v31, %v10352_v24  ;;  %13537 = vmatprep.mubr.bf16.mxu1 %v13941_v8  ;;  %v7157_v4 = vpop.f32.mrf.mxu1  ;;  %v10374_v16 = vshrl.u32 %v10077_v0, 16  ;;  %v10343_v23 = vrot.slane %v10342_v20, 4  ;;  %19646 = vst [vmem:[#allocation59_spill] sm:$0xff] %v18162_v12  ;;  %v18167_v7 = vpop.f32.mrf.mxu0 }
 0x43c   : > { %19643 = vst [vmem:[#allocation23_spill] sm:$0xff] %v18153_v14  ;;  %v10366_v38 = vor.u32 %v10365_v19, %v10361_v11  ;;  %v10371_v10 = vrot.slane %v10369_v59, 5  ;;  %v18160_v39 = vadd.f32 %v18077_v22, %v13248_v45  ;;  %13614 = vmatpush3.bf16.msra.mxu1 %v13949_v58  ;;  %v18165_v8 = vadd.f32 %v18086_v63, %v7157_v4  ;;  %v10080_v22 = vld [vmem:[#allocation2 + $0xa8] sm:$0xf] }
 0x43d   : > { %v10357_v3 = vrot.slane %v10356_v53, 4  ;;  %v10376_v47 = vrot.slane %v10374_v16, 4  ;;  %v10377_v9 = vshll.u32 %v10077_v0, 16  ;;  %13615 = vmatprep.subr.bf16.mxu1 %v13952_v61  ;;  %v10348_v24 = vsel %vm14296_vm9, %v10343_v23, %v10347_v5  ;;  %v18176_v53 = vld [vmem:[#allocation2 + $0xac] sm:$0xf]  ;;  %v18178_v4 = vpop.f32.mrf.mxu0 }
 0x43e   : > { %19645 = vst [vmem:[#allocation66_spill] sm:$0xff] %v18160_v39  ;;  %19647 = vst [vmem:[#allocation31_spill] sm:$0xff] %v18165_v8  ;;  %v10367_v31 = vrot.slane %v10366_v38, 4  ;;  %v10383_v20 = vshll.u32 %v18155_v36, 16  ;;  %v10387_v45 = vshrl.u32 %v18155_v36, 16  ;;  %v12227_v19 = vcombine.low %v10338_v40, %v10348_v24  ;;  %v13942_v40 = vld [vmem:[#allocation2 + $0x84] sm:$0xff]  }
 0x43f   : > { %v10362_v58 = vsel %vm14296_vm9, %v10357_v3, %v10361_v11  ;;  %v10379_v63 = vrot.slane %v10377_v9, 5  ;;  %v10393_v59 = vshll.u32 %v18162_v12, 16  ;;  %v13251_v0 = vpop.f32.mrf.mxu1  ;;  %19648 = vst [vmem:[#allocation56_spill] sm:$0xff] %v18176_v53  ;;  %v18185_v24 = vld [vmem:[#allocation2 + $0xb0] sm:$0x1]  ;;  %v10398_v8 = vshrl.u32 %v10080_v22, 16  ;;  %v18187_v12 = vpop.f32.mrf.mxu0 }
 0x440   : > { %v10372_v5 = vsel %vm14296_vm9, %v10367_v31, %v10371_v10  ;;  %v10385_v16 = vrot.slane %v10383_v20, 5  ;;  %v10389_v23 = vrot.slane %v10387_v45, 4  ;;  %v18183_v38 = vadd.f32 %v18096_v50, %v13251_v0  ;;  %19650 = vst [vmem:[#allocation62_spill] sm:$0xff] %v18185_v24  ;;  %13616 = vmatpush3.bf16.msra.mxu1 %v13952_v61  ;;  %13586 = vmatmul.mubr.bf16.gmra.mxu0 %v12227_v19  ;;  %v13944_v39 = vld [vmem:[#allocation2 + $0x90] sm:$0xff]  }
 0x441   : > { %v12228_v11 = vcombine.low %v10362_v58, %v10372_v5  ;;  %v10380_v3 = vor.u32 %v10379_v63, %v10376_v47  ;;  %v10395_v9 = vrot.slane %v10393_v59, 5  ;;  %v7170_v14 = vpop.f32.mrf.mxu1  ;;  %v10401_v10 = vshll.u32 %v10080_v22, 16  ;;  %v10083_v20 = vld [vmem:[#allocation2 + $0xb4] sm:$0xf]  ;;  %v18195_v63 = vpop.f32.mrf.mxu0 }
 0x442   : > { %19649 = vst [vmem:[#allocation26_spill] sm:$0xff] %v18183_v38  ;;  %v10390_v36 = vor.u32 %v10389_v23, %v10385_v16  ;;  %13538 = vmatmul.mubr.bf16.gmra.mxu1 %v13942_v40  ;;  %v10407_v31 = vshll.u32 %v18176_v53, 16  ;;  %v10411_v50 = vshrl.u32 %v18176_v53, 16  ;;  %v10400_v61 = vrot.slane %v10398_v8, 4  ;;  %v18197_v23 = vld [vmem:[#allocation2 + $0xb8] sm:$0xf] }
 0x443   : > { %13589 = vmatprep.mubr.bf16.mxu0 %v12228_v11  ;;  %v10381_v45 = vrot.slane %v10380_v3, 4  ;;  %v10417_v19 = vshll.u32 %v18185_v24, 16  ;;  %13541 = vmatprep.mubr.bf16.mxu1 %v13944_v39  ;;  %v18193_v47 = vadd.f32 %v18109_v18, %v7170_v14  ;;  %v13252_v58 = vpop.f32.mrf.mxu1  ;;  %v10403_v0 = vrot.slane %v10401_v10, 5  ;;  %19652 = vst [vmem:[#allocation45_spill] sm:$0xff] %v18197_v23  ;;  %v18204_v3 = vld [vmem:[#allocation2 + $0xbc] sm:$0x1]  ;;  %v18206_v14 = vpop.f32.mrf.mxu0 }
 0x444   : > { %v10391_v59 = vrot.slane %v10390_v36, 4  ;;  %v10409_v22 = vrot.slane %v10407_v31, 5  ;;  %v10413_v5 = vrot.slane %v10411_v50, 4  ;;  %v18202_v8 = vadd.f32 %v18117_v60, %v13252_v58  ;;  %19654 = vst [vmem:[#allocation39_spill] sm:$0xff] %v18204_v3 }
 0x445   : > { %19651 = vst [vmem:[#allocation48_spill] sm:$0xff] %v18193_v47  ;;  %v10386_v40 = vsel %vm14296_vm9, %v10381_v45, %v10385_v16  ;;  %v10419_v11 = vrot.slane %v10417_v19, 5  ;;  %v7173_v39 = vpop.f32.mrf.mxu1  ;;  %v10422_v18 = vshrl.u32 %v10083_v20, 16  ;;  %v10404_v10 = vor.u32 %v10403_v0, %v10400_v61  ;;  %v10086_v47 = vld [vmem:[#allocation2 + $0xc0] sm:$0xf] }
 0x446   : > { %19653 = vst [vmem:[#allocation35_spill] sm:$0xff] %v18202_v8  ;;  %v10396_v36 = vsel %vm14296_vm9, %v10391_v59, %v10395_v9  ;;  %v10414_v31 = vor.u32 %v10413_v5, %v10409_v22  ;;  %v18211_v50 = vadd.f32 %v18130_v49, %v7173_v39  ;;  %v10425_v19 = vshll.u32 %v10083_v20, 16  ;;  %v18214_v8 = vpop.f32.mrf.mxu0  ;;  %v13945_v61 = vld [vmem:[#allocation2 + $0x9c] sm:$0xff]   ;;  %v18221_v5 = vld [vmem:[#allocation2 + $0xc4] sm:$0xf] }
 0x447   : > { %v12229_v16 = vcombine.low %v10386_v40, %v10396_v36  ;;  %v10424_v45 = vrot.slane %v10422_v18, 4  ;;  %v10431_v60 = vshll.u32 %v18197_v23, 16  ;;  %v13255_v58 = vpop.f32.mrf.mxu1  ;;  %v10405_v38 = vrot.slane %v10404_v10, 4  ;;  %v13947_v40 = vld [vmem:[#allocation2 + $0xa8] sm:$0xff]  }
 0x448   : > { %19655 = vst [vmem:[#allocation37_spill] sm:$0xff] %v18211_v50  ;;  %v10415_v24 = vrot.slane %v10414_v31, 4  ;;  %v10435_v53 = vshrl.u32 %v18197_v23, 16  ;;  %v10441_v9 = vshll.u32 %v18204_v3, 16  ;;  %v10427_v59 = vrot.slane %v10425_v19, 5  ;;  %v18223_v18 = vpop.f32.mrf.mxu0 }
 0x449   : > { %13590 = vmatmul.mubr.bf16.gmra.mxu0 %v12229_v16  ;;  %v10433_v49 = vrot.slane %v10431_v60, 5  ;;  %v18219_v0 = vadd.f32 %v18140_v33, %v13255_v58  ;;  %v10446_v20 = vshrl.u32 %v10086_v47, 16  ;;  %v7186_v39 = vpop.f32.mrf.mxu1  ;;  %v10410_v36 = vsel %vm14296_vm9, %v10405_v38, %v10409_v22  ;;  %v18229_v60 = vld [vmem:[#allocation2 + $0xc8] sm:$0x1] }
 0x44a   : > { %v10420_v10 = vsel %vm14296_vm9, %v10415_v24, %v10419_v11  ;;  %v10437_v31 = vrot.slane %v10435_v53, 4  ;;  %13542 = vmatmul.mubr.bf16.gmra.mxu1 %v13945_v61  ;;  %v10428_v19 = vor.u32 %v10427_v59, %v10424_v45  ;;  %v10449_v58 = vshll.u32 %v10086_v47, 16  ;;  %v18231_v50 = vpop.f32.mrf.mxu0  ;;  %v10798_v61 = vld [vmem:[#allocation2 + $0x18] sm:$0xe] }
 0x44b   : > { %19656 = vst [vmem:[#allocation36_spill] sm:$0xff] %v18219_v0  ;;  %v12230_v16 = vcombine.low %v10410_v36, %v10420_v10  ;;  %v10448_v33 = vrot.slane %v10446_v20, 4  ;;  %13545 = vmatprep.mubr.bf16.mxu1 %v13947_v40  ;;  %v13256_v0 = vpop.f32.mrf.mxu1  ;;  %v10443_v23 = vrot.slane %v10441_v9, 5  ;;  %v10455_v1 = vshll.u32 %v18221_v5, 16  ;;  %v10089_v36 = vld [vmem:[#allocation2 + $0xcc] sm:$0xf] }
 0x44c   : > { %v10438_v3 = vor.u32 %v10437_v31, %v10433_v49  ;;  %v10459_v38 = vshrl.u32 %v18221_v5, 16  ;;  %v10429_v24 = vrot.slane %v10428_v19, 4  ;;  %v10451_v53 = vrot.slane %v10449_v58, 5  ;;  %v18241_v45 = vpop.f32.mrf.mxu0  ;;  %v18254_v19 = vld [vmem:[#allocation2 + $0xd0] sm:$0xf] }
 0x44d   : > { %13593 = vmatprep.mubr.bf16.mxu0 %v12230_v16  ;;  %v18236_v22 = vadd.f32 %v18145_v46, %v7186_v39  ;;  %v18239_v11 = vadd.f32 %v18157_v35, %v13256_v0  ;;  %v7189_v47 = vpop.f32.mrf.mxu1  ;;  %v10457_v20 = vrot.slane %v10455_v1, 5  ;;  %v10465_v40 = vshll.u32 %v18229_v60, 16  ;;  %v13948_v16 = vld [vmem:[#allocation2 + $0xb4] sm:$0xff]  }
 0x44e   : > { %v10439_v59 = vrot.slane %v10438_v3, 4  ;;  %v10461_v9 = vrot.slane %v10459_v38, 4  ;;  %v10434_v10 = vsel %vm14296_vm9, %v10429_v24, %v10433_v49  ;;  %v10452_v31 = vor.u32 %v10451_v53, %v10448_v33  ;;  %v18249_v39 = vpop.f32.mrf.mxu0  ;;  %v13950_v49 = vld [vmem:[#allocation2 + $0xc0] sm:$0xff]  }
 0x44f   : > { %19657 = vst [vmem:[#allocation58_spill] sm:$0xff] %v18239_v11  ;;  %v18247_v46 = vadd.f32 %v18167_v7, %v7189_v47  ;;  %v12242_v3 = vrot.slane %v10798_v61, 9  ;;  %v10881_v1 = vrot.slane %v17918_v27, 5  ;;  %v10470_v7 = vshrl.u32 %v10089_v36, 16 }
 0x450   : > { %v10444_v35 = vsel %vm14296_vm9, %v10439_v59, %v10443_v23  ;;  %v10462_v0 = vor.u32 %v10461_v9, %v10457_v20  ;;  %v10453_v38 = vrot.slane %v10452_v31, 4  ;;  %v18256_v33 = vpop.f32.mrf.mxu0  ;;  %v10473_v24 = vshll.u32 %v10089_v36, 16  ;;  %v18263_v59 = vld [vmem:[#allocation2 + $0xd4] sm:$0x1] }
 0x451   : > { %19658 = vst [vmem:[#allocation64_spill] sm:$0xff] %v18247_v46  ;;  %v12231_v58 = vcombine.low %v10434_v10, %v10444_v35  ;;  %v13259_v11 = vpop.f32.mrf.mxu1  ;;  %v10467_v47 = vrot.slane %v10465_v40, 5  ;;  %v10883_v23 = vrot.slane %v10881_v1, 4  ;;  %v10472_v9 = vrot.slane %v10470_v7, 4  ;;  %v10799_v35 = vld [vmem:[#allocation2 + $0x24] sm:$0xe] }
 0x452   : > { %v10463_v53 = vrot.slane %v10462_v0, 4  ;;  %v18259_v46 = vadd.f32 %v18178_v4, %v13259_v11  ;;  %13546 = vmatmul.mubr.bf16.gmra.mxu1 %v13948_v16  ;;  %v10458_v27 = vsel %vm14296_vm9, %v10453_v38, %v10457_v20  ;;  %v10475_v10 = vrot.slane %v10473_v24, 5  ;;  %v18266_v36 = vpop.f32.mrf.mxu0  ;;  %v10800_v0 = vld [vmem:[#allocation2 + $0x30] sm:$0xe] }
 0x453   : > { %13594 = vmatmul.mubr.bf16.gmra.mxu0 %v12231_v58  ;;  %13549 = vmatprep.mubr.bf16.mxu1 %v13950_v49  ;;  %v7202_v61 = vpop.f32.mrf.mxu1  ;;  %v10479_v31 = vshll.u32 %v18254_v19, 16  ;;  %v10884_v40 = vrot.slane %v17923_v25, 5  ;;  %v10483_v20 = vshrl.u32 %v18254_v19, 16  ;;  %v10882_v38 = vsel %vm14653_vm14, %v12242_v3, %v10881_v1 }
 0x454   : > { %v10468_v4 = vsel %vm14296_vm9, %v10463_v53, %v10467_v47  ;;  %v18271_v11 = vadd.f32 %v18187_v12, %v7202_v61  ;;  %v10476_v49 = vor.u32 %v10475_v10, %v10472_v9  ;;  %v18277_v24 = vpop.f32.mrf.mxu0  ;;  %v13951_v12 = vld [vmem:[#allocation2 + $0xcc] sm:$0xff]   ;;  %v10489_v61 = vshll.u32 %v18263_v59, 16 }
 0x455   : > { %v12232_v16 = vcombine.low %v10458_v27, %v10468_v4  ;;  %v13260_v58 = vpop.f32.mrf.mxu1  ;;  %v10481_v7 = vrot.slane %v10479_v31, 5  ;;  %v10885_v25 = vsel %vm14653_vm14, %v10883_v23, %v10884_v40  ;;  %v10485_v47 = vrot.slane %v10483_v20, 4  ;;  %v10801_v23 = vld [vmem:[#allocation2 + $0x3c] sm:$0xe] }
 0x456   : > { %19659 = vst [vmem:[#allocation43_spill] sm:$0xff] %v18271_v11  ;;  %v18280_v53 = vadd.f32 %v18195_v63, %v13260_v58  ;;  %v10477_v4 = vrot.slane %v10476_v49, 4  ;;  %v18285_v11 = vpop.f32.mrf.mxu0  ;;  %v12243_v3 = vrot.slane %v10799_v35, 9  ;;  %v10888_v1 = vrot.slane %v17936_v41, 5 }
 0x457   : > { %13597 = vmatprep.mubr.bf16.mxu0 %v12232_v16  ;;  %v7205_v27 = vpop.f32.mrf.mxu1  ;;  %v12244_v9 = vrot.slane %v10800_v0, 9  ;;  %v10486_v63 = vor.u32 %v10485_v47, %v10481_v7  ;;  %v10491_v31 = vrot.slane %v10489_v61, 5  ;;  %v10895_v58 = vrot.slane %v17956_v26, 5 }
 0x458   : > { %19660 = vst [vmem:[#allocation60_spill] sm:$0xff] %v18280_v53  ;;  %v18289_v10 = vadd.f32 %v18206_v14, %v7205_v27  ;;  %v12258_v20 = vcombine.low %v10882_v38, %v10885_v25  ;;  %v10482_v16 = vsel %vm14296_vm9, %v10477_v4, %v10481_v7  ;;  %v10890_v49 = vrot.slane %v10888_v1, 4  ;;  %v18295_v35 = vpop.f32.mrf.mxu0 }
 0x459   : > { %v13263_v40 = vpop.f32.mrf.mxu1  ;;  %v10891_v53 = vrot.slane %v17939_v62, 5  ;;  %v10487_v14 = vrot.slane %v10486_v63, 4  ;;  %v10897_v0 = vrot.slane %v10895_v58, 4  ;;  %v10898_v47 = vrot.slane %v17963_v54, 5 }
 0x45a   : > { %19661 = vst [vmem:[#allocation24_spill] sm:$0xff] %v18289_v10  ;;  %v18298_v41 = vadd.f32 %v18214_v8, %v13263_v40  ;;  %13550 = vmatmul.mubr.bf16.gmra.mxu1 %v13951_v12  ;;  %v10889_v38 = vsel %vm14653_vm14, %v12243_v3, %v10888_v1  ;;  %v18305_v25 = vpop.f32.mrf.mxu0  ;;  %v12245_v62 = vrot.slane %v10801_v23, 9  ;;  %v10902_v61 = vrot.slane %v17971_v17, 5  ;;  %v10802_v8 = vld [vmem:[#allocation2 + $0x48] sm:$0xe] }
 0x45b   : > { %13617 = vmatprep.mubr.bf16.mxu1 %v12258_v20  ;;  %v7218_v26 = vpop.f32.mrf.mxu1  ;;  %v10892_v7 = vsel %vm14653_vm14, %v10890_v49, %v10891_v53  ;;  %v10492_v54 = vsel %vm14296_vm9, %v10487_v14, %v10491_v31  ;;  %v10896_v27 = vsel %vm14653_vm14, %v12244_v9, %v10895_v58  ;;  %v10899_v4 = vsel %vm14653_vm14, %v10897_v0, %v10898_v47  ;;  %v10803_v3 = vld [vmem:[#allocation2 + $0x54] sm:$0xe]  ;;  %v10804_v9 = vld [vmem:[#allocation2 + $0x60] sm:$0xe] }
 0x45c   : > { %19662 = vst [vmem:[#allocation67_spill] sm:$0xff] %v18298_v41  ;;  %v18309_v12 = vadd.f32 %v18223_v18, %v7218_v26  ;;  %v12233_v53 = vcombine.low %v10482_v16, %v10492_v54  ;;  %v12259_v63 = vcombine.low %v10889_v38, %v10892_v7  ;;  %v18317_v23 = vpop.f32.mrf.mxu0  ;;  %v10904_v17 = vrot.slane %v10902_v61, 4  ;;  %v10805_v38 = vld [vmem:[#allocation2 + $0x6c] sm:$0xe] }
 0x45d   : > { %v13264_v1 = vpop.f32.mrf.mxu1  ;;  %v10905_v40 = vrot.slane %v17978_v30, 5  ;;  %v12260_v37 = vcombine.low %v10896_v27, %v10899_v4  ;;  %v12246_v31 = vrot.slane %v10802_v8, 9  ;;  %v10909_v20 = vrot.slane %v17985_v13, 5 }
 0x45e   : > { %19663 = vst [vmem:[#allocation50_spill] sm:$0xff] %v18309_v12  ;;  %v18321_v18 = vadd.f32 %v18231_v50, %v13264_v1  ;;  %13598 = vmatmul.mubr.bf16.gmra.mxu0 %v12233_v53  ;;  %v18324_v49 = vpop.f32.mrf.mxu0  ;;  %v10903_v16 = vsel %vm14653_vm14, %v12245_v62, %v10902_v61  ;;  %v12247_v0 = vrot.slane %v10803_v3, 9  ;;  %v10916_v30 = vrot.slane %v18006_v55, 5 }
 0x45f   : > { %v7221_v58 = vpop.f32.mrf.mxu1  ;;  %v10906_v14 = vsel %vm14653_vm14, %v10904_v17, %v10905_v40  ;;  %v10911_v47 = vrot.slane %v10909_v20, 4  ;;  %v10912_v13 = vrot.slane %v17993_v44, 5  ;;  %v10919_v26 = vrot.slane %v18019_v6, 5 }
 0x460   : > { %19664 = vst [vmem:[#allocation49_spill] sm:$0xff] %v18321_v18  ;;  %v18332_v50 = vadd.f32 %v18241_v45, %v7221_v58  ;;  %v12261_v8 = vcombine.low %v10903_v16, %v10906_v14  ;;  %v18336_v54 = vpop.f32.mrf.mxu0  ;;  %v10918_v62 = vrot.slane %v10916_v30, 4  ;;  %v12248_v61 = vrot.slane %v10804_v9, 9  ;;  %v10806_v45 = vld [vmem:[#allocation2 + $0x78] sm:$0xe] }
 0x461   : > { %v13331_v7 = vpop.f32.mrf.mxu1  ;;  %v10923_v27 = vrot.slane %v18030_v15, 5  ;;  %v10910_v55 = vsel %vm14653_vm14, %v12246_v31, %v10909_v20  ;;  %v10913_v44 = vsel %vm14653_vm14, %v10911_v47, %v10912_v13  ;;  %v18348_v6 = vsel %vm14653_vm14, %v12247_v0, %v10916_v30  ;;  %v10807_v20 = vld [vmem:[#allocation2 + $0x84] sm:$0xe] }
 0x462   : > { %19665 = vst [vmem:[#allocation40_spill] sm:$0xff] %v18332_v50  ;;  %v18340_v4 = vadd.f32 %v13331_v7, %v18001_v2  ;;  %13618 = vmatmul.mubr.bf16.vlgmr.msra.gmra.mxu1 %v12259_v63  ;;  %v18350_v53 = vpop.f32.mrf.mxu0  ;;  %v18354_v2 = vsel %vm14653_vm14, %v10918_v62, %v10919_v26  ;;  %v10926_v1 = vrot.slane %v18041_v34, 5  ;;  %v12249_v63 = vrot.slane %v10805_v38, 9  ;;  %v19672_v50 = vld [vmem:[#allocation54_spill] sm:$0xff] }
 0x463   : > { %13621 = vmatprep.mubr.bf16.mxu1 %v12260_v37  ;;  %v7861_v3 = vpop.f32.mrf.mxu1  ;;  %v10925_v15 = vrot.slane %v10923_v27, 4  ;;  %v12262_v40 = vcombine.low %v10910_v55, %v10913_v44  ;;  %v10930_v37 = vrot.slane %v18056_v52, 5  ;;  %v18367_v16 = vsel %vm14653_vm14, %v12248_v61, %v10923_v27  ;;  %v10808_v27 = vld [vmem:[#allocation2 + $0x90] sm:$0xe] }
 0x464   : > { %v18358_v17 = vadd.f32 %v7861_v3, %v18012_v51  ;;  %v18363_v58 = vpop.f32.mrf.mxu0  ;;  %v12250_v51 = vrot.slane %v10806_v45, 9  ;;  %v10937_v14 = vrot.slane %v18075_v43, 5  ;;  %v10933_v47 = vrot.slane %v18064_v28, 5 }
 0x465   : > { %v13332_v9 = vpop.f32.mrf.mxu1  ;;  %v18371_v34 = vsel %vm14653_vm14, %v10925_v15, %v10926_v1  ;;  %v10932_v30 = vrot.slane %v10930_v37, 4  ;;  %v10940_v7 = vrot.slane %v18091_v57, 5  ;;  %v12251_v62 = vrot.slane %v10807_v20, 9  ;;  %v10809_v57 = vld [vmem:[#allocation2 + $0x9c] sm:$0xe] }
 0x466   : > { %v18375_v0 = vadd.f32 %v13332_v9, %v18017_v42  ;;  %v18380_v26 = vpop.f32.mrf.mxu0  ;;  %v10939_v38 = vrot.slane %v10937_v14, 4  ;;  %v10944_v61 = vrot.slane %v18100_v32, 5  ;;  %v18389_v42 = vsel %vm14653_vm14, %v12249_v63, %v10930_v37  ;;  %v19666_v20 = vld [vmem:[#allocation32_spill] sm:$0xff] }
 0x467   : > { %v7864_v13 = vpop.f32.mrf.mxu1  ;;  %v18393_v28 = vsel %vm14653_vm14, %v10932_v30, %v10933_v47  ;;  %v18397_v55 = vsel %vm14653_vm14, %v12250_v51, %v10937_v14  ;;  %v10947_v15 = vrot.slane %v18114_v21, 5  ;;  %v12252_v37 = vrot.slane %v10808_v27, 9  ;;  %v10810_v51 = vld [vmem:[#allocation2 + $0xa8] sm:$0xe] }
 0x468   : > { %v18385_v43 = vadd.f32 %v7864_v13, %v18027_v29  ;;  %v18399_v45 = vpop.f32.mrf.mxu0  ;;  %v18405_v32 = vsel %vm14653_vm14, %v10939_v38, %v10940_v7  ;;  %v10946_v3 = vrot.slane %v10944_v61, 4  ;;  %v10951_v9 = vrot.slane %v19666_v20, 5  ;;  %v19668_v38 = vld [vmem:[#allocation27_spill] sm:$0xff] }
 0x469   : > { %v13335_v44 = vpop.f32.mrf.mxu1  ;;  %v18418_v47 = vsel %vm14653_vm14, %v12251_v62, %v10944_v61  ;;  %v12253_v21 = vrot.slane %v10809_v57, 9  ;;  %v19670_v61 = vld [vmem:[#allocation59_spill] sm:$0xff]  ;;  %v12254_v31 = vrot.slane %v10810_v51, 9 }
 0x46a   : > { %v18409_v1 = vadd.f32 %v13335_v44, %v18039_v48  ;;  %13622 = vmatmul.mubr.bf16.gmra.mxu1 %v12261_v8  ;;  %v18414_v30 = vpop.f32.mrf.mxu0  ;;  %v18422_v48 = vsel %vm14653_vm14, %v10946_v3, %v10947_v15  ;;  %v19667_v8 = vld [vmem:[#allocation55_spill] sm:$0xff]  ;;  %v19669_v44 = vld [vmem:[#allocation46_spill] sm:$0xff]  ;;  %v10961_v52 = vrot.slane %v19670_v61, 5  ;;  %v19671_v3 = vld [vmem:[#allocation56_spill] sm:$0xff] }
 0x46b   : > { %13625 = vmatprep.mubr.bf16.mxu1 %v12262_v40  ;;  %v7877_v14 = vpop.f32.mrf.mxu1  ;;  %v10958_v13 = vrot.slane %v19667_v8, 5  ;;  %v10953_v40 = vrot.slane %v10951_v9, 4  ;;  %v10954_v20 = vrot.slane %v19669_v44, 5  ;;  %v10965_v15 = vrot.slane %v19671_v3, 5  ;;  %v10811_v57 = vld [vmem:[#allocation2 + $0xb4] sm:$0xe] }
 0x46c   : > { %v7992_v7 = vadd.f32 %v7877_v14, %v19668_v38  ;;  %v18429_v29 = vpop.f32.mrf.mxu0  ;;  %v18436_v14 = vsel %vm14653_vm14, %v12252_v37, %v10951_v9  ;;  %v19673_v37 = vld [vmem:[#allocation62_spill] sm:$0xff]  ;;  %v19674_v3 = vld [vmem:[#allocation61_spill] sm:$0xff] }
 0x46d   : > { %v13336_v63 = vpop.f32.mrf.mxu1  ;;  %v10960_v62 = vrot.slane %v10958_v13, 4  ;;  %v18440_v38 = vsel %vm14653_vm14, %v10953_v40, %v10954_v20  ;;  %v18444_v44 = vsel %vm14653_vm14, %v12253_v21, %v10958_v13  ;;  %v10968_v9 = vrot.slane %v19673_v37, 5  ;;  %v19675_v13 = vld [vmem:[#allocation45_spill] sm:$0xff] }
 0x46e   : > { %v7995_v8 = vadd.f32 %v13336_v63, %v19672_v50  ;;  %v18446_v61 = vpop.f32.mrf.mxu0  ;;  %v10967_v63 = vrot.slane %v10965_v15, 4  ;;  %v12255_v21 = vrot.slane %v10811_v57, 9  ;;  %v10972_v18 = vrot.slane %v19675_v13, 5  ;;  %v19678_v13 = vld [vmem:[#allocation39_spill] sm:$0xff] }
 0x46f   : > { %v7880_v27 = vpop.f32.mrf.mxu1  ;;  %v18452_v50 = vsel %vm14653_vm14, %v10960_v62, %v10961_v52  ;;  %v18463_v51 = vsel %vm14653_vm14, %v12254_v31, %v10965_v15  ;;  %v19676_v62 = vld [vmem:[#allocation25_spill] sm:$0xff]  ;;  %v10975_v20 = vrot.slane %v19678_v13, 5  ;;  %v19679_v31 = vcombine.low %v18367_v16, %v18371_v34  ;;  %v19681_v34 = vld [vmem:[#allocation38_spill] sm:$0xff] }
 0x470   : > { %v7993_v40 = vadd.f32 %v7880_v27, %v19674_v3  ;;  %v18459_v41 = vpop.f32.mrf.mxu0  ;;  %v18467_v52 = vsel %vm14653_vm14, %v10967_v63, %v10968_v9  ;;  %v19677_v27 = vcombine.low %v18348_v6, %v18354_v2  ;;  %v10974_v3 = vrot.slane %v10972_v18, 4  ;;  %v19680_v63 = vld [vmem:[#allocation57_spill] sm:$0xff] }
 0x471   : > { %v13339_v12 = vpop.f32.mrf.mxu1  ;;  %v12270_v57 = vcombine.low %v18463_v51, %v18467_v52  ;;  %v18490_v2 = vadd.f32 %v18249_v39, %v18340_v4  ;;  %v18505_v39 = vadd.f32 %v18277_v24, %v18385_v43  ;;  %v18509_v4 = vadd.f32 %v18285_v11, %v18409_v1 }
 0x472   : > { %v7998_v37 = vadd.f32 %v13339_v12, %v19676_v62  ;;  %13626 = vmatmul.mubr.bf16.gmra.mxu1 %v19677_v27  ;;  %v13396_v10 = vpop.f32.mrf.mxu0  ;;  %v18482_v12 = vsel %vm14653_vm14, %v12255_v21, %v10972_v18  ;;  %v18486_v6 = vsel %vm14653_vm14, %v10974_v3, %v10975_v20  ;;  %v18501_v18 = vadd.f32 %v18266_v36, %v18375_v0 }
 0x473   : > { %13629 = vmatprep.mubr.bf16.mxu1 %v19679_v31  ;;  %v7893_v15 = vpop.f32.mrf.mxu1  ;;  %v12271_v16 = vcombine.low %v18482_v12, %v18486_v6  ;;  %v18497_v31 = vadd.f32 %v18256_v33, %v18358_v17  ;;  %v18512_v3 = vadd.f32 %v18295_v35, %v7992_v7  ;;  %v18516_v17 = vadd.f32 %v18305_v25, %v7995_v8  ;;  %v19683_v35 = vld [vmem:[#allocation42_spill] sm:$0xff]  ;;  %v19700_v12 = vld [vmem:[#allocation60_spill] sm:$0xff] }
 0x474   : > { %v7996_v9 = vadd.f32 %v7893_v15, %v19680_v63  ;;  %v8314_v27 = vpop.f32.mrf.mxu0  ;;  %v19682_v15 = vld [vmem:[#allocation34_spill] sm:$0xff]  ;;  %v18519_v36 = vadd.f32 %v18317_v23, %v7993_v40  ;;  %v18522_v24 = vadd.f32 %v18324_v49, %v7998_v37  ;;  %v19684_v25 = vcombine.low %v18389_v42, %v18393_v28 }
 0x475   : > { %v13340_v62 = vpop.f32.mrf.mxu1  ;;  %v19685_v7 = vcombine.low %v18397_v55, %v18405_v32 }
 0x476   : > { %v7999_v13 = vadd.f32 %v13340_v62, %v19681_v34  ;;  %v13399_v21 = vpop.f32.mrf.mxu0  ;;  %v18525_v43 = vadd.f32 %v18336_v54, %v7996_v9  ;;  %v19686_v54 = vld [vmem:[#allocation23_spill] sm:$0xff]  ;;  %v19687_v62 = vld [vmem:[#allocation66_spill] sm:$0xff] }
 0x477   : > { %v7896_v20 = vpop.f32.mrf.mxu1 }
 0x478   : > { %v7997_v33 = vadd.f32 %v7896_v20, %v19682_v15  ;;  %v8327_v63 = vpop.f32.mrf.mxu0  ;;  %v18528_v11 = vadd.f32 %v18350_v53, %v7999_v13  ;;  %v19688_v13 = vld [vmem:[#allocation31_spill] sm:$0xff] }
 0x479   : > { %v13343_v0 = vpop.f32.mrf.mxu1 }
 0x47a   : > { %v8002_v1 = vadd.f32 %v13343_v0, %v19683_v35  ;;  %13630 = vmatmul.mubr.bf16.gmra.mxu1 %v19684_v25  ;;  %v18535_v23 = vadd.f32 %v18363_v58, %v7997_v33  ;;  %v13400_v8 = vpop.f32.mrf.mxu0  ;;  %v19690_v0 = vcombine.low %v18418_v47, %v18422_v48  ;;  %v19691_v35 = vcombine.low %v18436_v14, %v18440_v38  ;;  %v19694_v38 = vld [vmem:[#allocation37_spill] sm:$0xff] }
 0x47b   : > { %13633 = vmatprep.mubr.bf16.mxu1 %v19685_v7  ;;  %v7909_v49 = vpop.f32.mrf.mxu1  ;;  %v10979_v48 = vrot.slane %v18221_v5, 5 }
 0x47c   : > { %v8000_v40 = vadd.f32 %v7909_v49, %v19686_v54  ;;  %v18542_v53 = vadd.f32 %v18380_v26, %v8002_v1  ;;  %v8330_v9 = vpop.f32.mrf.mxu0  ;;  %v19689_v26 = vld [vmem:[#allocation26_spill] sm:$0xff] }
 0x47d   : > { %v13344_v37 = vpop.f32.mrf.mxu1 }
 0x47e   : > { %v8003_v34 = vadd.f32 %v13344_v37, %v19687_v62  ;;  %v18546_v42 = vadd.f32 %v18399_v45, %v8000_v40  ;;  %v18548_v28 = vpop.f32.mrf.mxu0  ;;  %v19693_v37 = vld [vmem:[#allocation35_spill] sm:$0xff] }
 0x47f   : > { %v7912_v58 = vpop.f32.mrf.mxu1 }
 0x480   : > { %v8001_v55 = vadd.f32 %v7912_v58, %v19688_v13  ;;  %v18552_v32 = vadd.f32 %v18414_v30, %v8003_v34  ;;  %v18554_v15 = vpop.f32.mrf.mxu0  ;;  %v19692_v30 = vld [vmem:[#allocation48_spill] sm:$0xff] }
 0x481   : > { %v13347_v20 = vpop.f32.mrf.mxu1 }
 0x482   : > { %v8006_v33 = vadd.f32 %v13347_v20, %v19689_v26  ;;  %13634 = vmatmul.mubr.bf16.gmra.mxu1 %v19690_v0  ;;  %v18561_v45 = vadd.f32 %v18429_v29, %v8001_v55  ;;  %v13404_v25 = vpop.f32.mrf.mxu0  ;;  %v19695_v20 = vld [vmem:[#allocation36_spill] sm:$0xff]  ;;  %v10981_v0 = vrot.slane %v10979_v48, 4 }
 0x483   : > { %13637 = vmatprep.mubr.bf16.mxu1 %v19691_v35  ;;  %v7925_v1 = vpop.f32.mrf.mxu1 }
 0x484   : > { %v8004_v7 = vadd.f32 %v7925_v1, %v19692_v30  ;;  %v18568_v49 = vadd.f32 %v18446_v61, %v8006_v33  ;;  %v18570_v40 = vpop.f32.mrf.mxu0  ;;  %v10812_v61 = vld [vmem:[#allocation2 + $0xc0] sm:$0xe]  ;;  %v19696_v33 = vcombine.low %v18444_v44, %v18452_v50 }
 0x485   : > { %v13348_v54 = vpop.f32.mrf.mxu1  ;;  %v12256_v30 = vrot.slane %v10812_v61, 9 }
 0x486   : > { %v8007_v47 = vadd.f32 %v13348_v54, %v19693_v37  ;;  %v18575_v29 = vadd.f32 %v18459_v41, %v8004_v7  ;;  %v13407_v14 = vpop.f32.mrf.mxu0  ;;  %v10982_v7 = vrot.slane %v18229_v60, 5  ;;  %v10813_v54 = vld [vmem:[#allocation2 + $0xcc] sm:$0xe] }
 0x487   : > { %v7928_v62 = vpop.f32.mrf.mxu1 }
 0x488   : > { %v8005_v34 = vadd.f32 %v7928_v62, %v19694_v38  ;;  %v18578_v58 = vadd.f32 %v13396_v10, %v8007_v47  ;;  %v8359_v55 = vpop.f32.mrf.mxu0  ;;  %v10986_v10 = vrot.slane %v18254_v19, 5  ;;  %v10983_v51 = vsel %vm14653_vm14, %v10981_v0, %v10982_v7 }
 0x489   : > { %v13351_v13 = vpop.f32.mrf.mxu1  ;;  %v12257_v19 = vrot.slane %v10813_v54, 9 }
 0x48a   : > { %v8010_v26 = vadd.f32 %v13351_v13, %v19695_v20  ;;  %13638 = vmatmul.mubr.bf16.gmra.mxu1 %v19696_v33  ;;  %v18584_v5 = vadd.f32 %v8314_v27, %v8005_v34  ;;  %v13408_v35 = vpop.f32.mrf.mxu0  ;;  %v19697_v27 = vld [vmem:[#allocation58_spill] sm:$0xff]  ;;  %v10988_v38 = vrot.slane %v10986_v10, 4  ;;  %v19698_v34 = vld [vmem:[#allocation64_spill] sm:$0xff] }
 0x48b   : > { %13641 = vmatprep.mubr.bf16.mxu1 %v12270_v57  ;;  %v7941_v41 = vpop.f32.mrf.mxu1  ;;  %v10987_v0 = vsel %vm14653_vm14, %v12257_v19, %v10986_v10 }
 0x48c   : > { %v8008_v1 = vadd.f32 %v7941_v41, %v18236_v22  ;;  %v18592_v37 = vadd.f32 %v13399_v21, %v8010_v26  ;;  %v8362_v50 = vpop.f32.mrf.mxu0  ;;  %v10989_v22 = vrot.slane %v18263_v59, 5  ;;  %v10980_v21 = vsel %vm14653_vm14, %v12256_v30, %v10979_v48  ;;  %v19699_v41 = vld [vmem:[#allocation43_spill] sm:$0xff] }
 0x48d   : > { %v13352_v44 = vpop.f32.mrf.mxu1  ;;  %v12272_v20 = vcombine.low %v10980_v21, %v10983_v51 }
 0x48e   : > { %v8011_v47 = vadd.f32 %v13352_v44, %v19697_v27  ;;  %v18597_v52 = vadd.f32 %v8327_v63, %v8008_v1  ;;  %v19701_v44 = vld [vmem:[#allocation24_spill] sm:$0xff] }
 0x48f   : > { %v7944_v57 = vpop.f32.mrf.mxu1  ;;  %v13475_v62 = vpop.f32.mrf.mxu0 }
 0x490   : > { %v8009_v60 = vadd.f32 %v7944_v57, %v19698_v34  ;;  %v18603_v13 = vadd.f32 %v13400_v8, %v8011_v47  ;;  %v10990_v8 = vsel %vm14653_vm14, %v10988_v38, %v10989_v22  ;;  %v19703_v34 = vld [vmem:[#allocation50_spill] sm:$0xff] }
 0x491   : > { %v9499_v26 = vpop.f32.mrf.mxu0 }
 0x492   : > { %v13355_v61 = vpop.f32.mrf.mxu1  ;;  %13642 = vmatmul.mubr.bf16.gmra.mxu1 %v12271_v16  ;;  %v18609_v63 = vadd.f32 %v8330_v9, %v8009_v60  ;;  %v12273_v16 = vcombine.low %v10987_v0, %v10990_v8  ;;  %v19705_v8 = vld [vmem:[#allocation40_spill] sm:$0xff] }
 0x493   : > { %v8014_v33 = vadd.f32 %v13355_v61, %v18259_v46  ;;  %13645 = vmatprep.mubr.bf16.mxu1 %v12272_v20  ;;  %v13476_v48 = vpop.f32.mrf.mxu0 }
 0x494   : > { %v7957_v59 = vpop.f32.mrf.mxu1 }
 0x495   : > { %v8012_v1 = vadd.f32 %v7957_v59, %v19699_v41  ;;  %v18617_v30 = vadd.f32 %v18548_v28, %v8014_v33  ;;  %v18619_v7 = vpop.f32.mrf.mxu0  ;;  %v19702_v28 = vld [vmem:[#allocation67_spill] sm:$0xff] }
 0x496   : > { %v13356_v46 = vpop.f32.mrf.mxu1 }
 0x497   : > { %v8015_v6 = vadd.f32 %v13356_v46, %v19700_v12  ;;  %v18623_v9 = vadd.f32 %v18554_v15, %v8012_v1  ;;  %v13479_v10 = vpop.f32.mrf.mxu0 }
 0x498   : > { %v7960_v54 = vpop.f32.mrf.mxu1 }
 0x499   : > { %v8013_v56 = vadd.f32 %v7960_v54, %v19701_v44  ;;  %v18626_v27 = vadd.f32 %v13404_v25, %v8015_v6  ;;  %v18628_v51 = vpop.f32.mrf.mxu0  ;;  %v19704_v25 = vld [vmem:[#allocation49_spill] sm:$0xff] }
 0x49a   : > { %v13359_v47 = vpop.f32.mrf.mxu1  ;;  %13646 = vmatmul.mubr.bf16.gmra.mxu1 %v12273_v16 }
 0x49b   : > { %v8018_v57 = vadd.f32 %v13359_v47, %v19702_v28  ;;  %v18632_v19 = vadd.f32 %v18570_v40, %v8013_v56  ;;  %v13480_v22 = vpop.f32.mrf.mxu0 }
 0x49c   : > { %v7973_v38 = vpop.f32.mrf.mxu1 }
 0x49d   : > { %v8016_v15 = vadd.f32 %v7973_v38, %v19703_v34  ;;  %v18635_v60 = vadd.f32 %v13407_v14, %v8018_v57  ;;  %v18637_v61 = vpop.f32.mrf.mxu0 }
 0x49e   : > { %v13360_v21 = vpop.f32.mrf.mxu1 }
 0x49f   : > { %v8019_v20 = vadd.f32 %v13360_v21, %v19704_v25  ;;  %v18640_v33 = vadd.f32 %v8359_v55, %v8016_v15  ;;  %v13483_v0 = vpop.f32.mrf.mxu0 }
 0x4a0   : > { %v7976_v59 = vpop.f32.mrf.mxu1 }
 0x4a1   : > { %v8017_v41 = vadd.f32 %v7976_v59, %v19705_v8  ;;  %v18643_v1 = vadd.f32 %v13408_v35, %v8019_v20  ;;  %v18645_v46 = vpop.f32.mrf.mxu0 }
 0x4a2   : > { %v13427_v40 = vpop.f32.mrf.mxu1 }
 0x4a3   : > { %v9130_v12 = vadd.f32 %v13427_v40, %v18490_v2  ;;  %v18648_v14 = vadd.f32 %v8362_v50, %v8017_v41  ;;  %v13484_v16 = vpop.f32.mrf.mxu0 }
 0x4a4   : > { %v9001_v6 = vpop.f32.mrf.mxu1 }
 0x4a5   : > { %v9128_v54 = vadd.f32 %v9001_v6, %v18497_v31  ;;  %v18651_v44 = vadd.f32 %v13475_v62, %v9130_v12  ;;  %v18653_v56 = vpop.f32.mrf.mxu0 }
 0x4a6   : > { %v13428_v55 = vpop.f32.mrf.mxu1 }
 0x4a7   : > { %v9131_v47 = vadd.f32 %v13428_v55, %v18501_v18  ;;  %v18656_v35 = vadd.f32 %v9499_v26, %v9128_v54  ;;  %v13487_v57 = vpop.f32.mrf.mxu0 }
 0x4a8   : > { %v9004_v28 = vpop.f32.mrf.mxu1 }
 0x4a9   : > { %v18659_v38 = vadd.f32 %v9004_v28, %v18505_v39  ;;  %v18661_v2 = vadd.f32 %v13476_v48, %v9131_v47  ;;  %v18663_v34 = vpop.f32.mrf.mxu0 }
 0x4aa   : > { %v13431_v50 = vpop.f32.mrf.mxu1 }
 0x4ab   : > { %v9134_v31 = vadd.f32 %v13431_v50, %v18509_v4  ;;  %v13488_v15 = vpop.f32.mrf.mxu0 }
 0x4ac   : > { %v9017_v62 = vpop.f32.mrf.mxu1 }
 0x4ad   : > { %v18667_v21 = vadd.f32 %v9017_v62, %v18512_v3  ;;  %v18669_v18 = vadd.f32 %v13479_v10, %v9134_v31  ;;  %v18671_v25 = vpop.f32.mrf.mxu0 }
 0x4ae   : > { %v13432_v26 = vpop.f32.mrf.mxu1 }
 0x4af   : > { %v9135_v39 = vadd.f32 %v13432_v26, %v18516_v17  ;;  %v13491_v48 = vpop.f32.mrf.mxu0 }
 0x4b0   : > { %v9020_v20 = vpop.f32.mrf.mxu1 }
 0x4b1   : > { %v18675_v59 = vadd.f32 %v9020_v20, %v18519_v36  ;;  %v18677_v8 = vadd.f32 %v13480_v22, %v9135_v39  ;;  %v18679_v41 = vpop.f32.mrf.mxu0 }
 0x4b2   : > { %v13435_v4 = vpop.f32.mrf.mxu1 }
 0x4b3   : > { %v9138_v3 = vadd.f32 %v13435_v4, %v18522_v24  ;;  %v13492_v10 = vpop.f32.mrf.mxu0 }
 0x4b4   : > { %v9033_v40 = vpop.f32.mrf.mxu1 }
 0x4b5   : > { %v18683_v12 = vadd.f32 %v9033_v40, %v18525_v43  ;;  %v18685_v6 = vadd.f32 %v13483_v0, %v9138_v3  ;;  %v18687_v54 = vpop.f32.mrf.mxu0 }
 0x4b6   : > { %v13436_v17 = vpop.f32.mrf.mxu1 }
 0x4b7   : > { %v9139_v36 = vadd.f32 %v13436_v17, %v18528_v11  ;;  %v13495_v22 = vpop.f32.mrf.mxu0 }
 0x4b8   : > { %v9036_v55 = vpop.f32.mrf.mxu1 }
 0x4b9   : > { %v18691_v47 = vadd.f32 %v9036_v55, %v18535_v23  ;;  %v18693_v28 = vadd.f32 %v13484_v16, %v9139_v36  ;;  %v18695_v50 = vpop.f32.mrf.mxu0 }
 0x4ba   : > { %v13439_v24 = vpop.f32.mrf.mxu1  ;;  %19706 = vst [vmem:[#allocation33_spill] sm:$0xff] %v18695_v50 }
 0x4bb   : > { %v9142_v43 = vadd.f32 %v13439_v24, %v18542_v53  ;;  %v13496_v0 = vpop.f32.mrf.mxu0 }
 0x4bc   : > { %v9049_v31 = vpop.f32.mrf.mxu1 }
 0x4bd   : > { %v18699_v62 = vadd.f32 %v9049_v31, %v18546_v42  ;;  %v18701_v26 = vadd.f32 %v13487_v57, %v9142_v43  ;;  %v18704_v20 = vpop.f32.mrf.mxu0 }
 0x4be   : > { %v13440_v11 = vpop.f32.mrf.mxu1  ;;  %19707 = vst [vmem:[#allocation41_spill] sm:$0xff] %v18704_v20 }
 0x4bf   : > { %v9143_v39 = vadd.f32 %v13440_v11, %v18552_v32  ;;  %v13499_v40 = vpop.f32.mrf.mxu0 }
 0x4c0   : > { %v9052_v23 = vpop.f32.mrf.mxu1 }
 0x4c1   : > { %v18707_v16 = vadd.f32 %v9052_v23, %v18561_v45  ;;  %v18709_v4 = vadd.f32 %v13488_v15, %v9143_v39  ;;  %v18718_v55 = vpop.f32.mrf.mxu0 }
 0x4c2   : > { %v13443_v3 = vpop.f32.mrf.mxu1  ;;  %19708 = vst [vmem:[#allocation29_spill] sm:$0xff] %v18718_v55 }
 0x4c3   : > { %v9146_v53 = vadd.f32 %v13443_v3, %v18568_v49  ;;  %v13500_v31 = vpop.f32.mrf.mxu0 }
 0x4c4   : > { %v9065_v17 = vpop.f32.mrf.mxu1 }
 0x4c5   : > { %v18713_v42 = vadd.f32 %v9065_v17, %v18575_v29  ;;  %v18715_v57 = vadd.f32 %v13491_v48, %v9146_v53  ;;  %v18732_v23 = vpop.f32.mrf.mxu0 }
 0x4c6   : > { %v13444_v36 = vpop.f32.mrf.mxu1  ;;  %19710 = vst [vmem:[#allocation69_spill] sm:$0xff] %v18732_v23 }
 0x4c7   : > { %v9147_v32 = vadd.f32 %v13444_v36, %v18578_v58 }
 0x4c8   : > { %v9068_v24 = vpop.f32.mrf.mxu1 }
 0x4c9   : > { %v18721_v45 = vadd.f32 %v9068_v24, %v18584_v5  ;;  %v18723_v15 = vadd.f32 %v13492_v10, %v9147_v32 }
 0x4ca   : > { %v13447_v43 = vpop.f32.mrf.mxu1 }
 0x4cb   : > { %v9150_v49 = vadd.f32 %v13447_v43, %v18592_v37  ;;  %v13503_v37 = vpop.f32.mrf.mxu0 }
 0x4cc   : > { %v9081_v11 = vpop.f32.mrf.mxu1 }
 0x4cd   : > { %v18727_v29 = vadd.f32 %v9081_v11, %v18597_v52  ;;  %v18729_v48 = vadd.f32 %v13495_v22, %v9150_v49 }
 0x4ce   : > { %v13448_v39 = vpop.f32.mrf.mxu1 }
 0x4cf   : > { %19709 = vst [vmem:[#allocation63_spill] sm:$0xff] %v18727_v29  ;;  %v9151_v58 = vadd.f32 %v13448_v39, %v18603_v13  ;;  %v18745_v13 = vpop.f32.mrf.mxu0 }
 0x4d0   : > { %v9084_v3 = vpop.f32.mrf.mxu1  ;;  %19713 = vst [vmem:[#allocation28_spill] sm:$0xff] %v18745_v13 }
 0x4d1   : > { %v18735_v5 = vadd.f32 %v9084_v3, %v18609_v63  ;;  %v18737_v10 = vadd.f32 %v13496_v0, %v9151_v58  ;;  %v13504_v49 = vpop.f32.mrf.mxu0 }
 0x4d2   : > { %v13451_v53 = vpop.f32.mrf.mxu1 }
 0x4d3   : > { %19711 = vst [vmem:[#allocation47_spill] sm:$0xff] %v18735_v5  ;;  %v9154_v17 = vadd.f32 %v13451_v53, %v18617_v30  ;;  %v18759_v58 = vpop.f32.mrf.mxu0 }
 0x4d4   : > { %v9097_v36 = vpop.f32.mrf.mxu1  ;;  %19716 = vst [vmem:[#allocation53_spill] sm:$0xff] %v18759_v58 }
 0x4d5   : > { %v18741_v52 = vadd.f32 %v9097_v36, %v18623_v9  ;;  %v18743_v22 = vadd.f32 %v13499_v40, %v9154_v17 }
 0x4d6   : > { %v13452_v32 = vpop.f32.mrf.mxu1  ;;  %v18767_v17 = vpop.f32.mrf.mxu0 }
 0x4d7   : > { %19712 = vst [vmem:[#allocation65_spill] sm:$0xff] %v18741_v52  ;;  %v9155_v24 = vadd.f32 %v13452_v32, %v18626_v27 }
 0x4d8   : > { %v9100_v43 = vpop.f32.mrf.mxu1  ;;  %v18775_v32 = vpop.f32.mrf.mxu0 }
 0x4d9   : > { %v18749_v63 = vadd.f32 %v9100_v43, %v18632_v19  ;;  %v18751_v0 = vadd.f32 %v13500_v31, %v9155_v24 }
 0x4da   : > { %v13455_v11 = vpop.f32.mrf.mxu1  ;;  %v18780_v43 = vpop.f32.mrf.mxu0 }
 0x4db   : > { %19714 = vst [vmem:[#allocation51_spill] sm:$0xff] %v18749_v63  ;;  %v9158_v30 = vadd.f32 %v13455_v11, %v18635_v60 }
 0x4dc   : > { %v9113_v39 = vpop.f32.mrf.mxu1 }
 0x4dd   : > { %v18755_v9 = vadd.f32 %v9113_v39, %v18640_v33  ;;  %v18757_v40 = vadd.f32 %v13503_v37, %v9158_v30 }
 0x4de   : > { %v13456_v3 = vpop.f32.mrf.mxu1 }
 0x4df   : > { %19715 = vst [vmem:[#allocation44_spill] sm:$0xff] %v18755_v9  ;;  %v9159_v27 = vadd.f32 %v13456_v3, %v18643_v1 }
 0x4e0   : > { %v9116_v53 = vpop.f32.mrf.mxu1 }
 0x4e1   : > { %v18763_v19 = vadd.f32 %v9116_v53, %v18648_v14  ;;  %v18765_v31 = vadd.f32 %v13504_v49, %v9159_v27 }
 0x4e2   : > { %v13523_v60 = vpop.f32.mrf.mxu1 }
 0x4e3   : > { %19717 = vst [vmem:[#allocation68_spill] sm:$0xff] %v18763_v19  ;;  %v18770_v36 = vadd.f32 %v13523_v60, %v18651_v44  ;;  %v18785_v44 = vpop.f32.mrf.mxu0 }
 0x4e4   : > { %v9885_v33 = vpop.f32.mrf.mxu1 }
 0x4e5   : > { %v18773_v37 = vadd.f32 %v9885_v33, %v18656_v35  ;;  %v18792_v27 = vpop.f32.mrf.mxu0 }
 0x4e6   : > { %v13524_v24 = vpop.f32.mrf.mxu1 }
 0x4e7   : > { %v18778_v1 = vadd.f32 %v13524_v24, %v18661_v2  ;;  %v18799_v33 = vpop.f32.mrf.mxu0 }
 0x4e8   : > { %v9888_v14 = vpop.f32.mrf.mxu1 }
 0x4ea   : > { %v13527_v49 = vpop.f32.mrf.mxu1 }
 0x4eb   : > { %v18783_v11 = vadd.f32 %v13527_v49, %v18669_v18 }
 0x4ec   : > { %v9901_v30 = vpop.f32.mrf.mxu1 }
 0x4ee   : > { %v13528_v39 = vpop.f32.mrf.mxu1 }
 0x4ef   : > { %v18788_v35 = vadd.f32 %v13528_v39, %v18677_v8  ;;  %v18806_v8 = vpop.f32.mrf.mxu0 }
 0x4f0   : > { %v18790_v3 = vpop.f32.mrf.mxu1 }
 0x4f2   : > { %v13531_v2 = vpop.f32.mrf.mxu1 }
 0x4f3   : > { %v18795_v53 = vadd.f32 %v13531_v2, %v18685_v6  ;;  %v18813_v6 = vpop.f32.mrf.mxu0 }
 0x4f4   : > { %v18797_v60 = vpop.f32.mrf.mxu1 }
 0x4f6   : > { %v13532_v18 = vpop.f32.mrf.mxu1 }
 0x4f7   : > { %v18802_v24 = vadd.f32 %v13532_v18, %v18693_v28  ;;  %v18820_v28 = vpop.f32.mrf.mxu0 }
 0x4f8   : > { %v18804_v49 = vpop.f32.mrf.mxu1 }
 0x4fa   : > { %v13535_v39 = vpop.f32.mrf.mxu1 }
 0x4fb   : > { %v18809_v58 = vadd.f32 %v13535_v39, %v18701_v26  ;;  %v18827_v26 = vpop.f32.mrf.mxu0 }
 0x4fc   : > { %v18811_v19 = vpop.f32.mrf.mxu1 }
 0x4fe   : > { %v13536_v2 = vpop.f32.mrf.mxu1 }
 0x4ff   : > { %v18816_v13 = vadd.f32 %v13536_v2, %v18709_v4  ;;  %v18834_v4 = vpop.f32.mrf.mxu0 }
 0x500   : > { %v18818_v9 = vpop.f32.mrf.mxu1 }
 0x502   : > { %v13539_v18 = vpop.f32.mrf.mxu1 }
 0x503   : > { %v18823_v23 = vadd.f32 %v13539_v18, %v18715_v57  ;;  %v18841_v57 = vpop.f32.mrf.mxu0 }
 0x504   : > { %v18825_v63 = vpop.f32.mrf.mxu1 }
 0x505   : > { %19718 = vst [vmem:[#allocation52_spill] sm:$0xff] %v18823_v23 }
 0x506   : > { %v13540_v39 = vpop.f32.mrf.mxu1 }
 0x507   : > { %v18830_v55 = vadd.f32 %v13540_v39, %v18723_v15  ;;  %v18848_v15 = vpop.f32.mrf.mxu0 }
 0x508   : > { %v18832_v52 = vpop.f32.mrf.mxu1 }
 0x509   : > { %19719 = vst [vmem:[#allocation18_spill] sm:$0xff] %v18830_v55  ;;  %19720 = vst [vmem:[#allocation17_spill] sm:$0xff] %v18832_v52 }
 0x50a   : > { %v13543_v2 = vpop.f32.mrf.mxu1 }
 0x50b   : > { %v18837_v20 = vadd.f32 %v13543_v2, %v18729_v48  ;;  %v18855_v48 = vpop.f32.mrf.mxu0 }
 0x50c   : > { %v18839_v5 = vpop.f32.mrf.mxu1 }
 0x50d   : > { %19721 = vst [vmem:[#allocation14_spill] sm:$0xff] %v18837_v20  ;;  %19722 = vst [vmem:[#allocation12_spill] sm:$0xff] %v18839_v5 }
 0x50e   : > { %v13544_v18 = vpop.f32.mrf.mxu1 }
 0x50f   : > { %v18844_v23 = vadd.f32 %v13544_v18, %v18737_v10  ;;  %v18862_v10 = vpop.f32.mrf.mxu0 }
 0x510   : > { %v18846_v50 = vpop.f32.mrf.mxu1 }
 0x511   : > { %19723 = vst [vmem:[#allocation15_spill] sm:$0xff] %v18844_v23  ;;  %19724 = vst [vmem:[#allocation21_spill] sm:$0xff] %v18846_v50 }
 0x512   : > { %v13547_v39 = vpop.f32.mrf.mxu1 }
 0x513   : > { %v18851_v55 = vadd.f32 %v13547_v39, %v18743_v22  ;;  %v18869_v22 = vpop.f32.mrf.mxu0 }
 0x514   : > { %v18853_v29 = vpop.f32.mrf.mxu1 }
 0x515   : > { %19725 = vst [vmem:[#allocation22_spill] sm:$0xff] %v18851_v55  ;;  %19726 = vst [vmem:[#allocation30_spill] sm:$0xff] %v18853_v29 }
 0x516   : > { %v13548_v2 = vpop.f32.mrf.mxu1 }
 0x517   : > { %v18858_v20 = vadd.f32 %v13548_v2, %v18751_v0  ;;  %v9627_v0 = vadd.f32 %v18619_v7, %v18659_v38  ;;  %v18878_v2 = vpop.f32.mrf.mxu0  ;;  %v9631_v38 = vadd.f32 %v18637_v61, %v18675_v59 }
 0x518   : > { %v18860_v5 = vpop.f32.mrf.mxu1 }
 0x519   : > { %19727 = vst [vmem:[#allocation19_spill] sm:$0xff] %v18858_v20  ;;  %19728 = vst [vmem:[#allocation13_spill] sm:$0xff] %v18860_v5  ;;  %v10013_v5 = vadd.f32 %v9888_v14, %v9627_v0  ;;  %v18884_v52 = vpop.f32.mrf.mxu0 }
 0x51a   : > { %v13551_v18 = vpop.f32.mrf.mxu1 }
 0x51b   : > { %v18865_v23 = vadd.f32 %v13551_v18, %v18757_v40  ;;  %v9630_v40 = vadd.f32 %v18628_v51, %v18667_v21  ;;  %v10767_v7 = vadd.f32 %v18785_v44, %v10013_v5  ;;  %v10769_v21 = vadd.f32 %v18780_v43, %v18778_v1 }
 0x51c   : > { %v18867_v50 = vpop.f32.mrf.mxu1 }
 0x51d   : > { %19729 = vst [vmem:[#allocation16_spill] sm:$0xff] %v18865_v23  ;;  %19730 = vst [vmem:[#allocation32_spill] sm:$0xff] %v18867_v50  ;;  %v10766_v23 = vadd.f32 %v18775_v32, %v18773_v37  ;;  %v10016_v50 = vadd.f32 %v9901_v30, %v9630_v40  ;;  %v10017_v32 = vadd.f32 %v18790_v3, %v9631_v38  ;;  %v18900_v30 = vpop.f32.mrf.mxu0 }
 0x51e   : > { %v13552_v39 = vpop.f32.mrf.mxu1  ;;  %v10772_v40 = vadd.f32 %v18792_v27, %v18783_v11 }
 0x51f   : > { %v18872_v55 = vadd.f32 %v13552_v39, %v18765_v31  ;;  %v10768_v39 = vadd.f32 %v18767_v17, %v18770_v36  ;;  %v18919_v0 = vpop.f32.mrf.mxu0 }
 0x520   : > { %v18874_v29 = vpop.f32.mrf.mxu1 }
 0x521   : > { %19731 = vst [vmem:[#allocation55_spill] sm:$0xff] %v18872_v55 }
 0x522   : > { %v13619_v20 = vpop.f32.mrf.mxu1 }
 0x523   : > { %v18893_v51 = vadd.f32 %v13619_v20, %v10768_v39  ;;  %v9634_v20 = vadd.f32 %v18645_v46, %v18683_v12  ;;  %v10771_v39 = vadd.f32 %v18813_v6, %v10017_v32  ;;  %v18939_v6 = vpop.f32.mrf.mxu0 }
 0x524   : > { %v11137_v18 = vpop.f32.mrf.mxu1 }
 0x525   : > { %v18888_v55 = vadd.f32 %v11137_v18, %v10766_v23  ;;  %v10770_v23 = vadd.f32 %v18799_v33, %v10016_v50  ;;  %v11336_v43 = vmul.f32 %v18893_v51, %v18893_v51  ;;  %v10020_v33 = vadd.f32 %v18797_v60, %v9634_v20 }
 0x526   : > { %v13620_v31 = vpop.f32.mrf.mxu1  ;;  %v10773_v60 = vadd.f32 %v18806_v8, %v18788_v35 }
 0x527   : > { %v11334_v5 = vmul.f32 %v18888_v55, %v18888_v55  ;;  %v18905_v36 = vadd.f32 %v13620_v31, %v10769_v21 }
 0x528   : > { %v11140_v14 = vpop.f32.mrf.mxu1 }
 0x529   : > { %v18897_v37 = vadd.f32 %v11140_v14, %v10767_v7  ;;  %v11337_v46 = vmul.f32 %v18905_v36, %v18905_v36  ;;  %v9635_v7 = vadd.f32 %v18653_v56, %v18691_v47  ;;  %v10774_v56 = vadd.f32 %v18827_v26, %v10020_v33 }
 0x52a   : > { %v13623_v17 = vpop.f32.mrf.mxu1 }
 0x52b   : > { %v11296_v61 = vadd.f32 %v18897_v37, %v18888_v55  ;;  %v11335_v59 = vmul.f32 %v18897_v37, %v18897_v37  ;;  %v18929_v38 = vadd.f32 %v13623_v17, %v10772_v40 }
 0x52c   : > { %v11153_v1 = vpop.f32.mrf.mxu1 }
 0x52d   : > { %v11297_v50 = vadd.f32 %v11296_v61, %v18893_v51  ;;  %v11366_v44 = vadd.f32 %v11335_v59, %v11334_v5  ;;  %v18916_v3 = vadd.f32 %v11153_v1, %v10770_v23  ;;  %v10021_v5 = vadd.f32 %v18804_v49, %v9635_v7 }
 0x52e   : > { %v13624_v18 = vpop.f32.mrf.mxu1  ;;  %v9638_v61 = vadd.f32 %v18663_v34, %v18699_v62  ;;  %v11340_v49 = vmul.f32 %v18929_v38, %v18929_v38 }
 0x52f   : > { %v11367_v12 = vadd.f32 %v11366_v44, %v11336_v43  ;;  %v11298_v31 = vadd.f32 %v11297_v50, %v18905_v36  ;;  %v11338_v27 = vmul.f32 %v18916_v3, %v18916_v3  ;;  %v18942_v17 = vadd.f32 %v13624_v18, %v10773_v60  ;;  %v18955_v50 = vpop.f32.mrf.mxu0 }
 0x530   : > { %v11156_v14 = vpop.f32.mrf.mxu1  ;;  %v10024_v26 = vadd.f32 %v18811_v19, %v9638_v61  ;;  %v10776_v44 = vadd.f32 %v18820_v28, %v18795_v53  ;;  %v10775_v18 = vadd.f32 %v18841_v57, %v10021_v5  ;;  %v10777_v19 = vadd.f32 %v18834_v4, %v18802_v24 }
 0x531   : > { %v11299_v11 = vadd.f32 %v11298_v31, %v18916_v3  ;;  %v11368_v21 = vadd.f32 %v11367_v12, %v11337_v46  ;;  %v18936_v23 = vadd.f32 %v11156_v14, %v10771_v39  ;;  %v11341_v34 = vmul.f32 %v18942_v17, %v18942_v17  ;;  %v18975_v57 = vpop.f32.mrf.mxu0 }
 0x532   : > { %v13627_v32 = vpop.f32.mrf.mxu1  ;;  %v9639_v46 = vadd.f32 %v18671_v25, %v18707_v16  ;;  %v10778_v25 = vadd.f32 %v18855_v48, %v10024_v26 }
 0x533   : > { %v11369_v47 = vadd.f32 %v11368_v21, %v11338_v27  ;;  %v11300_v35 = vadd.f32 %v11299_v11, %v18936_v23  ;;  %v11339_v8 = vmul.f32 %v18936_v23, %v18936_v23  ;;  %v18965_v12 = vadd.f32 %v13627_v32, %v10776_v44 }
 0x534   : > { %v11169_v59 = vpop.f32.mrf.mxu1  ;;  %v10025_v60 = vadd.f32 %v18818_v9, %v9639_v46  ;;  %v9642_v27 = vadd.f32 %v18679_v41, %v18713_v42  ;;  %v19734_v46 = vld [vmem:[#allocation33_spill] sm:$0xff] }
 0x535   : > { %v11301_v20 = vadd.f32 %v11300_v35, %v18929_v38  ;;  %v11370_v1 = vadd.f32 %v11369_v47, %v11339_v8  ;;  %v18952_v43 = vadd.f32 %v11169_v59, %v10774_v56  ;;  %v11344_v9 = vmul.f32 %v18965_v12, %v18965_v12  ;;  %v18991_v47 = vpop.f32.mrf.mxu0 }
 0x536   : > { %v13628_v33 = vpop.f32.mrf.mxu1  ;;  %v10028_v48 = vadd.f32 %v18825_v63, %v9642_v27  ;;  %v10780_v35 = vadd.f32 %v18848_v15, %v18809_v58  ;;  %v10779_v59 = vadd.f32 %v18869_v22, %v10025_v60  ;;  %v10781_v63 = vadd.f32 %v18862_v10, %v18816_v13 }
 0x537   : > { %v11371_v62 = vadd.f32 %v11370_v1, %v11340_v49  ;;  %v11302_v40 = vadd.f32 %v11301_v20, %v18942_v17  ;;  %v11342_v28 = vmul.f32 %v18952_v43, %v18952_v43  ;;  %v18978_v11 = vadd.f32 %v13628_v33, %v10777_v19  ;;  %v19732_v33 = vld [vmem:[#allocation17_spill] sm:$0xff]  ;;  %v19011_v22 = vpop.f32.mrf.mxu0 }
 0x538   : > { %v11172_v31 = vpop.f32.mrf.mxu1  ;;  %v9643_v49 = vadd.f32 %v18687_v54, %v18721_v45  ;;  %v10782_v54 = vadd.f32 %v18884_v52, %v10028_v48  ;;  %v19738_v48 = vld [vmem:[#allocation41_spill] sm:$0xff] }
 0x539   : > { %v11303_v53 = vadd.f32 %v11302_v40, %v18952_v43  ;;  %v11372_v39 = vadd.f32 %v11371_v62, %v11341_v34  ;;  %v18972_v7 = vadd.f32 %v11172_v31, %v10775_v18  ;;  %v11345_v41 = vmul.f32 %v18978_v11, %v18978_v11  ;;  %v19733_v18 = vld [vmem:[#allocation63_spill] sm:$0xff]  ;;  %v10735_v52 = vpop.f32.mrf.mxu0 }
 0x53a   : > { %v13631_v14 = vpop.f32.mrf.mxu1  ;;  %v10029_v34 = vadd.f32 %v19732_v33, %v9643_v49  ;;  %v9646_v19 = vadd.f32 %v19734_v46, %v19733_v18 }
 0x53b   : > { %v11373_v16 = vadd.f32 %v11372_v39, %v11342_v28  ;;  %v11304_v24 = vadd.f32 %v11303_v53, %v18972_v7  ;;  %v11343_v4 = vmul.f32 %v18972_v7, %v18972_v7  ;;  %v19001_v20 = vadd.f32 %v13631_v14, %v10780_v35  ;;  %v19735_v14 = vld [vmem:[#allocation12_spill] sm:$0xff] }
 0x53c   : > { %v11185_v21 = vpop.f32.mrf.mxu1 }
 0x53d   : > { %v11305_v5 = vadd.f32 %v11304_v24, %v18965_v12  ;;  %v11374_v32 = vadd.f32 %v11373_v16, %v11343_v4  ;;  %v18988_v56 = vadd.f32 %v11185_v21, %v10778_v25  ;;  %v11348_v53 = vmul.f32 %v19001_v20, %v19001_v20  ;;  %v19736_v16 = vld [vmem:[#allocation52_spill] sm:$0xff] }
 0x53e   : > { %v13632_v8 = vpop.f32.mrf.mxu1  ;;  %v10032_v25 = vadd.f32 %v19735_v14, %v9646_v19  ;;  %v10784_v24 = vadd.f32 %v18878_v2, %v19736_v16 }
 0x53f   : > { %v11375_v42 = vadd.f32 %v11374_v32, %v11344_v9  ;;  %v11306_v61 = vadd.f32 %v11305_v5, %v18978_v11  ;;  %v11346_v15 = vmul.f32 %v18988_v56, %v18988_v56  ;;  %v19014_v40 = vadd.f32 %v13632_v8, %v10781_v63  ;;  %v19737_v32 = vld [vmem:[#allocation47_spill] sm:$0xff] }
 0x540   : > { %v11188_v1 = vpop.f32.mrf.mxu1  ;;  %v10783_v5 = vadd.f32 %v18919_v0, %v10029_v34  ;;  %v9647_v35 = vadd.f32 %v19738_v48, %v19737_v32 }
 0x541   : > { %v11307_v58 = vadd.f32 %v11306_v61, %v18988_v56  ;;  %v11376_v26 = vadd.f32 %v11375_v42, %v11345_v41  ;;  %v19008_v44 = vadd.f32 %v11188_v1, %v10779_v59  ;;  %v11349_v27 = vmul.f32 %v19014_v40, %v19014_v40  ;;  %v19739_v41 = vld [vmem:[#allocation18_spill] sm:$0xff]  ;;  %v13596_v1 = vpop.f32.mrf.mxu0 }
 0x542   : > { %v13635_v62 = vpop.f32.mrf.mxu1  ;;  %v10785_v42 = vadd.f32 %v18900_v30, %v19739_v41 }
 0x543   : > { %v11377_v45 = vadd.f32 %v11376_v26, %v11346_v15  ;;  %v11308_v13 = vadd.f32 %v11307_v58, %v19008_v44  ;;  %v11347_v10 = vmul.f32 %v19008_v44, %v19008_v44  ;;  %v19035_v8 = vadd.f32 %v13635_v62, %v10784_v24  ;;  %v19740_v58 = vld [vmem:[#allocation21_spill] sm:$0xff] }
 0x544   : > { %v11201_v31 = vpop.f32.mrf.mxu1  ;;  %v10033_v0 = vadd.f32 %v19740_v58, %v9647_v35  ;;  %v10786_v26 = vadd.f32 %v18955_v50, %v10032_v25  ;;  %v10738_v50 = vpop.f32.mrf.mxu0  ;;  %v19747_v35 = vld [vmem:[#allocation15_spill] sm:$0xff] }
 0x545   : > { %v11309_v28 = vadd.f32 %v11308_v13, %v19001_v20  ;;  %v11378_v39 = vadd.f32 %v11377_v45, %v11347_v10  ;;  %v19024_v60 = vadd.f32 %v11201_v31, %v10782_v54  ;;  %v19741_v54 = vld [vmem:[#allocation65_spill] sm:$0xff]  ;;  %v11352_v18 = vmul.f32 %v19035_v8, %v19035_v8 }
 0x546   : > { %v13636_v4 = vpop.f32.mrf.mxu1  ;;  %v19742_v45 = vld [vmem:[#allocation29_spill] sm:$0xff]  ;;  %v13599_v32 = vpop.f32.mrf.mxu0  ;;  %v10789_v41 = vadd.f32 %v18975_v57, %v19747_v35 }
 0x547   : > { %v11379_v21 = vadd.f32 %v11378_v39, %v11348_v53  ;;  %v11310_v9 = vadd.f32 %v11309_v28, %v19014_v40  ;;  %v11350_v59 = vmul.f32 %v19024_v60, %v19024_v60  ;;  %v19046_v34 = vadd.f32 %v13636_v4, %v10785_v42  ;;  %v19743_v53 = vld [vmem:[#allocation30_spill] sm:$0xff] }
 0x548   : > { %v11204_v61 = vpop.f32.mrf.mxu1  ;;  %v9650_v13 = vadd.f32 %v19742_v45, %v19741_v54  ;;  %v19744_v39 = vld [vmem:[#allocation14_spill] sm:$0xff]  ;;  %v10751_v45 = vpop.f32.mrf.mxu0 }
 0x549   : > { %v11311_v2 = vadd.f32 %v11310_v9, %v19024_v60  ;;  %v11380_v49 = vadd.f32 %v11379_v21, %v11349_v27  ;;  %v19042_v63 = vadd.f32 %v11204_v61, %v10783_v5  ;;  %v10788_v14 = vadd.f32 %v18939_v6, %v19744_v39  ;;  %v19745_v21 = vld [vmem:[#allocation51_spill] sm:$0xff]  ;;  %v19746_v9 = vld [vmem:[#allocation69_spill] sm:$0xff] }
 0x54a   : > { %v13639_v15 = vpop.f32.mrf.mxu1  ;;  %v10036_v28 = vadd.f32 %v19743_v53, %v9650_v13  ;;  %v11353_v16 = vmul.f32 %v19046_v34, %v19046_v34  ;;  %v10787_v27 = vadd.f32 %v18991_v47, %v10033_v0  ;;  %v9651_v5 = vadd.f32 %v19746_v9, %v19745_v21  ;;  %v19754_v21 = vld [vmem:[#allocation53_spill] sm:$0xff] }
 0x54b   : > { %v11381_v33 = vadd.f32 %v11380_v49, %v11350_v59  ;;  %v11312_v30 = vadd.f32 %v11311_v2, %v19042_v63  ;;  %v11351_v62 = vmul.f32 %v19042_v63, %v19042_v63  ;;  %v19067_v48 = vadd.f32 %v13639_v15, %v10788_v14  ;;  %v19748_v49 = vld [vmem:[#allocation13_spill] sm:$0xff] }
 0x54c   : > { %v11217_v10 = vpop.f32.mrf.mxu1  ;;  %v10037_v47 = vadd.f32 %v19748_v49, %v9651_v5  ;;  %v10790_v0 = vadd.f32 %v10735_v52, %v10036_v28  ;;  %v19752_v28 = vld [vmem:[#allocation22_spill] sm:$0xff]  ;;  %v13600_v5 = vpop.f32.mrf.mxu0 }
 0x54d   : > { %v11313_v46 = vadd.f32 %v11312_v30, %v19035_v8  ;;  %v11382_v19 = vadd.f32 %v11381_v33, %v11351_v62  ;;  %v19056_v31 = vadd.f32 %v11217_v10, %v10786_v26  ;;  %v19749_v30 = vld [vmem:[#allocation44_spill] sm:$0xff]  ;;  %v11356_v10 = vmul.f32 %v19067_v48, %v19067_v48 }
 0x54e   : > { %v13640_v25 = vpop.f32.mrf.mxu1  ;;  %v19750_v62 = vld [vmem:[#allocation28_spill] sm:$0xff]  ;;  %v10792_v39 = vadd.f32 %v19011_v22, %v19752_v28 }
 0x54f   : > { %v11383_v24 = vadd.f32 %v11382_v19, %v11352_v18  ;;  %v11314_v4 = vadd.f32 %v11313_v46, %v19046_v34  ;;  %v11354_v61 = vmul.f32 %v19056_v31, %v19056_v31  ;;  %v19077_v33 = vadd.f32 %v13640_v25, %v10789_v41  ;;  %v19751_v19 = vld [vmem:[#allocation32_spill] sm:$0xff]  ;;  %v19755_v41 = vld [vmem:[#allocation19_spill] sm:$0xff] }
 0x550   : > { %v11220_v42 = vpop.f32.mrf.mxu1  ;;  %v9654_v54 = vadd.f32 %v19750_v62, %v19749_v30 }
 0x551   : > { %v11315_v6 = vadd.f32 %v11314_v4, %v19056_v31  ;;  %v11384_v2 = vadd.f32 %v11383_v24, %v11353_v16  ;;  %v19074_v59 = vadd.f32 %v11220_v42, %v10787_v27  ;;  %v11357_v25 = vmul.f32 %v19077_v33, %v19077_v33  ;;  %v19753_v27 = vld [vmem:[#allocation68_spill] sm:$0xff] }
 0x552   : > { %v13643_v58 = vpop.f32.mrf.mxu1  ;;  %v10040_v53 = vadd.f32 %v19751_v19, %v9654_v54  ;;  %v10791_v4 = vadd.f32 %v10738_v50, %v10037_v47  ;;  %v9655_v9 = vadd.f32 %v19754_v21, %v19753_v27  ;;  %v10793_v42 = vadd.f32 %v13596_v1, %v19755_v41 }
 0x553   : > { %v11385_v26 = vadd.f32 %v11384_v2, %v11354_v61  ;;  %v11316_v15 = vadd.f32 %v11315_v6, %v19074_v59  ;;  %v11355_v57 = vmul.f32 %v19074_v59, %v19074_v59  ;;  %v19097_v35 = vadd.f32 %v13643_v58, %v10792_v39  ;;  %v19757_v39 = vld [vmem:[#allocation55_spill] sm:$0xff] }
 0x554   : > { %v11233_v13 = vpop.f32.mrf.mxu1  ;;  %v10041_v50 = vadd.f32 %v18874_v29, %v9655_v9  ;;  %v19756_v29 = vld [vmem:[#allocation16_spill] sm:$0xff] }
 0x555   : > { %v11317_v18 = vadd.f32 %v11316_v15, %v19067_v48  ;;  %v11386_v46 = vadd.f32 %v11385_v26, %v11355_v57  ;;  %v19087_v52 = vadd.f32 %v11233_v13, %v10790_v0  ;;  %v10794_v0 = vadd.f32 %v10751_v45, %v10040_v53  ;;  %v10754_v57 = vpop.f32.mrf.mxu0 }
 0x556   : > { %v13644_v14 = vpop.f32.mrf.mxu1  ;;  %v11360_v62 = vmul.f32 %v19097_v35, %v19097_v35 }
 0x557   : > { %v11387_v16 = vadd.f32 %v11386_v46, %v11356_v10  ;;  %v11318_v24 = vadd.f32 %v11317_v18, %v19077_v33  ;;  %v11358_v22 = vmul.f32 %v19087_v52, %v19087_v52  ;;  %v19106_v15 = vadd.f32 %v13644_v14, %v10793_v42 }
 0x558   : > { %v11236_v6 = vpop.f32.mrf.mxu1  ;;  %v10796_v10 = vadd.f32 %v13599_v32, %v19756_v29  ;;  %v10795_v46 = vadd.f32 %v10754_v57, %v10041_v50  ;;  %v10797_v14 = vadd.f32 %v13600_v5, %v19757_v39 }
 0x559   : > { %v11319_v61 = vadd.f32 %v11318_v24, %v19087_v52  ;;  %v11388_v2 = vadd.f32 %v11387_v16, %v11357_v25  ;;  %v19103_v49 = vadd.f32 %v11236_v6, %v10791_v4  ;;  %v11361_v19 = vmul.f32 %v19106_v15, %v19106_v15 }
 0x55a   : > { %v13647_v47 = vpop.f32.mrf.mxu1 }
 0x55b   : > { %v11389_v26 = vadd.f32 %v11388_v2, %v11358_v22  ;;  %v11320_v58 = vadd.f32 %v11319_v61, %v19103_v49  ;;  %v11359_v1 = vmul.f32 %v19103_v49, %v19103_v49  ;;  %v19121_v25 = vadd.f32 %v13647_v47, %v10796_v10 }
 0x55c   : > { %v11249_v30 = vpop.f32.mrf.mxu1 }
 0x55d   : > { %v11321_v54 = vadd.f32 %v11320_v58, %v19097_v35  ;;  %v11390_v13 = vadd.f32 %v11389_v26, %v11359_v1  ;;  %v19114_v45 = vadd.f32 %v11249_v30, %v10794_v0  ;;  %v11364_v6 = vmul.f32 %v19121_v25, %v19121_v25 }
 0x55e   : > { %v13648_v18 = vpop.f32.mrf.mxu1 }
 0x55f   : > { %v11391_v53 = vadd.f32 %v11390_v13, %v11360_v62  ;;  %v11322_v28 = vadd.f32 %v11321_v54, %v19106_v15  ;;  %v11362_v4 = vmul.f32 %v19114_v45, %v19114_v45  ;;  %v19126_v9 = vadd.f32 %v13648_v18, %v10797_v14 }
 0x560   : > { %v11252_v16 = vpop.f32.mrf.mxu1 }
 0x561   : > { %v11323_v24 = vadd.f32 %v11322_v28, %v19114_v45  ;;  %v11392_v27 = vadd.f32 %v11391_v53, %v11361_v19  ;;  %v11293_v32 = vadd.f32 %v11252_v16, %v10795_v46  ;;  %v11365_v22 = vmul.f32 %v19126_v9, %v19126_v9  ;;  %v11407_v16 = vld [vmem:[%s19369_s2 + $0x1] sm:$0x1] }
 0x563   : > { %v11393_v21 = vadd.f32 %v11392_v27, %v11362_v4  ;;  %v11324_v41 = vadd.f32 %v11323_v24, %v11293_v32  ;;  %v11363_v42 = vmul.f32 %v11293_v32, %v11293_v32  ;;  %v11411_v27 = vld [vmem:[%s19370_s3 + $0x1] sm:$0x1] }
 0x565   : > { %v11325_v5 = vadd.f32 %v11324_v41, %v19121_v25  ;;  %v11394_v61 = vadd.f32 %v11393_v21, %v11363_v42  ;;  %v19758_v41 = vld [vmem:[#allocation20_spill] sm:$0xff] }
 0x567   : > { %v11326_v2 = vadd.f32 %v11325_v5, %v19126_v9  ;;  %v11395_v0 = vadd.f32 %v11394_v61, %v11364_v6 }
 0x569   : > { %v11327_v50 = vrot.slane %v11326_v2, 4  ;;  %v11396_v47 = vadd.f32 %v11395_v0, %v11365_v22 }
 0x56b   : > { %v11328_v26 = vadd.f32 %v11327_v50, %v11326_v2  ;;  %v11397_v58 = vrot.slane %v11396_v47, 4 }
 0x56d   : > { %v11329_v1 = vrot.slane %v11328_v26, 2  ;;  %v11398_v57 = vadd.f32 %v11397_v58, %v11396_v47 }
 0x56f   : > { %v11330_v30 = vadd.f32 %v11329_v1, %v11328_v26  ;;  %v11399_v62 = vrot.slane %v11398_v57, 2 }
 0x571   : > { %v11331_v54 = vrot.slane %v11330_v30, 1  ;;  %v11400_v13 = vadd.f32 %v11399_v62, %v11398_v57 }
 0x573   : > { %v11332_v29 = vadd.f32 %v11331_v54, %v11330_v30  ;;  %v11401_v10 = vrot.slane %v11400_v13, 1 }
 0x575   : > { %v11333_v18 = vmul.f32 0.00390625, %v11332_v29  ;;  %v11402_v46 = vadd.f32 %v11401_v10, %v11400_v13 }
 0x577   : > { %v11403_v19 = vmul.f32 0.00390625, %v11402_v46  ;;  %v11404_v53 = vmul.f32 %v11333_v18, %v11333_v18 }
 0x579   : > { %v11405_v28 = vsub.f32 %v11403_v19, %v11404_v53 }
 0x57b   : > { %v11406_v39 = vmax.f32 %v11405_v28, 0.0 }
 0x57d   : > { %v11408_v14 = vadd.f32 1e-05, %v11406_v39 }
 0x57f   : > { %13955 = vrsqrt.f32 %v11408_v14 }
 0x58c   : > { %v13956_v24 = vpop.eup %13955 }
 0x58d   : > { %v11410_v4 = vmul.f32 %v13956_v24, %v11407_v16 }
 0x58f   : > { %v11412_v21 = vmul.f32 %v11410_v4, %v11333_v18  ;;  %v11417_v42 = vrot.slane %v11410_v4, %v19758_v41 }
 0x591   : > { %v11413_v6 = vsub.f32 %v11411_v27, %v11412_v21  ;;  %v11447_v5 = vmul.f32 %v11417_v42, %v11293_v32  ;;  %v11418_v61 = vmul.f32 %v11417_v42, %v18888_v55  ;;  %v11419_v22 = vmul.f32 %v11417_v42, %v18897_v37 }
 0x592   : > { %v11420_v2 = vmul.f32 %v11417_v42, %v18893_v51  ;;  %v11421_v0 = vmul.f32 %v11417_v42, %v18905_v36  ;;  %v11422_v50 = vmul.f32 %v11417_v42, %v18916_v3  ;;  %v11423_v47 = vmul.f32 %v11417_v42, %v18936_v23 }
 0x593   : > { %v11453_v26 = vrot.slane %v11413_v6, %v19758_v41  ;;  %v11424_v58 = vmul.f32 %v11417_v42, %v18929_v38  ;;  %v11425_v1 = vmul.f32 %v11417_v42, %v18942_v17  ;;  %v11426_v32 = vmul.f32 %v11417_v42, %v18952_v43 }
 0x594   : > { %v11427_v55 = vmul.f32 %v11417_v42, %v18972_v7  ;;  %v11428_v37 = vmul.f32 %v11417_v42, %v18965_v12  ;;  %v11429_v51 = vmul.f32 %v11417_v42, %v18978_v11  ;;  %v11430_v36 = vmul.f32 %v11417_v42, %v18988_v56 }
 0x595   : > { %v11483_v57 = vadd.f32 %v11453_v26, %v11447_v5  ;;  %v11431_v3 = vmul.f32 %v11417_v42, %v19008_v44  ;;  %v11432_v23 = vmul.f32 %v11417_v42, %v19001_v20  ;;  %v11433_v30 = vmul.f32 %v11417_v42, %v19014_v40 }
 0x596   : > { %v11434_v38 = vmul.f32 %v11417_v42, %v19024_v60  ;;  %v11435_v17 = vmul.f32 %v11417_v42, %v19042_v63  ;;  %v11436_v43 = vmul.f32 %v11417_v42, %v19035_v8  ;;  %v11437_v7 = vmul.f32 %v11417_v42, %v19046_v34 }
 0x597   : > { %v11515_v12 = vmul.f32 0.01, %v11483_v57  ;;  %v11438_v11 = vmul.f32 %v11417_v42, %v19056_v31  ;;  %v11439_v56 = vmul.f32 %v11417_v42, %v19074_v59  ;;  %v11440_v44 = vmul.f32 %v11417_v42, %v19067_v48 }
 0x598   : > { %v11441_v20 = vmul.f32 %v11417_v42, %v19077_v33  ;;  %v11442_v40 = vmul.f32 %v11417_v42, %v19087_v52  ;;  %v11443_v60 = vmul.f32 %v11417_v42, %v19103_v49  ;;  %v11444_v63 = vmul.f32 %v11417_v42, %v19097_v35 }
 0x599   : > { %v11547_v62 = vmax.f32 %v11483_v57, %v11515_v12  ;;  %v11445_v8 = vmul.f32 %v11417_v42, %v19106_v15  ;;  %v11446_v34 = vmul.f32 %v11417_v42, %v19114_v45  ;;  %v11448_v54 = vmul.f32 %v11417_v42, %v19121_v25 }
 0x59a   : > { %v11449_v31 = vmul.f32 %v11417_v42, %v19126_v9  ;;  %v11454_v59 = vadd.f32 %v11453_v26, %v11418_v61  ;;  %v11455_v13 = vadd.f32 %v11453_v26, %v11419_v22  ;;  %v11456_v48 = vadd.f32 %v11453_v26, %v11420_v2 }
 0x59b   : > { %11579 = vst [vmem:[%s19175_s13 + $0xe8] sm:$0xff] %v11547_v62  ;;  %v11457_v33 = vadd.f32 %v11453_v26, %v11421_v0  ;;  %v19178_v52 = vadd.f32 %v11453_v26, %v11422_v50  ;;  %v19180_v35 = vadd.f32 %v11453_v26, %v11423_v47  ;;  %v19182_v49 = vadd.f32 %v11453_v26, %v11424_v58 }
 0x59c   : > { %v19184_v15 = vadd.f32 %v11453_v26, %v11425_v1  ;;  %v19186_v45 = vadd.f32 %v11453_v26, %v11426_v32  ;;  %v19188_v25 = vadd.f32 %v11453_v26, %v11427_v55  ;;  %v19190_v9 = vadd.f32 %v11453_v26, %v11428_v37 }
 0x59d   : > { %v19192_v29 = vadd.f32 %v11453_v26, %v11429_v51  ;;  %v19194_v10 = vadd.f32 %v11453_v26, %v11430_v36  ;;  %v19196_v18 = vadd.f32 %v11453_v26, %v11431_v3  ;;  %v19198_v46 = vadd.f32 %v11453_v26, %v11432_v23 }
 0x59e   : > { %v19200_v19 = vadd.f32 %v11453_v26, %v11433_v30  ;;  %v19202_v53 = vadd.f32 %v11453_v26, %v11434_v38  ;;  %v19204_v28 = vadd.f32 %v11453_v26, %v11435_v17  ;;  %v19206_v39 = vadd.f32 %v11453_v26, %v11436_v43 }
 0x59f   : > { %v19208_v14 = vadd.f32 %v11453_v26, %v11437_v7  ;;  %v19210_v16 = vadd.f32 %v11453_v26, %v11438_v11  ;;  %v19212_v24 = vadd.f32 %v11453_v26, %v11439_v56  ;;  %v19214_v4 = vadd.f32 %v11453_v26, %v11440_v44 }
 0x5a0   : > { %v19216_v27 = vadd.f32 %v11453_v26, %v11441_v20  ;;  %v19218_v21 = vadd.f32 %v11453_v26, %v11442_v40  ;;  %v19220_v41 = vadd.f32 %v11453_v26, %v11443_v60  ;;  %v19222_v42 = vadd.f32 %v11453_v26, %v11444_v63 }
 0x5a1   : > { %v19224_v6 = vadd.f32 %v11453_v26, %v11445_v8  ;;  %v19226_v5 = vadd.f32 %v11453_v26, %v11446_v34  ;;  %v19228_v61 = vadd.f32 %v11453_v26, %v11448_v54  ;;  %v19230_v22 = vadd.f32 %v11453_v26, %v11449_v31 }
 0x5a2   : > { %v11486_v2 = vmul.f32 0.01, %v11454_v59  ;;  %v11487_v0 = vmul.f32 0.01, %v11455_v13  ;;  %v11488_v50 = vmul.f32 0.01, %v11456_v48 }
 0x5a3   : > { %v11489_v47 = vmul.f32 0.01, %v11457_v33  ;;  %v11490_v58 = vmul.f32 0.01, %v19178_v52  ;;  %v11491_v1 = vmul.f32 0.01, %v19180_v35 }
 0x5a4   : > { %v11492_v32 = vmul.f32 0.01, %v19182_v49  ;;  %v11493_v55 = vmul.f32 0.01, %v19184_v15  ;;  %v11494_v37 = vmul.f32 0.01, %v19186_v45  ;;  %v11518_v51 = vmax.f32 %v11454_v59, %v11486_v2 }
 0x5a5   : > { %v11495_v26 = vmul.f32 0.01, %v19188_v25  ;;  %v11496_v36 = vmul.f32 0.01, %v19190_v9  ;;  %v11497_v57 = vmul.f32 0.01, %v19192_v29  ;;  %v11519_v3 = vmax.f32 %v11455_v13, %v11487_v0 }
 0x5a6   : > { %v11498_v23 = vmul.f32 0.01, %v19194_v10  ;;  %v11499_v30 = vmul.f32 0.01, %v19196_v18  ;;  %v11500_v38 = vmul.f32 0.01, %v19198_v46  ;;  %v11520_v17 = vmax.f32 %v11456_v48, %v11488_v50  ;;  %11550 = vst [vmem:[%s19175_s13] sm:$0xff] %v11518_v51 }
 0x5a7   : > { %v11501_v43 = vmul.f32 0.01, %v19200_v19  ;;  %v11502_v7 = vmul.f32 0.01, %v19202_v53  ;;  %v11503_v12 = vmul.f32 0.01, %v19204_v28  ;;  %v11521_v11 = vmax.f32 %v11457_v33, %v11489_v47 }
 0x5a8   : > { %11551 = vst [vmem:[%s19175_s13 + $0x8] sm:$0xff] %v11519_v3  ;;  %v11504_v56 = vmul.f32 0.01, %v19206_v39  ;;  %v11505_v44 = vmul.f32 0.01, %v19208_v14  ;;  %v11522_v40 = vmax.f32 %v19178_v52, %v11490_v58  ;;  %11552 = vst [vmem:[%s19175_s13 + $0x10] sm:$0xff] %v11520_v17  ;;  %v11523_v8 = vmax.f32 %v19180_v35, %v11491_v1 }
 0x5a9   : > { %v11506_v20 = vmul.f32 0.01, %v19210_v16  ;;  %v11507_v60 = vmul.f32 0.01, %v19212_v24  ;;  %v11508_v63 = vmul.f32 0.01, %v19214_v4  ;;  %v11524_v59 = vmax.f32 %v19182_v49, %v11492_v32 }
 0x5aa   : > { %v11509_v62 = vmul.f32 0.01, %v19216_v27  ;;  %11553 = vst [vmem:[%s19175_s13 + $0x18] sm:$0xff] %v11521_v11  ;;  %v11510_v34 = vmul.f32 0.01, %v19218_v21  ;;  %11554 = vst [vmem:[%s19175_s13 + $0x20] sm:$0xff] %v11522_v40  ;;  %v11525_v52 = vmax.f32 %v19184_v15, %v11493_v55  ;;  %v11526_v2 = vmax.f32 %v19186_v45, %v11494_v37 }
 0x5ab   : > { %v11511_v54 = vmul.f32 0.01, %v19220_v41  ;;  %v11512_v31 = vmul.f32 0.01, %v19222_v42  ;;  %v11513_v13 = vmul.f32 0.01, %v19224_v6  ;;  %v11527_v49 = vmax.f32 %v19188_v25, %v11495_v26 }
 0x5ac   : > { %v11514_v48 = vmul.f32 0.01, %v19226_v5  ;;  %v11516_v33 = vmul.f32 0.01, %v19228_v61  ;;  %11555 = vst [vmem:[%s19175_s13 + $0x28] sm:$0xff] %v11523_v8  ;;  %v11528_v0 = vmax.f32 %v19190_v9, %v11496_v36  ;;  %11556 = vst [vmem:[%s19175_s13 + $0x30] sm:$0xff] %v11524_v59  ;;  %v11529_v50 = vmax.f32 %v19192_v29, %v11497_v57 }
 0x5ad   : > { %v11517_v35 = vmul.f32 0.01, %v19230_v22  ;;  %v11530_v47 = vmax.f32 %v19194_v10, %v11498_v23  ;;  %v11531_v58 = vmax.f32 %v19196_v18, %v11499_v30  ;;  %v11532_v15 = vmax.f32 %v19198_v46, %v11500_v38  ;;  %11557 = vst [vmem:[%s19175_s13 + $0x38] sm:$0xff] %v11525_v52  ;;  %11558 = vst [vmem:[%s19175_s13 + $0x40] sm:$0xff] %v11526_v2 }
 0x5ae   : > { %v11533_v45 = vmax.f32 %v19200_v19, %v11501_v43  ;;  %v11534_v25 = vmax.f32 %v19202_v53, %v11502_v7  ;;  %v11535_v9 = vmax.f32 %v19204_v28, %v11503_v12  ;;  %v11536_v29 = vmax.f32 %v19206_v39, %v11504_v56  ;;  %11559 = vst [vmem:[%s19175_s13 + $0x48] sm:$0xff] %v11527_v49 }
 0x5af   : > { %11560 = vst [vmem:[%s19175_s13 + $0x50] sm:$0xff] %v11528_v0  ;;  %v11537_v10 = vmax.f32 %v19208_v14, %v11505_v44  ;;  %v11538_v18 = vmax.f32 %v19210_v16, %v11506_v20  ;;  %v11539_v46 = vmax.f32 %v19212_v24, %v11507_v60  ;;  %v11540_v19 = vmax.f32 %v19214_v4, %v11508_v63 }
 0x5b0   : > { %11561 = vst [vmem:[%s19175_s13 + $0x58] sm:$0xff] %v11529_v50  ;;  %11562 = vst [vmem:[%s19175_s13 + $0x60] sm:$0xff] %v11530_v47  ;;  %v11541_v53 = vmax.f32 %v19216_v27, %v11509_v62  ;;  %v11542_v28 = vmax.f32 %v19218_v21, %v11510_v34  ;;  %v11543_v39 = vmax.f32 %v19220_v41, %v11511_v54 }
 0x5b1   : > { %11563 = vst [vmem:[%s19175_s13 + $0x68] sm:$0xff] %v11531_v58  ;;  %11564 = vst [vmem:[%s19175_s13 + $0x70] sm:$0xff] %v11532_v15  ;;  %v11544_v14 = vmax.f32 %v19222_v42, %v11512_v31  ;;  %v11545_v16 = vmax.f32 %v19224_v6, %v11513_v13  ;;  %v11546_v24 = vmax.f32 %v19226_v5, %v11514_v48 }
 0x5b2   : > { %11565 = vst [vmem:[%s19175_s13 + $0x78] sm:$0xff] %v11533_v45  ;;  %11566 = vst [vmem:[%s19175_s13 + $0x80] sm:$0xff] %v11534_v25  ;;  %v11548_v4 = vmax.f32 %v19228_v61, %v11516_v33  ;;  %v11549_v27 = vmax.f32 %v19230_v22, %v11517_v35 }
 0x5b3   : > { %11567 = vst [vmem:[%s19175_s13 + $0x88] sm:$0xff] %v11535_v9  ;;  %11568 = vst [vmem:[%s19175_s13 + $0x90] sm:$0xff] %v11536_v29 }
 0x5b4   : > { %11569 = vst [vmem:[%s19175_s13 + $0x98] sm:$0xff] %v11537_v10  ;;  %11570 = vst [vmem:[%s19175_s13 + $0xa0] sm:$0xff] %v11538_v18 }
 0x5b5   : > { %11571 = vst [vmem:[%s19175_s13 + $0xa8] sm:$0xff] %v11539_v46  ;;  %11572 = vst [vmem:[%s19175_s13 + $0xb0] sm:$0xff] %v11540_v19 }
 0x5b6   : > { %11573 = vst [vmem:[%s19175_s13 + $0xb8] sm:$0xff] %v11541_v53  ;;  %11574 = vst [vmem:[%s19175_s13 + $0xc0] sm:$0xff] %v11542_v28 }
 0x5b7   : > { %11575 = vst [vmem:[%s19175_s13 + $0xc8] sm:$0xff] %v11543_v39  ;;  %11576 = vst [vmem:[%s19175_s13 + $0xd0] sm:$0xff] %v11544_v14 }
 0x5b8   : > { %11577 = vst [vmem:[%s19175_s13 + $0xd8] sm:$0xff] %v11545_v16  ;;  %11578 = vst [vmem:[%s19175_s13 + $0xe0] sm:$0xff] %v11546_v24 }
 0x5b9   : > { %11580 = vst [vmem:[%s19175_s13 + $0xf0] sm:$0xff] %v11548_v4  ;;  %11581 = vst [vmem:[%s19175_s13 + $0xf8] sm:$0xff] %v11549_v27 }
 0x5ba   : > { %14049 = shalt.err (!%p14046_p0)
}
 0x5bb   : > { %s14050_s24 = scalar_lea.hbm %s19306_s30, 4096  ;;  %s14054_s29 = scalar_lea.hbm %s19371_s4, 8192 }
 0x5bc   : > { %p14051_p5 = scmp.ne.s32.totalorder %s19306_s30, %s14050_s24  ;;  %p14055_p4 = scmp.lt.s32.totalorder %s19306_s30, %s19371_s4 }
 0x5bd   : > { %p14056_p6 = scmp.lt.s32.totalorder %s14054_s29, %s14050_s24 }
 0x5be   : > { %p14052_p9 = pnand %p14051_p5, %p19759_p11 }
 0x5bf   : > { %p14057_p8 = por %p14056_p6, %p14055_p4 }
 0x5c0   : > { %p14053_p1 = pneg %p14052_p9 }
 0x5c2   : > { %p14058_p3 = pnand %p14057_p8, %p14053_p1 }
 0x5c4   : > { %14061 = shalt.err (!%p14058_p3)
}
 0x5c5   : > { %s14114_s13 = smov 128   ;;  %s14115_s14 = smov 8  }
 0x5c6   : > { %13655 = dma.vmem_to_hbm [thread:$0]  (%p19759_p11), %s19308_s20, 4096, %s19306_s30, %s11583_s6, %s14114_s13, %s14114_s13, %s14115_s14  }
 0x5c7 PF: > { %s11611_s19 = sand.u32 1, %s14092_s15   ;;  %p19760_p7 = scmp.ne.s32.totalorder %s19406_s22, 0 }
 0x5c8   : > { %p19761_p12 = scmp.ge.s32.totalorder %s14104_s18, 2  ;;  %s11612_s25 = scalar_lea.sflag [#allocation5], %s11611_s19 }
 0x5ca   : > { %p13666_p10 = pnand %p19761_p12, %p19760_p7 }
 0x5cc   : > { %p13667_p2 = pneg %p13666_p10 }
 0x5ce   : > { %14087 = dma.done.wait (%p13667_p2), %s11612_s25, 4096  }
 0x5cf   : > { %14089 = vsyncadd (%p13667_p2), %s11612_s25, 4294963200  ;;  %p18_p13 = scmp.ge.s32.totalorder %s14195_s27, 4   ;;  %s19762_s15 = smov %s14096_s16 }
 0x5d0   : > { %s19763_s16 = smov %s14100_s17  ;;  %s19764_s17 = smov %s14212_s9 }
 0x5d1   : > { %s19765_s18 = smov %s14195_s27  ;;  %20 = sbr.rel (!%p18_p13) target bundleno = 6 (0x6), region = 105 }
 0x5d6   :  { %11617 = vsyncpa [#allocation4], 1 }
 0x5d7   :  { %11619 = vsyncpa [#allocation4 + $0x1], 1 }
 0x5d8   :  { %11620 = vsyncpa [#allocation7], 1 }
 0x5d9   :  { %11621 = vsyncpa [#allocation5], 1 }
 0x5da   :  { %11623 = vsyncpa [#allocation5 + $0x1], 1 }

</bundles_post_ra>
